<compile_context>
chip_gen: v5e
topology: v5e:2x2
jax: 0.10.0
libtpu: 0.0.40
codegen_flags: <defaults>
</compile_context>

<pallas_src>
import functools

import jax
import jax.numpy as jnp
from jax import lax
from jax.experimental import pallas as pl
from jax.experimental.pallas import tpu as pltpu


def _sigmoid(z):
    # Exact identity sigmoid(z) = 0.5*tanh(z/2) + 0.5 -> single EUP tanh push.
    return 0.5 * jnp.tanh(0.5 * z) + 0.5


def _silu(z):
    return z * _sigmoid(z)


def caa_kernel(x_ref, w1_ref, b1_ref, wh_ref, wv_ref, bt_ref, w2_ref, b2_ref,
               o_ref, *, W):
    # x_ref / o_ref block: (NB, C, H*W), flattened spatial axis on the lanes.
    NB, C, HW = x_ref.shape

    # Lane-position iotas (used only while building the masks, then dead).
    flat = lax.broadcasted_iota(jnp.int32, (C, HW), 1)
    col = (flat & (W - 1)) if (W & (W - 1)) == 0 else (flat % W)

    # Boundary masks, memoized: each unique (direction, offset) mask is built
    # once and shared by the pool taps, h_conv, v_conv and all NB images.
    wmasks, hmasks = {}, {}

    def wmask(dx):
        if dx not in wmasks:
            wmasks[dx] = (col < W - dx) if dx > 0 else (col >= -dx)
        return wmasks[dx]

    def hmask(dy):
        if dy not in hmasks:
            d = dy * W
            hmasks[dy] = (flat < HW - d) if dy > 0 else (flat >= -d)
        return hmasks[dy]

    def shift_w(v, dx):
        # out[:, h*W + w] = v[:, h*W + (w + dx)], zero outside the row.
        return jnp.where(wmask(dx), pltpu.roll(v, (-dx) % HW, 1), 0.0)

    def shift_h(v, dy):
        # out[:, h*W + w] = v[:, (h + dy)*W + w], zero outside the image.
        return jnp.where(hmask(dy), pltpu.roll(v, (-dy * W) % HW, 1), 0.0)

    for n in range(NB):
        xb = x_ref[n]                                  # (C, HW) f32

        # ---- AvgPool2d(7, stride=1, pad=3), count_include_pad=True ----
        # Separable 7-tap box sums; the 1/49 normalizer is folded into w1.
        hs = xb
        for dx in range(1, 4):
            hs = hs + shift_w(xb, dx) + shift_w(xb, -dx)
        vs = hs
        for dy in range(1, 4):
            vs = vs + shift_h(hs, dy) + shift_h(hs, -dy)

        # ---- conv1: 1x1 conv + BN(eval) + SiLU (scale & 1/49 folded into w1) ----
        z = jnp.dot(w1_ref[...], vs, preferred_element_type=jnp.float32)
        z = _silu(z + b1_ref[...])

        # ---- h_conv: depthwise (1, 11), pad (0, 5); bias folded into bt ----
        wh = wh_ref[...]                               # (C, 11)
        acc = z * wh[:, 5:6]
        for dx in range(1, 6):
            acc = acc + shift_w(z, dx) * wh[:, 5 + dx:6 + dx]
            acc = acc + shift_w(z, -dx) * wh[:, 5 - dx:6 - dx]

        # ---- v_conv: depthwise (11, 1), pad (5, 0); + combined bias field ----
        wv = wv_ref[...]                               # (C, 11)
        y = acc * wv[:, 5:6]
        for dy in range(1, 6):
            y = y + shift_h(acc, dy) * wv[:, 5 + dy:6 + dy]
            y = y + shift_h(acc, -dy) * wv[:, 5 - dy:6 - dy]
        y = y + bt_ref[...]        # exact fold of (bh through v_conv) + bv

        # ---- conv2: 1x1 conv + BN(eval) + SiLU, then Sigmoid ----
        z = jnp.dot(w2_ref[...], y, preferred_element_type=jnp.float32)
        z = _silu(z + b2_ref[...])
        attn = _sigmoid(z)

        # ---- out = x * attn_factor (x re-read only here: short live range) ----
        o_ref[n] = x_ref[n] * attn


def _tensorcores_per_chip():
    # Heuristic: v7x-class chips have 2 TensorCores per Pallas device; the
    # v5e/v6e inference chips this is tuned for expose 1.
    try:
        kind = jax.devices()[0].device_kind.lower()
    except Exception:
        return 1
    return 2 if ("v7" in kind or "7x" in kind) else 1


def caa_forward(x_nchw, raw_params, *, num_grid_steps=None):
    """CAA forward. x in NCHW; raw_params mirror the PyTorch module (BN eval)."""
    (w1, g1, b1, rm1, rv1, wh, bh, wv, bv, w2, g2, b2, rm2, rv2, eps) = raw_params
    N, C, H, W = x_nchw.shape
    HW = H * W
    f32 = jnp.float32
    # TODO(synk): pad the flattened spatial axis to a multiple of 128 (and mask
    # in-kernel) for production shapes where H*W % 128 != 0.

    # ---- Fold every purely-linear piece into the kernel operands (wrapper) ----
    s1 = g1 / jnp.sqrt(rv1 + eps)
    s2 = g2 / jnp.sqrt(rv2 + eps)
    w1f = (s1[:, None] * w1 * (1.0 / 49.0)).astype(f32)   # BN scale + 1/49 folded
    w2f = (s2[:, None] * w2).astype(f32)                   # BN scale folded
    b1c = (b1 - rm1 * s1).reshape(C, 1).astype(f32)
    b2c = (b2 - rm2 * s2).reshape(C, 1).astype(f32)

    # h_conv bias folded exactly through the zero-padded v_conv:
    # v_out = v_conv(h_raw) + bh * g[c,h] + bv,  g[c,h] = sum of wv taps that
    # land inside the image at row h (row-dependent near top/bottom edges).
    taps = jnp.arange(-5, 6)
    rows = jnp.arange(H)
    valid = ((rows[:, None] + taps[None, :] >= 0) &
             (rows[:, None] + taps[None, :] < H)).astype(f32)     # (H, 11)
    g_rows = jnp.einsum('ck,hk->ch', wv.astype(f32), valid)        # (C, H)
    btot = (bv[:, None] + bh[:, None] * g_rows)                    # (C, H)
    btot = jnp.repeat(btot, W, axis=1).astype(f32)                 # (C, H*W)

    # NCHW -> (N, C, H*W): merges the two minor dims only (no transpose).
    x_flat = x_nchw.reshape(N, C, HW).astype(f32)

    # Grid: 1 step (whole batch) on single-TC chips to amortize per-step
    # overhead; keep a 2-way "parallel" split on 2-TC chips (v7x).
    if num_grid_steps is None:
        num_grid_steps = 2 if (_tensorcores_per_chip() >= 2 and N % 2 == 0) else 1
    assert N % num_grid_steps == 0
    NB = N // num_grid_steps

    def const_spec(a):
        return pl.BlockSpec(a.shape, lambda b, nd=a.ndim: (0,) * nd)

    kernel = functools.partial(caa_kernel, W=W)

    out_flat = pl.pallas_call(
        kernel,
        out_shape=jax.ShapeDtypeStruct((N, C, HW), f32),
        grid=(num_grid_steps,),
        in_specs=[
            pl.BlockSpec((NB, C, HW), lambda b: (b, 0, 0)),
            const_spec(w1f), const_spec(b1c),
            const_spec(wh), const_spec(wv), const_spec(btot),
            const_spec(w2f), const_spec(b2c),
        ],
        out_specs=pl.BlockSpec((NB, C, HW), lambda b: (b, 0, 0)),
        compiler_params=pltpu.CompilerParams(
            dimension_semantics=("parallel",)),
    )(x_flat, w1f, b1c, wh.astype(f32), wv.astype(f32), btot, w2f, b2c)

    return out_flat.reshape(N, C, H, W)


def reference_caa(x, raw):
    """Pure-JAX reference mirroring the PyTorch module (NCHW, BN in eval mode)."""
    (w1, g1, b1, rm1, rv1, wh, bh, wv, bv, w2, g2, b2, rm2, rv2, eps) = raw
    C = x.shape[1]

    p = lax.reduce_window(x, 0.0, lax.add, (1, 1, 7, 7), (1, 1, 1, 1),
                          [(0, 0), (0, 0), (3, 3), (3, 3)]) / 49.0

    def bn(y, g, b, rm, rv):
        return ((y - rm[None, :, None, None]) /
                jnp.sqrt(rv + eps)[None, :, None, None] *
                g[None, :, None, None] + b[None, :, None, None])

    y = jnp.einsum('nchw,oc->nohw', p, w1)
    y = bn(y, g1, b1, rm1, rv1)
    y = y * jax.nn.sigmoid(y)

    y = lax.conv_general_dilated(
        y, wh.reshape(C, 1, 1, 11), (1, 1), [(0, 0), (5, 5)],
        feature_group_count=C,
        dimension_numbers=('NCHW', 'OIHW', 'NCHW')) + bh[None, :, None, None]
    y = lax.conv_general_dilated(
        y, wv.reshape(C, 1, 11, 1), (1, 1), [(5, 5), (0, 0)],
        feature_group_count=C,
        dimension_numbers=('NCHW', 'OIHW', 'NCHW')) + bv[None, :, None, None]

    z = jnp.einsum('nchw,oc->nohw', y, w2)
    z = bn(z, g2, b2, rm2, rv2)
    z = z * jax.nn.sigmoid(z)
    attn = jax.nn.sigmoid(z)
    return x * attn


if __name__ == "__main__":
    N, C, H, W = 2, 32, 16, 16
    eps = 1e-3  # norm_cfg eps
    key = jax.random.PRNGKey(0)
    ks = jax.random.split(key, 16)

    x = jax.random.normal(ks[0], (N, C, H, W), jnp.float32)

    # conv1 (1x1, no bias) + BN params
    w1 = 0.1 * jax.random.normal(ks[1], (C, C), jnp.float32)          # (out, in)
    g1 = 1.0 + 0.1 * jax.random.normal(ks[2], (C,), jnp.float32)
    b1 = 0.1 * jax.random.normal(ks[3], (C,), jnp.float32)
    rm1 = 0.05 * jax.random.normal(ks[4], (C,), jnp.float32)
    rv1 = 1.0 + 0.1 * jnp.abs(jax.random.normal(ks[5], (C,), jnp.float32))

    # depthwise h_conv (1,11) / v_conv (11,1) with bias
    wh = 0.1 * jax.random.normal(ks[6], (C, 11), jnp.float32)
    bh = 0.05 * jax.random.normal(ks[7], (C,), jnp.float32)
    wv = 0.1 * jax.random.normal(ks[8], (C, 11), jnp.float32)
    bv = 0.05 * jax.random.normal(ks[9], (C,), jnp.float32)

    # conv2 (1x1, no bias) + BN params
    w2 = 0.1 * jax.random.normal(ks[10], (C, C), jnp.float32)
    g2 = 1.0 + 0.1 * jax.random.normal(ks[11], (C,), jnp.float32)
    b2 = 0.1 * jax.random.normal(ks[12], (C,), jnp.float32)
    rm2 = 0.05 * jax.random.normal(ks[13], (C,), jnp.float32)
    rv2 = 1.0 + 0.1 * jnp.abs(jax.random.normal(ks[14], (C,), jnp.float32))

    raw_params = (w1, g1, b1, rm1, rv1, wh, bh, wv, bv,
                  w2, g2, b2, rm2, rv2, eps)

    out = caa_forward(x, raw_params)
    out = jax.block_until_ready(out)

    ref = reference_caa(x, raw_params)
    ref = jax.block_until_ready(ref)

    assert out.shape == (N, C, H, W)
    assert jnp.allclose(out, ref, atol=2e-3, rtol=2e-3), (
        float(jnp.max(jnp.abs(out - ref))))
    print("KERNEL_OK")
</pallas_src>

<mosaic_0001>
module attributes {stable_mosaic.version = 11 : i64} {
  func.func @caa_kernel(%arg0: i32, %arg1: memref<2x32x256xf32, #tpu.memory_space<vmem>>, %arg2: memref<32x32xf32, #tpu.memory_space<vmem>>, %arg3: memref<32x1xf32, #tpu.memory_space<vmem>>, %arg4: memref<32x11xf32, #tpu.memory_space<vmem>>, %arg5: memref<32x11xf32, #tpu.memory_space<vmem>>, %arg6: memref<32x256xf32, #tpu.memory_space<vmem>>, %arg7: memref<32x32xf32, #tpu.memory_space<vmem>>, %arg8: memref<32x1xf32, #tpu.memory_space<vmem>>, %arg9: memref<2x32x256xf32, #tpu.memory_space<vmem>>) attributes {dimension_semantics = [#tpu.dimension_semantics<parallel>], iteration_bounds = array<i64: 1>, scalar_prefetch = 0 : i64, scratch_operands = 0 : i64, tpu.core_type = #tpu.core_type<tc>, window_params = [{transform_indices = @transform_0, window_bounds = array<i64: 2, 32, 256>}, {pipeline_mode = #tpu.pipeline_mode<synchronous>, transform_indices = @transform_1, window_bounds = array<i64: 32, 32>}, {pipeline_mode = #tpu.pipeline_mode<synchronous>, transform_indices = @transform_2, window_bounds = array<i64: 32, 1>}, {pipeline_mode = #tpu.pipeline_mode<synchronous>, transform_indices = @transform_3, window_bounds = array<i64: 32, 11>}, {pipeline_mode = #tpu.pipeline_mode<synchronous>, transform_indices = @transform_4, window_bounds = array<i64: 32, 11>}, {pipeline_mode = #tpu.pipeline_mode<synchronous>, transform_indices = @transform_5, window_bounds = array<i64: 32, 256>}, {pipeline_mode = #tpu.pipeline_mode<synchronous>, transform_indices = @transform_6, window_bounds = array<i64: 32, 32>}, {pipeline_mode = #tpu.pipeline_mode<synchronous>, transform_indices = @transform_7, window_bounds = array<i64: 32, 1>}, {transform_indices = @transform_8, window_bounds = array<i64: 2, 32, 256>}]} {
    %0 = tpu.iota {dimensions = array<i32: 1>} : vector<32x256xi32>
    %c15_i32 = arith.constant 15 : i32
    %1 = vector.broadcast %c15_i32 : i32 to vector<32x256xi32>
    %2 = arith.andi %0, %1 : vector<32x256xi32>
    %c0 = arith.constant 0 : index
    %c0_0 = arith.constant 0 : index
    %c0_1 = arith.constant 0 : index
    %3 = vector.load %arg1[%c0, %c0_0, %c0_1] : memref<2x32x256xf32, #tpu.memory_space<vmem>>, vector<1x32x256xf32>
    %4 = vector.shape_cast %3 : vector<1x32x256xf32> to vector<32x256xf32>
    %c15_i32_2 = arith.constant 15 : i32
    %5 = vector.broadcast %c15_i32_2 : i32 to vector<32x256xi32>
    %6 = arith.cmpi slt, %2, %5 : vector<32x256xi32>
    %c255_i32 = arith.constant 255 : i32
    %7 = tpu.dynamic_rotate %4 by %c255_i32 dim 1 : vector<32x256xf32>, i32 -> vector<32x256xf32>
    %cst = arith.constant 0.000000e+00 : f32
    %8 = vector.broadcast %cst : f32 to vector<32x256xf32>
    %9 = arith.select %6, %7, %8 : vector<32x256xi1>, vector<32x256xf32>
    %10 = arith.addf %4, %9 : vector<32x256xf32>
    %c1_i32 = arith.constant 1 : i32
    %11 = vector.broadcast %c1_i32 : i32 to vector<32x256xi32>
    %12 = arith.cmpi sge, %2, %11 : vector<32x256xi32>
    %c1_i32_3 = arith.constant 1 : i32
    %13 = tpu.dynamic_rotate %4 by %c1_i32_3 dim 1 : vector<32x256xf32>, i32 -> vector<32x256xf32>
    %cst_4 = arith.constant 0.000000e+00 : f32
    %14 = vector.broadcast %cst_4 : f32 to vector<32x256xf32>
    %15 = arith.select %12, %13, %14 : vector<32x256xi1>, vector<32x256xf32>
    %16 = arith.addf %10, %15 : vector<32x256xf32>
    %c14_i32 = arith.constant 14 : i32
    %17 = vector.broadcast %c14_i32 : i32 to vector<32x256xi32>
    %18 = arith.cmpi slt, %2, %17 : vector<32x256xi32>
    %c254_i32 = arith.constant 254 : i32
    %19 = tpu.dynamic_rotate %4 by %c254_i32 dim 1 : vector<32x256xf32>, i32 -> vector<32x256xf32>
    %cst_5 = arith.constant 0.000000e+00 : f32
    %20 = vector.broadcast %cst_5 : f32 to vector<32x256xf32>
    %21 = arith.select %18, %19, %20 : vector<32x256xi1>, vector<32x256xf32>
    %22 = arith.addf %16, %21 : vector<32x256xf32>
    %c2_i32 = arith.constant 2 : i32
    %23 = vector.broadcast %c2_i32 : i32 to vector<32x256xi32>
    %24 = arith.cmpi sge, %2, %23 : vector<32x256xi32>
    %c2_i32_6 = arith.constant 2 : i32
    %25 = tpu.dynamic_rotate %4 by %c2_i32_6 dim 1 : vector<32x256xf32>, i32 -> vector<32x256xf32>
    %cst_7 = arith.constant 0.000000e+00 : f32
    %26 = vector.broadcast %cst_7 : f32 to vector<32x256xf32>
    %27 = arith.select %24, %25, %26 : vector<32x256xi1>, vector<32x256xf32>
    %28 = arith.addf %22, %27 : vector<32x256xf32>
    %c13_i32 = arith.constant 13 : i32
    %29 = vector.broadcast %c13_i32 : i32 to vector<32x256xi32>
    %30 = arith.cmpi slt, %2, %29 : vector<32x256xi32>
    %c253_i32 = arith.constant 253 : i32
    %31 = tpu.dynamic_rotate %4 by %c253_i32 dim 1 : vector<32x256xf32>, i32 -> vector<32x256xf32>
    %cst_8 = arith.constant 0.000000e+00 : f32
    %32 = vector.broadcast %cst_8 : f32 to vector<32x256xf32>
    %33 = arith.select %30, %31, %32 : vector<32x256xi1>, vector<32x256xf32>
    %34 = arith.addf %28, %33 : vector<32x256xf32>
    %c3_i32 = arith.constant 3 : i32
    %35 = vector.broadcast %c3_i32 : i32 to vector<32x256xi32>
    %36 = arith.cmpi sge, %2, %35 : vector<32x256xi32>
    %c3_i32_9 = arith.constant 3 : i32
    %37 = tpu.dynamic_rotate %4 by %c3_i32_9 dim 1 : vector<32x256xf32>, i32 -> vector<32x256xf32>
    %cst_10 = arith.constant 0.000000e+00 : f32
    %38 = vector.broadcast %cst_10 : f32 to vector<32x256xf32>
    %39 = arith.select %36, %37, %38 : vector<32x256xi1>, vector<32x256xf32>
    %40 = arith.addf %34, %39 : vector<32x256xf32>
    %c240_i32 = arith.constant 240 : i32
    %41 = vector.broadcast %c240_i32 : i32 to vector<32x256xi32>
    %42 = arith.cmpi slt, %0, %41 : vector<32x256xi32>
    %c240_i32_11 = arith.constant 240 : i32
    %43 = tpu.dynamic_rotate %40 by %c240_i32_11 dim 1 : vector<32x256xf32>, i32 -> vector<32x256xf32>
    %cst_12 = arith.constant 0.000000e+00 : f32
    %44 = vector.broadcast %cst_12 : f32 to vector<32x256xf32>
    %45 = arith.select %42, %43, %44 : vector<32x256xi1>, vector<32x256xf32>
    %46 = arith.addf %40, %45 : vector<32x256xf32>
    %c16_i32 = arith.constant 16 : i32
    %47 = vector.broadcast %c16_i32 : i32 to vector<32x256xi32>
    %48 = arith.cmpi sge, %0, %47 : vector<32x256xi32>
    %c16_i32_13 = arith.constant 16 : i32
    %49 = tpu.dynamic_rotate %40 by %c16_i32_13 dim 1 : vector<32x256xf32>, i32 -> vector<32x256xf32>
    %cst_14 = arith.constant 0.000000e+00 : f32
    %50 = vector.broadcast %cst_14 : f32 to vector<32x256xf32>
    %51 = arith.select %48, %49, %50 : vector<32x256xi1>, vector<32x256xf32>
    %52 = arith.addf %46, %51 : vector<32x256xf32>
    %c224_i32 = arith.constant 224 : i32
    %53 = vector.broadcast %c224_i32 : i32 to vector<32x256xi32>
    %54 = arith.cmpi slt, %0, %53 : vector<32x256xi32>
    %c224_i32_15 = arith.constant 224 : i32
    %55 = tpu.dynamic_rotate %40 by %c224_i32_15 dim 1 : vector<32x256xf32>, i32 -> vector<32x256xf32>
    %cst_16 = arith.constant 0.000000e+00 : f32
    %56 = vector.broadcast %cst_16 : f32 to vector<32x256xf32>
    %57 = arith.select %54, %55, %56 : vector<32x256xi1>, vector<32x256xf32>
    %58 = arith.addf %52, %57 : vector<32x256xf32>
    %c32_i32 = arith.constant 32 : i32
    %59 = vector.broadcast %c32_i32 : i32 to vector<32x256xi32>
    %60 = arith.cmpi sge, %0, %59 : vector<32x256xi32>
    %c32_i32_17 = arith.constant 32 : i32
    %61 = tpu.dynamic_rotate %40 by %c32_i32_17 dim 1 : vector<32x256xf32>, i32 -> vector<32x256xf32>
    %cst_18 = arith.constant 0.000000e+00 : f32
    %62 = vector.broadcast %cst_18 : f32 to vector<32x256xf32>
    %63 = arith.select %60, %61, %62 : vector<32x256xi1>, vector<32x256xf32>
    %64 = arith.addf %58, %63 : vector<32x256xf32>
    %c208_i32 = arith.constant 208 : i32
    %65 = vector.broadcast %c208_i32 : i32 to vector<32x256xi32>
    %66 = arith.cmpi slt, %0, %65 : vector<32x256xi32>
    %c208_i32_19 = arith.constant 208 : i32
    %67 = tpu.dynamic_rotate %40 by %c208_i32_19 dim 1 : vector<32x256xf32>, i32 -> vector<32x256xf32>
    %cst_20 = arith.constant 0.000000e+00 : f32
    %68 = vector.broadcast %cst_20 : f32 to vector<32x256xf32>
    %69 = arith.select %66, %67, %68 : vector<32x256xi1>, vector<32x256xf32>
    %70 = arith.addf %64, %69 : vector<32x256xf32>
    %c48_i32 = arith.constant 48 : i32
    %71 = vector.broadcast %c48_i32 : i32 to vector<32x256xi32>
    %72 = arith.cmpi sge, %0, %71 : vector<32x256xi32>
    %c48_i32_21 = arith.constant 48 : i32
    %73 = tpu.dynamic_rotate %40 by %c48_i32_21 dim 1 : vector<32x256xf32>, i32 -> vector<32x256xf32>
    %cst_22 = arith.constant 0.000000e+00 : f32
    %74 = vector.broadcast %cst_22 : f32 to vector<32x256xf32>
    %75 = arith.select %72, %73, %74 : vector<32x256xi1>, vector<32x256xf32>
    %76 = arith.addf %70, %75 : vector<32x256xf32>
    %c0_23 = arith.constant 0 : index
    %c0_24 = arith.constant 0 : index
    %77 = vector.load %arg2[%c0_23, %c0_24] : memref<32x32xf32, #tpu.memory_space<vmem>>, vector<32x32xf32>
    %cst_25 = arith.constant dense<0.000000e+00> : vector<32x256xf32>
    %78 = tpu.matmul %77, %76, %cst_25 {dimension_numbers = #tpu.dot_dimension_numbers<[1], [0], [0], [1], [0, 0, 1, 1], [], []>} : vector<32x32xf32>, vector<32x256xf32>, vector<32x256xf32> -> vector<32x256xf32>
    %c0_26 = arith.constant 0 : index
    %c0_27 = arith.constant 0 : index
    %79 = vector.load %arg3[%c0_26, %c0_27] : memref<32x1xf32, #tpu.memory_space<vmem>>, vector<32x1xf32>
    %80 = vector.broadcast %79 : vector<32x1xf32> to vector<32x256xf32>
    %81 = arith.addf %78, %80 : vector<32x256xf32>
    %cst_28 = arith.constant 5.000000e-01 : f32
    %82 = vector.broadcast %cst_28 : f32 to vector<32x256xf32>
    %83 = arith.mulf %82, %81 : vector<32x256xf32>
    %84 = math.tanh %83 : vector<32x256xf32>
    %cst_29 = arith.constant 5.000000e-01 : f32
    %85 = vector.broadcast %cst_29 : f32 to vector<32x256xf32>
    %86 = arith.mulf %85, %84 : vector<32x256xf32>
    %cst_30 = arith.constant 5.000000e-01 : f32
    %87 = vector.broadcast %cst_30 : f32 to vector<32x256xf32>
    %88 = arith.addf %86, %87 : vector<32x256xf32>
    %89 = arith.mulf %81, %88 : vector<32x256xf32>
    %c0_31 = arith.constant 0 : index
    %c0_32 = arith.constant 0 : index
    %90 = vector.load %arg4[%c0_31, %c0_32] : memref<32x11xf32, #tpu.memory_space<vmem>>, vector<32x11xf32>
    %91 = vector.extract_strided_slice %90 {offsets = [0, 5], sizes = [32, 1], strides = [1, 1]} : vector<32x11xf32> to vector<32x1xf32>
    %92 = vector.broadcast %91 : vector<32x1xf32> to vector<32x256xf32>
    %93 = arith.mulf %89, %92 : vector<32x256xf32>
    %c255_i32_33 = arith.constant 255 : i32
    %94 = tpu.dynamic_rotate %89 by %c255_i32_33 dim 1 : vector<32x256xf32>, i32 -> vector<32x256xf32>
    %cst_34 = arith.constant 0.000000e+00 : f32
    %95 = vector.broadcast %cst_34 : f32 to vector<32x256xf32>
    %96 = arith.select %6, %94, %95 : vector<32x256xi1>, vector<32x256xf32>
    %97 = vector.extract_strided_slice %90 {offsets = [0, 6], sizes = [32, 1], strides = [1, 1]} : vector<32x11xf32> to vector<32x1xf32>
    %98 = vector.broadcast %97 : vector<32x1xf32> to vector<32x256xf32>
    %99 = arith.mulf %96, %98 : vector<32x256xf32>
    %100 = arith.addf %93, %99 : vector<32x256xf32>
    %c1_i32_35 = arith.constant 1 : i32
    %101 = tpu.dynamic_rotate %89 by %c1_i32_35 dim 1 : vector<32x256xf32>, i32 -> vector<32x256xf32>
    %cst_36 = arith.constant 0.000000e+00 : f32
    %102 = vector.broadcast %cst_36 : f32 to vector<32x256xf32>
    %103 = arith.select %12, %101, %102 : vector<32x256xi1>, vector<32x256xf32>
    %104 = vector.extract_strided_slice %90 {offsets = [0, 4], sizes = [32, 1], strides = [1, 1]} : vector<32x11xf32> to vector<32x1xf32>
    %105 = vector.broadcast %104 : vector<32x1xf32> to vector<32x256xf32>
    %106 = arith.mulf %103, %105 : vector<32x256xf32>
    %107 = arith.addf %100, %106 : vector<32x256xf32>
    %c254_i32_37 = arith.constant 254 : i32
    %108 = tpu.dynamic_rotate %89 by %c254_i32_37 dim 1 : vector<32x256xf32>, i32 -> vector<32x256xf32>
    %cst_38 = arith.constant 0.000000e+00 : f32
    %109 = vector.broadcast %cst_38 : f32 to vector<32x256xf32>
    %110 = arith.select %18, %108, %109 : vector<32x256xi1>, vector<32x256xf32>
    %111 = vector.extract_strided_slice %90 {offsets = [0, 7], sizes = [32, 1], strides = [1, 1]} : vector<32x11xf32> to vector<32x1xf32>
    %112 = vector.broadcast %111 : vector<32x1xf32> to vector<32x256xf32>
    %113 = arith.mulf %110, %112 : vector<32x256xf32>
    %114 = arith.addf %107, %113 : vector<32x256xf32>
    %c2_i32_39 = arith.constant 2 : i32
    %115 = tpu.dynamic_rotate %89 by %c2_i32_39 dim 1 : vector<32x256xf32>, i32 -> vector<32x256xf32>
    %cst_40 = arith.constant 0.000000e+00 : f32
    %116 = vector.broadcast %cst_40 : f32 to vector<32x256xf32>
    %117 = arith.select %24, %115, %116 : vector<32x256xi1>, vector<32x256xf32>
    %118 = vector.extract_strided_slice %90 {offsets = [0, 3], sizes = [32, 1], strides = [1, 1]} : vector<32x11xf32> to vector<32x1xf32>
    %119 = vector.broadcast %118 : vector<32x1xf32> to vector<32x256xf32>
    %120 = arith.mulf %117, %119 : vector<32x256xf32>
    %121 = arith.addf %114, %120 : vector<32x256xf32>
    %c253_i32_41 = arith.constant 253 : i32
    %122 = tpu.dynamic_rotate %89 by %c253_i32_41 dim 1 : vector<32x256xf32>, i32 -> vector<32x256xf32>
    %cst_42 = arith.constant 0.000000e+00 : f32
    %123 = vector.broadcast %cst_42 : f32 to vector<32x256xf32>
    %124 = arith.select %30, %122, %123 : vector<32x256xi1>, vector<32x256xf32>
    %125 = vector.extract_strided_slice %90 {offsets = [0, 8], sizes = [32, 1], strides = [1, 1]} : vector<32x11xf32> to vector<32x1xf32>
    %126 = vector.broadcast %125 : vector<32x1xf32> to vector<32x256xf32>
    %127 = arith.mulf %124, %126 : vector<32x256xf32>
    %128 = arith.addf %121, %127 : vector<32x256xf32>
    %c3_i32_43 = arith.constant 3 : i32
    %129 = tpu.dynamic_rotate %89 by %c3_i32_43 dim 1 : vector<32x256xf32>, i32 -> vector<32x256xf32>
    %cst_44 = arith.constant 0.000000e+00 : f32
    %130 = vector.broadcast %cst_44 : f32 to vector<32x256xf32>
    %131 = arith.select %36, %129, %130 : vector<32x256xi1>, vector<32x256xf32>
    %132 = vector.extract_strided_slice %90 {offsets = [0, 2], sizes = [32, 1], strides = [1, 1]} : vector<32x11xf32> to vector<32x1xf32>
    %133 = vector.broadcast %132 : vector<32x1xf32> to vector<32x256xf32>
    %134 = arith.mulf %131, %133 : vector<32x256xf32>
    %135 = arith.addf %128, %134 : vector<32x256xf32>
    %c12_i32 = arith.constant 12 : i32
    %136 = vector.broadcast %c12_i32 : i32 to vector<32x256xi32>
    %137 = arith.cmpi slt, %2, %136 : vector<32x256xi32>
    %c252_i32 = arith.constant 252 : i32
    %138 = tpu.dynamic_rotate %89 by %c252_i32 dim 1 : vector<32x256xf32>, i32 -> vector<32x256xf32>
    %cst_45 = arith.constant 0.000000e+00 : f32
    %139 = vector.broadcast %cst_45 : f32 to vector<32x256xf32>
    %140 = arith.select %137, %138, %139 : vector<32x256xi1>, vector<32x256xf32>
    %141 = vector.extract_strided_slice %90 {offsets = [0, 9], sizes = [32, 1], strides = [1, 1]} : vector<32x11xf32> to vector<32x1xf32>
    %142 = vector.broadcast %141 : vector<32x1xf32> to vector<32x256xf32>
    %143 = arith.mulf %140, %142 : vector<32x256xf32>
    %144 = arith.addf %135, %143 : vector<32x256xf32>
    %c4_i32 = arith.constant 4 : i32
    %145 = vector.broadcast %c4_i32 : i32 to vector<32x256xi32>
    %146 = arith.cmpi sge, %2, %145 : vector<32x256xi32>
    %c4_i32_46 = arith.constant 4 : i32
    %147 = tpu.dynamic_rotate %89 by %c4_i32_46 dim 1 : vector<32x256xf32>, i32 -> vector<32x256xf32>
    %cst_47 = arith.constant 0.000000e+00 : f32
    %148 = vector.broadcast %cst_47 : f32 to vector<32x256xf32>
    %149 = arith.select %146, %147, %148 : vector<32x256xi1>, vector<32x256xf32>
    %150 = vector.extract_strided_slice %90 {offsets = [0, 1], sizes = [32, 1], strides = [1, 1]} : vector<32x11xf32> to vector<32x1xf32>
    %151 = vector.broadcast %150 : vector<32x1xf32> to vector<32x256xf32>
    %152 = arith.mulf %149, %151 : vector<32x256xf32>
    %153 = arith.addf %144, %152 : vector<32x256xf32>
    %c11_i32 = arith.constant 11 : i32
    %154 = vector.broadcast %c11_i32 : i32 to vector<32x256xi32>
    %155 = arith.cmpi slt, %2, %154 : vector<32x256xi32>
    %c251_i32 = arith.constant 251 : i32
    %156 = tpu.dynamic_rotate %89 by %c251_i32 dim 1 : vector<32x256xf32>, i32 -> vector<32x256xf32>
    %cst_48 = arith.constant 0.000000e+00 : f32
    %157 = vector.broadcast %cst_48 : f32 to vector<32x256xf32>
    %158 = arith.select %155, %156, %157 : vector<32x256xi1>, vector<32x256xf32>
    %159 = vector.extract_strided_slice %90 {offsets = [0, 10], sizes = [32, 1], strides = [1, 1]} : vector<32x11xf32> to vector<32x1xf32>
    %160 = vector.broadcast %159 : vector<32x1xf32> to vector<32x256xf32>
    %161 = arith.mulf %158, %160 : vector<32x256xf32>
    %162 = arith.addf %153, %161 : vector<32x256xf32>
    %c5_i32 = arith.constant 5 : i32
    %163 = vector.broadcast %c5_i32 : i32 to vector<32x256xi32>
    %164 = arith.cmpi sge, %2, %163 : vector<32x256xi32>
    %c5_i32_49 = arith.constant 5 : i32
    %165 = tpu.dynamic_rotate %89 by %c5_i32_49 dim 1 : vector<32x256xf32>, i32 -> vector<32x256xf32>
    %cst_50 = arith.constant 0.000000e+00 : f32
    %166 = vector.broadcast %cst_50 : f32 to vector<32x256xf32>
    %167 = arith.select %164, %165, %166 : vector<32x256xi1>, vector<32x256xf32>
    %168 = vector.extract_strided_slice %90 {offsets = [0, 0], sizes = [32, 1], strides = [1, 1]} : vector<32x11xf32> to vector<32x1xf32>
    %169 = vector.broadcast %168 : vector<32x1xf32> to vector<32x256xf32>
    %170 = arith.mulf %167, %169 : vector<32x256xf32>
    %171 = arith.addf %162, %170 : vector<32x256xf32>
    %c0_51 = arith.constant 0 : index
    %c0_52 = arith.constant 0 : index
    %172 = vector.load %arg5[%c0_51, %c0_52] : memref<32x11xf32, #tpu.memory_space<vmem>>, vector<32x11xf32>
    %173 = vector.extract_strided_slice %172 {offsets = [0, 5], sizes = [32, 1], strides = [1, 1]} : vector<32x11xf32> to vector<32x1xf32>
    %174 = vector.broadcast %173 : vector<32x1xf32> to vector<32x256xf32>
    %175 = arith.mulf %171, %174 : vector<32x256xf32>
    %c240_i32_53 = arith.constant 240 : i32
    %176 = tpu.dynamic_rotate %171 by %c240_i32_53 dim 1 : vector<32x256xf32>, i32 -> vector<32x256xf32>
    %cst_54 = arith.constant 0.000000e+00 : f32
    %177 = vector.broadcast %cst_54 : f32 to vector<32x256xf32>
    %178 = arith.select %42, %176, %177 : vector<32x256xi1>, vector<32x256xf32>
    %179 = vector.extract_strided_slice %172 {offsets = [0, 6], sizes = [32, 1], strides = [1, 1]} : vector<32x11xf32> to vector<32x1xf32>
    %180 = vector.broadcast %179 : vector<32x1xf32> to vector<32x256xf32>
    %181 = arith.mulf %178, %180 : vector<32x256xf32>
    %182 = arith.addf %175, %181 : vector<32x256xf32>
    %c16_i32_55 = arith.constant 16 : i32
    %183 = tpu.dynamic_rotate %171 by %c16_i32_55 dim 1 : vector<32x256xf32>, i32 -> vector<32x256xf32>
    %cst_56 = arith.constant 0.000000e+00 : f32
    %184 = vector.broadcast %cst_56 : f32 to vector<32x256xf32>
    %185 = arith.select %48, %183, %184 : vector<32x256xi1>, vector<32x256xf32>
    %186 = vector.extract_strided_slice %172 {offsets = [0, 4], sizes = [32, 1], strides = [1, 1]} : vector<32x11xf32> to vector<32x1xf32>
    %187 = vector.broadcast %186 : vector<32x1xf32> to vector<32x256xf32>
    %188 = arith.mulf %185, %187 : vector<32x256xf32>
    %189 = arith.addf %182, %188 : vector<32x256xf32>
    %c224_i32_57 = arith.constant 224 : i32
    %190 = tpu.dynamic_rotate %171 by %c224_i32_57 dim 1 : vector<32x256xf32>, i32 -> vector<32x256xf32>
    %cst_58 = arith.constant 0.000000e+00 : f32
    %191 = vector.broadcast %cst_58 : f32 to vector<32x256xf32>
    %192 = arith.select %54, %190, %191 : vector<32x256xi1>, vector<32x256xf32>
    %193 = vector.extract_strided_slice %172 {offsets = [0, 7], sizes = [32, 1], strides = [1, 1]} : vector<32x11xf32> to vector<32x1xf32>
    %194 = vector.broadcast %193 : vector<32x1xf32> to vector<32x256xf32>
    %195 = arith.mulf %192, %194 : vector<32x256xf32>
    %196 = arith.addf %189, %195 : vector<32x256xf32>
    %c32_i32_59 = arith.constant 32 : i32
    %197 = tpu.dynamic_rotate %171 by %c32_i32_59 dim 1 : vector<32x256xf32>, i32 -> vector<32x256xf32>
    %cst_60 = arith.constant 0.000000e+00 : f32
    %198 = vector.broadcast %cst_60 : f32 to vector<32x256xf32>
    %199 = arith.select %60, %197, %198 : vector<32x256xi1>, vector<32x256xf32>
    %200 = vector.extract_strided_slice %172 {offsets = [0, 3], sizes = [32, 1], strides = [1, 1]} : vector<32x11xf32> to vector<32x1xf32>
    %201 = vector.broadcast %200 : vector<32x1xf32> to vector<32x256xf32>
    %202 = arith.mulf %199, %201 : vector<32x256xf32>
    %203 = arith.addf %196, %202 : vector<32x256xf32>
    %c208_i32_61 = arith.constant 208 : i32
    %204 = tpu.dynamic_rotate %171 by %c208_i32_61 dim 1 : vector<32x256xf32>, i32 -> vector<32x256xf32>
    %cst_62 = arith.constant 0.000000e+00 : f32
    %205 = vector.broadcast %cst_62 : f32 to vector<32x256xf32>
    %206 = arith.select %66, %204, %205 : vector<32x256xi1>, vector<32x256xf32>
    %207 = vector.extract_strided_slice %172 {offsets = [0, 8], sizes = [32, 1], strides = [1, 1]} : vector<32x11xf32> to vector<32x1xf32>
    %208 = vector.broadcast %207 : vector<32x1xf32> to vector<32x256xf32>
    %209 = arith.mulf %206, %208 : vector<32x256xf32>
    %210 = arith.addf %203, %209 : vector<32x256xf32>
    %c48_i32_63 = arith.constant 48 : i32
    %211 = tpu.dynamic_rotate %171 by %c48_i32_63 dim 1 : vector<32x256xf32>, i32 -> vector<32x256xf32>
    %cst_64 = arith.constant 0.000000e+00 : f32
    %212 = vector.broadcast %cst_64 : f32 to vector<32x256xf32>
    %213 = arith.select %72, %211, %212 : vector<32x256xi1>, vector<32x256xf32>
    %214 = vector.extract_strided_slice %172 {offsets = [0, 2], sizes = [32, 1], strides = [1, 1]} : vector<32x11xf32> to vector<32x1xf32>
    %215 = vector.broadcast %214 : vector<32x1xf32> to vector<32x256xf32>
    %216 = arith.mulf %213, %215 : vector<32x256xf32>
    %217 = arith.addf %210, %216 : vector<32x256xf32>
    %c192_i32 = arith.constant 192 : i32
    %218 = vector.broadcast %c192_i32 : i32 to vector<32x256xi32>
    %219 = arith.cmpi slt, %0, %218 : vector<32x256xi32>
    %c192_i32_65 = arith.constant 192 : i32
    %220 = tpu.dynamic_rotate %171 by %c192_i32_65 dim 1 : vector<32x256xf32>, i32 -> vector<32x256xf32>
    %cst_66 = arith.constant 0.000000e+00 : f32
    %221 = vector.broadcast %cst_66 : f32 to vector<32x256xf32>
    %222 = arith.select %219, %220, %221 : vector<32x256xi1>, vector<32x256xf32>
    %223 = vector.extract_strided_slice %172 {offsets = [0, 9], sizes = [32, 1], strides = [1, 1]} : vector<32x11xf32> to vector<32x1xf32>
    %224 = vector.broadcast %223 : vector<32x1xf32> to vector<32x256xf32>
    %225 = arith.mulf %222, %224 : vector<32x256xf32>
    %226 = arith.addf %217, %225 : vector<32x256xf32>
    %c64_i32 = arith.constant 64 : i32
    %227 = vector.broadcast %c64_i32 : i32 to vector<32x256xi32>
    %228 = arith.cmpi sge, %0, %227 : vector<32x256xi32>
    %c64_i32_67 = arith.constant 64 : i32
    %229 = tpu.dynamic_rotate %171 by %c64_i32_67 dim 1 : vector<32x256xf32>, i32 -> vector<32x256xf32>
    %cst_68 = arith.constant 0.000000e+00 : f32
    %230 = vector.broadcast %cst_68 : f32 to vector<32x256xf32>
    %231 = arith.select %228, %229, %230 : vector<32x256xi1>, vector<32x256xf32>
    %232 = vector.extract_strided_slice %172 {offsets = [0, 1], sizes = [32, 1], strides = [1, 1]} : vector<32x11xf32> to vector<32x1xf32>
    %233 = vector.broadcast %232 : vector<32x1xf32> to vector<32x256xf32>
    %234 = arith.mulf %231, %233 : vector<32x256xf32>
    %235 = arith.addf %226, %234 : vector<32x256xf32>
    %c176_i32 = arith.constant 176 : i32
    %236 = vector.broadcast %c176_i32 : i32 to vector<32x256xi32>
    %237 = arith.cmpi slt, %0, %236 : vector<32x256xi32>
    %c176_i32_69 = arith.constant 176 : i32
    %238 = tpu.dynamic_rotate %171 by %c176_i32_69 dim 1 : vector<32x256xf32>, i32 -> vector<32x256xf32>
    %cst_70 = arith.constant 0.000000e+00 : f32
    %239 = vector.broadcast %cst_70 : f32 to vector<32x256xf32>
    %240 = arith.select %237, %238, %239 : vector<32x256xi1>, vector<32x256xf32>
    %241 = vector.extract_strided_slice %172 {offsets = [0, 10], sizes = [32, 1], strides = [1, 1]} : vector<32x11xf32> to vector<32x1xf32>
    %242 = vector.broadcast %241 : vector<32x1xf32> to vector<32x256xf32>
    %243 = arith.mulf %240, %242 : vector<32x256xf32>
    %244 = arith.addf %235, %243 : vector<32x256xf32>
    %c80_i32 = arith.constant 80 : i32
    %245 = vector.broadcast %c80_i32 : i32 to vector<32x256xi32>
    %246 = arith.cmpi sge, %0, %245 : vector<32x256xi32>
    %c80_i32_71 = arith.constant 80 : i32
    %247 = tpu.dynamic_rotate %171 by %c80_i32_71 dim 1 : vector<32x256xf32>, i32 -> vector<32x256xf32>
    %cst_72 = arith.constant 0.000000e+00 : f32
    %248 = vector.broadcast %cst_72 : f32 to vector<32x256xf32>
    %249 = arith.select %246, %247, %248 : vector<32x256xi1>, vector<32x256xf32>
    %250 = vector.extract_strided_slice %172 {offsets = [0, 0], sizes = [32, 1], strides = [1, 1]} : vector<32x11xf32> to vector<32x1xf32>
    %251 = vector.broadcast %250 : vector<32x1xf32> to vector<32x256xf32>
    %252 = arith.mulf %249, %251 : vector<32x256xf32>
    %253 = arith.addf %244, %252 : vector<32x256xf32>
    %c0_73 = arith.constant 0 : index
    %c0_74 = arith.constant 0 : index
    %254 = vector.load %arg6[%c0_73, %c0_74] : memref<32x256xf32, #tpu.memory_space<vmem>>, vector<32x256xf32>
    %255 = arith.addf %253, %254 : vector<32x256xf32>
    %c0_75 = arith.constant 0 : index
    %c0_76 = arith.constant 0 : index
    %256 = vector.load %arg7[%c0_75, %c0_76] : memref<32x32xf32, #tpu.memory_space<vmem>>, vector<32x32xf32>
    %cst_77 = arith.constant dense<0.000000e+00> : vector<32x256xf32>
    %257 = tpu.matmul %256, %255, %cst_77 {dimension_numbers = #tpu.dot_dimension_numbers<[1], [0], [0], [1], [0, 0, 1, 1], [], []>} : vector<32x32xf32>, vector<32x256xf32>, vector<32x256xf32> -> vector<32x256xf32>
    %c0_78 = arith.constant 0 : index
    %c0_79 = arith.constant 0 : index
    %258 = vector.load %arg8[%c0_78, %c0_79] : memref<32x1xf32, #tpu.memory_space<vmem>>, vector<32x1xf32>
    %259 = vector.broadcast %258 : vector<32x1xf32> to vector<32x256xf32>
    %260 = arith.addf %257, %259 : vector<32x256xf32>
    %cst_80 = arith.constant 5.000000e-01 : f32
    %261 = vector.broadcast %cst_80 : f32 to vector<32x256xf32>
    %262 = arith.mulf %261, %260 : vector<32x256xf32>
    %263 = math.tanh %262 : vector<32x256xf32>
    %cst_81 = arith.constant 5.000000e-01 : f32
    %264 = vector.broadcast %cst_81 : f32 to vector<32x256xf32>
    %265 = arith.mulf %264, %263 : vector<32x256xf32>
    %cst_82 = arith.constant 5.000000e-01 : f32
    %266 = vector.broadcast %cst_82 : f32 to vector<32x256xf32>
    %267 = arith.addf %265, %266 : vector<32x256xf32>
    %268 = arith.mulf %260, %267 : vector<32x256xf32>
    %cst_83 = arith.constant 5.000000e-01 : f32
    %269 = vector.broadcast %cst_83 : f32 to vector<32x256xf32>
    %270 = arith.mulf %269, %268 : vector<32x256xf32>
    %271 = math.tanh %270 : vector<32x256xf32>
    %cst_84 = arith.constant 5.000000e-01 : f32
    %272 = vector.broadcast %cst_84 : f32 to vector<32x256xf32>
    %273 = arith.mulf %272, %271 : vector<32x256xf32>
    %cst_85 = arith.constant 5.000000e-01 : f32
    %274 = vector.broadcast %cst_85 : f32 to vector<32x256xf32>
    %275 = arith.addf %273, %274 : vector<32x256xf32>
    %c0_86 = arith.constant 0 : index
    %c0_87 = arith.constant 0 : index
    %c0_88 = arith.constant 0 : index
    %276 = vector.load %arg1[%c0_86, %c0_87, %c0_88] : memref<2x32x256xf32, #tpu.memory_space<vmem>>, vector<1x32x256xf32>
    %277 = vector.shape_cast %276 : vector<1x32x256xf32> to vector<32x256xf32>
    %278 = arith.mulf %277, %275 : vector<32x256xf32>
    %c0_89 = arith.constant 0 : index
    %c0_90 = arith.constant 0 : index
    %c0_91 = arith.constant 0 : index
    %279 = vector.load %arg9[%c0_89, %c0_90, %c0_91] : memref<2x32x256xf32, #tpu.memory_space<vmem>>, vector<1x32x256xf32>
    %280 = vector.shape_cast %279 : vector<1x32x256xf32> to vector<32x256xf32>
    %281 = vector.shape_cast %278 : vector<32x256xf32> to vector<1x32x256xf32>
    tpu.vector_store %arg9[%c0_89, %c0_90, %c0_91], %281 {strides = array<i32>} : memref<2x32x256xf32, #tpu.memory_space<vmem>>, vector<1x32x256xf32>,
    %c1 = arith.constant 1 : index
    %c0_92 = arith.constant 0 : index
    %c0_93 = arith.constant 0 : index
    %282 = vector.load %arg1[%c1, %c0_92, %c0_93] : memref<2x32x256xf32, #tpu.memory_space<vmem>>, vector<1x32x256xf32>
    %283 = vector.shape_cast %282 : vector<1x32x256xf32> to vector<32x256xf32>
    %c255_i32_94 = arith.constant 255 : i32
    %284 = tpu.dynamic_rotate %283 by %c255_i32_94 dim 1 : vector<32x256xf32>, i32 -> vector<32x256xf32>
    %cst_95 = arith.constant 0.000000e+00 : f32
    %285 = vector.broadcast %cst_95 : f32 to vector<32x256xf32>
    %286 = arith.select %6, %284, %285 : vector<32x256xi1>, vector<32x256xf32>
    %287 = arith.addf %283, %286 : vector<32x256xf32>
    %c1_i32_96 = arith.constant 1 : i32
    %288 = tpu.dynamic_rotate %283 by %c1_i32_96 dim 1 : vector<32x256xf32>, i32 -> vector<32x256xf32>
    %cst_97 = arith.constant 0.000000e+00 : f32
    %289 = vector.broadcast %cst_97 : f32 to vector<32x256xf32>
    %290 = arith.select %12, %288, %289 : vector<32x256xi1>, vector<32x256xf32>
    %291 = arith.addf %287, %290 : vector<32x256xf32>
    %c254_i32_98 = arith.constant 254 : i32
    %292 = tpu.dynamic_rotate %283 by %c254_i32_98 dim 1 : vector<32x256xf32>, i32 -> vector<32x256xf32>
    %cst_99 = arith.constant 0.000000e+00 : f32
    %293 = vector.broadcast %cst_99 : f32 to vector<32x256xf32>
    %294 = arith.select %18, %292, %293 : vector<32x256xi1>, vector<32x256xf32>
    %295 = arith.addf %291, %294 : vector<32x256xf32>
    %c2_i32_100 = arith.constant 2 : i32
    %296 = tpu.dynamic_rotate %283 by %c2_i32_100 dim 1 : vector<32x256xf32>, i32 -> vector<32x256xf32>
    %cst_101 = arith.constant 0.000000e+00 : f32
    %297 = vector.broadcast %cst_101 : f32 to vector<32x256xf32>
    %298 = arith.select %24, %296, %297 : vector<32x256xi1>, vector<32x256xf32>
    %299 = arith.addf %295, %298 : vector<32x256xf32>
    %c253_i32_102 = arith.constant 253 : i32
    %300 = tpu.dynamic_rotate %283 by %c253_i32_102 dim 1 : vector<32x256xf32>, i32 -> vector<32x256xf32>
    %cst_103 = arith.constant 0.000000e+00 : f32
    %301 = vector.broadcast %cst_103 : f32 to vector<32x256xf32>
    %302 = arith.select %30, %300, %301 : vector<32x256xi1>, vector<32x256xf32>
    %303 = arith.addf %299, %302 : vector<32x256xf32>
    %c3_i32_104 = arith.constant 3 : i32
    %304 = tpu.dynamic_rotate %283 by %c3_i32_104 dim 1 : vector<32x256xf32>, i32 -> vector<32x256xf32>
    %cst_105 = arith.constant 0.000000e+00 : f32
    %305 = vector.broadcast %cst_105 : f32 to vector<32x256xf32>
    %306 = arith.select %36, %304, %305 : vector<32x256xi1>, vector<32x256xf32>
    %307 = arith.addf %303, %306 : vector<32x256xf32>
    %c240_i32_106 = arith.constant 240 : i32
    %308 = tpu.dynamic_rotate %307 by %c240_i32_106 dim 1 : vector<32x256xf32>, i32 -> vector<32x256xf32>
    %cst_107 = arith.constant 0.000000e+00 : f32
    %309 = vector.broadcast %cst_107 : f32 to vector<32x256xf32>
    %310 = arith.select %42, %308, %309 : vector<32x256xi1>, vector<32x256xf32>
    %311 = arith.addf %307, %310 : vector<32x256xf32>
    %c16_i32_108 = arith.constant 16 : i32
    %312 = tpu.dynamic_rotate %307 by %c16_i32_108 dim 1 : vector<32x256xf32>, i32 -> vector<32x256xf32>
    %cst_109 = arith.constant 0.000000e+00 : f32
    %313 = vector.broadcast %cst_109 : f32 to vector<32x256xf32>
    %314 = arith.select %48, %312, %313 : vector<32x256xi1>, vector<32x256xf32>
    %315 = arith.addf %311, %314 : vector<32x256xf32>
    %c224_i32_110 = arith.constant 224 : i32
    %316 = tpu.dynamic_rotate %307 by %c224_i32_110 dim 1 : vector<32x256xf32>, i32 -> vector<32x256xf32>
    %cst_111 = arith.constant 0.000000e+00 : f32
    %317 = vector.broadcast %cst_111 : f32 to vector<32x256xf32>
    %318 = arith.select %54, %316, %317 : vector<32x256xi1>, vector<32x256xf32>
    %319 = arith.addf %315, %318 : vector<32x256xf32>
    %c32_i32_112 = arith.constant 32 : i32
    %320 = tpu.dynamic_rotate %307 by %c32_i32_112 dim 1 : vector<32x256xf32>, i32 -> vector<32x256xf32>
    %cst_113 = arith.constant 0.000000e+00 : f32
    %321 = vector.broadcast %cst_113 : f32 to vector<32x256xf32>
    %322 = arith.select %60, %320, %321 : vector<32x256xi1>, vector<32x256xf32>
    %323 = arith.addf %319, %322 : vector<32x256xf32>
    %c208_i32_114 = arith.constant 208 : i32
    %324 = tpu.dynamic_rotate %307 by %c208_i32_114 dim 1 : vector<32x256xf32>, i32 -> vector<32x256xf32>
    %cst_115 = arith.constant 0.000000e+00 : f32
    %325 = vector.broadcast %cst_115 : f32 to vector<32x256xf32>
    %326 = arith.select %66, %324, %325 : vector<32x256xi1>, vector<32x256xf32>
    %327 = arith.addf %323, %326 : vector<32x256xf32>
    %c48_i32_116 = arith.constant 48 : i32
    %328 = tpu.dynamic_rotate %307 by %c48_i32_116 dim 1 : vector<32x256xf32>, i32 -> vector<32x256xf32>
    %cst_117 = arith.constant 0.000000e+00 : f32
    %329 = vector.broadcast %cst_117 : f32 to vector<32x256xf32>
    %330 = arith.select %72, %328, %329 : vector<32x256xi1>, vector<32x256xf32>
    %331 = arith.addf %327, %330 : vector<32x256xf32>
    %c0_118 = arith.constant 0 : index
    %c0_119 = arith.constant 0 : index
    %332 = vector.load %arg2[%c0_118, %c0_119] : memref<32x32xf32, #tpu.memory_space<vmem>>, vector<32x32xf32>
    %cst_120 = arith.constant dense<0.000000e+00> : vector<32x256xf32>
    %333 = tpu.matmul %332, %331, %cst_120 {dimension_numbers = #tpu.dot_dimension_numbers<[1], [0], [0], [1], [0, 0, 1, 1], [], []>} : vector<32x32xf32>, vector<32x256xf32>, vector<32x256xf32> -> vector<32x256xf32>
    %c0_121 = arith.constant 0 : index
    %c0_122 = arith.constant 0 : index
    %334 = vector.load %arg3[%c0_121, %c0_122] : memref<32x1xf32, #tpu.memory_space<vmem>>, vector<32x1xf32>
    %335 = vector.broadcast %334 : vector<32x1xf32> to vector<32x256xf32>
    %336 = arith.addf %333, %335 : vector<32x256xf32>
    %cst_123 = arith.constant 5.000000e-01 : f32
    %337 = vector.broadcast %cst_123 : f32 to vector<32x256xf32>
    %338 = arith.mulf %337, %336 : vector<32x256xf32>
    %339 = math.tanh %338 : vector<32x256xf32>
    %cst_124 = arith.constant 5.000000e-01 : f32
    %340 = vector.broadcast %cst_124 : f32 to vector<32x256xf32>
    %341 = arith.mulf %340, %339 : vector<32x256xf32>
    %cst_125 = arith.constant 5.000000e-01 : f32
    %342 = vector.broadcast %cst_125 : f32 to vector<32x256xf32>
    %343 = arith.addf %341, %342 : vector<32x256xf32>
    %344 = arith.mulf %336, %343 : vector<32x256xf32>
    %c0_126 = arith.constant 0 : index
    %c0_127 = arith.constant 0 : index
    %345 = vector.load %arg4[%c0_126, %c0_127] : memref<32x11xf32, #tpu.memory_space<vmem>>, vector<32x11xf32>
    %346 = vector.extract_strided_slice %345 {offsets = [0, 5], sizes = [32, 1], strides = [1, 1]} : vector<32x11xf32> to vector<32x1xf32>
    %347 = vector.broadcast %346 : vector<32x1xf32> to vector<32x256xf32>
    %348 = arith.mulf %344, %347 : vector<32x256xf32>
    %c255_i32_128 = arith.constant 255 : i32
    %349 = tpu.dynamic_rotate %344 by %c255_i32_128 dim 1 : vector<32x256xf32>, i32 -> vector<32x256xf32>
    %cst_129 = arith.constant 0.000000e+00 : f32
    %350 = vector.broadcast %cst_129 : f32 to vector<32x256xf32>
    %351 = arith.select %6, %349, %350 : vector<32x256xi1>, vector<32x256xf32>
    %352 = vector.extract_strided_slice %345 {offsets = [0, 6], sizes = [32, 1], strides = [1, 1]} : vector<32x11xf32> to vector<32x1xf32>
    %353 = vector.broadcast %352 : vector<32x1xf32> to vector<32x256xf32>
    %354 = arith.mulf %351, %353 : vector<32x256xf32>
    %355 = arith.addf %348, %354 : vector<32x256xf32>
    %c1_i32_130 = arith.constant 1 : i32
    %356 = tpu.dynamic_rotate %344 by %c1_i32_130 dim 1 : vector<32x256xf32>, i32 -> vector<32x256xf32>
    %cst_131 = arith.constant 0.000000e+00 : f32
    %357 = vector.broadcast %cst_131 : f32 to vector<32x256xf32>
    %358 = arith.select %12, %356, %357 : vector<32x256xi1>, vector<32x256xf32>
    %359 = vector.extract_strided_slice %345 {offsets = [0, 4], sizes = [32, 1], strides = [1, 1]} : vector<32x11xf32> to vector<32x1xf32>
    %360 = vector.broadcast %359 : vector<32x1xf32> to vector<32x256xf32>
    %361 = arith.mulf %358, %360 : vector<32x256xf32>
    %362 = arith.addf %355, %361 : vector<32x256xf32>
    %c254_i32_132 = arith.constant 254 : i32
    %363 = tpu.dynamic_rotate %344 by %c254_i32_132 dim 1 : vector<32x256xf32>, i32 -> vector<32x256xf32>
    %cst_133 = arith.constant 0.000000e+00 : f32
    %364 = vector.broadcast %cst_133 : f32 to vector<32x256xf32>
    %365 = arith.select %18, %363, %364 : vector<32x256xi1>, vector<32x256xf32>
    %366 = vector.extract_strided_slice %345 {offsets = [0, 7], sizes = [32, 1], strides = [1, 1]} : vector<32x11xf32> to vector<32x1xf32>
    %367 = vector.broadcast %366 : vector<32x1xf32> to vector<32x256xf32>
    %368 = arith.mulf %365, %367 : vector<32x256xf32>
    %369 = arith.addf %362, %368 : vector<32x256xf32>
    %c2_i32_134 = arith.constant 2 : i32
    %370 = tpu.dynamic_rotate %344 by %c2_i32_134 dim 1 : vector<32x256xf32>, i32 -> vector<32x256xf32>
    %cst_135 = arith.constant 0.000000e+00 : f32
    %371 = vector.broadcast %cst_135 : f32 to vector<32x256xf32>
    %372 = arith.select %24, %370, %371 : vector<32x256xi1>, vector<32x256xf32>
    %373 = vector.extract_strided_slice %345 {offsets = [0, 3], sizes = [32, 1], strides = [1, 1]} : vector<32x11xf32> to vector<32x1xf32>
    %374 = vector.broadcast %373 : vector<32x1xf32> to vector<32x256xf32>
    %375 = arith.mulf %372, %374 : vector<32x256xf32>
    %376 = arith.addf %369, %375 : vector<32x256xf32>
    %c253_i32_136 = arith.constant 253 : i32
    %377 = tpu.dynamic_rotate %344 by %c253_i32_136 dim 1 : vector<32x256xf32>, i32 -> vector<32x256xf32>
    %cst_137 = arith.constant 0.000000e+00 : f32
    %378 = vector.broadcast %cst_137 : f32 to vector<32x256xf32>
    %379 = arith.select %30, %377, %378 : vector<32x256xi1>, vector<32x256xf32>
    %380 = vector.extract_strided_slice %345 {offsets = [0, 8], sizes = [32, 1], strides = [1, 1]} : vector<32x11xf32> to vector<32x1xf32>
    %381 = vector.broadcast %380 : vector<32x1xf32> to vector<32x256xf32>
    %382 = arith.mulf %379, %381 : vector<32x256xf32>
    %383 = arith.addf %376, %382 : vector<32x256xf32>
    %c3_i32_138 = arith.constant 3 : i32
    %384 = tpu.dynamic_rotate %344 by %c3_i32_138 dim 1 : vector<32x256xf32>, i32 -> vector<32x256xf32>
    %cst_139 = arith.constant 0.000000e+00 : f32
    %385 = vector.broadcast %cst_139 : f32 to vector<32x256xf32>
    %386 = arith.select %36, %384, %385 : vector<32x256xi1>, vector<32x256xf32>
    %387 = vector.extract_strided_slice %345 {offsets = [0, 2], sizes = [32, 1], strides = [1, 1]} : vector<32x11xf32> to vector<32x1xf32>
    %388 = vector.broadcast %387 : vector<32x1xf32> to vector<32x256xf32>
    %389 = arith.mulf %386, %388 : vector<32x256xf32>
    %390 = arith.addf %383, %389 : vector<32x256xf32>
    %c252_i32_140 = arith.constant 252 : i32
    %391 = tpu.dynamic_rotate %344 by %c252_i32_140 dim 1 : vector<32x256xf32>, i32 -> vector<32x256xf32>
    %cst_141 = arith.constant 0.000000e+00 : f32
    %392 = vector.broadcast %cst_141 : f32 to vector<32x256xf32>
    %393 = arith.select %137, %391, %392 : vector<32x256xi1>, vector<32x256xf32>
    %394 = vector.extract_strided_slice %345 {offsets = [0, 9], sizes = [32, 1], strides = [1, 1]} : vector<32x11xf32> to vector<32x1xf32>
    %395 = vector.broadcast %394 : vector<32x1xf32> to vector<32x256xf32>
    %396 = arith.mulf %393, %395 : vector<32x256xf32>
    %397 = arith.addf %390, %396 : vector<32x256xf32>
    %c4_i32_142 = arith.constant 4 : i32
    %398 = tpu.dynamic_rotate %344 by %c4_i32_142 dim 1 : vector<32x256xf32>, i32 -> vector<32x256xf32>
    %cst_143 = arith.constant 0.000000e+00 : f32
    %399 = vector.broadcast %cst_143 : f32 to vector<32x256xf32>
    %400 = arith.select %146, %398, %399 : vector<32x256xi1>, vector<32x256xf32>
    %401 = vector.extract_strided_slice %345 {offsets = [0, 1], sizes = [32, 1], strides = [1, 1]} : vector<32x11xf32> to vector<32x1xf32>
    %402 = vector.broadcast %401 : vector<32x1xf32> to vector<32x256xf32>
    %403 = arith.mulf %400, %402 : vector<32x256xf32>
    %404 = arith.addf %397, %403 : vector<32x256xf32>
    %c251_i32_144 = arith.constant 251 : i32
    %405 = tpu.dynamic_rotate %344 by %c251_i32_144 dim 1 : vector<32x256xf32>, i32 -> vector<32x256xf32>
    %cst_145 = arith.constant 0.000000e+00 : f32
    %406 = vector.broadcast %cst_145 : f32 to vector<32x256xf32>
    %407 = arith.select %155, %405, %406 : vector<32x256xi1>, vector<32x256xf32>
    %408 = vector.extract_strided_slice %345 {offsets = [0, 10], sizes = [32, 1], strides = [1, 1]} : vector<32x11xf32> to vector<32x1xf32>
    %409 = vector.broadcast %408 : vector<32x1xf32> to vector<32x256xf32>
    %410 = arith.mulf %407, %409 : vector<32x256xf32>
    %411 = arith.addf %404, %410 : vector<32x256xf32>
    %c5_i32_146 = arith.constant 5 : i32
    %412 = tpu.dynamic_rotate %344 by %c5_i32_146 dim 1 : vector<32x256xf32>, i32 -> vector<32x256xf32>
    %cst_147 = arith.constant 0.000000e+00 : f32
    %413 = vector.broadcast %cst_147 : f32 to vector<32x256xf32>
    %414 = arith.select %164, %412, %413 : vector<32x256xi1>, vector<32x256xf32>
    %415 = vector.extract_strided_slice %345 {offsets = [0, 0], sizes = [32, 1], strides = [1, 1]} : vector<32x11xf32> to vector<32x1xf32>
    %416 = vector.broadcast %415 : vector<32x1xf32> to vector<32x256xf32>
    %417 = arith.mulf %414, %416 : vector<32x256xf32>
    %418 = arith.addf %411, %417 : vector<32x256xf32>
    %c0_148 = arith.constant 0 : index
    %c0_149 = arith.constant 0 : index
    %419 = vector.load %arg5[%c0_148, %c0_149] : memref<32x11xf32, #tpu.memory_space<vmem>>, vector<32x11xf32>
    %420 = vector.extract_strided_slice %419 {offsets = [0, 5], sizes = [32, 1], strides = [1, 1]} : vector<32x11xf32> to vector<32x1xf32>
    %421 = vector.broadcast %420 : vector<32x1xf32> to vector<32x256xf32>
    %422 = arith.mulf %418, %421 : vector<32x256xf32>
    %c240_i32_150 = arith.constant 240 : i32
    %423 = tpu.dynamic_rotate %418 by %c240_i32_150 dim 1 : vector<32x256xf32>, i32 -> vector<32x256xf32>
    %cst_151 = arith.constant 0.000000e+00 : f32
    %424 = vector.broadcast %cst_151 : f32 to vector<32x256xf32>
    %425 = arith.select %42, %423, %424 : vector<32x256xi1>, vector<32x256xf32>
    %426 = vector.extract_strided_slice %419 {offsets = [0, 6], sizes = [32, 1], strides = [1, 1]} : vector<32x11xf32> to vector<32x1xf32>
    %427 = vector.broadcast %426 : vector<32x1xf32> to vector<32x256xf32>
    %428 = arith.mulf %425, %427 : vector<32x256xf32>
    %429 = arith.addf %422, %428 : vector<32x256xf32>
    %c16_i32_152 = arith.constant 16 : i32
    %430 = tpu.dynamic_rotate %418 by %c16_i32_152 dim 1 : vector<32x256xf32>, i32 -> vector<32x256xf32>
    %cst_153 = arith.constant 0.000000e+00 : f32
    %431 = vector.broadcast %cst_153 : f32 to vector<32x256xf32>
    %432 = arith.select %48, %430, %431 : vector<32x256xi1>, vector<32x256xf32>
    %433 = vector.extract_strided_slice %419 {offsets = [0, 4], sizes = [32, 1], strides = [1, 1]} : vector<32x11xf32> to vector<32x1xf32>
    %434 = vector.broadcast %433 : vector<32x1xf32> to vector<32x256xf32>
    %435 = arith.mulf %432, %434 : vector<32x256xf32>
    %436 = arith.addf %429, %435 : vector<32x256xf32>
    %c224_i32_154 = arith.constant 224 : i32
    %437 = tpu.dynamic_rotate %418 by %c224_i32_154 dim 1 : vector<32x256xf32>, i32 -> vector<32x256xf32>
    %cst_155 = arith.constant 0.000000e+00 : f32
    %438 = vector.broadcast %cst_155 : f32 to vector<32x256xf32>
    %439 = arith.select %54, %437, %438 : vector<32x256xi1>, vector<32x256xf32>
    %440 = vector.extract_strided_slice %419 {offsets = [0, 7], sizes = [32, 1], strides = [1, 1]} : vector<32x11xf32> to vector<32x1xf32>
    %441 = vector.broadcast %440 : vector<32x1xf32> to vector<32x256xf32>
    %442 = arith.mulf %439, %441 : vector<32x256xf32>
    %443 = arith.addf %436, %442 : vector<32x256xf32>
    %c32_i32_156 = arith.constant 32 : i32
    %444 = tpu.dynamic_rotate %418 by %c32_i32_156 dim 1 : vector<32x256xf32>, i32 -> vector<32x256xf32>
    %cst_157 = arith.constant 0.000000e+00 : f32
    %445 = vector.broadcast %cst_157 : f32 to vector<32x256xf32>
    %446 = arith.select %60, %444, %445 : vector<32x256xi1>, vector<32x256xf32>
    %447 = vector.extract_strided_slice %419 {offsets = [0, 3], sizes = [32, 1], strides = [1, 1]} : vector<32x11xf32> to vector<32x1xf32>
    %448 = vector.broadcast %447 : vector<32x1xf32> to vector<32x256xf32>
    %449 = arith.mulf %446, %448 : vector<32x256xf32>
    %450 = arith.addf %443, %449 : vector<32x256xf32>
    %c208_i32_158 = arith.constant 208 : i32
    %451 = tpu.dynamic_rotate %418 by %c208_i32_158 dim 1 : vector<32x256xf32>, i32 -> vector<32x256xf32>
    %cst_159 = arith.constant 0.000000e+00 : f32
    %452 = vector.broadcast %cst_159 : f32 to vector<32x256xf32>
    %453 = arith.select %66, %451, %452 : vector<32x256xi1>, vector<32x256xf32>
    %454 = vector.extract_strided_slice %419 {offsets = [0, 8], sizes = [32, 1], strides = [1, 1]} : vector<32x11xf32> to vector<32x1xf32>
    %455 = vector.broadcast %454 : vector<32x1xf32> to vector<32x256xf32>
    %456 = arith.mulf %453, %455 : vector<32x256xf32>
    %457 = arith.addf %450, %456 : vector<32x256xf32>
    %c48_i32_160 = arith.constant 48 : i32
    %458 = tpu.dynamic_rotate %418 by %c48_i32_160 dim 1 : vector<32x256xf32>, i32 -> vector<32x256xf32>
    %cst_161 = arith.constant 0.000000e+00 : f32
    %459 = vector.broadcast %cst_161 : f32 to vector<32x256xf32>
    %460 = arith.select %72, %458, %459 : vector<32x256xi1>, vector<32x256xf32>
    %461 = vector.extract_strided_slice %419 {offsets = [0, 2], sizes = [32, 1], strides = [1, 1]} : vector<32x11xf32> to vector<32x1xf32>
    %462 = vector.broadcast %461 : vector<32x1xf32> to vector<32x256xf32>
    %463 = arith.mulf %460, %462 : vector<32x256xf32>
    %464 = arith.addf %457, %463 : vector<32x256xf32>
    %c192_i32_162 = arith.constant 192 : i32
    %465 = tpu.dynamic_rotate %418 by %c192_i32_162 dim 1 : vector<32x256xf32>, i32 -> vector<32x256xf32>
    %cst_163 = arith.constant 0.000000e+00 : f32
    %466 = vector.broadcast %cst_163 : f32 to vector<32x256xf32>
    %467 = arith.select %219, %465, %466 : vector<32x256xi1>, vector<32x256xf32>
    %468 = vector.extract_strided_slice %419 {offsets = [0, 9], sizes = [32, 1], strides = [1, 1]} : vector<32x11xf32> to vector<32x1xf32>
    %469 = vector.broadcast %468 : vector<32x1xf32> to vector<32x256xf32>
    %470 = arith.mulf %467, %469 : vector<32x256xf32>
    %471 = arith.addf %464, %470 : vector<32x256xf32>
    %c64_i32_164 = arith.constant 64 : i32
    %472 = tpu.dynamic_rotate %418 by %c64_i32_164 dim 1 : vector<32x256xf32>, i32 -> vector<32x256xf32>
    %cst_165 = arith.constant 0.000000e+00 : f32
    %473 = vector.broadcast %cst_165 : f32 to vector<32x256xf32>
    %474 = arith.select %228, %472, %473 : vector<32x256xi1>, vector<32x256xf32>
    %475 = vector.extract_strided_slice %419 {offsets = [0, 1], sizes = [32, 1], strides = [1, 1]} : vector<32x11xf32> to vector<32x1xf32>
    %476 = vector.broadcast %475 : vector<32x1xf32> to vector<32x256xf32>
    %477 = arith.mulf %474, %476 : vector<32x256xf32>
    %478 = arith.addf %471, %477 : vector<32x256xf32>
    %c176_i32_166 = arith.constant 176 : i32
    %479 = tpu.dynamic_rotate %418 by %c176_i32_166 dim 1 : vector<32x256xf32>, i32 -> vector<32x256xf32>
    %cst_167 = arith.constant 0.000000e+00 : f32
    %480 = vector.broadcast %cst_167 : f32 to vector<32x256xf32>
    %481 = arith.select %237, %479, %480 : vector<32x256xi1>, vector<32x256xf32>
    %482 = vector.extract_strided_slice %419 {offsets = [0, 10], sizes = [32, 1], strides = [1, 1]} : vector<32x11xf32> to vector<32x1xf32>
    %483 = vector.broadcast %482 : vector<32x1xf32> to vector<32x256xf32>
    %484 = arith.mulf %481, %483 : vector<32x256xf32>
    %485 = arith.addf %478, %484 : vector<32x256xf32>
    %c80_i32_168 = arith.constant 80 : i32
    %486 = tpu.dynamic_rotate %418 by %c80_i32_168 dim 1 : vector<32x256xf32>, i32 -> vector<32x256xf32>
    %cst_169 = arith.constant 0.000000e+00 : f32
    %487 = vector.broadcast %cst_169 : f32 to vector<32x256xf32>
    %488 = arith.select %246, %486, %487 : vector<32x256xi1>, vector<32x256xf32>
    %489 = vector.extract_strided_slice %419 {offsets = [0, 0], sizes = [32, 1], strides = [1, 1]} : vector<32x11xf32> to vector<32x1xf32>
    %490 = vector.broadcast %489 : vector<32x1xf32> to vector<32x256xf32>
    %491 = arith.mulf %488, %490 : vector<32x256xf32>
    %492 = arith.addf %485, %491 : vector<32x256xf32>
    %c0_170 = arith.constant 0 : index
    %c0_171 = arith.constant 0 : index
    %493 = vector.load %arg6[%c0_170, %c0_171] : memref<32x256xf32, #tpu.memory_space<vmem>>, vector<32x256xf32>
    %494 = arith.addf %492, %493 : vector<32x256xf32>
    %c0_172 = arith.constant 0 : index
    %c0_173 = arith.constant 0 : index
    %495 = vector.load %arg7[%c0_172, %c0_173] : memref<32x32xf32, #tpu.memory_space<vmem>>, vector<32x32xf32>
    %cst_174 = arith.constant dense<0.000000e+00> : vector<32x256xf32>
    %496 = tpu.matmul %495, %494, %cst_174 {dimension_numbers = #tpu.dot_dimension_numbers<[1], [0], [0], [1], [0, 0, 1, 1], [], []>} : vector<32x32xf32>, vector<32x256xf32>, vector<32x256xf32> -> vector<32x256xf32>
    %c0_175 = arith.constant 0 : index
    %c0_176 = arith.constant 0 : index
    %497 = vector.load %arg8[%c0_175, %c0_176] : memref<32x1xf32, #tpu.memory_space<vmem>>, vector<32x1xf32>
    %498 = vector.broadcast %497 : vector<32x1xf32> to vector<32x256xf32>
    %499 = arith.addf %496, %498 : vector<32x256xf32>
    %cst_177 = arith.constant 5.000000e-01 : f32
    %500 = vector.broadcast %cst_177 : f32 to vector<32x256xf32>
    %501 = arith.mulf %500, %499 : vector<32x256xf32>
    %502 = math.tanh %501 : vector<32x256xf32>
    %cst_178 = arith.constant 5.000000e-01 : f32
    %503 = vector.broadcast %cst_178 : f32 to vector<32x256xf32>
    %504 = arith.mulf %503, %502 : vector<32x256xf32>
    %cst_179 = arith.constant 5.000000e-01 : f32
    %505 = vector.broadcast %cst_179 : f32 to vector<32x256xf32>
    %506 = arith.addf %504, %505 : vector<32x256xf32>
    %507 = arith.mulf %499, %506 : vector<32x256xf32>
    %cst_180 = arith.constant 5.000000e-01 : f32
    %508 = vector.broadcast %cst_180 : f32 to vector<32x256xf32>
    %509 = arith.mulf %508, %507 : vector<32x256xf32>
    %510 = math.tanh %509 : vector<32x256xf32>
    %cst_181 = arith.constant 5.000000e-01 : f32
    %511 = vector.broadcast %cst_181 : f32 to vector<32x256xf32>
    %512 = arith.mulf %511, %510 : vector<32x256xf32>
    %cst_182 = arith.constant 5.000000e-01 : f32
    %513 = vector.broadcast %cst_182 : f32 to vector<32x256xf32>
    %514 = arith.addf %512, %513 : vector<32x256xf32>
    %c1_183 = arith.constant 1 : index
    %c0_184 = arith.constant 0 : index
    %c0_185 = arith.constant 0 : index
    %515 = vector.load %arg1[%c1_183, %c0_184, %c0_185] : memref<2x32x256xf32, #tpu.memory_space<vmem>>, vector<1x32x256xf32>
    %516 = vector.shape_cast %515 : vector<1x32x256xf32> to vector<32x256xf32>
    %517 = arith.mulf %516, %514 : vector<32x256xf32>
    %c1_186 = arith.constant 1 : index
    %c0_187 = arith.constant 0 : index
    %c0_188 = arith.constant 0 : index
    %518 = vector.load %arg9[%c1_186, %c0_187, %c0_188] : memref<2x32x256xf32, #tpu.memory_space<vmem>>, vector<1x32x256xf32>
    %519 = vector.shape_cast %518 : vector<1x32x256xf32> to vector<32x256xf32>
    %520 = vector.shape_cast %517 : vector<32x256xf32> to vector<1x32x256xf32>
    tpu.vector_store %arg9[%c1_186, %c0_187, %c0_188], %520 {strides = array<i32>} : memref<2x32x256xf32, #tpu.memory_space<vmem>>, vector<1x32x256xf32>,
    return
  }
  func.func @transform_0(%arg0: i32) -> (i32, i32, i32) {
    %c0_i32 = arith.constant 0 : i32
    %c0_i32_0 = arith.constant 0 : i32
    %c0_i32_1 = arith.constant 0 : i32
    return %arg0, %c0_i32, %c0_i32_0 : i32, i32, i32
  }
  func.func @transform_1(%arg0: i32) -> (i32, i32) {
    %c0_i32 = arith.constant 0 : i32
    %c0_i32_0 = arith.constant 0 : i32
    %c0_i32_1 = arith.constant 0 : i32
    return %c0_i32, %c0_i32_0 : i32, i32
  }
  func.func @transform_2(%arg0: i32) -> (i32, i32) {
    %c0_i32 = arith.constant 0 : i32
    %c0_i32_0 = arith.constant 0 : i32
    %c0_i32_1 = arith.constant 0 : i32
    return %c0_i32, %c0_i32_0 : i32, i32
  }
  func.func @transform_3(%arg0: i32) -> (i32, i32) {
    %c0_i32 = arith.constant 0 : i32
    %c0_i32_0 = arith.constant 0 : i32
    %c0_i32_1 = arith.constant 0 : i32
    return %c0_i32, %c0_i32_0 : i32, i32
  }
  func.func @transform_4(%arg0: i32) -> (i32, i32) {
    %c0_i32 = arith.constant 0 : i32
    %c0_i32_0 = arith.constant 0 : i32
    %c0_i32_1 = arith.constant 0 : i32
    return %c0_i32, %c0_i32_0 : i32, i32
  }
  func.func @transform_5(%arg0: i32) -> (i32, i32) {
    %c0_i32 = arith.constant 0 : i32
    %c0_i32_0 = arith.constant 0 : i32
    %c0_i32_1 = arith.constant 0 : i32
    return %c0_i32, %c0_i32_0 : i32, i32
  }
  func.func @transform_6(%arg0: i32) -> (i32, i32) {
    %c0_i32 = arith.constant 0 : i32
    %c0_i32_0 = arith.constant 0 : i32
    %c0_i32_1 = arith.constant 0 : i32
    return %c0_i32, %c0_i32_0 : i32, i32
  }
  func.func @transform_7(%arg0: i32) -> (i32, i32) {
    %c0_i32 = arith.constant 0 : i32
    %c0_i32_0 = arith.constant 0 : i32
    %c0_i32_1 = arith.constant 0 : i32
    return %c0_i32, %c0_i32_0 : i32, i32
  }
  func.func @transform_8(%arg0: i32) -> (i32, i32, i32) {
    %c0_i32 = arith.constant 0 : i32
    %c0_i32_0 = arith.constant 0 : i32
    %c0_i32_1 = arith.constant 0 : i32
    return %arg0, %c0_i32, %c0_i32_0 : i32, i32, i32
  }
}

</mosaic_0001>

<bundles_post_ra>
// kernel: tpu_custom_call.1
= control target key start
LH: loop header
LB: loop body
LE: loop exit
PB: predicated region body
PF: predicated region fallthrough
CT: control target
= control target key end

     0   :  { %13 = vsyncpa [#allocation3], 0  ;;  %s10668_s0 = inlined_call_operand.hbm [shape: f32[2,32,256], index: 0, kind: input, shape index: {}]   ;;  %s10669_s1 = inlined_call_operand.vmem [shape: f32[32,32], index: 1, kind: input, shape index: {}]   ;;  %s10670_s2 = inlined_call_operand.vmem [shape: f32[32,1], index: 2, kind: input, shape index: {}]   ;;  %s10671_s3 = inlined_call_operand.vmem [shape: f32[32,11], index: 3, kind: input, shape index: {}]   ;;  %s10672_s4 = inlined_call_operand.vmem [shape: f32[32,11], index: 4, kind: input, shape index: {}]   ;;  %s10673_s5 = inlined_call_operand.vmem [shape: f32[32,256], index: 5, kind: input, shape index: {}]   ;;  %s10674_s6 = inlined_call_operand.vmem [shape: f32[32,32], index: 6, kind: input, shape index: {}]   ;;  %s10675_s7 = inlined_call_operand.vmem [shape: f32[32,1], index: 7, kind: input, shape index: {}]   ;;  %s10676_s8 = inlined_call_operand.hbm [shape: f32[2,32,256], index: 8, kind: output, shape index: {}]  }
   0x1   :  { %14 = vsyncpa [#allocation4], 0  ;;  %s19_s29 = sshll.u32 %s10668_s0, 4  ;;  %s4685_s30 = smov [#allocation2]   ;;  %s20_s29 = int_to_ptr.hbm [resolvable:$true] %s19_s29 }
   0x2   :  { %s21_s9 = sshll.u32 %s4685_s30, 4  ;;  %s10823_s10 = smov 256   ;;  %s22_s9 = int_to_ptr.vmem [resolvable:$true] %s21_s9 }
   0x3   :  { %s4687_s11 = smov 16  }
   0x4   :  { %27 = dma.hbm_to_vmem [thread:$0]  %s20_s29, 2048, %s22_s9, [#allocation3], %s10823_s10, %s10823_s10, %s4687_s11  }
   0x5   :  { %4681 = dma.done.wait [#allocation3], 2048  }
   0x6   :  { %4682 = vsyncadd [#allocation3], 4294965248  ;;  %v4767_v0 = vld [vmem:[#allocation2 + $0x20] sm:$0xff]  ;;  %s4688_s12 = smov 127   ;;  %v4775_v2 = vld [vmem:[#allocation2 + $0x8] sm:$0xff]  ;;  %s4689_s0 = smov 1   ;;  %v46_v40 = vlaneseq }
   0x7   :  { %v4769_v1 = vld [vmem:[#allocation2] sm:$0xff]  ;;  %65 = vrot.lane.b32.xlu1 %v4767_v0, %s4688_s12  ;;  %69 = vrot.lane.b32.xlu2 %v4775_v2, %s4688_s12  ;;  %v4779_v3 = vld [vmem:[#allocation2 + $0x30] sm:$0xff]  ;;  %v4783_v5 = vld [vmem:[#allocation2 + $0x18] sm:$0xff]  ;;  %s4690_s13 = smov 126   ;;  %s4691_s14 = smov 2  }
   0x8   :  { %61 = vrot.lane.b32.xlu0 %v4769_v1, %s4688_s12  ;;  %v4781_v4 = vld [vmem:[#allocation2 + $0x10] sm:$0xff]  ;;  %v4791_v6 = vld [vmem:[#allocation2 + $0x38] sm:$0xff]  ;;  %v4793_v7 = vld [vmem:[#allocation2 + $0x28] sm:$0xff]  ;;  %s4692_s15 = smov 125   ;;  %s4693_s16 = smov 3   ;;  %v4937_v42 = vand.u32 127, %v46_v40 }
   0x9   :  { %s4694_s17 = smov 112   ;;  %s4695_s18 = smov 96  }
   0xa   :  { %v4944_v45 = vadd.s32 128, %v4937_v42  ;;  %v4947_v46 = vand.u32 15, %v4937_v42  ;;  %vm10796_vm0 = vcmp.lt.s32.totalorder %v4937_v42, 127  ;;  %vm10795_vm3 = vcmp.lt.s32.totalorder %v4937_v42, 1  ;;  %s4696_s19 = smov 32   ;;  %s4697_s20 = smov 80  }
   0xb   :  { %vm10790_vm4 = vcmp.lt.s32.totalorder %v4937_v42, 126  ;;  %vm10789_vm8 = vcmp.lt.s32.totalorder %v4937_v42, 2  ;;  %vm10793_vm9 = vcmp.lt.s32.totalorder %v4937_v42, 125  ;;  %vm10684_vm12 = vcmp.lt.s32.totalorder %v4937_v42, 3  ;;  %s4698_s21 = smov 48   ;;  %s4707_s26 = smov 124  }
   0xc   :  { %10988 = vst [vmem:[#allocation9_spill] sm:$0xff] %v4944_v45  ;;  %v4951_v47 = vand.u32 15, %v4944_v45  ;;  %vm10794_vm1 = vcmp.lt.s32.totalorder %v4947_v46, 15  ;;  %vm10680_vm5 = vcmp.ge.s32.totalorder %v4947_v46, 1  ;;  %vm10787_vm6 = vcmp.lt.s32.totalorder %v4947_v46, 14  ;;  %s4709_s27 = smov 4  }
   0xd   :  { %vm10681_vm10 = vcmp.ge.s32.totalorder %v4947_v46, 2  ;;  %vm10792_vm11 = vcmp.lt.s32.totalorder %v4947_v46, 13  ;;  %vm10683_vm13 = vcmp.ge.s32.totalorder %v4947_v46, 3  ;;  %s4711_s28 = smov 123   ;;  %s4713_s29 = smov 5  }
   0xe   :  { %vm10791_vm2 = vcmp.lt.s32.totalorder %v4951_v47, 15  ;;  %vm10788_vm7 = vcmp.ge.s32.totalorder %v4951_v47, 1  ;;  %vm10691_vm14 = vcmp.lt.s32.totalorder %v4951_v47, 14  ;;  %vm10685_vm15 = vcmp.ge.s32.totalorder %v4951_v47, 2  ;;  %s4714_s22 = smov 64  }
   0xf   :  { %67 = vrot.lane.b32.xlu1 %v4779_v3, %s4688_s12  ;;  %71 = vrot.lane.b32.xlu2 %v4783_v5, %s4688_s12 }
  0x10   :  { %63 = vrot.lane.b32.xlu0 %v4781_v4, %s4688_s12 }
  0x17   :  { %75 = vrot.lane.b32.xlu1 %v4791_v6, %s4688_s12  ;;  %104 = vrot.lane.b32.xlu2 %v4769_v1, %s4689_s0 }
  0x18   :  { %73 = vrot.lane.b32.xlu0 %v4793_v7, %s4688_s12 }
  0x1f   :  { %108 = vrot.lane.b32.xlu1 %v4767_v0, %s4689_s0  ;;  %110 = vrot.lane.b32.xlu2 %v4779_v3, %s4689_s0 }
  0x20   :  { %106 = vrot.lane.b32.xlu0 %v4781_v4, %s4689_s0 }
  0x27   :  { %114 = vrot.lane.b32.xlu1 %v4783_v5, %s4689_s0  ;;  %116 = vrot.lane.b32.xlu2 %v4793_v7, %s4689_s0 }
  0x28   :  { %112 = vrot.lane.b32.xlu0 %v4775_v2, %s4689_s0 }
  0x2f   :  { %147 = vrot.lane.b32.xlu1 %v4769_v1, %s4690_s13  ;;  %149 = vrot.lane.b32.xlu2 %v4781_v4, %s4690_s13 }
  0x30   :  { %118 = vrot.lane.b32.xlu0 %v4791_v6, %s4689_s0 }
  0x37   :  { %153 = vrot.lane.b32.xlu1 %v4779_v3, %s4690_s13  ;;  %155 = vrot.lane.b32.xlu2 %v4775_v2, %s4690_s13 }
  0x38   :  { %151 = vrot.lane.b32.xlu0 %v4767_v0, %s4690_s13 }
  0x3f   :  { %159 = vrot.lane.b32.xlu1 %v4793_v7, %s4690_s13  ;;  %161 = vrot.lane.b32.xlu2 %v4791_v6, %s4690_s13 }
  0x40   :  { %157 = vrot.lane.b32.xlu0 %v4783_v5, %s4690_s13 }
  0x47   :  { %192 = vrot.lane.b32.xlu1 %v4781_v4, %s4691_s14  ;;  %194 = vrot.lane.b32.xlu2 %v4767_v0, %s4691_s14 }
  0x48   :  { %190 = vrot.lane.b32.xlu0 %v4769_v1, %s4691_s14 }
  0x4f   :  { %198 = vrot.lane.b32.xlu1 %v4775_v2, %s4691_s14  ;;  %200 = vrot.lane.b32.xlu2 %v4783_v5, %s4691_s14 }
  0x50   :  { %196 = vrot.lane.b32.xlu0 %v4779_v3, %s4691_s14 }
  0x57   :  { %204 = vrot.lane.b32.xlu1 %v4791_v6, %s4691_s14  ;;  %233 = vrot.lane.b32.xlu2 %v4769_v1, %s4692_s15 }
  0x58   :  { %202 = vrot.lane.b32.xlu0 %v4793_v7, %s4691_s14 }
  0x5f   :  { %237 = vrot.lane.b32.xlu1 %v4767_v0, %s4692_s15  ;;  %239 = vrot.lane.b32.xlu2 %v4779_v3, %s4692_s15 }
  0x60   :  { %235 = vrot.lane.b32.xlu0 %v4781_v4, %s4692_s15 }
  0x61   :  { %v70_v8 = vpop.permute.xlu2 %69 }
  0x67   :  { %243 = vrot.lane.b32.xlu1 %v4783_v5, %s4692_s15  ;;  %245 = vrot.lane.b32.xlu2 %v4793_v7, %s4692_s15 }
  0x68   :  { %241 = vrot.lane.b32.xlu0 %v4775_v2, %s4692_s15 }
  0x69   :  { %v4861_v9 = vpop.permute.xlu2 %71 }
  0x6f   :  { %276 = vrot.lane.b32.xlu1 %v4769_v1, %s4693_s16  ;;  %278 = vrot.lane.b32.xlu2 %v4781_v4, %s4693_s16 }
  0x70   :  { %247 = vrot.lane.b32.xlu0 %v4791_v6, %s4692_s15 }
  0x71   :  { %v4869_v10 = vpop.permute.xlu2 %104 }
  0x77   :  { %282 = vrot.lane.b32.xlu1 %v4779_v3, %s4693_s16  ;;  %284 = vrot.lane.b32.xlu2 %v4775_v2, %s4693_s16 }
  0x78   :  { %280 = vrot.lane.b32.xlu0 %v4767_v0, %s4693_s16 }
  0x79   :  { %v4877_v11 = vpop.permute.xlu1 %65  ;;  %v4879_v13 = vpop.permute.xlu2 %110 }
  0x7a   :  { %v62_v12 = vpop.permute.xlu0 %61 }
  0x7b   :  { %v78_v50 = vsel %vm10796_vm0, %v62_v12, %v70_v8  ;;  %v82_v52 = vsel %vm10796_vm0, %v70_v8, %v62_v12 }
  0x7c   :  { %v86_v53 = vsel %vm10794_vm1, %v78_v50, 0.0  ;;  %v87_v55 = vsel %vm10791_vm2, %v82_v52, 0.0 }
  0x7d   :  { %v94_v57 = vadd.f32 %v86_v53, %v4769_v1  ;;  %v5005_v8 = vadd.f32 %v87_v55, %v4775_v2 }
  0x7f   :  { %288 = vrot.lane.b32.xlu1 %v4793_v7, %s4693_s16  ;;  %290 = vrot.lane.b32.xlu2 %v4791_v6, %s4693_s16 }
  0x80   :  { %286 = vrot.lane.b32.xlu0 %v4783_v5, %s4693_s16 }
  0x81   :  { %v4887_v14 = vpop.permute.xlu1 %67  ;;  %v4889_v16 = vpop.permute.xlu2 %116 }
  0x82   :  { %v64_v15 = vpop.permute.xlu0 %63 }
  0x83   :  { %v79_v61 = vsel %vm10796_vm0, %v64_v15, %v4861_v9  ;;  %v83_v12 = vsel %vm10796_vm0, %v4861_v9, %v64_v15 }
  0x84   :  { %v88_v9 = vsel %vm10794_vm1, %v79_v61, 0.0 }
  0x89   :  { %v4891_v17 = vpop.permute.xlu1 %75  ;;  %v4893_v19 = vpop.permute.xlu2 %149 }
  0x8a   :  { %v74_v18 = vpop.permute.xlu0 %73  ;;  %v81_v62 = vsel %vm10796_vm0, %v4887_v14, %v4891_v17 }
  0x8b   :  { %v80_v63 = vsel %vm10796_vm0, %v4877_v11, %v74_v18  ;;  %v84_v50 = vsel %vm10796_vm0, %v74_v18, %v4877_v11  ;;  %v92_v15 = vsel %vm10794_vm1, %v81_v62, 0.0 }
  0x8c   :  { %v90_v53 = vsel %vm10794_vm1, %v80_v63, 0.0 }
  0x91   :  { %v4895_v20 = vpop.permute.xlu1 %108  ;;  %v4899_v22 = vpop.permute.xlu2 %155 }
  0x92   :  { %v4897_v21 = vpop.permute.xlu0 %106  ;;  %v123_v62 = vsel %vm10795_vm3, %v4895_v20, %v4889_v16 }
  0x99   :  { %v4901_v23 = vpop.permute.xlu1 %114  ;;  %v4905_v25 = vpop.permute.xlu2 %161 }
  0x9a   :  { %v4903_v24 = vpop.permute.xlu0 %112 }
  0x9b   :  { %v125_v54 = vsel %vm10795_vm3, %v4903_v24, %v4869_v10 }
  0x9c   :  { %v129_v58 = vsel %vm10680_vm5, %v125_v54, 0.0  ;;  %v127_v54 = vsel %vm10795_vm3, %v4889_v16, %v4895_v20 }
  0x9d   :  { %v137_v52 = vadd.f32 %v129_v58, %v94_v57  ;;  %v5042_v57 = vsel %vm10791_vm2, %v83_v12, 0.0  ;;  %v91_v58 = vsel %vm10791_vm2, %v84_v50, 0.0  ;;  %v100_v12 = vadd.f32 %v92_v15, %v4779_v3 }
  0x9e   :  { %v133_v50 = vsel %vm10680_vm5, %v127_v54, 0.0 }
  0xa1   :  { %v4907_v26 = vpop.permute.xlu1 %147  ;;  %v4911_v28 = vpop.permute.xlu2 %194 }
  0xa2   :  { %v4909_v27 = vpop.permute.xlu0 %118  ;;  %v164_v56 = vsel %vm10790_vm4, %v4907_v26, %v4899_v22 }
  0xa3   :  { %v172_v40 = vsel %vm10787_vm6, %v164_v56, 0.0  ;;  %v128_v56 = vsel %vm10795_vm3, %v4909_v27, %v4879_v13 }
  0xa4   :  { %v180_v55 = vadd.f32 %v172_v40, %v137_v52  ;;  %v98_v40 = vadd.f32 %v90_v53, %v4767_v0  ;;  %v135_v16 = vsel %vm10680_vm5, %v128_v56, 0.0  ;;  %v99_v53 = vadd.f32 %v91_v58, %v4793_v7 }
  0xa5   :  { %v122_v56 = vsel %vm10795_vm3, %v4897_v21, %v4901_v23  ;;  %v96_v58 = vadd.f32 %v88_v9, %v4781_v4 }
  0xa6   :  { %v132_v4 = vsel %vm10788_vm7, %v122_v56, 0.0 }
  0xa9   :  { %v4913_v29 = vpop.permute.xlu1 %153  ;;  %v4917_v31 = vpop.permute.xlu2 %200 }
  0xaa   :  { %v4915_v30 = vpop.permute.xlu0 %151  ;;  %v167_v63 = vsel %vm10790_vm4, %v4913_v29, %v4905_v25 }
  0xab   :  { %v178_v54 = vsel %vm10787_vm6, %v167_v63, 0.0 }
  0xb1   :  { %v4919_v32 = vpop.permute.xlu1 %159  ;;  %v4923_v34 = vpop.permute.xlu2 %233 }
  0xb2   :  { %v4921_v33 = vpop.permute.xlu0 %157  ;;  %v170_v9 = vsel %vm10790_vm4, %v4919_v32, %v4915_v30 }
  0xb9   :  { %v4925_v35 = vpop.permute.xlu1 %192  ;;  %v4929_v37 = vpop.permute.xlu2 %239 }
  0xba   :  { %v4927_v36 = vpop.permute.xlu0 %190 }
  0xc1   :  { %v4931_v38 = vpop.permute.xlu1 %198  ;;  %v4935_v41 = vpop.permute.xlu2 %245 }
  0xc2   :  { %v4933_v39 = vpop.permute.xlu0 %196  ;;  %v211_v1 = vsel %vm10789_vm8, %v4931_v38, %v4927_v36 }
  0xc3   :  { %10987 = vst [vmem:[#allocation8_spill] sm:$0xff] %v4933_v39  ;;  %v215_v11 = vsel %vm10681_vm10, %v211_v1, 0.0 }
  0xc4   :  { %v223_v1 = vadd.f32 %v215_v11, %v180_v55  ;;  %v134_v11 = vsel %vm10788_vm7, %v123_v62, 0.0  ;;  %v141_v62 = vadd.f32 %v133_v50, %v98_v40 }
  0xc5   :  { %v142_v45 = vadd.f32 %v134_v11, %v99_v53 }
  0xc9   :  { %v4939_v43 = vpop.permute.xlu1 %204  ;;  %v4960_v51 = vpop.permute.xlu2 %278 }
  0xca   :  { %v4941_v44 = vpop.permute.xlu0 %202  ;;  %v214_v0 = vsel %vm10789_vm8, %v4939_v43, %v4933_v39 }
  0xd1   :  { %v4953_v48 = vpop.permute.xlu1 %237  ;;  %v5029_v18 = vpop.permute.xlu2 %284 }
  0xd2   :  { %v4955_v49 = vpop.permute.xlu0 %235  ;;  %v256_v11 = vsel %vm10793_vm9, %v4935_v41, %v4953_v48 }
  0xd9   :  { %v4986_v59 = vpop.permute.xlu1 %243  ;;  %v5122_v40 = vpop.permute.xlu2 %290 }
  0xda   :  { %v4988_v60 = vpop.permute.xlu0 %241 }
  0xdb   :  { %v250_v2 = vsel %vm10793_vm9, %v4923_v34, %v4988_v60 }
  0xdc   :  { %v258_v61 = vsel %vm10792_vm11, %v250_v2, 0.0  ;;  %v126_v2 = vsel %vm10795_vm3, %v4901_v23, %v4897_v21  ;;  %v166_v21 = vsel %vm10790_vm4, %v4915_v30, %v4919_v32  ;;  %v121_v23 = vsel %vm10795_vm3, %v4869_v10, %v4903_v24 }
  0xdd   :  { %v266_v3 = vadd.f32 %v258_v61, %v223_v1  ;;  %v143_v61 = vadd.f32 %v135_v16, %v100_v12  ;;  %v131_v63 = vsel %vm10680_vm5, %v126_v2, 0.0  ;;  %v168_v16 = vsel %vm10790_vm4, %v4899_v22, %v4907_v26 }
  0xde   :  { %v139_v50 = vadd.f32 %v131_v63, %v96_v58  ;;  %v165_v10 = vsel %vm10790_vm4, %v4893_v19, %v4921_v33  ;;  %v176_v30 = vsel %vm10787_vm6, %v166_v21, 0.0  ;;  %v209_v32 = vsel %vm10789_vm8, %v4911_v28, %v4941_v44 }
  0xdf   :  { %v186_v39 = vadd.f32 %v178_v54, %v143_v61  ;;  %v213_v2 = vsel %vm10789_vm8, %v4941_v44, %v4911_v28  ;;  %vm10689_vm5 = vcmp.lt.s32.totalorder %v4951_v47, 13  ;;  %v174_v28 = vsel %vm10787_vm6, %v165_v10, 0.0 }
  0xe0   :  { %v252_v44 = vsel %vm10793_vm9, %v4953_v48, %v4935_v41  ;;  %v220_v56 = vsel %vm10685_vm15, %v209_v32, 0.0  ;;  %v251_v61 = vsel %vm10793_vm9, %v4955_v49, %v4986_v59  ;;  %v184_v58 = vadd.f32 %v176_v30, %v141_v62 }
  0xe1   :  { %v5065_v20 = vpop.permute.xlu1 %276  ;;  %v169_v41 = vsel %vm10790_vm4, %v4921_v33, %v4893_v19  ;;  %v182_v21 = vadd.f32 %v174_v28, %v139_v50  ;;  %v260_v62 = vsel %vm10792_vm11, %v251_v61, 0.0 }
  0xe2   :  { %v5067_v52 = vpop.permute.xlu0 %247  ;;  %v297_v15 = vsel %vm10684_vm12, %v5029_v18, %v5065_v20 }
  0xe3   :  { %v301_v55 = vsel %vm10683_vm13, %v297_v15, 0.0  ;;  %v253_v7 = vsel %vm10793_vm9, %v4929_v37, %v5067_v52  ;;  %v221_v15 = vsel %vm10681_vm10, %v214_v0, 0.0  ;;  %v212_v0 = vsel %vm10789_vm8, %v4917_v31, %v4925_v35 }
  0xe4   :  { %v5092_v1 = vadd.f32 %v301_v55, %v266_v3  ;;  %v264_v12 = vsel %vm10792_vm11, %v253_v7, 0.0  ;;  %v229_v24 = vadd.f32 %v221_v15, %v186_v39  ;;  %v177_v39 = vsel %vm10691_vm14, %v170_v9, 0.0 }
  0xe5   :  { %v219_v55 = vsel %vm10681_vm10, %v213_v2, 0.0  ;;  %v185_v63 = vadd.f32 %v177_v39, %v142_v45  ;;  %v217_v48 = vsel %vm10681_vm10, %v212_v0, 0.0  ;;  %v97_v15 = vadd.f32 %v5042_v57, %v4783_v5 }
  0xe6   :  { %319 = vrot.lane.b32.xlu0 %v5092_v1, %s4694_s17  ;;  %v272_v3 = vadd.f32 %v264_v12, %v229_v24  ;;  %v262_v9 = vsel %vm10792_vm11, %v252_v44, 0.0  ;;  %v263_v12 = vsel %vm10689_vm5, %v256_v11, 0.0  ;;  %v130_v45 = vsel %vm10788_vm7, %v121_v23, 0.0 }
  0xe7   :  { %v227_v19 = vadd.f32 %v219_v55, %v184_v58  ;;  %v228_v33 = vadd.f32 %v220_v56, %v185_v63  ;;  %v140_v10 = vadd.f32 %v132_v4, %v97_v15  ;;  %v173_v5 = vsel %vm10691_vm14, %v168_v16, 0.0 }
  0xe8   :  { %v175_v57 = vsel %vm10691_vm14, %v169_v41, 0.0  ;;  %v225_v50 = vadd.f32 %v217_v48, %v182_v21  ;;  %v208_v24 = vsel %vm10789_vm8, %v4925_v35, %v4917_v31  ;;  %vm10682_vm10 = vcmp.ge.s32.totalorder %v4951_v47, 3  ;;  %v10989_v48 = vld [vmem:[#allocation8_spill] sm:$0xff] }
  0xe9   :  { %v5143_v22 = vpop.permute.xlu1 %282  ;;  %v270_v30 = vadd.f32 %v262_v9, %v227_v19  ;;  %v271_v23 = vadd.f32 %v263_v12, %v228_v33  ;;  %v207_v31 = vsel %vm10789_vm8, %v4927_v36, %v4931_v38  ;;  %v85_v36 = vsel %vm10796_vm0, %v4891_v17, %v4887_v14 }
  0xea   :  { %v281_v26 = vpop.permute.xlu0 %280  ;;  %v300_v53 = vsel %vm10684_vm12, %v5122_v40, %v5143_v22  ;;  %v268_v39 = vadd.f32 %v260_v62, %v225_v50  ;;  %v138_v38 = vadd.f32 %v130_v45, %v5005_v8  ;;  %v216_v55 = vsel %vm10685_vm15, %v207_v31, 0.0 }
  0xeb   :  { %v307_v54 = vsel %vm10683_vm13, %v300_v53, 0.0  ;;  %v124_v17 = vsel %vm10795_vm3, %v4879_v13, %v4909_v27  ;;  %v171_v13 = vsel %vm10790_vm4, %v4905_v25, %v4913_v29  ;;  %v210_v15 = vsel %vm10789_vm8, %v10989_v48, %v4939_v43 }
  0xec   :  { %v5175_v7 = vadd.f32 %v307_v54, %v272_v3  ;;  %v218_v54 = vsel %vm10685_vm15, %v208_v24, 0.0  ;;  %v181_v14 = vadd.f32 %v173_v5, %v138_v38  ;;  %v179_v25 = vsel %vm10691_vm14, %v171_v13, 0.0 }
  0xed   :  { %v257_v45 = vsel %vm10793_vm9, %v5067_v52, %v4929_v37  ;;  %v296_v19 = vsel %vm10684_vm12, %v5143_v22, %v5122_v40 }
  0xee   :  { %325 = vrot.lane.b32.xlu0 %v5175_v7, %s4694_s17  ;;  %v224_v27 = vadd.f32 %v216_v55, %v181_v14  ;;  %v265_v37 = vsel %vm10689_vm5, %v257_v45, 0.0  ;;  %v308_v33 = vsel %vm10682_vm10, %v296_v19, 0.0 }
  0xf1   :  { %v289_v32 = vpop.permute.xlu1 %288 }
  0xf2   :  { %v287_v2 = vpop.permute.xlu0 %286  ;;  %v295_v4 = vsel %vm10684_vm12, %v281_v26, %v289_v32  ;;  %v299_v16 = vsel %vm10684_vm12, %v289_v32, %v281_v26  ;;  %v255_v26 = vsel %vm10793_vm9, %v4986_v59, %v4955_v49  ;;  %v254_v49 = vsel %vm10793_vm9, %v4988_v60, %v4923_v34 }
  0xf3   :  { %v298_v0 = vsel %vm10684_vm12, %v287_v2, %v4960_v51  ;;  %v305_v35 = vsel %vm10683_vm13, %v299_v16, 0.0  ;;  %v306_v3 = vsel %vm10682_vm10, %v295_v4, 0.0  ;;  %v183_v59 = vadd.f32 %v175_v57, %v140_v10 }
  0xf4   :  { %v303_v53 = vsel %vm10683_vm13, %v298_v0, 0.0  ;;  %v5225_v28 = vadd.f32 %v305_v35, %v270_v30  ;;  %v5227_v44 = vadd.f32 %v306_v3, %v271_v23  ;;  %v294_v56 = vsel %vm10684_vm12, %v4960_v51, %v287_v2 }
  0xf5   :  { %v5229_v11 = vadd.f32 %v303_v53, %v268_v39  ;;  %v261_v34 = vsel %vm10689_vm5, %v255_v26, 0.0  ;;  %v293_v51 = vsel %vm10684_vm12, %v5065_v20, %v5029_v18  ;;  %v93_v60 = vsel %vm10791_vm2, %v85_v36, 0.0 }
  0xf6   :  { %323 = vrot.lane.b32.xlu2 %v5225_v28, %s4694_s17  ;;  %331 = vrot.lane.b32.xlu0 %v5227_v44, %s4694_s17  ;;  %v226_v8 = vadd.f32 %v218_v54, %v183_v59  ;;  %v259_v61 = vsel %vm10689_vm5, %v254_v49, 0.0  ;;  %v304_v58 = vsel %vm10682_vm10, %v294_v56, 0.0  ;;  %v136_v18 = vsel %vm10788_vm7, %v124_v17, 0.0 }
  0xf7   :  { %321 = vrot.lane.b32.xlu1 %v5229_v11, %s4694_s17  ;;  %v302_v63 = vsel %vm10682_vm10, %v293_v51, 0.0  ;;  %v101_v41 = vadd.f32 %v93_v60, %v4791_v6  ;;  %v267_v21 = vadd.f32 %v259_v61, %v224_v27  ;;  %v222_v6 = vsel %vm10685_vm15, %v210_v15, 0.0 }
  0xf8   :  { %v269_v20 = vadd.f32 %v261_v34, %v226_v8  ;;  %vm10687_vm10 = vcmp.lt.s32.totalorder %v4937_v42, 112  ;;  %vm10690_vm12 = vcmp.lt.s32.totalorder %v4937_v42, 16  ;;  %vm10688_vm15 = vcmp.ge.s32.totalorder %v4937_v42, 16 }
  0xf9   :  { %v144_v9 = vadd.f32 %v136_v18, %v101_v41  ;;  %v5286_v12 = vadd.f32 %v302_v63, %v267_v21  ;;  %v10990_v63 = vld [vmem:[#allocation9_spill] sm:$0xff]  ;;  %vm464_vm5 = vcmp.lt.s32.totalorder %v4937_v42, 32 }
  0xfa   :  { %v5284_v29 = vadd.f32 %v304_v58, %v269_v20  ;;  %vm10686_vm13 = vcmp.lt.s32.totalorder %v10990_v63, 240  ;;  %vm10694_vm14 = vcmp.lt.s32.totalorder %v10990_v63, 208 }
  0xfb   :  { %v187_v43 = vadd.f32 %v179_v25, %v144_v9 }
  0xfd   :  { %v230_v52 = vadd.f32 %v222_v6, %v187_v43 }
  0xfe   :  { %364 = vrot.lane.b32.xlu0 %v5229_v11, %s4687_s11  ;;  %329 = vrot.lane.b32.xlu2 %v5284_v29, %s4694_s17 }
  0xff   :  { %327 = vrot.lane.b32.xlu1 %v5286_v12, %s4694_s17  ;;  %v273_v62 = vadd.f32 %v265_v37, %v230_v52 }
 0x101   :  { %v5308_v10 = vadd.f32 %v308_v33, %v273_v62 }
 0x106   :  { %370 = vrot.lane.b32.xlu0 %v5286_v12, %s4687_s11  ;;  %362 = vrot.lane.b32.xlu2 %v5092_v1, %s4687_s11 }
 0x107   :  { %333 = vrot.lane.b32.xlu1 %v5308_v10, %s4694_s17 }
 0x10e   :  { %376 = vrot.lane.b32.xlu0 %v5308_v10, %s4687_s11  ;;  %368 = vrot.lane.b32.xlu2 %v5175_v7, %s4687_s11 }
 0x10f   :  { %366 = vrot.lane.b32.xlu1 %v5225_v28, %s4687_s11 }
 0x116   :  { %409 = vrot.lane.b32.xlu0 %v5225_v28, %s4695_s18  ;;  %374 = vrot.lane.b32.xlu2 %v5227_v44, %s4687_s11 }
 0x117   :  { %372 = vrot.lane.b32.xlu1 %v5284_v29, %s4687_s11 }
 0x11e   :  { %415 = vrot.lane.b32.xlu0 %v5284_v29, %s4695_s18  ;;  %407 = vrot.lane.b32.xlu2 %v5229_v11, %s4695_s18 }
 0x11f   :  { %405 = vrot.lane.b32.xlu1 %v5092_v1, %s4695_s18 }
 0x126   :  { %448 = vrot.lane.b32.xlu0 %v5092_v1, %s4696_s19  ;;  %413 = vrot.lane.b32.xlu2 %v5286_v12, %s4695_s18 }
 0x127   :  { %411 = vrot.lane.b32.xlu1 %v5175_v7, %s4695_s18 }
 0x12e   :  { %454 = vrot.lane.b32.xlu0 %v5175_v7, %s4696_s19  ;;  %419 = vrot.lane.b32.xlu2 %v5308_v10, %s4695_s18 }
 0x12f   :  { %417 = vrot.lane.b32.xlu1 %v5227_v44, %s4695_s18 }
 0x136   :  { %460 = vrot.lane.b32.xlu0 %v5227_v44, %s4696_s19  ;;  %452 = vrot.lane.b32.xlu2 %v5225_v28, %s4696_s19 }
 0x137   :  { %450 = vrot.lane.b32.xlu1 %v5229_v11, %s4696_s19 }
 0x13e   :  { %493 = vrot.lane.b32.xlu0 %v5229_v11, %s4697_s20  ;;  %458 = vrot.lane.b32.xlu2 %v5284_v29, %s4696_s19 }
 0x13f   :  { %456 = vrot.lane.b32.xlu1 %v5286_v12, %s4696_s19 }
 0x146   :  { %499 = vrot.lane.b32.xlu0 %v5286_v12, %s4697_s20  ;;  %491 = vrot.lane.b32.xlu2 %v5092_v1, %s4697_s20 }
 0x147   :  { %462 = vrot.lane.b32.xlu1 %v5308_v10, %s4696_s19 }
 0x14e   :  { %505 = vrot.lane.b32.xlu0 %v5308_v10, %s4697_s20  ;;  %497 = vrot.lane.b32.xlu2 %v5175_v7, %s4697_s20 }
 0x14f   :  { %495 = vrot.lane.b32.xlu1 %v5225_v28, %s4697_s20 }
 0x150   :  { %v324_v40 = vpop.permute.xlu2 %323 }
 0x156   :  { %538 = vrot.lane.b32.xlu0 %v5225_v28, %s4698_s21  ;;  %503 = vrot.lane.b32.xlu2 %v5227_v44, %s4697_s20 }
 0x157   :  { %501 = vrot.lane.b32.xlu1 %v5284_v29, %s4697_s20 }
 0x158   :  { %v330_v22 = vpop.permute.xlu2 %329  ;;  %v320_v5 = vpop.permute.xlu0 %319 }
 0x15e   :  { %544 = vrot.lane.b32.xlu0 %v5284_v29, %s4698_s21  ;;  %536 = vrot.lane.b32.xlu2 %v5229_v11, %s4698_s21 }
 0x15f   :  { %534 = vrot.lane.b32.xlu1 %v5092_v1, %s4698_s21 }
 0x160   :  { %v5382_v57 = vpop.permute.xlu2 %362  ;;  %v5384_v50 = vpop.permute.xlu0 %325 }
 0x166   :  { %542 = vrot.lane.b32.xlu2 %v5286_v12, %s4698_s21 }
 0x167   :  { %540 = vrot.lane.b32.xlu1 %v5175_v7, %s4698_s21 }
 0x168   :  { %v5390_v24 = vpop.permute.xlu2 %368  ;;  %v332_v30 = vpop.permute.xlu0 %331 }
 0x169   :  { %v322_v23 = vpop.permute.xlu1 %321  ;;  %v342_v41 = vsel %vm10687_vm10, %v332_v30, %v324_v40  ;;  %v338_v21 = vsel %vm10687_vm10, %v324_v40, %v332_v30 }
 0x16a   :  { %v341_v15 = vsel %vm10687_vm10, %v330_v22, %v322_v23  ;;  %v337_v9 = vsel %vm10687_vm10, %v322_v23, %v330_v22  ;;  %v349_v6 = vsel %vm10686_vm13, %v342_v41, 0.0  ;;  %v356_v52 = vadd.f32 %v338_v21, %v5225_v28 }
 0x16b   :  { %v347_v37 = vsel %vm10686_vm13, %v341_v15, 0.0  ;;  %v354_v62 = vadd.f32 %v337_v9, %v5229_v11  ;;  %v357_v23 = vadd.f32 %v349_v6, %v5227_v44 }
 0x16e   :  { %548 = vrot.lane.b32.xlu2 %v5308_v10, %s4698_s21 }
 0x16f   :  { %546 = vrot.lane.b32.xlu1 %v5227_v44, %s4698_s21 }
 0x170   :  { %v5396_v32 = vpop.permute.xlu2 %374  ;;  %v5398_v2 = vpop.permute.xlu0 %364 }
 0x171   :  { %v328_v39 = vpop.permute.xlu1 %327 }
 0x172   :  { %v340_v48 = vsel %vm10687_vm10, %v328_v39, %v320_v5  ;;  %v336_v43 = vsel %vm10687_vm10, %v320_v5, %v328_v39 }
 0x173   :  { %v345_v19 = vsel %vm10686_vm13, %v340_v48, 0.0  ;;  %v352_v39 = vadd.f32 %v336_v43, %v5092_v1 }
 0x174   :  { %v353_v11 = vadd.f32 %v345_v19, %v5286_v12 }
 0x178   :  { %v5400_v4 = vpop.permute.xlu2 %407  ;;  %v371_v16 = vpop.permute.xlu0 %370 }
 0x179   :  { %v334_v0 = vpop.permute.xlu1 %333  ;;  %v383_v33 = vsel %vm10690_vm12, %v371_v16, %v5382_v57  ;;  %v379_v48 = vsel %vm10690_vm12, %v5382_v57, %v371_v16  ;;  %v355_v16 = vadd.f32 %v347_v37, %v5284_v29 }
 0x17a   :  { %v343_v45 = vsel %vm10687_vm10, %v334_v0, %v5384_v50  ;;  %v339_v41 = vsel %vm10687_vm10, %v5384_v50, %v334_v0  ;;  %v387_v15 = vsel %vm10688_vm15, %v383_v33, 0.0  ;;  %vm10693_vm10 = vcmp.lt.s32.totalorder %v4937_v42, 96 }
 0x17b   :  { %v351_v40 = vsel %vm10686_vm13, %v343_v45, 0.0  ;;  %vm10692_vm13 = vcmp.lt.s32.totalorder %v10990_v63, 224  ;;  %v395_v0 = vadd.f32 %v387_v15, %v352_v39 }
 0x17c   :  { %v359_v44 = vadd.f32 %v351_v40, %v5308_v10  ;;  %v5520_v10 = vadd.f32 %v379_v48, %v353_v11 }
 0x180   :  { %v5402_v31 = vpop.permute.xlu2 %413  ;;  %v377_v35 = vpop.permute.xlu0 %376 }
 0x181   :  { %v367_v3 = vpop.permute.xlu1 %366  ;;  %v386_v5 = vsel %vm10690_vm12, %v377_v35, %v5390_v24  ;;  %v382_v21 = vsel %vm10690_vm12, %v5390_v24, %v377_v35  ;;  %v358_v24 = vadd.f32 %v339_v41, %v5175_v7 }
 0x182   :  { %v385_v22 = vsel %vm10690_vm12, %v5396_v32, %v367_v3  ;;  %v381_v12 = vsel %vm10690_vm12, %v367_v3, %v5396_v32  ;;  %v393_v50 = vsel %vm10688_vm15, %v386_v5, 0.0  ;;  %v402_v35 = vadd.f32 %v382_v21, %v359_v44 }
 0x183   :  { %v391_v57 = vsel %vm10688_vm15, %v385_v22, 0.0  ;;  %v400_v9 = vadd.f32 %v381_v12, %v357_v23  ;;  %v401_v45 = vadd.f32 %v393_v50, %v358_v24  ;;  %v579_v22 = vld [vmem:[%s10670_s2] sm:$0xff] }
 0x184   :  { %v5524_v3 = vadd.f32 %v391_v57, %v356_v52 }
 0x188   :  { %v5404_v53 = vpop.permute.xlu0 %409  ;;  %v5408_v36 = vpop.permute.xlu2 %419 }
 0x189   :  { %v5406_v26 = vpop.permute.xlu1 %372 }
 0x18a   :  { %v384_v1 = vsel %vm10690_vm12, %v5406_v26, %v5398_v2  ;;  %v380_v6 = vsel %vm10690_vm12, %v5398_v2, %v5406_v26  ;;  %vm507_vm12 = vcmp.lt.s32.totalorder %v4937_v42, 80 }
 0x18b   :  { %v389_v32 = vsel %vm10688_vm15, %v384_v1, 0.0  ;;  %vm10797_vm15 = vcmp.ge.s32.totalorder %v4937_v42, 32  ;;  %v398_v5 = vadd.f32 %v380_v6, %v355_v16 }
 0x18c   :  { %v397_v19 = vadd.f32 %v389_v32, %v354_v62 }
 0x190   :  { %v5410_v38 = vpop.permute.xlu0 %415  ;;  %v5414_v49 = vpop.permute.xlu2 %452 }
 0x191   :  { %v5412_v54 = vpop.permute.xlu1 %405  ;;  %v427_v43 = vsel %vm10693_vm10, %v5410_v38, %v5400_v4  ;;  %v423_v2 = vsel %vm10693_vm10, %v5400_v4, %v5410_v38 }
 0x192   :  { %v422_v37 = vsel %vm10693_vm10, %v5412_v54, %v5402_v31  ;;  %v426_v33 = vsel %vm10693_vm10, %v5402_v31, %v5412_v54  ;;  %v433_v38 = vsel %vm10692_vm13, %v427_v43, 0.0  ;;  %v440_v23 = vadd.f32 %v423_v2, %v397_v19 }
 0x193   :  { %v431_v11 = vsel %vm10692_vm13, %v426_v33, 0.0  ;;  %v438_v15 = vadd.f32 %v422_v37, %v395_v0  ;;  %v441_v21 = vadd.f32 %v433_v38, %v398_v5 }
 0x194   :  { %v439_v2 = vadd.f32 %v431_v11, %v5520_v10 }
 0x198   :  { %v5416_v59 = vpop.permute.xlu0 %448  ;;  %v5420_v56 = vpop.permute.xlu2 %458 }
 0x199   :  { %v5418_v55 = vpop.permute.xlu1 %411 }
 0x19a   :  { %v429_v7 = vsel %vm10693_vm10, %v5408_v36, %v5418_v55  ;;  %v425_v40 = vsel %vm10693_vm10, %v5418_v55, %v5408_v36  ;;  %v10709_v55 = vmov 0  }
 0x19b   :  { %v437_v62 = vsel %vm10692_vm13, %v429_v7, 0.0  ;;  %4393 = vset.pattern.permute.xlu0 %v10709_v55  ;;  %4394 = vset.pattern.permute.xlu1 %v10709_v55  ;;  %v580_v7 = vld [vmem:[%s10670_s2 + $0x8] sm:$0xff] }
 0x19c   :  { %v445_v41 = vadd.f32 %v437_v62, %v402_v35  ;;  %585 = vperm.xlu0 %4393, %v579_v22   ;;  %4395 = vset.pattern.permute.xlu2 %v10709_v55 }
 0x19d   :  { %590 = vperm.xlu1 %4394, %v580_v7   ;;  %v10697_v7 = vmov 8  }
 0x1a0   :  { %v5424_v17 = vpop.permute.xlu0 %454  ;;  %v5426_v34 = vpop.permute.xlu2 %491 }
 0x1a1   :  { %v5422_v14 = vpop.permute.xlu1 %417 }
 0x1a2   :  { %v428_v26 = vsel %vm10693_vm10, %v5422_v14, %v5404_v53  ;;  %v424_v1 = vsel %vm10693_vm10, %v5404_v53, %v5422_v14  ;;  %vm10785_vm10 = vcmp.ge.s32.totalorder %v4937_v42, 48 }
 0x1a3   :  { %v435_v39 = vsel %vm10692_vm13, %v428_v26, 0.0  ;;  %vm10786_vm13 = vcmp.lt.s32.totalorder %v4937_v42, 48  ;;  %v442_v26 = vadd.f32 %v424_v1, %v5524_v3 }
 0x1a4   :  { %v443_v44 = vadd.f32 %v435_v39, %v400_v9 }
 0x1a8   :  { %v5430_v60 = vpop.permute.xlu0 %460  ;;  %v5432_v8 = vpop.permute.xlu2 %497 }
 0x1a9   :  { %v5428_v51 = vpop.permute.xlu1 %450  ;;  %v467_v16 = vsel %vm464_vm5, %v5414_v49, %v5430_v60  ;;  %v471_v53 = vsel %vm464_vm5, %v5430_v60, %v5414_v49 }
 0x1aa   :  { %v466_v50 = vsel %vm464_vm5, %v5428_v51, %v5420_v56  ;;  %v477_v43 = vsel %vm10797_vm15, %v471_v53, 0.0  ;;  %v486_v38 = vadd.f32 %v467_v16, %v443_v44 }
 0x1ab   :  { %v484_v3 = vadd.f32 %v466_v50, %v441_v21 }
 0x1b0   :  { %v5436_v13 = vpop.permute.xlu0 %493  ;;  %v5440_v58 = vpop.permute.xlu2 %503 }
 0x1b1   :  { %v5434_v61 = vpop.permute.xlu1 %456 }
 0x1b2   :  { %v465_v19 = vsel %vm464_vm5, %v5416_v59, %v5434_v61 }
 0x1b8   :  { %v5442_v18 = vpop.permute.xlu0 %499  ;;  %v5457_v25 = vpop.permute.xlu2 %536 }
 0x1b9   :  { %v5438_v27 = vpop.permute.xlu1 %462  ;;  %v512_v62 = vsel %vm507_vm12, %v5442_v18, %v5426_v34  ;;  %v508_v5 = vsel %vm507_vm12, %v5426_v34, %v5442_v18 }
 0x1ba   :  { %v472_v4 = vsel %vm464_vm5, %v5438_v27, %v5424_v17  ;;  %v468_v36 = vsel %vm464_vm5, %v5424_v17, %v5438_v27  ;;  %v444_v17 = vadd.f32 %v425_v40, %v401_v45  ;;  %v482_v40 = vadd.f32 %v465_v19, %v439_v2 }
 0x1bb   :  { %v479_v48 = vsel %vm10797_vm15, %v472_v4, 0.0  ;;  %v488_v12 = vadd.f32 %v468_v36, %v445_v41 }
 0x1bc   :  { %v487_v14 = vadd.f32 %v479_v48, %v444_v17 }
 0x1c0   :  { %v5486_v28 = vpop.permute.xlu0 %505  ;;  %v5530_v29 = vpop.permute.xlu2 %542 }
 0x1c1   :  { %v5445_v20 = vpop.permute.xlu1 %495  ;;  %v515_v31 = vsel %vm507_vm12, %v5486_v28, %v5432_v8  ;;  %v511_v57 = vsel %vm507_vm12, %v5432_v8, %v5486_v28  ;;  %v470_v8 = vsel %vm464_vm5, %v5420_v56, %v5428_v51  ;;  %v469_v28 = vsel %vm464_vm5, %v5434_v61, %v5416_v59 }
 0x1c2   :  { %v523_v27 = vsel %vm10694_vm14, %v515_v31, 0.0  ;;  %v530_v49 = vadd.f32 %v511_v57, %v487_v14  ;;  %v514_v56 = vsel %vm507_vm12, %v5440_v58, %v5445_v20  ;;  %v475_v6 = vsel %vm10797_vm15, %v470_v8, 0.0 }
 0x1c3   :  { %v531_v35 = vadd.f32 %v523_v27, %v488_v12  ;;  %v473_v33 = vsel %vm10797_vm15, %v469_v28, 0.0  ;;  %v510_v59 = vsel %vm507_vm12, %v5445_v20, %v5440_v58  ;;  %v521_v61 = vsel %vm10694_vm14, %v514_v56, 0.0  ;;  %v581_v27 = vld [vmem:[%s10670_s2 + $0x10] sm:$0xff] }
 0x1c4   :  { %v485_v31 = vadd.f32 %v477_v43, %v442_v26  ;;  %v483_v22 = vadd.f32 %v475_v6, %v440_v23  ;;  %v517_v20 = vsel %vm10694_vm14, %v512_v62, 0.0  ;;  %v481_v39 = vadd.f32 %v473_v33, %v438_v15  ;;  %595 = vperm.xlu2 %4395, %v581_v27   ;;  %v577_v56 = vld [vmem:[%s10669_s1 + $0x10] sm:$0xff] }
 0x1c5   :  { %v529_v23 = vadd.f32 %v521_v61, %v486_v38  ;;  %v10707_v57 = vmov 5   ;;  %v525_v16 = vadd.f32 %v517_v20, %v482_v40 }
 0x1c6   :  { %v528_v41 = vadd.f32 %v510_v59, %v485_v31  ;;  %4397 = vset.pattern.permute.xlu0 %v10707_v57  ;;  %v524_v8 = vadd.f32 %v508_v5, %v481_v39 }
 0x1c8   :  { %v5577_v54 = vpop.permute.xlu0 %538  ;;  %v549_v24 = vpop.permute.xlu2 %548 }
 0x1c9   :  { %v5488_v30 = vpop.permute.xlu1 %501 }
 0x1ca   :  { %v513_v51 = vsel %vm507_vm12, %v5488_v30, %v5436_v13  ;;  %v509_v36 = vsel %vm507_vm12, %v5436_v13, %v5488_v30 }
 0x1cb   :  { %v519_v10 = vsel %vm10694_vm14, %v513_v51, 0.0  ;;  %v526_v44 = vadd.f32 %v509_v36, %v483_v22  ;;  %vm10784_vm14 = vcmask 261120   ;;  %v578_v51 = vld [vmem:[%s10669_s1 + $0x18] sm:$0xff] }
 0x1cc   :  { %v527_v48 = vadd.f32 %v519_v10, %v484_v3  ;;  %4396 = vset.pattern.permute.xlu2 %v10707_v57 }
 0x1d0   :  { %v545_v4 = vpop.permute.xlu0 %544 }
 0x1d1   :  { %v5554_v52 = vpop.permute.xlu1 %534  ;;  %v556_v58 = vsel %vm10786_vm13, %v545_v4, %v5457_v25  ;;  %v552_v15 = vsel %vm10786_vm13, %v5457_v25, %v545_v4  ;;  %v5705_v25 = vld [vmem:[%s10671_s3 + $0x8] sm:$0xff] }
 0x1d2   :  { %v555_v13 = vsel %vm10786_vm13, %v5530_v29, %v5554_v52  ;;  %v561_v17 = vsel %vm10785_vm10, %v556_v58, 0.0  ;;  %v551_v12 = vsel %vm10786_vm13, %v5554_v52, %v5530_v29  ;;  %v570_v50 = vadd.f32 %v552_v15, %v527_v48  ;;  %725 = vperm.xlu0 %4397, %v5705_v25   ;;  %v575_v29 = vld [vmem:[%s10669_s1] sm:$0xff] }
 0x1d3   :  { %v559_v53 = vsel %vm10785_vm10, %v555_v13, 0.0  ;;  %v569_v14 = vadd.f32 %v561_v17, %v526_v44  ;;  %v568_v28 = vadd.f32 %v551_v12, %v525_v16 }
 0x1d4   :  { %v567_v52 = vadd.f32 %v559_v53, %v524_v8 }
 0x1d9   :  { %v541_v0 = vpop.permute.xlu1 %540 }
 0x1da   :  { %v554_v32 = vsel %vm10786_vm13, %v541_v0, %v549_v24  ;;  %v558_v60 = vsel %vm10786_vm13, %v549_v24, %v541_v0  ;;  %v5725_v24 = vld [vmem:[%s10671_s3 + $0x10] sm:$0xff]  ;;  %v5731_v0 = vld [vmem:[%s10671_s3] sm:$0xff] }
 0x1db   :  { %v574_v9 = vadd.f32 %v554_v32, %v531_v35  ;;  %v565_v45 = vsel %vm10785_vm10, %v558_v60, 0.0  ;;  %v10705_v35 = vmov 6   ;;  %v576_v32 = vld [vmem:[%s10669_s1 + $0x8] sm:$0xff]  ;;  %720 = vperm.xlu2 %4396, %v5731_v0   ;;  %v10703_v60 = vmov 4  }
 0x1dc   :  { %v573_v37 = vadd.f32 %v565_v45, %v530_v49  ;;  %4399 = vset.pattern.permute.xlu0 %v10705_v35  ;;  %v5747_v49 = vld [vmem:[%s10671_s3 + $0x18] sm:$0xff]  ;;  %v10699_v45 = vmov 3  }
 0x1dd   :  { %657 = vmatpush.msra.mxu1 %v574_v9  ;;  %779 = vperm.xlu0 %4399, %v5731_v0   ;;  %v10701_v9 = vmov 7  }
 0x1de   :  { %628 = vmatpush.msra.mxu0 %v573_v37 }
 0x1e1   :  { %v547_v11 = vpop.permute.xlu1 %546 }
 0x1e2   :  { %v553_v34 = vsel %vm10786_vm13, %v5577_v54, %v547_v11  ;;  %v557_v18 = vsel %vm10786_vm13, %v547_v11, %v5577_v54  ;;  %v582_v54 = vld [vmem:[%s10670_s2 + $0x18] sm:$0xff]  ;;  %vm11057_vm13 = vcmp.lt.s32.totalorder %v4951_v47, 13 }
 0x1e3   :  { %v572_v30 = vadd.f32 %v553_v34, %v529_v23  ;;  %v563_v21 = vsel %vm10785_vm10, %v557_v18, 0.0  ;;  %600 = vperm.xlu1 %4394, %v582_v54   ;;  %735 = vperm.xlu2 %4396, %v5747_v49   ;;  %vm11056_vm10 = vcmp.ge.s32.totalorder %v4947_v46, 1 }
 0x1e4   :  { %v571_v1 = vadd.f32 %v563_v21, %v528_v41 }
 0x1e5   :  { %658 = vmatpush.msra.mxu1 %v572_v30  ;;  %4404 = vset.pattern.permute.xlu0 %v10703_v60 }
 0x1e6   :  { %629 = vmatpush.msra.mxu0 %v571_v1  ;;  %851 = vperm.xlu0 %4404, %v5725_v24  }
 0x1e7   :  { %659 = vmatpush.msra.mxu1 %v570_v50 }
 0x1e8   :  { %630 = vmatpush.msra.mxu0 %v569_v14 }
 0x1e9   :  { %660 = vmatpush.msra.mxu1 %v568_v28 }
 0x1ea   :  { %631 = vmatpush.msra.mxu0 %v567_v52  ;;  %4334 = vmatmul.msk.f32.vlgmr.msra.gmra.mxu1 %vm10784_vm14, %v575_v29 }
 0x1eb   :  { %4330 = vmatmul.msk.f32.vlgmr.msra.gmra.mxu0 %vm10784_vm14, %v575_v29  ;;  %4398 = vset.pattern.permute.xlu1 %v10707_v57 }
 0x1ec   :  { %730 = vperm.xlu1 %4398, %v5725_v24   ;;  %4401 = vset.pattern.permute.xlu2 %v10705_v35 }
 0x1ed   :  { %787 = vperm.xlu2 %4401, %v5725_v24  }
 0x1ee   :  { %4406 = vset.pattern.permute.xlu0 %v10701_v9 }
 0x1ef   :  { %911 = vperm.xlu0 %4406, %v5705_v25  }
 0x1f2   :  { %4335 = vmatmul.msk.f32.gmra.mxu1 %vm10784_vm14, %v576_v32 }
 0x1f3   :  { %4331 = vmatmul.msk.f32.gmra.mxu0 %vm10784_vm14, %v576_v32 }
 0x1f4   :  { %4400 = vset.pattern.permute.xlu1 %v10705_v35 }
 0x1f5   :  { %783 = vperm.xlu1 %4400, %v5705_v25   ;;  %4403 = vset.pattern.permute.xlu2 %v10703_v60 }
 0x1f6   :  { %847 = vperm.xlu2 %4403, %v5705_v25  }
 0x1f7   :  { %4408 = vset.pattern.permute.xlu0 %v10699_v45 }
 0x1f8   :  { %971 = vperm.xlu0 %4408, %v5731_v0  }
 0x1fa   :  { %4336 = vmatmul.msk.f32.gmra.mxu1 %vm10784_vm14, %v577_v56 }
 0x1fb   :  { %4332 = vmatmul.msk.f32.gmra.mxu0 %vm10784_vm14, %v577_v56 }
 0x1fd   :  { %791 = vperm.xlu1 %4400, %v5747_v49  }
 0x1fe   :  { %4405 = vset.pattern.permute.xlu2 %v10701_v9 }
 0x1ff   :  { %907 = vperm.xlu2 %4405, %v5731_v0  }
 0x200   :  { %4413 = vset.pattern.permute.xlu0 %v10697_v7 }
 0x202   :  { %4337 = vmatmul.msk.f32.gmra.mxu1 %vm10784_vm14, %v578_v51 }
 0x203   :  { %4333 = vmatmul.msk.f32.gmra.mxu0 %vm10784_vm14, %v578_v51  ;;  %vm11054_vm14 = vcmp.ge.s32.totalorder %v4947_v46, 1 }
 0x205   :  { %4402 = vset.pattern.permute.xlu1 %v10703_v60 }
 0x206   :  { %843 = vperm.xlu1 %4402, %v5731_v0  }
 0x207   :  { %919 = vperm.xlu2 %4405, %v5747_v49  }
 0x20e   :  { %855 = vperm.xlu1 %4402, %v5747_v49   ;;  %v586_v6 = vpop.permute.xlu0 %585 }
 0x20f   :  { %4410 = vset.pattern.permute.xlu2 %v10699_v45  ;;  %v591_v62 = vpop.permute.xlu1 %590 }
 0x210   :  { %979 = vperm.xlu2 %4410, %v5725_v24  }
 0x216   :  { %4407 = vset.pattern.permute.xlu1 %v10701_v9 }
 0x217   :  { %915 = vperm.xlu1 %4407, %v5725_v24  }
 0x218   :  { %4412 = vset.pattern.permute.xlu2 %v10697_v7 }
 0x219   :  { %1039 = vperm.xlu2 %4412, %v5705_v25  }
 0x21e   :  { %v596_v36 = vpop.permute.xlu2 %595 }
 0x21f   :  { %4409 = vset.pattern.permute.xlu1 %v10699_v45  ;;  %v10711_v45 = vmov 1  }
 0x220   :  { %975 = vperm.xlu1 %4409, %v5705_v25  }
 0x228   :  { %983 = vperm.xlu1 %4409, %v5747_v49  }
 0x230   :  { %4411 = vset.pattern.permute.xlu1 %v10697_v7 }
 0x231   :  { %1035 = vperm.xlu1 %4411, %v5731_v0  }
 0x235   :  { %v5809_v18 = vpop.permute.xlu2 %720 }
 0x23d   :  { %v5817_v54 = vpop.permute.xlu2 %735 }
 0x247   :  { %v5829_v50 = vpop.permute.xlu2 %787 }
 0x250   :  { %v5845_v52 = vpop.permute.xlu2 %847 }
 0x255   :  { %v601_v21 = vpop.permute.xlu1 %600 }
 0x25e   :  { %v5825_v44 = vpop.permute.xlu1 %730 }
 0x267   :  { %v662_v43 = vpop.f32.mrf.mxu1  ;;  %v5837_v28 = vpop.permute.xlu1 %783 }
 0x268   :  { %v663_v19 = vadd.f32 %v662_v43, %v586_v6  ;;  %v633_v37 = vpop.f32.mrf.mxu0 }
 0x269   :  { %v634_v2 = vadd.f32 %v633_v37, %v586_v6 }
 0x26a   :  { %v675_v26 = vmul.f32 0.5, %v663_v19 }
 0x26b   :  { %v674_v33 = vmul.f32 0.5, %v634_v2 }
 0x26c   :  { %4511 = vtanh.f32 %v675_v26  ;;  %v5857_v26 = vpop.permute.xlu2 %907 }
 0x26d   :  { %4513 = vtanh.f32 %v674_v33 }
 0x26f   :  { %v665_v39 = vpop.f32.mrf.mxu1 }
 0x270   :  { %v636_v4 = vpop.f32.mrf.mxu0  ;;  %v666_v11 = vadd.f32 %v665_v39, %v591_v62 }
 0x271   :  { %v637_v38 = vadd.f32 %v636_v4, %v591_v62 }
 0x272   :  { %v4512_v59 = vpop.eup %4511  ;;  %v677_v41 = vmul.f32 0.5, %v666_v11 }
 0x273   :  { %v4514_v61 = vpop.eup %4513  ;;  %v691_v10 = vmul.f32 0.5, %v4512_v59  ;;  %v676_v3 = vmul.f32 0.5, %v637_v38 }
 0x274   :  { %v690_v40 = vmul.f32 0.5, %v4514_v61 }
 0x275   :  { %v699_v31 = vadd.f32 0.5, %v691_v10  ;;  %4515 = vtanh.f32 %v676_v3  ;;  %v5867_v10 = vpop.permute.xlu2 %919 }
 0x276   :  { %v698_v22 = vadd.f32 0.5, %v690_v40  ;;  %4517 = vtanh.f32 %v677_v41  ;;  %10992 = vst [vmem:[#allocation10_spill] sm:$0xff] %v5867_v10 }
 0x277   :  { %v5791_v5 = vmul.f32 %v699_v31, %v663_v19  ;;  %v668_v53 = vpop.f32.mrf.mxu1  ;;  %v5851_v19 = vpop.permute.xlu1 %791 }
 0x278   :  { %v5793_v58 = vmul.f32 %v698_v22, %v634_v2  ;;  %v639_v13 = vpop.f32.mrf.mxu0  ;;  %v669_v14 = vadd.f32 %v668_v53, %v596_v36  ;;  %10991 = vst [vmem:[#allocation8_spill] sm:$0xff] %v5851_v19  ;;  %v5877_v22 = vpop.permute.xlu0 %725  ;;  %v11005_v19 = vmov 1  }
 0x279   :  { %818 = vrot.lane.b32.xlu0 %v5791_v5, %s4689_s0  ;;  %v640_v30 = vadd.f32 %v639_v13, %v596_v36 }
 0x27a   :  { %810 = vrot.lane.b32.xlu2 %v5793_v58, %s4689_s0  ;;  %746 = vrot.lane.b32.xlu1 %v5793_v58, %s4688_s12  ;;  %v679_v29 = vmul.f32 0.5, %v669_v14 }
 0x27b   :  { %v4516_v20 = vpop.eup %4515  ;;  %v678_v27 = vmul.f32 0.5, %v640_v30 }
 0x27c   :  { %v692_v23 = vmul.f32 0.5, %v4516_v20  ;;  %v4518_v15 = vpop.eup %4517 }
 0x27d   :  { %v693_v17 = vmul.f32 0.5, %v4518_v15  ;;  %4519 = vtanh.f32 %v678_v27  ;;  %v10695_v27 = vmov 2  }
 0x27e   :  { %v700_v48 = vadd.f32 0.5, %v692_v23  ;;  %4521 = vtanh.f32 %v679_v29  ;;  %v5883_v23 = vpop.permute.xlu2 %979  ;;  %4414 = vset.pattern.permute.xlu2 %v10695_v27 }
 0x27f   :  { %v701_v1 = vadd.f32 0.5, %v693_v17  ;;  %v671_v37 = vpop.f32.mrf.mxu1  ;;  %v5865_v61 = vpop.permute.xlu1 %843  ;;  %10994 = vst [vmem:[#allocation12_spill] sm:$0xff] %v5883_v23 }
 0x280   :  { %v5807_v34 = vmul.f32 %v700_v48, %v637_v38  ;;  %v642_v56 = vpop.f32.mrf.mxu0  ;;  %v672_v33 = vadd.f32 %v671_v37, %v601_v21  ;;  %v5891_v48 = vpop.permute.xlu0 %779 }
 0x281   :  { %1010 = vrot.lane.b32.xlu0 %v5791_v5, %s4692_s15  ;;  %v5827_v12 = vmul.f32 %v701_v1, %v666_v11  ;;  %v643_v51 = vadd.f32 %v642_v56, %v601_v21 }
 0x282   :  { %874 = vrot.lane.b32.xlu2 %v5793_v58, %s4690_s13  ;;  %938 = vrot.lane.b32.xlu1 %v5793_v58, %s4691_s14  ;;  %v681_v4 = vmul.f32 0.5, %v672_v33 }
 0x283   :  { %v4520_v16 = vpop.eup %4519  ;;  %v680_v43 = vmul.f32 0.5, %v643_v51 }
 0x284   :  { %v694_v8 = vmul.f32 0.5, %v4520_v16  ;;  %v4522_v2 = vpop.eup %4521 }
 0x285   :  { %4523 = vtanh.f32 %v680_v43  ;;  %v695_v62 = vmul.f32 0.5, %v4522_v2 }
 0x286   :  { %v702_v32 = vadd.f32 0.5, %v694_v8  ;;  %4525 = vtanh.f32 %v681_v4  ;;  %v10715_v4 = vmov 9  }
 0x287   :  { %v703_v38 = vadd.f32 0.5, %v695_v62  ;;  %v5879_v39 = vpop.permute.xlu1 %855 }
 0x288   :  { %v5847_v6 = vmul.f32 %v702_v32, %v640_v30  ;;  %10993 = vst [vmem:[#allocation11_spill] sm:$0xff] %v5879_v39  ;;  %v5903_v30 = vpop.permute.xlu2 %1039  ;;  %v5905_v21 = vpop.permute.xlu0 %851 }
 0x289   :  { %812 = vrot.lane.b32.xlu0 %v5807_v34, %s4689_s0  ;;  %v5869_v3 = vmul.f32 %v703_v38, %v669_v14  ;;  %10996 = vst [vmem:[#allocation14_spill] sm:$0xff] %v5905_v21 }
 0x28a   :  { %1002 = vrot.lane.b32.xlu2 %v5793_v58, %s4692_s15  ;;  %882 = vrot.lane.b32.xlu1 %v5791_v5, %s4690_s13 }
 0x28b   :  { %v4524_v59 = vpop.eup %4523 }
 0x28c   :  { %v696_v40 = vmul.f32 0.5, %v4524_v59  ;;  %v4526_v20 = vpop.eup %4525 }
 0x28d   :  { %v697_v36 = vmul.f32 0.5, %v4526_v20 }
 0x28e   :  { %v704_v31 = vadd.f32 0.5, %v696_v40 }
 0x28f   :  { %v705_v41 = vadd.f32 0.5, %v697_v36  ;;  %v5893_v15 = vpop.permute.xlu1 %915 }
 0x290   :  { %v5881_v11 = vmul.f32 %v704_v31, %v643_v51  ;;  %10995 = vst [vmem:[#allocation13_spill] sm:$0xff] %v5893_v15  ;;  %v5918_v16 = vpop.permute.xlu0 %911  ;;  %v10725_v15 = vmov 10  }
 0x291   :  { %1004 = vrot.lane.b32.xlu0 %v5807_v34, %s4692_s15  ;;  %v5895_v13 = vmul.f32 %v705_v41, %v672_v33 }
 0x292   :  { %754 = vrot.lane.b32.xlu2 %v5791_v5, %s4688_s12  ;;  %876 = vrot.lane.b32.xlu1 %v5807_v34, %s4690_s13 }
 0x297   :  { %v5907_v17 = vpop.permute.xlu1 %975 }
 0x298   :  { %v5931_v8 = vpop.permute.xlu0 %971 }
 0x299   :  { %756 = vrot.lane.b32.xlu0 %v5827_v12, %s4688_s12 }
 0x29a   :  { %946 = vrot.lane.b32.xlu2 %v5791_v5, %s4691_s14  ;;  %820 = vrot.lane.b32.xlu1 %v5827_v12, %s4689_s0 }
 0x29f   :  { %v5921_v53 = vpop.permute.xlu1 %983 }
 0x2a0   :  { %10997 = vst [vmem:[#allocation15_spill] sm:$0xff] %v5921_v53 }
 0x2a1   :  { %948 = vrot.lane.b32.xlu0 %v5827_v12, %s4691_s14 }
 0x2a2   :  { %748 = vrot.lane.b32.xlu2 %v5807_v34, %s4688_s12  ;;  %1012 = vrot.lane.b32.xlu1 %v5827_v12, %s4692_s15 }
 0x2a7   :  { %v5936_v29 = vpop.permute.xlu1 %1035 }
 0x2a9   :  { %750 = vrot.lane.b32.xlu0 %v5847_v6, %s4688_s12 }
 0x2aa   :  { %940 = vrot.lane.b32.xlu2 %v5807_v34, %s4691_s14  ;;  %814 = vrot.lane.b32.xlu1 %v5847_v6, %s4689_s0 }
 0x2b1   :  { %942 = vrot.lane.b32.xlu0 %v5847_v6, %s4691_s14 }
 0x2b2   :  { %884 = vrot.lane.b32.xlu2 %v5827_v12, %s4690_s13  ;;  %1006 = vrot.lane.b32.xlu1 %v5847_v6, %s4692_s15 }
 0x2b9   :  { %886 = vrot.lane.b32.xlu0 %v5869_v3, %s4690_s13 }
 0x2ba   :  { %878 = vrot.lane.b32.xlu2 %v5847_v6, %s4690_s13  ;;  %758 = vrot.lane.b32.xlu1 %v5869_v3, %s4688_s12 }
 0x2c1   :  { %880 = vrot.lane.b32.xlu0 %v5881_v11, %s4690_s13 }
 0x2c2   :  { %822 = vrot.lane.b32.xlu2 %v5869_v3, %s4689_s0  ;;  %950 = vrot.lane.b32.xlu1 %v5869_v3, %s4691_s14 }
 0x2c9   :  { %824 = vrot.lane.b32.xlu0 %v5895_v13, %s4689_s0 }
 0x2ca   :  { %1014 = vrot.lane.b32.xlu2 %v5869_v3, %s4692_s15  ;;  %752 = vrot.lane.b32.xlu1 %v5881_v11, %s4688_s12 }
 0x2d1   :  { %1016 = vrot.lane.b32.xlu0 %v5895_v13, %s4692_s15 }
 0x2d2   :  { %816 = vrot.lane.b32.xlu2 %v5881_v11, %s4689_s0  ;;  %944 = vrot.lane.b32.xlu1 %v5881_v11, %s4691_s14 }
 0x2d4   :  { %v5916_v1 = vpop.permute.xlu2 %810 }
 0x2d9   :  { %1043 = vperm.xlu0 %4413, %v5725_v24  }
 0x2da   :  { %1008 = vrot.lane.b32.xlu2 %v5881_v11, %s4692_s15  ;;  %888 = vrot.lane.b32.xlu1 %v5895_v13, %s4690_s13 }
 0x2dc   :  { %v5927_v14 = vpop.permute.xlu2 %874 }
 0x2e1   :  { %1072 = vrot.lane.b32.xlu0 %v5881_v11, %s4693_s16 }
 0x2e2   :  { %760 = vrot.lane.b32.xlu2 %v5895_v13, %s4688_s12  ;;  %1047 = vperm.xlu1 %4411, %v5747_v49  }
 0x2e3   :  { %4415 = vset.pattern.permute.xlu0 %v10695_v27 }
 0x2e4   :  { %v5939_v32 = vpop.permute.xlu2 %1002 }
 0x2e9   :  { %1078 = vrot.lane.b32.xlu0 %v5869_v3, %s4693_s16 }
 0x2ea   :  { %952 = vrot.lane.b32.xlu2 %v5895_v13, %s4691_s14  ;;  %1068 = vrot.lane.b32.xlu1 %v5807_v34, %s4693_s16 }
 0x2eb   :  { %v5947_v56 = vpop.permute.xlu0 %818  ;;  %4416 = vset.pattern.permute.xlu1 %v10695_v27 }
 0x2ec   :  { %v5950_v51 = vpop.permute.xlu2 %754  ;;  %v5952_v43 = vpop.permute.xlu1 %746 }
 0x2f1   :  { %1103 = vperm.xlu0 %4415, %v5705_v25  }
 0x2f2   :  { %1066 = vrot.lane.b32.xlu2 %v5793_v58, %s4693_s16  ;;  %1074 = vrot.lane.b32.xlu1 %v5791_v5, %s4693_s16 }
 0x2f3   :  { %v5959_v37 = vpop.permute.xlu0 %1010 }
 0x2f4   :  { %v5961_v2 = vpop.permute.xlu2 %946  ;;  %v5963_v33 = vpop.permute.xlu1 %938 }
 0x2f9   :  { %1136 = vrot.lane.b32.xlu0 %v5847_v6, %s4707_s26 }
 0x2fa   :  { %1070 = vrot.lane.b32.xlu2 %v5847_v6, %s4693_s16  ;;  %1080 = vrot.lane.b32.xlu1 %v5895_v13, %s4693_s16 }
 0x2fb   :  { %v5971_v62 = vpop.permute.xlu0 %812  ;;  %4417 = vset.pattern.permute.xlu0 %v10715_v4 }
 0x2fc   :  { %v5974_v38 = vpop.permute.xlu2 %748  ;;  %v5976_v59 = vpop.permute.xlu1 %882 }
 0x301   :  { %1142 = vrot.lane.b32.xlu0 %v5827_v12, %s4707_s26 }
 0x302   :  { %1076 = vrot.lane.b32.xlu2 %v5827_v12, %s4693_s16  ;;  %1107 = vperm.xlu1 %4416, %v5725_v24  }
 0x303   :  { %v5983_v40 = vpop.permute.xlu0 %1004 }
 0x304   :  { %v5985_v31 = vpop.permute.xlu2 %940  ;;  %v5987_v20 = vpop.permute.xlu1 %876 }
 0x309   :  { %1166 = vperm.xlu0 %4417, %v5731_v0  }
 0x30a   :  { %1099 = vperm.xlu2 %4414, %v5731_v0   ;;  %1132 = vrot.lane.b32.xlu1 %v5793_v58, %s4707_s26 }
 0x30b   :  { %v5993_v36 = vpop.permute.xlu0 %756  ;;  %4418 = vset.pattern.permute.xlu1 %v10715_v4 }
 0x30c   :  { %v5996_v41 = vpop.permute.xlu2 %884  ;;  %v5998_v27 = vpop.permute.xlu1 %820 }
 0x311   :  { %1201 = vrot.lane.b32.xlu0 %v5807_v34, %s4709_s27 }
 0x312   :  { %1111 = vperm.xlu2 %4414, %v5747_v49   ;;  %1138 = vrot.lane.b32.xlu1 %v5881_v11, %s4707_s26 }
 0x313   :  { %v6005_v7 = vpop.permute.xlu0 %948  ;;  %4422 = vset.pattern.permute.xlu0 %v10711_v45 }
 0x314   :  { %v6008_v9 = vpop.permute.xlu2 %878  ;;  %v6010_v60 = vpop.permute.xlu1 %1012 }
 0x315   :  { %10998 = vst [vmem:[#allocation16_spill] sm:$0xff] %v6008_v9 }
 0x319   :  { %1207 = vrot.lane.b32.xlu0 %v5791_v5, %s4709_s27 }
 0x31a   :  { %1134 = vrot.lane.b32.xlu2 %v5807_v34, %s4707_s26  ;;  %1144 = vrot.lane.b32.xlu1 %v5869_v3, %s4707_s26 }
 0x31b   :  { %v6018_v35 = vpop.permute.xlu0 %750  ;;  %4419 = vset.pattern.permute.xlu2 %v10715_v4 }
 0x31c   :  { %v6021_v57 = vpop.permute.xlu2 %822  ;;  %v6023_v55 = vpop.permute.xlu1 %814 }
 0x321   :  { %1213 = vrot.lane.b32.xlu0 %v5895_v13, %s4709_s27 }
 0x322   :  { %1140 = vrot.lane.b32.xlu2 %v5791_v5, %s4707_s26  ;;  %1170 = vperm.xlu1 %4418, %v5705_v25  }
 0x323   :  { %v6030_v45 = vpop.permute.xlu0 %942 }
 0x324   :  { %10999 = vst [vmem:[#allocation17_spill] sm:$0xff] %v6030_v45  ;;  %v6032_v63 = vpop.permute.xlu2 %1014  ;;  %v6034_v53 = vpop.permute.xlu1 %1006 }
 0x325   :  { %11000 = vst [vmem:[#allocation18_spill] sm:$0xff] %v6032_v63 }
 0x326   :  { %11001 = vst [vmem:[#allocation19_spill] sm:$0xff] %v6034_v53 }
 0x329   :  { %1241 = vperm.xlu0 %4422, %v5725_v24  }
 0x32a   :  { %1146 = vrot.lane.b32.xlu2 %v5895_v13, %s4707_s26  ;;  %1178 = vperm.xlu1 %4418, %v5747_v49  }
 0x32b   :  { %v6040_v4 = vpop.permute.xlu0 %886 }
 0x32c   :  { %11002 = vst [vmem:[#allocation20_spill] sm:$0xff] %v6040_v4  ;;  %v6042_v10 = vpop.permute.xlu2 %816  ;;  %v6044_v39 = vpop.permute.xlu1 %758 }
 0x32d   :  { %11003 = vst [vmem:[#allocation21_spill] sm:$0xff] %v6042_v10 }
 0x331   :  { %1272 = vrot.lane.b32.xlu0 %v5881_v11, %s4711_s28 }
 0x332   :  { %1174 = vperm.xlu2 %4419, %v5725_v24   ;;  %1203 = vrot.lane.b32.xlu1 %v5847_v6, %s4709_s27 }
 0x333   :  { %v6051_v23 = vpop.permute.xlu0 %880  ;;  %4424 = vset.pattern.permute.xlu0 %v10725_v15  ;;  %4420 = vset.pattern.permute.xlu1 %v11005_v19 }
 0x334   :  { %11004 = vst [vmem:[#allocation22_spill] sm:$0xff] %v6051_v23  ;;  %v6055_v53 = vpop.permute.xlu2 %1008  ;;  %v6057_v10 = vpop.permute.xlu1 %950 }
 0x335   :  { %11006 = vst [vmem:[#allocation23_spill] sm:$0xff] %v6055_v53 }
 0x336   :  { %11007 = vst [vmem:[#allocation24_spill] sm:$0xff] %v6057_v10 }
 0x339   :  { %1278 = vrot.lane.b32.xlu0 %v5869_v3, %s4711_s28 }
 0x33a   :  { %1199 = vrot.lane.b32.xlu2 %v5793_v58, %s4709_s27  ;;  %1209 = vrot.lane.b32.xlu1 %v5827_v12, %s4709_s27 }
 0x33b   :  { %v6065_v63 = vpop.permute.xlu0 %824  ;;  %4421 = vset.pattern.permute.xlu2 %v11005_v19 }
 0x33c   :  { %11008 = vst [vmem:[#allocation25_spill] sm:$0xff] %v6065_v63  ;;  %v6068_v15 = vpop.permute.xlu2 %760  ;;  %v6070_v23 = vpop.permute.xlu1 %752  ;;  %v11013_v63 = vmov 0  }
 0x341   :  { %1304 = vperm.xlu0 %4424, %v5705_v25  }
 0x342   :  { %1205 = vrot.lane.b32.xlu2 %v5881_v11, %s4709_s27  ;;  %1233 = vperm.xlu1 %4420, %v5731_v0  }
 0x343   :  { %v6076_v53 = vpop.permute.xlu0 %1016 }
 0x344   :  { %11009 = vst [vmem:[#allocation26_spill] sm:$0xff] %v6076_v53  ;;  %v6078_v21 = vpop.permute.xlu2 %952  ;;  %v6080_v10 = vpop.permute.xlu1 %944 }
 0x345   :  { %11010 = vst [vmem:[#allocation27_spill] sm:$0xff] %v6078_v21  ;;  %v11017_v21 = vmov 10  }
 0x346   :  { %11011 = vst [vmem:[#allocation28_spill] sm:$0xff] %v6080_v10 }
 0x349   :  { %1337 = vrot.lane.b32.xlu0 %v5847_v6, %s4713_s29 }
 0x34a   :  { %1211 = vrot.lane.b32.xlu2 %v5869_v3, %s4709_s27  ;;  %1245 = vperm.xlu1 %4420, %v5747_v49  }
 0x34b   :  { %v6087_v19 = vpop.permute.xlu0 %1043  ;;  %4426 = vset.pattern.permute.xlu0 %v11013_v63 }
 0x34c   :  { %11012 = vst [vmem:[#allocation29_spill] sm:$0xff] %v6087_v19  ;;  %v6090_v45 = vpop.permute.xlu2 %1066  ;;  %v6092_v53 = vpop.permute.xlu1 %888 }
 0x34d   :  { %11014 = vst [vmem:[#allocation30_spill] sm:$0xff] %v6090_v45 }
 0x34e   :  { %11015 = vst [vmem:[#allocation31_spill] sm:$0xff] %v6092_v53 }
 0x351   :  { %1343 = vrot.lane.b32.xlu0 %v5827_v12, %s4713_s29 }
 0x352   :  { %1237 = vperm.xlu2 %4421, %v5705_v25   ;;  %1268 = vrot.lane.b32.xlu1 %v5807_v34, %s4711_s28 }
 0x353   :  { %v6099_v10 = vpop.permute.xlu0 %1072  ;;  %4425 = vset.pattern.permute.xlu1 %v11017_v21 }
 0x354   :  { %11016 = vst [vmem:[#allocation32_spill] sm:$0xff] %v6099_v10  ;;  %v6102_v9 = vpop.permute.xlu2 %1070  ;;  %v6104_v19 = vpop.permute.xlu1 %1047 }
 0x355   :  { %11018 = vst [vmem:[#allocation33_spill] sm:$0xff] %v6102_v9 }
 0x356   :  { %11019 = vst [vmem:[#allocation34_spill] sm:$0xff] %v6104_v19 }
 0x359   :  { %1367 = vperm.xlu0 %4426, %v5731_v0  }
 0x35a   :  { %1266 = vrot.lane.b32.xlu2 %v5793_v58, %s4711_s28  ;;  %1274 = vrot.lane.b32.xlu1 %v5791_v5, %s4711_s28 }
 0x35b   :  { %v6111_v45 = vpop.permute.xlu0 %1078  ;;  %4423 = vset.pattern.permute.xlu2 %v11017_v21 }
 0x35c   :  { %11020 = vst [vmem:[#allocation35_spill] sm:$0xff] %v6111_v45  ;;  %v6114_v53 = vpop.permute.xlu2 %1076  ;;  %v6116_v10 = vpop.permute.xlu1 %1068 }
 0x35d   :  { %11021 = vst [vmem:[#allocation36_spill] sm:$0xff] %v6114_v53 }
 0x35e   :  { %11022 = vst [vmem:[#allocation37_spill] sm:$0xff] %v6116_v10 }
 0x362   :  { %1270 = vrot.lane.b32.xlu2 %v5847_v6, %s4711_s28  ;;  %1280 = vrot.lane.b32.xlu1 %v5895_v13, %s4711_s28 }
 0x363   :  { %v6122_v9 = vpop.permute.xlu0 %1103 }
 0x364   :  { %11023 = vst [vmem:[#allocation38_spill] sm:$0xff] %v6122_v9  ;;  %v6124_v19 = vpop.permute.xlu2 %1099  ;;  %v6126_v4 = vpop.permute.xlu1 %1074 }
 0x365   :  { %11024 = vst [vmem:[#allocation39_spill] sm:$0xff] %v6124_v19 }
 0x36a   :  { %1276 = vrot.lane.b32.xlu2 %v5827_v12, %s4711_s28  ;;  %1308 = vperm.xlu1 %4425, %v5725_v24  }
 0x36b   :  { %v6135_v10 = vpop.permute.xlu0 %1136 }
 0x36c   :  { %v6131_v21 = vpop.permute.xlu2 %1111  ;;  %v6133_v45 = vpop.permute.xlu1 %1080  ;;  %11027 = vst [vmem:[#allocation42_spill] sm:$0xff] %v6135_v10 }
 0x36d   :  { %11025 = vst [vmem:[#allocation40_spill] sm:$0xff] %v6131_v21 }
 0x36e   :  { %11026 = vst [vmem:[#allocation41_spill] sm:$0xff] %v6133_v45 }
 0x372   :  { %1300 = vperm.xlu2 %4423, %v5731_v0   ;;  %1333 = vrot.lane.b32.xlu1 %v5793_v58, %s4713_s29 }
 0x373   :  { %4427 = vset.pattern.permute.xlu1 %v11013_v63  ;;  %v6145_v19 = vpop.permute.xlu0 %1142 }
 0x374   :  { %v6141_v9 = vpop.permute.xlu2 %1134  ;;  %v6143_v53 = vpop.permute.xlu1 %1107  ;;  %11030 = vst [vmem:[#allocation45_spill] sm:$0xff] %v6145_v19 }
 0x375   :  { %11028 = vst [vmem:[#allocation43_spill] sm:$0xff] %v6141_v9 }
 0x376   :  { %11029 = vst [vmem:[#allocation44_spill] sm:$0xff] %v6143_v53 }
 0x37a   :  { %1312 = vperm.xlu2 %4423, %v5747_v49   ;;  %1339 = vrot.lane.b32.xlu1 %v5881_v11, %s4713_s29 }
 0x37b   :  { %v6154_v0 = vpop.permute.xlu0 %1166 }
 0x37c   :  { %v6150_v21 = vpop.permute.xlu2 %1140  ;;  %v6152_v10 = vpop.permute.xlu1 %1132  ;;  %11031 = vst [vmem:[#allocation46_spill] sm:$0xff] %v6154_v0 }
 0x382   :  { %1335 = vrot.lane.b32.xlu2 %v5807_v34, %s4713_s29  ;;  %1345 = vrot.lane.b32.xlu1 %v5869_v3, %s4713_s29 }
 0x383   :  { %4428 = vset.pattern.permute.xlu2 %v11013_v63  ;;  %v6168_v19 = vpop.permute.xlu0 %1201 }
 0x384   :  { %v6161_v53 = vpop.permute.xlu2 %1146  ;;  %v6163_v9 = vpop.permute.xlu1 %1138  ;;  %11034 = vst [vmem:[#allocation49_spill] sm:$0xff] %v6168_v19  ;;  %v11041_v19 = vmov 5  }
 0x385   :  { %11032 = vst [vmem:[#allocation47_spill] sm:$0xff] %v6161_v53 }
 0x386   :  { %11033 = vst [vmem:[#allocation48_spill] sm:$0xff] %v6163_v9 }
 0x38a   :  { %1341 = vrot.lane.b32.xlu2 %v5791_v5, %s4713_s29  ;;  %1371 = vperm.xlu1 %4427, %v5705_v25   ;;  %v6186_v25 = vld [vmem:[%s10672_s4 + $0x10] sm:$0xff] }
 0x38b   :  { %v6181_v9 = vpop.permute.xlu0 %1207  ;;  %11040 = vst [vmem:[#allocation55_spill] sm:$0xff] %v6186_v25 }
 0x38c   :  { %v6170_v45 = vpop.permute.xlu2 %1174  ;;  %v6172_v0 = vpop.permute.xlu1 %1144  ;;  %11039 = vst [vmem:[#allocation54_spill] sm:$0xff] %v6181_v9 }
 0x38d   :  { %11035 = vst [vmem:[#allocation50_spill] sm:$0xff] %v6170_v45 }
 0x38e   :  { %11036 = vst [vmem:[#allocation51_spill] sm:$0xff] %v6172_v0 }
 0x392   :  { %1347 = vrot.lane.b32.xlu2 %v5895_v13, %s4713_s29  ;;  %1379 = vperm.xlu1 %4427, %v5747_v49  }
 0x393   :  { %v6195_v0 = vpop.permute.xlu0 %1213 }
 0x394   :  { %v6177_v63 = vpop.permute.xlu2 %1199  ;;  %v6179_v53 = vpop.permute.xlu1 %1170  ;;  %11044 = vst [vmem:[#allocation58_spill] sm:$0xff] %v6195_v0 }
 0x395   :  { %11037 = vst [vmem:[#allocation52_spill] sm:$0xff] %v6177_v63  ;;  %v830_v63 = vsel %vm10795_vm3, %v5947_v56, %v5916_v1 }
 0x396   :  { %11038 = vst [vmem:[#allocation53_spill] sm:$0xff] %v6179_v53  ;;  %v6200_v53 = vld [vmem:[%s10672_s4] sm:$0xff] }
 0x397   :  { %11045 = vst [vmem:[#allocation59_spill] sm:$0xff] %v6200_v53 }
 0x39a   :  { %1375 = vperm.xlu2 %4428, %v5725_v24   ;;  %4430 = vset.pattern.permute.xlu1 %v11041_v19  ;;  %v11046_v24 = vmov 6  }
 0x39b   :  { %1414 = vperm.xlu1 %4430, %v6186_v25   ;;  %v6214_v0 = vpop.permute.xlu0 %1241 }
 0x39c   :  { %v6191_v45 = vpop.permute.xlu2 %1205  ;;  %v6193_v49 = vpop.permute.xlu1 %1178  ;;  %11050 = vst [vmem:[#allocation63_spill] sm:$0xff] %v6214_v0 }
 0x39d   :  { %11042 = vst [vmem:[#allocation56_spill] sm:$0xff] %v6191_v45 }
 0x39e   :  { %11043 = vst [vmem:[#allocation57_spill] sm:$0xff] %v6193_v49  ;;  %v6212_v49 = vld [vmem:[%s10672_s4 + $0x18] sm:$0xff] }
 0x39f   :  { %11049 = vst [vmem:[#allocation62_spill] sm:$0xff] %v6212_v49 }
 0x3a2   :  { %4429 = vset.pattern.permute.xlu2 %v11041_v19 }
 0x3a3   :  { %1404 = vperm.xlu2 %4429, %v6200_v53   ;;  %4431 = vset.pattern.permute.xlu1 %v11046_v24  ;;  %v762_v53 = vsel %vm10796_vm0, %v5952_v43, %v5950_v51 }
 0x3a4   :  { %v6205_v9 = vpop.permute.xlu2 %1211  ;;  %v6207_v25 = vpop.permute.xlu1 %1203 }
 0x3a5   :  { %11047 = vst [vmem:[#allocation60_spill] sm:$0xff] %v6205_v9  ;;  %v766_v9 = vsel %vm10796_vm0, %v5950_v51, %v5952_v43  ;;  %v739_v51 = vmul.f32 %v5809_v18, %v5791_v5  ;;  %v826_v43 = vsel %vm10795_vm3, %v5916_v1, %v5947_v56  ;;  %v763_v1 = vsel %vm10796_vm0, %v5974_v38, %v5993_v36 }
 0x3a6   :  { %11048 = vst [vmem:[#allocation61_spill] sm:$0xff] %v6207_v25  ;;  %v6229_v25 = vpop.permute.xlu0 %1272  ;;  %v6268_v56 = vmul.f32 %v5825_v44, %v5869_v3 }
 0x3a7   :  { %11053 = vst [vmem:[#allocation66_spill] sm:$0xff] %v6229_v25  ;;  %v741_v25 = vmul.f32 %v5877_v22, %v5827_v12  ;;  %v6278_v12 = vmul.f32 %v5817_v54, %v5895_v13 }
 0x3ab   :  { %1419 = vperm.xlu2 %4429, %v6212_v49  }
 0x3ac   :  { %v6217_v45 = vpop.permute.xlu2 %1237  ;;  %v6219_v19 = vpop.permute.xlu1 %1209 }
 0x3ad   :  { %11051 = vst [vmem:[#allocation64_spill] sm:$0xff] %v6217_v45  ;;  %v770_v45 = vsel %vm10794_vm1, %v762_v53, 0.0  ;;  %v738_v53 = vmul.f32 %v5809_v18, %v5793_v58  ;;  %v834_v58 = vsel %vm11054_vm14, %v830_v63, 0.0  ;;  %v767_v18 = vsel %vm10796_vm0, %v5993_v36, %v5974_v38 }
 0x3ae   :  { %11052 = vst [vmem:[#allocation65_spill] sm:$0xff] %v6219_v19  ;;  %v771_v19 = vsel %vm10791_vm2, %v766_v9, 0.0  ;;  %v890_v9 = vsel %vm10790_vm4, %v5927_v14, %v5976_v59  ;;  %v858_v38 = vmul.f32 %v5865_v61, %v834_v58  ;;  %vm11055_vm14 = vcmp.lt.s32.totalorder %v4951_v47, 14 }
 0x3af   :  { %v795_v5 = vmul.f32 %v5891_v48, %v771_v19  ;;  %v6282_v19 = vmul.f32 %v5825_v44, %v5847_v6  ;;  %v898_v3 = vsel %vm10787_vm6, %v890_v9, 0.0  ;;  %v772_v44 = vsel %vm10794_vm1, %v763_v1, 0.0  ;;  %v6309_v9 = vpop.permute.xlu0 %1278 }
 0x3b1   :  { %v803_v36 = vadd.f32 %v795_v5, %v739_v51  ;;  %v827_v51 = vsel %vm10795_vm3, %v5971_v62, %v5998_v27 }
 0x3b3   :  { %4432 = vset.pattern.permute.xlu2 %v11046_v24  ;;  %v794_v24 = vmul.f32 %v5891_v48, %v770_v45  ;;  %v740_v45 = vmul.f32 %v5877_v22, %v5807_v34  ;;  %v835_v34 = vsel %vm10788_vm7, %v826_v43, 0.0  ;;  %v1018_v22 = vsel %vm10793_vm9, %v5939_v32, %v5959_v37 }
 0x3b4   :  { %v6232_v0 = vpop.permute.xlu2 %1266  ;;  %v6234_v49 = vpop.permute.xlu1 %1233  ;;  %v894_v48 = vsel %vm10790_vm4, %v5976_v59, %v5927_v14  ;;  %v831_v43 = vsel %vm10795_vm3, %v5998_v27, %v5971_v62  ;;  %v859_v14 = vmul.f32 %v5865_v61, %v835_v34  ;;  %v1022_v59 = vsel %vm10793_vm9, %v5959_v37, %v5939_v32 }
 0x3b5   :  { %v802_v63 = vadd.f32 %v794_v24, %v738_v53  ;;  %v773_v24 = vsel %vm10791_vm2, %v767_v18, 0.0  ;;  %v922_v53 = vmul.f32 %v5857_v26, %v898_v3  ;;  %v1026_v5 = vsel %vm10792_vm11, %v1018_v22, 0.0 }
 0x3b6   :  { %v958_v61 = vsel %vm10789_vm8, %v5961_v2, %v5963_v33  ;;  %v899_v1 = vsel %vm11055_vm14, %v894_v48, 0.0  ;;  %v796_v32 = vmul.f32 %v5837_v28, %v772_v44  ;;  %v6332_v37 = vmul.f32 %v5817_v54, %v5881_v11 }
 0x3b7   :  { %v866_v58 = vadd.f32 %v858_v38, %v802_v63  ;;  %v797_v27 = vmul.f32 %v5837_v28, %v773_v24  ;;  %v836_v62 = vsel %vm11056_vm10, %v831_v43, 0.0  ;;  %v1027_v18 = vsel %vm11057_vm13, %v1022_v59, 0.0 }
 0x3b8   :  { %v954_v34 = vsel %vm10789_vm8, %v5963_v33, %v5961_v2  ;;  %v867_v3 = vadd.f32 %v859_v14, %v803_v36  ;;  %v837_v22 = vsel %vm10788_vm7, %v827_v51, 0.0  ;;  %v1050_v54 = vmul.f32 %v5936_v29, %v1026_v5 }
 0x3b9   :  { %vm11058_vm14 = vcmp.ge.s32.totalorder %v4947_v46, 2  ;;  %v923_v11 = vmul.f32 %v5857_v26, %v899_v1  ;;  %v930_v63 = vadd.f32 %v922_v53, %v866_v58  ;;  %v804_v48 = vadd.f32 %v796_v32, %v740_v45 }
 0x3ba   :  { %v962_v28 = vsel %vm11058_vm14, %v958_v61, 0.0  ;;  %v891_v44 = vsel %vm10790_vm4, %v5987_v20, %v5996_v41  ;;  %v860_v2 = vmul.f32 %v5845_v52, %v836_v62  ;;  %v959_v33 = vsel %vm10789_vm8, %v6005_v7, %v5985_v31  ;;  %vm11060_vm13 = vmmov %vm11058_vm14  ;;  %v6395_v61 = vpop.permute.xlu0 %1304 }
 0x3bb   :  { %v805_v38 = vadd.f32 %v797_v27, %v741_v25  ;;  %v895_v26 = vsel %vm10790_vm4, %v5996_v41, %v5987_v20  ;;  %v861_v45 = vmul.f32 %v5845_v52, %v837_v22  ;;  %v764_v36 = vsel %vm10796_vm0, %v6018_v35, %v6044_v39 }
 0x3bc   :  { %v6298_v6 = vpop.permute.xlu2 %1270  ;;  %v6300_v13 = vpop.permute.xlu1 %1245  ;;  %v1051_v14 = vmul.f32 %v5936_v29, %v1027_v18  ;;  %vm11059_vm10 = vcmp.ge.s32.totalorder %v4951_v47, 2  ;;  %v986_v59 = vmul.f32 %v5931_v8, %v962_v28  ;;  %v955_v52 = vsel %vm10789_vm8, %v5985_v31, %v6005_v7 }
 0x3bd   :  { %v963_v25 = vsel %vm11059_vm10, %v954_v34, 0.0  ;;  %v931_v20 = vadd.f32 %v923_v11, %v867_v3  ;;  %v900_v41 = vsel %vm10787_vm6, %v891_v44, 0.0  ;;  %v964_v53 = vsel %vm11060_vm13, %v959_v33, 0.0 }
 0x3be   :  { %v768_v29 = vsel %vm10796_vm0, %v6044_v39, %v6018_v35  ;;  %vm11061_vm14 = vcmp.lt.s32.totalorder %v4951_v47, 14  ;;  %v868_v5 = vadd.f32 %v860_v2, %v804_v48  ;;  %v1019_v7 = vsel %vm10793_vm9, %v5983_v40, %v6010_v60 }
 0x3bf   :  { %v901_v51 = vsel %vm11061_vm14, %v895_v26, 0.0  ;;  %v774_v31 = vsel %vm10794_vm1, %v764_v36, 0.0  ;;  %v987_v1 = vmul.f32 %v5931_v8, %v963_v25  ;;  %v994_v32 = vadd.f32 %v986_v59, %v930_v63  ;;  %v11066_v25 = vld [vmem:[#allocation17_spill] sm:$0xff]  ;;  %v11067_v59 = vld [vmem:[#allocation24_spill] sm:$0xff] }
 0x3c0   :  { %v869_v58 = vadd.f32 %v861_v45, %v805_v38  ;;  %v965_v35 = vsel %vm11059_vm10, %v955_v52, 0.0  ;;  %v924_v39 = vmul.f32 %v5918_v16, %v900_v41  ;;  %v988_v27 = vmul.f32 %v5907_v17, %v964_v53 }
 0x3c1   :  { %v1023_v62 = vsel %vm10793_vm9, %v6010_v60, %v5983_v40  ;;  %v775_v18 = vsel %vm10791_vm2, %v768_v29, 0.0  ;;  %v925_v34 = vmul.f32 %v5918_v16, %v901_v51  ;;  %v1028_v8 = vsel %vm10792_vm11, %v1019_v7, 0.0  ;;  %v11068_v51 = vld [vmem:[#allocation14_spill] sm:$0xff] }
 0x3c2   :  { %v832_v3 = vsel %vm10795_vm3, %v6021_v57, %v6023_v55  ;;  %v798_v22 = vmul.f32 %v5829_v50, %v774_v31  ;;  %v995_v28 = vadd.f32 %v987_v1, %v931_v20  ;;  %v932_v11 = vadd.f32 %v924_v39, %v868_v5 }
 0x3c3   :  { %v989_v63 = vmul.f32 %v5907_v17, %v965_v35  ;;  %v828_v60 = vsel %vm10795_vm3, %v6023_v55, %v6021_v57  ;;  %v933_v16 = vadd.f32 %v925_v34, %v869_v58  ;;  %vm11062_vm13 = vcmp.lt.s32.totalorder %v4951_v47, 13  ;;  %v6470_v58 = vpop.permute.xlu0 %1337  ;;  %v11071_v35 = vld [vmem:[#allocation19_spill] sm:$0xff]  ;;  %v11074_v34 = vld [vmem:[#allocation25_spill] sm:$0xff] }
 0x3c4   :  { %v6367_v24 = vpop.permute.xlu2 %1276  ;;  %v6369_v43 = vpop.permute.xlu1 %1268  ;;  %v1029_v40 = vsel %vm11062_vm13, %v1023_v62, 0.0  ;;  %v799_v48 = vmul.f32 %v5829_v50, %v775_v18  ;;  %v6424_v44 = vadd.f32 %v1050_v54, %v994_v32  ;;  %v996_v38 = vadd.f32 %v988_v27, %v932_v11  ;;  %v11064_v50 = vld [vmem:[#allocation20_spill] sm:$0xff]  ;;  %v11073_v18 = vld [vmem:[#allocation21_spill] sm:$0xff] }
 0x3c5   :  { %v1052_v17 = vmul.f32 %v5903_v30, %v1028_v8  ;;  %vm11063_vm14 = vcmp.ge.s32.totalorder %v4947_v46, 1  ;;  %v765_v55 = vsel %vm10796_vm0, %v6070_v23, %v6068_v15  ;;  %v839_v57 = vsel %vm10788_vm7, %v828_v60, 0.0  ;;  %v11065_v54 = vld [vmem:[#allocation16_spill] sm:$0xff]  ;;  %v11076_v11 = vld [vmem:[#allocation13_spill] sm:$0xff] }
 0x3c6   :  { %v838_v26 = vsel %vm11063_vm14, %v832_v3, 0.0  ;;  %v892_v45 = vsel %vm10790_vm4, %v11065_v54, %v11064_v50  ;;  %v806_v36 = vadd.f32 %v798_v22, %v6282_v19  ;;  %v960_v52 = vsel %vm10789_vm8, %v11067_v59, %v11066_v25  ;;  %v11075_v22 = vld [vmem:[#allocation8_spill] sm:$0xff] }
 0x3c7   :  { %v997_v20 = vadd.f32 %v989_v63, %v933_v16  ;;  %v1053_v41 = vmul.f32 %v5903_v30, %v1029_v40  ;;  %v896_v53 = vsel %vm10790_vm4, %v11064_v50, %v11065_v54  ;;  %v6453_v29 = vadd.f32 %v1051_v14, %v995_v28  ;;  %v11077_v16 = vld [vmem:[#allocation12_spill] sm:$0xff] }
 0x3c8   :  { %v862_v5 = vmul.f32 %v11068_v51, %v838_v26  ;;  %v807_v7 = vadd.f32 %v799_v48, %v6268_v56  ;;  %v769_v19 = vsel %vm10796_vm0, %v6068_v15, %v6070_v23  ;;  %v776_v31 = vsel %vm10794_vm1, %v765_v55, 0.0  ;;  %v11070_v56 = vld [vmem:[#allocation18_spill] sm:$0xff] }
 0x3c9   :  { %v863_v30 = vmul.f32 %v11068_v51, %v839_v57  ;;  %v902_v1 = vsel %vm10787_vm6, %v892_v45, 0.0  ;;  %vm11069_vm10 = vcmp.ge.s32.totalorder %v4947_v46, 2  ;;  %v6468_v32 = vadd.f32 %v1052_v17, %v996_v38 }
 0x3ca   :  { %v966_v14 = vsel %vm11069_vm10, %v960_v52, 0.0  ;;  %v1020_v23 = vsel %vm10793_vm9, %v11071_v35, %v11070_v56  ;;  %vm11072_vm13 = vcmp.lt.s32.totalorder %v4951_v47, 14  ;;  %v870_v39 = vadd.f32 %v862_v5, %v806_v36 }
 0x3cb   :  { %v903_v15 = vsel %vm11072_vm13, %v896_v53, 0.0  ;;  %v956_v27 = vsel %vm10789_vm8, %v11066_v25, %v11067_v59  ;;  %v1024_v62 = vsel %vm10793_vm9, %v11070_v56, %v11071_v35  ;;  %v833_v8 = vsel %vm10795_vm3, %v11074_v34, %v11073_v18  ;;  %v11080_v25 = vld [vmem:[#allocation31_spill] sm:$0xff]  ;;  %v11081_v59 = vld [vmem:[#allocation22_spill] sm:$0xff] }
 0x3cc   :  { %v6426_v2 = vpop.permute.xlu2 %1300  ;;  %v6428_v33 = vpop.permute.xlu1 %1274  ;;  %v777_v3 = vsel %vm10791_vm2, %v769_v19, 0.0  ;;  %v800_v28 = vmul.f32 %v11075_v22, %v776_v31  ;;  %v926_v63 = vmul.f32 %v11076_v11, %v902_v1  ;;  %v871_v60 = vadd.f32 %v863_v30, %v807_v7  ;;  %v11085_v30 = vld [vmem:[#allocation11_spill] sm:$0xff] }
 0x3cd   :  { %v990_v40 = vmul.f32 %v11077_v16, %v966_v14  ;;  %v829_v48 = vsel %vm10795_vm3, %v11073_v18, %v11074_v34  ;;  %v927_v26 = vmul.f32 %v11076_v11, %v903_v15  ;;  %vm11078_vm14 = vcmp.ge.s32.totalorder %v4951_v47, 2 }
 0x3ce   :  { %v967_v55 = vsel %vm11078_vm14, %v956_v27, 0.0  ;;  %v1030_v57 = vsel %vm10792_vm11, %v1020_v23, 0.0  ;;  %v6508_v50 = vadd.f32 %v1053_v41, %v997_v20  ;;  %vm11079_vm10 = vcmp.ge.s32.totalorder %v4947_v46, 1  ;;  %v11083_v41 = vld [vmem:[#allocation30_spill] sm:$0xff]  ;;  %v11088_v27 = vld [vmem:[#allocation28_spill] sm:$0xff] }
 0x3cf   :  { %v840_v54 = vsel %vm11079_vm10, %v833_v8, 0.0  ;;  %v801_v45 = vmul.f32 %v11075_v22, %v777_v3  ;;  %v934_v36 = vadd.f32 %v926_v63, %v870_v39  ;;  %v893_v52 = vsel %vm10790_vm4, %v11081_v59, %v11080_v25  ;;  %v11087_v39 = vld [vmem:[#allocation27_spill] sm:$0xff]  ;;  %v6553_v8 = vpop.permute.xlu0 %1343  ;;  %v11090_v3 = vld [vmem:[#allocation10_spill] sm:$0xff] }
 0x3d0   :  { %v841_v53 = vsel %vm10788_vm7, %v829_v48, 0.0  ;;  %v808_v51 = vadd.f32 %v800_v28, %v6332_v37  ;;  %vm11082_vm13 = vcmp.lt.s32.totalorder %v4951_v47, 13  ;;  %vm11084_vm14 = vcmp.lt.s32.totalorder %v4937_v42, 3  ;;  %v11093_v48 = vld [vmem:[#allocation54_spill] sm:$0xff] }
 0x3d1   :  { %v1031_v20 = vsel %vm11082_vm13, %v1024_v62, 0.0  ;;  %v1086_v5 = vsel %vm11084_vm14, %v6126_v4, %v11083_v41  ;;  %v991_v7 = vmul.f32 %v11077_v16, %v967_v55  ;;  %v935_v19 = vadd.f32 %v927_v26, %v871_v60  ;;  %v11091_v60 = vld [vmem:[#allocation39_spill] sm:$0xff] }
 0x3d2   :  { %v998_v31 = vadd.f32 %v990_v40, %v934_v36  ;;  %vm1148_vm10 = vcmp.lt.s32.totalorder %v4937_v42, 124  ;;  %v864_v1 = vmul.f32 %v11085_v30, %v840_v54  ;;  %v897_v37 = vsel %vm10790_vm4, %v11080_v25, %v11081_v59  ;;  %v11092_v40 = vld [vmem:[#allocation52_spill] sm:$0xff]  ;;  %v11094_v54 = vld [vmem:[#allocation26_spill] sm:$0xff] }
 0x3d3   :  { %v904_v14 = vsel %vm10787_vm6, %v893_v52, 0.0  ;;  %v1149_v56 = vsel %vm1148_vm10, %v6152_v10, %v6150_v21  ;;  %v865_v35 = vmul.f32 %v11085_v30, %v841_v53  ;;  %v809_v23 = vadd.f32 %v801_v45, %v6278_v12  ;;  %v11095_v45 = vld [vmem:[#allocation23_spill] sm:$0xff]  ;;  %v11098_v53 = vld [vmem:[#allocation29_spill] sm:$0xff]  ;;  %v11099_v30 = vld [vmem:[#allocation46_spill] sm:$0xff] }
 0x3d4   :  { %v6499_v38 = vpop.permute.xlu2 %1312  ;;  %v6501_v17 = vpop.permute.xlu1 %1280  ;;  %vm11086_vm13 = vcmp.ge.s32.totalorder %v4947_v46, 3  ;;  %vm1215_vm14 = vcmp.lt.s32.totalorder %v4937_v42, 4  ;;  %v957_v62 = vsel %vm10789_vm8, %v11088_v27, %v11087_v39  ;;  %v961_v18 = vsel %vm10789_vm8, %v11087_v39, %v11088_v27 }
 0x3d5   :  { %v1090_v15 = vsel %vm11086_vm13, %v1086_v5, 0.0  ;;  %v872_v34 = vadd.f32 %v864_v1, %v808_v51  ;;  %vm10892_vm6 = vcmp.lt.s32.totalorder %v4947_v46, 12  ;;  %vm11089_vm7 = vcmp.lt.s32.totalorder %v4951_v47, 14 }
 0x3d6   :  { %v905_v12 = vsel %vm11089_vm7, %v897_v37, 0.0  ;;  %v928_v22 = vmul.f32 %v11090_v3, %v904_v14  ;;  %v1157_v28 = vsel %vm10892_vm6, %v1149_v56, 0.0  ;;  %vm10878_vm13 = vcmp.lt.s32.totalorder %v4937_v42, 123 }
 0x3d7   :  { %v1114_v16 = vmul.f32 %v11091_v60, %v1090_v15  ;;  %v1220_v26 = vsel %vm1215_vm14, %v11093_v48, %v11092_v40  ;;  %vm1197_vm7 = vcmp.ge.s32.totalorder %v4947_v46, 4  ;;  %v1283_v55 = vsel %vm10878_vm13, %v6232_v0, %v6428_v33 }
 0x3d8   :  { %v1021_v36 = vsel %vm10793_vm9, %v11095_v45, %v11094_v54  ;;  %v1025_v25 = vsel %vm10793_vm9, %v11094_v54, %v11095_v45  ;;  %vm11096_vm8 = vcmp.ge.s32.totalorder %v4947_v46, 2  ;;  %vm11097_vm4 = vcmp.ge.s32.totalorder %v4951_v47, 2 }
 0x3d9   :  { %v968_v59 = vsel %vm11096_vm8, %v961_v18, 0.0  ;;  %v969_v52 = vsel %vm11097_vm4, %v957_v62, 0.0  ;;  %v1054_v51 = vmul.f32 %v11098_v53, %v1030_v57  ;;  %v929_v5 = vmul.f32 %v11090_v3, %v905_v12  ;;  %v11100_v18 = vld [vmem:[#allocation15_spill] sm:$0xff] }
 0x3da   :  { %v1181_v1 = vmul.f32 %v11099_v30, %v1157_v28  ;;  %vm10876_vm2 = vcmp.lt.s32.totalorder %v4947_v46, 11  ;;  %v999_v37 = vadd.f32 %v991_v7, %v935_v19  ;;  %v936_v14 = vadd.f32 %v928_v22, %v872_v34 }
 0x3db   :  { %v1224_v56 = vsel %vm1197_vm7, %v1220_v26, 0.0  ;;  %v1291_v15 = vsel %vm10876_vm2, %v1283_v55, 0.0  ;;  %v873_v39 = vadd.f32 %v865_v35, %v809_v23  ;;  %v1032_v27 = vsel %vm10792_vm11, %v1021_v36, 0.0  ;;  %v6605_v23 = vpop.permute.xlu0 %1367 }
 0x3dc   :  { %v6561_v11 = vpop.permute.xlu2 %1335  ;;  %v6563_v63 = vpop.permute.xlu1 %1308  ;;  %v1122_v57 = vadd.f32 %v1114_v16, %v6424_v44  ;;  %v1248_v62 = vmul.f32 %v6234_v49, %v1224_v56  ;;  %v992_v12 = vmul.f32 %v11100_v18, %v968_v59  ;;  %v993_v3 = vmul.f32 %v11100_v18, %v969_v52  ;;  %v11102_v44 = vld [vmem:[#allocation36_spill] sm:$0xff]  ;;  %v11103_v16 = vld [vmem:[#allocation37_spill] sm:$0xff]  ;;  %v11107_v59 = vld [vmem:[#allocation34_spill] sm:$0xff] }
 0x3dd   :  { %v1055_v7 = vmul.f32 %v11098_v53, %v1031_v20  ;;  %vm11101_vm4 = vcmp.lt.s32.totalorder %v4951_v47, 13  ;;  %v1062_v34 = vadd.f32 %v1054_v51, %v998_v31  ;;  %v937_v22 = vadd.f32 %v929_v5, %v873_v39  ;;  %v11108_v53 = vld [vmem:[#allocation41_spill] sm:$0xff]  ;;  %v11109_v51 = vld [vmem:[#allocation32_spill] sm:$0xff] }
 0x3de   :  { %v1033_v19 = vsel %vm11101_vm4, %v1025_v25, 0.0  ;;  %v1189_v28 = vadd.f32 %v1181_v1, %v1122_v57  ;;  %v1315_v35 = vmul.f32 %v6426_v2, %v1291_v15  ;;  %v1000_v26 = vadd.f32 %v992_v12, %v936_v14  ;;  %v11112_v39 = vld [vmem:[#allocation33_spill] sm:$0xff] }
 0x3df   :  { %vm11104_vm8 = vcmp.lt.s32.totalorder %v4937_v42, 3  ;;  %vm10862_vm4 = vcmp.lt.s32.totalorder %v4937_v42, 5  ;;  %v1056_v52 = vmul.f32 %v11107_v59, %v1032_v27  ;;  %v1001_v1 = vadd.f32 %v993_v3, %v937_v22  ;;  %v11113_v27 = vld [vmem:[#allocation35_spill] sm:$0xff] }
 0x3e0   :  { %v1083_v55 = vsel %vm11104_vm8, %v11103_v16, %v11102_v44  ;;  %vm11105_vm11 = vmmov %vm11104_vm8  ;;  %v1256_v36 = vadd.f32 %v1248_v62, %v1189_v28  ;;  %v1057_v14 = vmul.f32 %v11107_v59, %v1033_v19  ;;  %vm11116_vm3 = vcmp.ge.s32.totalorder %v4951_v47, 3  ;;  %v11120_v22 = vld [vmem:[#allocation51_spill] sm:$0xff]  ;;  %v11121_v28 = vld [vmem:[#allocation42_spill] sm:$0xff] }
 0x3e1   :  { %v1087_v20 = vsel %vm11105_vm11, %v11102_v44, %v11103_v16  ;;  %vm11106_vm9 = vmmov %vm11104_vm8  ;;  %vm10857_vm8 = vcmp.ge.s32.totalorder %v4947_v46, 5  ;;  %v1093_v18 = vsel %vm11116_vm3, %v1083_v55, 0.0  ;;  %v6662_v16 = vadd.f32 %v1055_v7, %v999_v37  ;;  %v11123_v55 = vld [vmem:[#allocation38_spill] sm:$0xff]  ;;  %v11127_v37 = vld [vmem:[#allocation40_spill] sm:$0xff] }
 0x3e2   :  { %v1082_v45 = vsel %vm11106_vm9, %v11083_v41, %v6126_v4  ;;  %vm11110_vm11 = vmmov %vm11106_vm9  ;;  %v1323_v56 = vadd.f32 %v1315_v35, %v1256_v36  ;;  %v1151_v35 = vsel %vm1148_vm10, %v11121_v28, %v11120_v22 }
 0x3e3   :  { %v1085_v5 = vsel %vm11110_vm11, %v11109_v51, %v11108_v53  ;;  %vm11111_vm1 = vmmov %vm11106_vm9  ;;  %vm11115_vm11 = vcmp.ge.s32.totalorder %v4947_v46, 3 }
 0x3e4   :  { %v6616_v31 = vpop.permute.xlu2 %1341  ;;  %v6618_v54 = vpop.permute.xlu1 %1333  ;;  %v1089_v4 = vsel %vm11111_vm1, %v11108_v53, %v11109_v51  ;;  %vm11114_vm9 = vmmov %vm11111_vm1  ;;  %v1092_v62 = vsel %vm11115_vm11, %v1087_v20, 0.0  ;;  %v1064_v20 = vadd.f32 %v1056_v52, %v1000_v26  ;;  %v11125_v51 = vld [vmem:[#allocation61_spill] sm:$0xff] }
 0x3e5   :  { %v1354_v25 = vsel %vm10862_vm4, %v6616_v31, %v6618_v54  ;;  %v1088_v57 = vsel %vm11114_vm9, %v11113_v27, %v11112_v39  ;;  %vm11117_vm1 = vmmov %vm11116_vm3  ;;  %v1116_v36 = vmul.f32 %v11123_v55, %v1092_v62 }
 0x3e6   :  { %v1358_v41 = vsel %vm10857_vm8, %v1354_v25, 0.0  ;;  %v1091_v12 = vsel %vm11117_vm1, %v1082_v45, 0.0  ;;  %vm11118_vm0 = vmmov %vm11115_vm11  ;;  %v1117_v45 = vmul.f32 %v11123_v55, %v1093_v18  ;;  %v1065_v25 = vadd.f32 %v1057_v14, %v1001_v1  ;;  %v11129_v14 = vld [vmem:[#allocation45_spill] sm:$0xff] }
 0x3e7   :  { %v1382_v15 = vmul.f32 %v6605_v23, %v1358_v41  ;;  %v1096_v3 = vsel %vm11118_vm0, %v1089_v4, 0.0  ;;  %vm11119_vm15 = vmmov %vm11117_vm1  ;;  %v1115_v53 = vmul.f32 %v11091_v60, %v1091_v12  ;;  %v1161_v41 = vsel %vm10892_vm6, %v1151_v35, 0.0 }
 0x3e8   :  { %v1097_v19 = vsel %vm11119_vm15, %v1085_v5, 0.0  ;;  %vm11124_vm0 = vmmov %vm11114_vm9  ;;  %v11126_v5 = vld [vmem:[#allocation60_spill] sm:$0xff]  ;;  %v1120_v7 = vmul.f32 %v11127_v37, %v1096_v3  ;;  %vm10885_vm15 = vcmp.lt.s32.totalorder %v4951_v47, 12  ;;  %v1124_v62 = vadd.f32 %v1116_v36, %v6468_v32 }
 0x3e9   :  { %v6660_v44 = vadd.f32 %v1382_v15, %v1323_v56  ;;  %v1084_v59 = vsel %vm11124_vm0, %v11112_v39, %v11113_v27  ;;  %v1222_v4 = vsel %vm1215_vm14, %v11126_v5, %v11125_v51  ;;  %v1121_v26 = vmul.f32 %v11127_v37, %v1097_v19  ;;  %vm11128_vm3 = vmmov %vm11115_vm11  ;;  %v11130_v56 = vld [vmem:[#allocation43_spill] sm:$0xff]  ;;  %v11131_v39 = vld [vmem:[#allocation44_spill] sm:$0xff] }
 0x3ea   :  { %v1094_v52 = vsel %vm11128_vm3, %v1088_v57, 0.0  ;;  %v1150_v15 = vsel %vm1148_vm10, %v11130_v56, %v11129_v14  ;;  %v1153_v57 = vsel %vm1148_vm10, %v6150_v21, %v6152_v10  ;;  %v1125_v18 = vadd.f32 %v1117_v45, %v6508_v50  ;;  %vm11132_vm9 = vmmov %vm11117_vm1  ;;  %v11133_v10 = vld [vmem:[#allocation50_spill] sm:$0xff]  ;;  %v11136_v37 = vld [vmem:[#allocation63_spill] sm:$0xff] }
 0x3eb   :  { %11122 = vst [vmem:[#allocation20_spill] sm:$0xff] %v6660_v44  ;;  %1430 = vrot.lane.b32.xlu1 %v6660_v44, %s4694_s17  ;;  %v1118_v27 = vmul.f32 %v11131_v39, %v1094_v52  ;;  %v6701_v12 = vsel %vm11132_vm9, %v1084_v59, 0.0  ;;  %v1228_v3 = vsel %vm1197_vm7, %v1222_v4, 0.0  ;;  %v6706_v19 = vadd.f32 %v1115_v53, %v6453_v29  ;;  %v11134_v59 = vld [vmem:[#allocation47_spill] sm:$0xff]  ;;  %v11135_v53 = vld [vmem:[#allocation48_spill] sm:$0xff] }
 0x3ec   :  { %v6683_v1 = vpop.permute.xlu2 %1347  ;;  %v6685_v60 = vpop.permute.xlu1 %1339  ;;  %v1154_v35 = vsel %vm1148_vm10, %v11129_v14, %v11130_v56  ;;  %v1185_v21 = vmul.f32 %v11133_v10, %v1161_v41  ;;  %v1285_v32 = vsel %vm10878_vm13, %v6298_v6, %v6309_v9  ;;  %v1158_v50 = vsel %vm10885_vm15, %v1153_v57, 0.0  ;;  %v11137_v41 = vld [vmem:[#allocation49_spill] sm:$0xff] }
 0x3ed   :  { %v1159_v55 = vsel %vm10892_vm6, %v1150_v15, 0.0  ;;  %v6721_v29 = vadd.f32 %v1120_v7, %v1064_v20  ;;  %v6723_v36 = vadd.f32 %v1121_v26, %v1065_v25  ;;  %v1126_v45 = vadd.f32 %v1118_v27, %v1062_v34  ;;  %v11138_v14 = vld [vmem:[#allocation65_spill] sm:$0xff] }
 0x3ee   :  { %v1152_v4 = vsel %vm1148_vm10, %v11135_v53, %v11134_v59  ;;  %v1252_v52 = vmul.f32 %v11136_v37, %v1228_v3  ;;  %v1221_v56 = vsel %vm1215_vm14, %v11138_v14, %v11137_v41  ;;  %v1160_v15 = vsel %vm10885_vm15, %v1154_v35, 0.0  ;;  %v11139_v3 = vld [vmem:[#allocation53_spill] sm:$0xff] }
 0x3ef   :  { %vm1198_vm11 = vcmp.ge.s32.totalorder %v4951_v47, 4  ;;  %v1217_v34 = vsel %vm1215_vm14, %v11137_v41, %v11138_v14  ;;  %v1295_v20 = vsel %vm10876_vm2, %v1285_v32, 0.0  ;;  %v1182_v25 = vmul.f32 %v11099_v30, %v1158_v50 }
 0x3f0   :  { %v1193_v7 = vadd.f32 %v1185_v21, %v1126_v45  ;;  %v1284_v26 = vsel %vm10878_vm13, %v6369_v43, %v6367_v24  ;;  %v1319_v27 = vmul.f32 %v6563_v63, %v1295_v20  ;;  %v6753_v57 = vsel %vm1148_vm10, %v11134_v59, %v11135_v53 }
 0x3f1   :  { %v1183_v35 = vmul.f32 %v11139_v3, %v1159_v55  ;;  %v1163_v32 = vsel %vm10892_vm6, %v1152_v4, 0.0  ;;  %v1226_v30 = vsel %vm1197_vm7, %v1221_v56, 0.0  ;;  %v1227_v45 = vsel %vm1198_vm11, %v1217_v34, 0.0 }
 0x3f2   :  { %v1288_v59 = vsel %vm10878_vm13, %v6367_v24, %v6369_v43  ;;  %v1260_v53 = vadd.f32 %v1252_v52, %v1193_v7  ;;  %v1216_v4 = vsel %vm1215_vm14, %v11092_v40, %v11093_v48  ;;  %v1184_v41 = vmul.f32 %v11139_v3, %v1160_v15  ;;  %v11140_v24 = vld [vmem:[#allocation64_spill] sm:$0xff] }
 0x3f3   :  { %v1293_v14 = vsel %vm10876_vm2, %v1284_v26, 0.0  ;;  %v1250_v43 = vmul.f32 %v11140_v24, %v1226_v30  ;;  %vm10873_vm1 = vcmp.lt.s32.totalorder %v4951_v47, 11  ;;  %v1191_v20 = vadd.f32 %v1183_v35, %v1124_v62  ;;  %v11142_v35 = vld [vmem:[#allocation56_spill] sm:$0xff]  ;;  %v11143_v30 = vld [vmem:[#allocation58_spill] sm:$0xff] }
 0x3f4   :  { %v6760_v21 = vpop.permute.xlu1 %1345  ;;  %v6762_v50 = vpop.permute.xlu2 %1375  ;;  %v1327_v52 = vadd.f32 %v1319_v27, %v1260_v53  ;;  %v1251_v7 = vmul.f32 %v11140_v24, %v1227_v45  ;;  %v1294_v40 = vsel %vm10873_vm1, %v1288_v59, 0.0  ;;  %vm10850_vm0 = vcmp.ge.s32.totalorder %v4951_v47, 5 }
 0x3f5   :  { %v1356_v55 = vsel %vm10862_vm4, %v6760_v21, %v6470_v58  ;;  %v1317_v48 = vmul.f32 %v6395_v61, %v1293_v14  ;;  %v1351_v15 = vsel %vm10862_vm4, %v6561_v11, %v6553_v8  ;;  %v1355_v26 = vsel %vm10862_vm4, %v6553_v8, %v6561_v11  ;;  %v11144_v11 = vld [vmem:[#allocation66_spill] sm:$0xff] }
 0x3f6   :  { %v1362_v56 = vsel %vm10857_vm8, %v1356_v55, 0.0  ;;  %v1155_v27 = vsel %vm1148_vm10, %v11120_v22, %v11121_v28  ;;  %v1192_v3 = vadd.f32 %v1184_v41, %v1125_v18  ;;  %v1223_v45 = vsel %vm1215_vm14, %v11143_v30, %v11142_v35  ;;  %v11145_v28 = vld [vmem:[#allocation57_spill] sm:$0xff] }
 0x3f7   :  { %v1386_v34 = vmul.f32 %v6762_v50, %v1362_v56  ;;  %v1225_v59 = vsel %vm1198_vm11, %v1216_v4, 0.0  ;;  %v1258_v53 = vadd.f32 %v1250_v43, %v1191_v20  ;;  %v1318_v55 = vmul.f32 %v6395_v61, %v1294_v40 }
 0x3f8   :  { %v1287_v8 = vsel %vm10878_vm13, %v6428_v33, %v6232_v0  ;;  %v1286_v22 = vsel %vm10878_vm13, %v11144_v11, %v6501_v17  ;;  %v1187_v18 = vmul.f32 %v11145_v28, %v1163_v32  ;;  %v1259_v41 = vadd.f32 %v1251_v7, %v1192_v3 }
 0x3f9   :  { %v6799_v62 = vadd.f32 %v1386_v34, %v1327_v52  ;;  %v1360_v61 = vsel %vm10857_vm8, %v1355_v26, 0.0  ;;  %v1361_v14 = vsel %vm10850_vm0, %v1351_v15, 0.0  ;;  %v1350_v0 = vsel %vm10862_vm4, %v6618_v54, %v6616_v31 }
 0x3fa   :  { %v1325_v33 = vadd.f32 %v1317_v48, %v1258_v53  ;;  %v1218_v32 = vsel %vm1215_vm14, %v11125_v51, %v11126_v5  ;;  %v1230_v43 = vsel %vm1197_vm7, %v1223_v45, 0.0  ;;  %v1292_v52 = vsel %vm10873_vm1, %v1287_v8, 0.0 }
 0x3fb   :  { %11141 = vst [vmem:[#allocation16_spill] sm:$0xff] %v6799_v62  ;;  %1434 = vrot.lane.b32.xlu0 %v6799_v62, %s4694_s17  ;;  %v1297_v34 = vsel %vm10876_vm2, %v1286_v22, 0.0  ;;  %v1249_v20 = vmul.f32 %v6234_v49, %v1225_v59  ;;  %v1254_v31 = vmul.f32 %v6300_v13, %v1230_v43  ;;  %v1326_v54 = vadd.f32 %v1318_v55, %v1259_v41  ;;  %v11153_v43 = vld [vmem:[#allocation59_spill] sm:$0xff] }
 0x3fc   :  { %v1372_v4 = vpop.permute.xlu1 %1371  ;;  %v1162_v40 = vsel %vm10885_vm15, %v1155_v27, 0.0  ;;  %v1195_v51 = vadd.f32 %v1187_v18, %v6721_v29  ;;  %v1190_v5 = vadd.f32 %v1182_v25, %v6706_v19  ;;  %v1359_v48 = vsel %vm10850_vm0, %v1350_v0, 0.0 }
 0x3fd   :  { %v1384_v56 = vmul.f32 %v1372_v4, %v1360_v61  ;;  %v1385_v24 = vmul.f32 %v1372_v4, %v1361_v14  ;;  %v1316_v15 = vmul.f32 %v6426_v2, %v1292_v52  ;;  %v1321_v26 = vmul.f32 %v6499_v38, %v1297_v34  ;;  %v6975_v34 = vpop.permute.xlu2 %1404 }
 0x3fe   :  { %v1357_v49 = vsel %vm10862_vm4, %v6683_v1, %v6685_v60  ;;  %v1119_v19 = vmul.f32 %v11131_v39, %v6701_v12  ;;  %v1219_v2 = vsel %vm1215_vm14, %v11142_v35, %v11143_v30  ;;  %v1164_v29 = vsel %vm10885_vm15, %v6753_v57, 0.0  ;;  %11155 = vst [vmem:[#allocation19_spill] sm:$0xff] %v6975_v34 }
 0x3ff   :  { %v6843_v7 = vadd.f32 %v1384_v56, %v1325_v33  ;;  %v6857_v3 = vadd.f32 %v1385_v24, %v1326_v54  ;;  %v1229_v25 = vsel %vm1198_vm11, %v1218_v32, 0.0  ;;  %v1257_v27 = vadd.f32 %v1249_v20, %v1190_v5  ;;  %v11150_v56 = vld [vmem:[#allocation55_spill] sm:$0xff]  ;;  %v11151_v24 = vld [vmem:[#allocation62_spill] sm:$0xff] }
 0x400   :  { %v1262_v45 = vadd.f32 %v1254_v31, %v1195_v51  ;;  %v1290_v59 = vsel %vm10878_vm13, %v6501_v17, %v11144_v11  ;;  %v1383_v39 = vmul.f32 %v6605_v23, %v1359_v48  ;;  %v1186_v12 = vmul.f32 %v11133_v10, %v1162_v40 }
 0x401   :  { %11146 = vst [vmem:[#allocation17_spill] sm:$0xff] %v6843_v7  ;;  %1432 = vrot.lane.b32.xlu2 %v6843_v7, %s4694_s17  ;;  %v1188_v35 = vmul.f32 %v11145_v28, %v1164_v29  ;;  %v1289_v57 = vsel %vm10878_vm13, %v6309_v9, %v6298_v6  ;;  %v1364_v30 = vsel %vm10857_vm8, %v1357_v49, 0.0  ;;  %v1324_v55 = vadd.f32 %v1316_v15, %v1257_v27 }
 0x402   :  { %11147 = vst [vmem:[#allocation24_spill] sm:$0xff] %v6857_v3  ;;  %v1352_v17 = vsel %vm10862_vm4, %v6470_v58, %v6760_v21  ;;  %v1329_v23 = vadd.f32 %v1321_v26, %v1262_v45  ;;  %v1127_v10 = vadd.f32 %v1119_v19, %v6662_v16  ;;  %v1253_v11 = vmul.f32 %v11136_v37, %v1229_v25 }
 0x403   :  { %1440 = vrot.lane.b32.xlu0 %v6857_v3, %s4694_s17  ;;  %v1231_v22 = vsel %vm1198_vm11, %v1219_v2, 0.0  ;;  %v1298_v6 = vsel %vm10873_vm1, %v1290_v59, 0.0  ;;  %v6898_v28 = vadd.f32 %v1383_v39, %v1324_v55  ;;  %v1353_v58 = vsel %vm10862_vm4, %v6685_v60, %v6683_v1 }
 0x404   :  { %v1380_v53 = vpop.permute.xlu1 %1379  ;;  %v1255_v9 = vmul.f32 %v6300_v13, %v1231_v22  ;;  %v1194_v16 = vadd.f32 %v1186_v12, %v1127_v10  ;;  %v1296_v37 = vsel %vm10873_vm1, %v1289_v57, 0.0  ;;  %v1363_v18 = vsel %vm10850_vm0, %v1352_v17, 0.0 }
 0x405   :  { %v1388_v8 = vmul.f32 %v1380_v53, %v1364_v30  ;;  %11148 = vst [vmem:[#allocation14_spill] sm:$0xff] %v6898_v28  ;;  %v1196_v41 = vadd.f32 %v1188_v35, %v6723_v36  ;;  %v1322_v13 = vmul.f32 %v6499_v38, %v1298_v6  ;;  %v1320_v4 = vmul.f32 %v6563_v63, %v1296_v37  ;;  %v6983_v20 = vpop.permute.xlu2 %1419 }
 0x406   :  { %v1365_v1 = vsel %vm10850_vm0, %v1353_v58, 0.0  ;;  %v1261_v61 = vadd.f32 %v1253_v11, %v1194_v16  ;;  %v1387_v14 = vmul.f32 %v6762_v50, %v1363_v18  ;;  %v6935_v50 = vld [vmem:[%s10672_s4 + $0x8] sm:$0xff]  ;;  %v11152_v32 = vmov 4  }
 0x407   :  { %v6904_v21 = vadd.f32 %v1388_v8, %v1329_v23  ;;  %v1263_v60 = vadd.f32 %v1255_v9, %v1196_v41  ;;  %v1389_v0 = vmul.f32 %v1380_v53, %v1365_v1  ;;  %v11154_v52 = vmov 7  }
 0x408   :  { %v1328_v38 = vadd.f32 %v1320_v4, %v1261_v61  ;;  %v11158_v40 = vmov 3   ;;  %v11164_v29 = vmov 8   ;;  %v11172_v30 = vmov 2  }
 0x409   :  { %1438 = vrot.lane.b32.xlu2 %v6898_v28, %s4694_s17  ;;  %1436 = vrot.lane.b32.xlu1 %v6904_v21, %s4694_s17  ;;  %v1330_v36 = vadd.f32 %v1322_v13, %v1263_v60  ;;  %v11183_v18 = vmov 9   ;;  %vm11223_vm3 = vcmp.lt.s32.totalorder %v4937_v42, 112  ;;  %vm11224_vm9 = vcmp.lt.s32.totalorder %v4937_v42, 16 }
 0x40a   :  { %v6922_v63 = vadd.f32 %v1387_v14, %v1328_v38  ;;  %v7145_v38 = vld [vmem:[%s10672_s4 + $0x10] sm:$0xff]  ;;  %vm11225_vm0 = vmmov %vm11223_vm3  ;;  %vm11229_vm8 = vcmp.ge.s32.totalorder %v4937_v42, 16  ;;  %vm11247_vm1 = vcmp.lt.s32.totalorder %v4937_v42, 127  ;;  %vm11248_vm2 = vcmp.lt.s32.totalorder %v4937_v42, 1 }
 0x40b   :  { %1496 = vrot.lane.b32.xlu0 %v6843_v7, %s4687_s11  ;;  %v6924_v33 = vadd.f32 %v1389_v0, %v1330_v36  ;;  %11189 = vst [vmem:[#allocation38_spill] sm:$0xff] %v7145_v38  ;;  %vm11249_vm13 = vcmp.lt.s32.totalorder %v4947_v46, 15  ;;  %vm11268_vm6 = vcmp.lt.s32.totalorder %v4937_v42, 1 }
 0x40c   :  { %11149 = vst [vmem:[#allocation18_spill] sm:$0xff] %v6922_v63 }
 0x40d   :  { %v7006_v51 = vpop.permute.xlu1 %1414 }
 0x40e   :  { %11159 = vst [vmem:[#allocation8_spill] sm:$0xff] %v7006_v51 }
 0x411   :  { %1444 = vrot.lane.b32.xlu2 %v6924_v33, %s4694_s17  ;;  %1442 = vrot.lane.b32.xlu1 %v6922_v63, %s4694_s17 }
 0x413   :  { %1502 = vrot.lane.b32.xlu0 %v6898_v28, %s4687_s11 }
 0x419   :  { %1471 = vperm.xlu2 %4432, %v11150_v56   ;;  %1467 = vperm.xlu1 %4431, %v6935_v50  }
 0x41b   :  { %1508 = vrot.lane.b32.xlu0 %v6924_v33, %s4687_s11 }
 0x421   :  { %1494 = vrot.lane.b32.xlu2 %v6660_v44, %s4687_s11  ;;  %1475 = vperm.xlu1 %4431, %v11151_v24  }
 0x422   :  { %4434 = vset.pattern.permute.xlu2 %v11152_v32 }
 0x423   :  { %1564 = vrot.lane.b32.xlu0 %v6904_v21, %s4695_s18 }
 0x429   :  { %1500 = vrot.lane.b32.xlu2 %v6904_v21, %s4687_s11  ;;  %1498 = vrot.lane.b32.xlu1 %v6799_v62, %s4687_s11 }
 0x42a   :  { %4433 = vset.pattern.permute.xlu1 %v11152_v32 }
 0x42b   :  { %1570 = vrot.lane.b32.xlu0 %v6922_v63, %s4695_s18 }
 0x431   :  { %1506 = vrot.lane.b32.xlu2 %v6922_v63, %s4687_s11  ;;  %1504 = vrot.lane.b32.xlu1 %v6857_v3, %s4687_s11 }
 0x433   :  { %1626 = vrot.lane.b32.xlu0 %v6799_v62, %s4696_s19 }
 0x439   :  { %1531 = vperm.xlu2 %4434, %v6935_v50   ;;  %1527 = vperm.xlu1 %4433, %v11153_v43  }
 0x43b   :  { %1632 = vrot.lane.b32.xlu0 %v6857_v3, %s4696_s19 }
 0x441   :  { %1558 = vrot.lane.b32.xlu2 %v6660_v44, %s4695_s18  ;;  %1539 = vperm.xlu1 %4433, %v11151_v24  }
 0x442   :  { %4435 = vset.pattern.permute.xlu2 %v11154_v52 }
 0x443   :  { %1688 = vrot.lane.b32.xlu0 %v6843_v7, %s4697_s20 }
 0x449   :  { %1562 = vrot.lane.b32.xlu2 %v6799_v62, %s4695_s18  ;;  %1560 = vrot.lane.b32.xlu1 %v6843_v7, %s4695_s18 }
 0x44a   :  { %4436 = vset.pattern.permute.xlu1 %v11154_v52 }
 0x44b   :  { %1694 = vrot.lane.b32.xlu0 %v6898_v28, %s4697_s20 }
 0x451   :  { %1568 = vrot.lane.b32.xlu2 %v6857_v3, %s4695_s18  ;;  %1566 = vrot.lane.b32.xlu1 %v6898_v28, %s4695_s18 }
 0x453   :  { %1700 = vrot.lane.b32.xlu0 %v6924_v33, %s4697_s20 }
 0x459   :  { %1591 = vperm.xlu2 %4435, %v11153_v43   ;;  %1572 = vrot.lane.b32.xlu1 %v6924_v33, %s4695_s18 }
 0x45b   :  { %v6990_v31 = vpop.permute.xlu2 %1432  ;;  %1756 = vrot.lane.b32.xlu0 %v6904_v21, %s4698_s21 }
 0x45c   :  { %11156 = vst [vmem:[#allocation21_spill] sm:$0xff] %v6990_v31 }
 0x45d   :  { %v7016_v48 = vpop.permute.xlu1 %1430 }
 0x45e   :  { %11160 = vst [vmem:[#allocation13_spill] sm:$0xff] %v7016_v48 }
 0x461   :  { %1603 = vperm.xlu2 %4435, %v11151_v24   ;;  %1599 = vperm.xlu1 %4436, %v11150_v56  }
 0x463   :  { %1762 = vrot.lane.b32.xlu0 %v6922_v63, %s4698_s21  ;;  %v6998_v54 = vpop.permute.xlu2 %1438 }
 0x464   :  { %11157 = vst [vmem:[#allocation25_spill] sm:$0xff] %v6998_v54 }
 0x469   :  { %1624 = vrot.lane.b32.xlu2 %v6843_v7, %s4696_s19  ;;  %1622 = vrot.lane.b32.xlu1 %v6660_v44, %s4696_s19 }
 0x46a   :  { %4438 = vset.pattern.permute.xlu2 %v11158_v40  ;;  %4437 = vset.pattern.permute.xlu1 %v11158_v40 }
 0x46b   :  { %1820 = vrot.lane.b32.xlu0 %v6799_v62, %s4714_s22  ;;  %v7010_v5 = vpop.permute.xlu2 %1444 }
 0x46d   :  { %v7093_v11 = vpop.permute.xlu0 %1434 }
 0x46e   :  { %11177 = vst [vmem:[#allocation46_spill] sm:$0xff] %v7093_v11 }
 0x471   :  { %1630 = vrot.lane.b32.xlu2 %v6898_v28, %s4696_s19  ;;  %1628 = vrot.lane.b32.xlu1 %v6904_v21, %s4696_s19 }
 0x473   :  { %1826 = vrot.lane.b32.xlu0 %v6857_v3, %s4714_s22  ;;  %v7020_v15 = vpop.permute.xlu2 %1471 }
 0x474   :  { %11161 = vst [vmem:[#allocation12_spill] sm:$0xff] %v7020_v15 }
 0x475   :  { %v7102_v9 = vpop.permute.xlu0 %1440 }
 0x476   :  { %11180 = vst [vmem:[#allocation37_spill] sm:$0xff] %v7102_v9  ;;  %v2029_v9 = vld [vmem:[%s10675_s7 + $0x10] sm:$0xff] }
 0x479   :  { %1636 = vrot.lane.b32.xlu2 %v6924_v33, %s4696_s19  ;;  %1634 = vrot.lane.b32.xlu1 %v6922_v63, %s4696_s19 }
 0x47b   :  { %1988 = vperm.xlu0 %4426, %v11151_v24   ;;  %v7027_v26 = vpop.permute.xlu2 %1494  ;;  %v7029_v49 = vpop.permute.xlu1 %1436 }
 0x47c   :  { %11162 = vst [vmem:[#allocation31_spill] sm:$0xff] %v7027_v26  ;;  %v7201_v26 = vld [vmem:[#allocation2 + $0x50] sm:$0xff] }
 0x47d   :  { %v7114_v37 = vpop.permute.xlu0 %1496 }
 0x47e   :  { %11182 = vst [vmem:[#allocation41_spill] sm:$0xff] %v7114_v37 }
 0x481   :  { %1663 = vperm.xlu2 %4438, %v11150_v56   ;;  %1659 = vperm.xlu1 %4437, %v6935_v50  }
 0x483   :  { %v7033_v19 = vpop.permute.xlu2 %1500  ;;  %v7035_v2 = vpop.permute.xlu1 %1442 }
 0x484   :  { %11163 = vst [vmem:[#allocation22_spill] sm:$0xff] %v7035_v2 }
 0x485   :  { %v7130_v60 = vpop.permute.xlu0 %1502 }
 0x486   :  { %11187 = vst [vmem:[#allocation51_spill] sm:$0xff] %v7130_v60 }
 0x489   :  { %1686 = vrot.lane.b32.xlu2 %v6660_v44, %s4697_s20  ;;  %1667 = vperm.xlu1 %4437, %v11151_v24  }
 0x48a   :  { %4440 = vset.pattern.permute.xlu2 %v11164_v29 }
 0x48b   :  { %v7041_v25 = vpop.permute.xlu2 %1506  ;;  %v7043_v27 = vpop.permute.xlu1 %1467 }
 0x48c   :  { %11165 = vst [vmem:[#allocation30_spill] sm:$0xff] %v7041_v25 }
 0x48d   :  { %11166 = vst [vmem:[#allocation11_spill] sm:$0xff] %v7043_v27  ;;  %v7140_v0 = vpop.permute.xlu0 %1508 }
 0x491   :  { %1692 = vrot.lane.b32.xlu2 %v6904_v21, %s4697_s20  ;;  %1690 = vrot.lane.b32.xlu1 %v6799_v62, %s4697_s20 }
 0x492   :  { %4439 = vset.pattern.permute.xlu1 %v11164_v29 }
 0x493   :  { %v7050_v45 = vpop.permute.xlu2 %1531  ;;  %v7052_v59 = vpop.permute.xlu1 %1475 }
 0x494   :  { %11167 = vst [vmem:[#allocation27_spill] sm:$0xff] %v7050_v45  ;;  %v11200_v45 = vmov 0  }
 0x499   :  { %1698 = vrot.lane.b32.xlu2 %v6922_v63, %s4697_s20  ;;  %1696 = vrot.lane.b32.xlu1 %v6857_v3, %s4697_s20 }
 0x49b   :  { %v7058_v39 = vpop.permute.xlu2 %1558  ;;  %v7060_v12 = vpop.permute.xlu1 %1498 }
 0x49c   :  { %11168 = vst [vmem:[#allocation28_spill] sm:$0xff] %v7058_v39  ;;  %v11196_v39 = vmov 10  }
 0x49d   :  { %11169 = vst [vmem:[#allocation10_spill] sm:$0xff] %v7060_v12 }
 0x4a1   :  { %1723 = vperm.xlu2 %4440, %v6935_v50   ;;  %1719 = vperm.xlu1 %4439, %v11153_v43  }
 0x4a3   :  { %v7064_v35 = vpop.permute.xlu2 %1562  ;;  %v7066_v57 = vpop.permute.xlu1 %1504 }
 0x4a4   :  { %11170 = vst [vmem:[#allocation39_spill] sm:$0xff] %v7064_v35  ;;  %v11227_v35 = vld [vmem:[#allocation9_spill] sm:$0xff] }
 0x4a5   :  { %11171 = vst [vmem:[#allocation52_spill] sm:$0xff] %v7066_v57  ;;  %vm10880_vm4 = vcmp.lt.s32.totalorder %v11227_v35, 176 }
 0x4a9   :  { %1750 = vrot.lane.b32.xlu2 %v6660_v44, %s4698_s21  ;;  %1731 = vperm.xlu1 %4439, %v11151_v24  }
 0x4aa   :  { %4441 = vset.pattern.permute.xlu2 %v11172_v30 }
 0x4ab   :  { %v7072_v53 = vpop.permute.xlu2 %1568  ;;  %v7074_v55 = vpop.permute.xlu1 %1527 }
 0x4ac   :  { %11173 = vst [vmem:[#allocation54_spill] sm:$0xff] %v7072_v53 }
 0x4ad   :  { %11174 = vst [vmem:[#allocation26_spill] sm:$0xff] %v7074_v55 }
 0x4b1   :  { %1754 = vrot.lane.b32.xlu2 %v6799_v62, %s4698_s21  ;;  %1752 = vrot.lane.b32.xlu1 %v6843_v7, %s4698_s21 }
 0x4b2   :  { %4442 = vset.pattern.permute.xlu1 %v11172_v30 }
 0x4b3   :  { %v7081_v17 = vpop.permute.xlu2 %1591  ;;  %v7083_v23 = vpop.permute.xlu1 %1539 }
 0x4b4   :  { %11175 = vst [vmem:[#allocation23_spill] sm:$0xff] %v7081_v17 }
 0x4b9   :  { %1760 = vrot.lane.b32.xlu2 %v6857_v3, %s4698_s21  ;;  %1758 = vrot.lane.b32.xlu1 %v6898_v28, %s4698_s21  ;;  %v11191_v3 = vmov 1  }
 0x4bb   :  { %v7089_v8 = vpop.permute.xlu2 %1603  ;;  %v7091_v10 = vpop.permute.xlu1 %1560 }
 0x4bc   :  { %11176 = vst [vmem:[#allocation29_spill] sm:$0xff] %v7091_v10 }
 0x4c1   :  { %1783 = vperm.xlu2 %4441, %v11153_v43   ;;  %1764 = vrot.lane.b32.xlu1 %v6924_v33, %s4698_s21  ;;  %v7153_v43 = vpop.permute.xlu0 %1564 }
 0x4c3   :  { %v7098_v22 = vpop.permute.xlu2 %1624  ;;  %v7100_v6 = vpop.permute.xlu1 %1566 }
 0x4c4   :  { %11178 = vst [vmem:[#allocation15_spill] sm:$0xff] %v7098_v22 }
 0x4c5   :  { %11179 = vst [vmem:[#allocation36_spill] sm:$0xff] %v7100_v6 }
 0x4c9   :  { %1795 = vperm.xlu2 %4441, %v11151_v24   ;;  %1791 = vperm.xlu1 %4442, %v11150_v56  }
 0x4cb   :  { %v7106_v58 = vpop.permute.xlu2 %1630  ;;  %v7108_v16 = vpop.permute.xlu1 %1572 }
 0x4cc   :  { %11181 = vst [vmem:[#allocation34_spill] sm:$0xff] %v7106_v58  ;;  %v7164_v58 = vld [vmem:[#allocation2 + $0x40] sm:$0xff] }
 0x4cd   :  { %2218 = vrot.lane.b32.xlu0 %v7164_v58, %s4688_s12 }
 0x4d1   :  { %1818 = vrot.lane.b32.xlu2 %v6843_v7, %s4714_s22  ;;  %1816 = vrot.lane.b32.xlu1 %v6660_v44, %s4714_s22  ;;  %v4608_v7 = vld [vmem:[%s10672_s4] sm:$0xff] }
 0x4d2   :  { %4444 = vset.pattern.permute.xlu2 %v11183_v18  ;;  %4443 = vset.pattern.permute.xlu1 %v11183_v18 }
 0x4d3   :  { %v7118_v41 = vpop.permute.xlu2 %1636  ;;  %v7120_v13 = vpop.permute.xlu1 %1599 }
 0x4d4   :  { %11184 = vst [vmem:[#allocation32_spill] sm:$0xff] %v7120_v13 }
 0x4d9   :  { %1824 = vrot.lane.b32.xlu2 %v6898_v28, %s4714_s22  ;;  %1822 = vrot.lane.b32.xlu1 %v6904_v21, %s4714_s22 }
 0x4db   :  { %v7126_v4 = vpop.permute.xlu2 %1663  ;;  %v7128_v1 = vpop.permute.xlu1 %1622 }
 0x4dc   :  { %11185 = vst [vmem:[#allocation33_spill] sm:$0xff] %v7126_v4 }
 0x4dd   :  { %11186 = vst [vmem:[#allocation35_spill] sm:$0xff] %v7128_v1  ;;  %v7169_v1 = vpop.permute.xlu0 %1570 }
 0x4de   :  { %11194 = vst [vmem:[#allocation45_spill] sm:$0xff] %v7169_v1 }
 0x4e1   :  { %1830 = vrot.lane.b32.xlu2 %v6924_v33, %s4714_s22  ;;  %1828 = vrot.lane.b32.xlu1 %v6922_v63, %s4714_s22 }
 0x4e3   :  { %v7136_v61 = vpop.permute.xlu2 %1686  ;;  %v7138_v14 = vpop.permute.xlu1 %1628 }
 0x4e4   :  { %11188 = vst [vmem:[#allocation42_spill] sm:$0xff] %v7136_v61 }
 0x4e5   :  { %v7190_v55 = vpop.permute.xlu0 %1626 }
 0x4e6   :  { %11199 = vst [vmem:[#allocation47_spill] sm:$0xff] %v7190_v55 }
 0x4e9   :  { %1858 = vperm.xlu2 %4444, %v7145_v38   ;;  %1854 = vperm.xlu1 %4443, %v6935_v50  }
 0x4eb   :  { %v7149_v36 = vpop.permute.xlu2 %1692  ;;  %v7151_v56 = vpop.permute.xlu1 %1634 }
 0x4ec   :  { %11190 = vst [vmem:[#allocation61_spill] sm:$0xff] %v7151_v56 }
 0x4f1   :  { %4445 = vset.pattern.permute.xlu2 %v11191_v3  ;;  %1862 = vperm.xlu1 %4443, %v11151_v24   ;;  %v4609_v24 = vld [vmem:[%s10672_s4 + $0x18] sm:$0xff] }
 0x4f2   :  { %1892 = vperm.xlu2 %4445, %v4608_v7  }
 0x4f3   :  { %v7160_v61 = vpop.permute.xlu2 %1698  ;;  %v7162_v17 = vpop.permute.xlu1 %1659 }
 0x4f4   :  { %11192 = vst [vmem:[#allocation60_spill] sm:$0xff] %v7160_v61 }
 0x4f5   :  { %11193 = vst [vmem:[#allocation40_spill] sm:$0xff] %v7162_v17  ;;  %v7179_v17 = vld [vmem:[#allocation2 + $0x70] sm:$0xff] }
 0x4f6   :  { %2224 = vrot.lane.b32.xlu0 %v7179_v17, %s4688_s12 }
 0x4f9   :  { %4446 = vset.pattern.permute.xlu1 %v11191_v3 }
 0x4fa   :  { %1904 = vperm.xlu2 %4445, %v4609_v24   ;;  %1900 = vperm.xlu1 %4446, %v7145_v38  }
 0x4fb   :  { %v7175_v22 = vpop.permute.xlu2 %1723  ;;  %v7177_v6 = vpop.permute.xlu1 %1667 }
 0x4fc   :  { %11195 = vst [vmem:[#allocation43_spill] sm:$0xff] %v7175_v22  ;;  %v7192_v22 = vld [vmem:[#allocation2 + $0x68] sm:$0xff] }
 0x4fe   :  { %2230 = vrot.lane.b32.xlu0 %v7192_v22, %s4688_s12 }
 0x502   :  { %4448 = vset.pattern.permute.xlu2 %v11196_v39  ;;  %4447 = vset.pattern.permute.xlu1 %v11196_v39 }
 0x503   :  { %1938 = vperm.xlu2 %4448, %v6935_v50   ;;  %v7186_v53 = vpop.permute.xlu2 %1750  ;;  %1934 = vperm.xlu1 %4447, %v4608_v7   ;;  %v7188_v10 = vpop.permute.xlu1 %1690 }
 0x504   :  { %11197 = vst [vmem:[#allocation44_spill] sm:$0xff] %v7186_v53  ;;  %v7203_v53 = vpop.permute.xlu0 %1632 }
 0x505   :  { %11198 = vst [vmem:[#allocation50_spill] sm:$0xff] %v7188_v10 }
 0x506   :  { %11203 = vst [vmem:[#allocation49_spill] sm:$0xff] %v7203_v53  ;;  %2260 = vrot.lane.b32.xlu0 %v7201_v26, %s4689_s0 }
 0x50b   :  { %4449 = vset.pattern.permute.xlu2 %v11200_v45  ;;  %v7197_v27 = vpop.permute.xlu2 %1754  ;;  %1946 = vperm.xlu1 %4447, %v4609_v24   ;;  %v7199_v60 = vpop.permute.xlu1 %1696  ;;  %v7214_v24 = vld [vmem:[#allocation2 + $0x48] sm:$0xff] }
 0x50c   :  { %11201 = vst [vmem:[#allocation48_spill] sm:$0xff] %v7197_v27  ;;  %1976 = vperm.xlu2 %4449, %v4608_v7   ;;  %v7218_v7 = vpop.permute.xlu0 %1688 }
 0x50d   :  { %11202 = vst [vmem:[#allocation63_spill] sm:$0xff] %v7199_v60  ;;  %v2028_v60 = vld [vmem:[%s10675_s7 + $0x8] sm:$0xff] }
 0x50e   :  { %2266 = vrot.lane.b32.xlu0 %v7214_v24, %s4689_s0  ;;  %11206 = vst [vmem:[#allocation64_spill] sm:$0xff] %v7218_v7  ;;  %v2030_v7 = vld [vmem:[%s10675_s7 + $0x18] sm:$0xff] }
 0x513   :  { %v7207_v57 = vpop.permute.xlu2 %1760  ;;  %4450 = vset.pattern.permute.xlu1 %v11200_v45  ;;  %v7210_v37 = vpop.permute.xlu1 %1719 }
 0x514   :  { %11204 = vst [vmem:[#allocation65_spill] sm:$0xff] %v7207_v57  ;;  %1984 = vperm.xlu2 %4449, %v7145_v38   ;;  %1980 = vperm.xlu1 %4450, %v6935_v50   ;;  %v2027_v57 = vld [vmem:[%s10675_s7] sm:$0xff]  ;;  %v7230_v50 = vld [vmem:[#allocation2 + $0x78] sm:$0xff]  ;;  %v7240_v31 = vpop.permute.xlu0 %1694 }
 0x515   :  { %11205 = vst [vmem:[#allocation53_spill] sm:$0xff] %v7210_v37 }
 0x516   :  { %2272 = vrot.lane.b32.xlu0 %v7230_v50, %s4689_s0  ;;  %11208 = vst [vmem:[#allocation58_spill] sm:$0xff] %v7240_v31 }
 0x51b   :  { %v7226_v37 = vpop.permute.xlu2 %1783  ;;  %v7228_v53 = vpop.permute.xlu1 %1731 }
 0x51c   :  { %11207 = vst [vmem:[#allocation56_spill] sm:$0xff] %v7226_v37  ;;  %2038 = vperm.xlu2 %4449, %v2028_v60   ;;  %2033 = vperm.xlu1 %4450, %v2027_v57   ;;  %v7246_v57 = vld [vmem:[#allocation2 + $0x60] sm:$0xff]  ;;  %v7258_v31 = vpop.permute.xlu0 %1700 }
 0x51e   :  { %2302 = vrot.lane.b32.xlu0 %v7246_v57, %s4690_s13 }
 0x523   :  { %v7242_v37 = vpop.permute.xlu2 %1795  ;;  %v7244_v28 = vpop.permute.xlu1 %1752 }
 0x524   :  { %11209 = vst [vmem:[#allocation66_spill] sm:$0xff] %v7244_v28  ;;  %2048 = vperm.xlu2 %4449, %v2030_v7   ;;  %2043 = vperm.xlu1 %4450, %v2029_v9   ;;  %v7260_v28 = vld [vmem:[#allocation2 + $0x58] sm:$0xff] }
 0x526   :  { %2308 = vrot.lane.b32.xlu0 %v7260_v28, %s4690_s13 }
 0x52b   :  { %v7250_v60 = vpop.permute.xlu2 %1818  ;;  %v7252_v34 = vpop.permute.xlu1 %1758 }
 0x52c   :  { %11210 = vst [vmem:[#allocation57_spill] sm:$0xff] %v7250_v60  ;;  %2220 = vrot.lane.b32.xlu1 %v7201_v26, %s4688_s12  ;;  %2222 = vrot.lane.b32.xlu2 %v7246_v57, %s4688_s12  ;;  %v7274_v60 = vpop.permute.xlu0 %1756 }
 0x52d   :  { %11211 = vst [vmem:[#allocation55_spill] sm:$0xff] %v7252_v34 }
 0x52e   :  { %2338 = vrot.lane.b32.xlu0 %v7164_v58, %s4691_s14 }
 0x533   :  { %v7264_v9 = vpop.permute.xlu2 %1824  ;;  %v7266_v7 = vpop.permute.xlu1 %1764 }
 0x534   :  { %11212 = vst [vmem:[#allocation62_spill] sm:$0xff] %v7264_v9  ;;  %2226 = vrot.lane.b32.xlu1 %v7214_v24, %s4688_s12  ;;  %2228 = vrot.lane.b32.xlu2 %v7260_v28, %s4688_s12  ;;  %v7286_v9 = vpop.permute.xlu0 %1762 }
 0x535   :  { %11214 = vst [vmem:[#allocation67_spill] sm:$0xff] %v7286_v9 }
 0x536   :  { %2344 = vrot.lane.b32.xlu0 %v7179_v17, %s4691_s14 }
 0x53b   :  { %v7276_v34 = vpop.permute.xlu2 %1830  ;;  %v7278_v44 = vpop.permute.xlu1 %1791 }
 0x53c   :  { %11213 = vst [vmem:[#allocation59_spill] sm:$0xff] %v7278_v44  ;;  %2232 = vrot.lane.b32.xlu1 %v7230_v50, %s4688_s12  ;;  %2258 = vrot.lane.b32.xlu2 %v7164_v58, %s4689_s0  ;;  %v7298_v44 = vpop.permute.xlu0 %1820 }
 0x53d   :  { %11217 = vst [vmem:[#allocation70_spill] sm:$0xff] %v7298_v44 }
 0x53e   :  { %2350 = vrot.lane.b32.xlu0 %v7192_v22, %s4691_s14 }
 0x543   :  { %v7288_v54 = vpop.permute.xlu1 %1816  ;;  %v7290_v48 = vpop.permute.xlu2 %1858 }
 0x544   :  { %11215 = vst [vmem:[#allocation68_spill] sm:$0xff] %v7288_v54  ;;  %2262 = vrot.lane.b32.xlu1 %v7246_v57, %s4689_s0  ;;  %2264 = vrot.lane.b32.xlu2 %v7179_v17, %s4689_s0 }
 0x545   :  { %11216 = vst [vmem:[#allocation69_spill] sm:$0xff] %v7290_v48 }
 0x546   :  { %2380 = vrot.lane.b32.xlu0 %v7201_v26, %s4692_s15 }
 0x54b   :  { %v7300_v4 = vpop.permute.xlu1 %1822 }
 0x54c   :  { %v7302_v27 = vpop.permute.xlu2 %1892  ;;  %2268 = vrot.lane.b32.xlu1 %v7260_v28, %s4689_s0  ;;  %2270 = vrot.lane.b32.xlu2 %v7192_v22, %s4689_s0 }
 0x54d   :  { %11218 = vst [vmem:[#allocation71_spill] sm:$0xff] %v7302_v27  ;;  %v7318_v27 = vpop.permute.xlu0 %1826 }
 0x54e   :  { %11220 = vst [vmem:[#allocation73_spill] sm:$0xff] %v7318_v27  ;;  %2386 = vrot.lane.b32.xlu0 %v7214_v24, %s4692_s15  ;;  %v1449_v27 = vsel %vm11225_vm0, %v7029_v49, %v7010_v5 }
 0x54f   :  { %v1484_v13 = vmul.f32 %v7052_v59, %v1449_v27 }
 0x553   :  { %v7310_v54 = vpop.permute.xlu1 %1828 }
 0x554   :  { %11219 = vst [vmem:[#allocation72_spill] sm:$0xff] %v7310_v54  ;;  %v7312_v48 = vpop.permute.xlu2 %1904  ;;  %2298 = vrot.lane.b32.xlu1 %v7164_v58, %s4690_s13  ;;  %2300 = vrot.lane.b32.xlu2 %v7201_v26, %s4690_s13 }
 0x555   :  { %v7332_v9 = vpop.permute.xlu0 %1988 }
 0x556   :  { %2392 = vrot.lane.b32.xlu0 %v7230_v50, %s4692_s15 }
 0x55b   :  { %v7322_v44 = vpop.permute.xlu1 %1854 }
 0x55c   :  { %11221 = vst [vmem:[#allocation74_spill] sm:$0xff] %v7322_v44  ;;  %2304 = vrot.lane.b32.xlu1 %v7179_v17, %s4690_s13  ;;  %2306 = vrot.lane.b32.xlu2 %v7214_v24, %s4690_s13  ;;  %v1453_v44 = vsel %vm11223_vm3, %v7010_v5, %v7029_v49  ;;  %vm11228_vm3 = vcmp.lt.s32.totalorder %v11227_v35, 240  ;;  %v1428_v49 = vmul.f32 %v6983_v20, %v6904_v21 }
 0x55d   :  { %v7328_v54 = vpop.permute.xlu2 %1938  ;;  %v7357_v1 = vpop.permute.xlu0 %2218  ;;  %v1461_v63 = vsel %vm11228_vm3, %v1453_v44, 0.0  ;;  %vm11233_vm3 = vcmp.lt.s32.totalorder %v11227_v35, 224 }
 0x55e   :  { %11222 = vst [vmem:[#allocation75_spill] sm:$0xff] %v7328_v54  ;;  %v1517_v54 = vsel %vm11224_vm9, %v7140_v0, %v7033_v19  ;;  %2422 = vrot.lane.b32.xlu0 %v7246_v57, %s4693_s16  ;;  %vm11230_vm9 = vcmp.lt.s32.totalorder %v4937_v42, 96  ;;  %v1492_v51 = vadd.f32 %v1484_v13, %v1428_v49 }
 0x55f   :  { %v1524_v56 = vsel %vm11229_vm8, %v1517_v54, 0.0  ;;  %v1581_v5 = vsel %vm11230_vm9, %v7108_v16, %v7153_v43  ;;  %vm11231_vm0 = vmmov %vm11230_vm9  ;;  %v1429_v54 = vmul.f32 %v6983_v20, %v6924_v33  ;;  %vm11232_vm8 = vcmp.lt.s32.totalorder %v4937_v42, 16 }
 0x560   :  { %v1548_v27 = vmul.f32 %v7083_v23, %v1524_v56  ;;  %v1577_v44 = vsel %vm11231_vm0, %v7153_v43, %v7108_v16  ;;  %v1513_v55 = vsel %vm11232_vm8, %v7033_v19, %v7140_v0  ;;  %v1589_v21 = vsel %vm11233_vm3, %v1581_v5, 0.0 }
 0x561   :  { %v1612_v16 = vmul.f32 %v7089_v8, %v1577_v44  ;;  %v1613_v13 = vmul.f32 %v7089_v8, %v1589_v21  ;;  %v1709_v0 = vsel %vm507_vm12, %v7258_v31, %v7149_v36  ;;  %vm11235_vm9 = vcmp.ge.s32.totalorder %v4937_v42, 32 }
 0x562   :  { %v1556_v19 = vadd.f32 %v1548_v27, %v1492_v51  ;;  %vm11236_vm0 = vcmp.lt.s32.totalorder %v4937_v42, 48  ;;  %v1641_v51 = vsel %vm464_vm5, %v7138_v14, %v7118_v41  ;;  %v1705_v5 = vsel %vm507_vm12, %v7149_v36, %v7258_v31 }
 0x563   :  { %v7334_v61 = vpop.permute.xlu1 %1862  ;;  %v1677_v49 = vmul.f32 %v7177_v6, %v1641_v51  ;;  %vm11238_vm8 = vcmp.lt.s32.totalorder %v11227_v35, 208  ;;  %vm1832_vm3 = vcmp.lt.s32.totalorder %v4937_v42, 64  ;;  %v1740_v31 = vmul.f32 %v7228_v53, %v1705_v5 }
 0x564   :  { %2310 = vrot.lane.b32.xlu1 %v7192_v22, %s4690_s13  ;;  %2312 = vrot.lane.b32.xlu2 %v7230_v50, %s4690_s13  ;;  %v1620_v43 = vadd.f32 %v1612_v16, %v1556_v19  ;;  %v1717_v44 = vsel %vm11238_vm8, %v1709_v0, 0.0  ;;  %v1840_v36 = vsel %vm1832_vm3, %v7276_v34, %v7300_v4  ;;  %vm1815_vm8 = vcmp.lt.s32.totalorder %v11227_v35, 192 }
 0x566   :  { %v7352_v10 = vpop.permute.xlu2 %1976  ;;  %2428 = vrot.lane.b32.xlu0 %v7260_v28, %s4693_s16 }
 0x567   :  { %11226 = vst [vmem:[#allocation76_spill] sm:$0xff] %v7352_v10  ;;  %v1485_v10 = vmul.f32 %v7052_v59, %v1461_v63  ;;  %v1645_v63 = vsel %vm464_vm5, %v7118_v41, %v7138_v14  ;;  %v1549_v59 = vmul.f32 %v7083_v23, %v1513_v55  ;;  %v1773_v23 = vsel %vm11236_vm0, %v7266_v7, %v7274_v60 }
 0x568   :  { %v1652_v55 = vsel %vm11235_vm9, %v1645_v63, 0.0  ;;  %v7420_v27 = vpop.permute.xlu0 %2224  ;;  %vm11239_vm9 = vmmov %vm11236_vm0  ;;  %vm11240_vm0 = vcmp.ge.s32.totalorder %v4937_v42, 48 }
 0x569   :  { %v1493_v20 = vadd.f32 %v1485_v10, %v1429_v54  ;;  %v1676_v8 = vmul.f32 %v7177_v6, %v1652_v55  ;;  %v1769_v41 = vsel %vm11239_vm9, %v7274_v60, %v7266_v7  ;;  %v1780_v14 = vsel %vm11240_vm0, %v1773_v23, 0.0 }
 0x56a   :  { %v1741_v6 = vmul.f32 %v7228_v53, %v1717_v44  ;;  %v1805_v16 = vmul.f32 %v7242_v37, %v1769_v41  ;;  %v1836_v53 = vsel %vm1832_vm3, %v7300_v4, %v7276_v34  ;;  %v1848_v60 = vsel %vm1815_vm8, %v1840_v36, 0.0 }
 0x56b   :  { %v1557_v10 = vadd.f32 %v1549_v59, %v1493_v20  ;;  %v1684_v21 = vadd.f32 %v1676_v8, %v1620_v43  ;;  %v1804_v59 = vmul.f32 %v7242_v37, %v1780_v14  ;;  %v1871_v19 = vmul.f32 %v7334_v61, %v1836_v53 }
 0x56c   :  { %2340 = vrot.lane.b32.xlu1 %v7201_v26, %s4691_s14  ;;  %v7391_v33 = vpop.permute.xlu1 %1900  ;;  %2342 = vrot.lane.b32.xlu2 %v7246_v57, %s4691_s14  ;;  %vm1881_vm9 = vcmp.ge.s32.totalorder %v4937_v42, 64  ;;  %vm10882_vm0 = vcmp.ge.s32.totalorder %v4937_v42, 80  ;;  %v1914_v44 = vmul.f32 %v7312_v48, %v1836_v53 }
 0x56d   :  { %11234 = vst [vmem:[#allocation77_spill] sm:$0xff] %v7391_v33  ;;  %v1621_v54 = vadd.f32 %v1613_v13, %v1557_v10  ;;  %v1748_v20 = vadd.f32 %v1740_v31, %v1684_v21  ;;  %v1872_v13 = vmul.f32 %v7334_v61, %v1848_v60  ;;  %v1889_v43 = vsel %vm1881_vm9, %v1840_v36, 0.0 }
 0x56e   :  { %v7406_v56 = vpop.permute.xlu2 %1984  ;;  %v1973_v61 = vsel %vm10882_vm0, %v1709_v0, 0.0  ;;  %v2013_v0 = vld [vmem:[%s10673_s5 + $0x30] sm:$0xff]  ;;  %vm11251_vm0 = vmmov %vm11247_vm1 }
 0x56f   :  { %11237 = vst [vmem:[#allocation78_spill] sm:$0xff] %v7406_v56  ;;  %v1685_v63 = vadd.f32 %v1677_v49, %v1621_v54  ;;  %v1812_v8 = vadd.f32 %v1804_v59, %v1748_v20  ;;  %v1913_v49 = vmul.f32 %v7312_v48, %v1889_v43  ;;  %v1932_v54 = vsel %vm10880_vm4, %v1773_v23, 0.0  ;;  %v2014_v23 = vld [vmem:[%s10673_s5 + $0x38] sm:$0xff]  ;;  %vm11250_vm4 = vmmov %vm11247_vm1 }
 0x570   :  { %v7456_v10 = vpop.permute.xlu0 %2230  ;;  %v1998_v59 = vmul.f32 %v7332_v9, %v1705_v5  ;;  %vm11253_vm15 = vmmov %vm11251_vm0 }
 0x571   :  { %v1749_v37 = vadd.f32 %v1741_v6, %v1685_v63  ;;  %v1879_v34 = vadd.f32 %v1871_v19, %v1812_v8  ;;  %v1997_v63 = vmul.f32 %v7332_v9, %v1973_v61 }
 0x573   :  { %v1813_v51 = vadd.f32 %v1805_v16, %v1749_v37  ;;  %v1921_v48 = vadd.f32 %v1913_v49, %v1879_v34 }
 0x574   :  { %2346 = vrot.lane.b32.xlu1 %v7214_v24, %s4691_s14  ;;  %2348 = vrot.lane.b32.xlu2 %v7260_v28, %s4691_s14 }
 0x575   :  { %v7450_v7 = vpop.permute.xlu1 %1934  ;;  %v1880_v4 = vadd.f32 %v1872_v13, %v1813_v51 }
 0x576   :  { %11241 = vst [vmem:[#allocation79_spill] sm:$0xff] %v7450_v7  ;;  %v7454_v55 = vpop.permute.xlu2 %2038 }
 0x577   :  { %11242 = vst [vmem:[#allocation80_spill] sm:$0xff] %v7454_v55  ;;  %v1922_v21 = vadd.f32 %v1914_v44, %v1880_v4 }
 0x578   :  { %v7483_v20 = vpop.permute.xlu0 %2260 }
 0x57c   :  { %2352 = vrot.lane.b32.xlu1 %v7230_v50, %s4691_s14  ;;  %2378 = vrot.lane.b32.xlu2 %v7164_v58, %s4692_s15 }
 0x57d   :  { %v1947_v14 = vpop.permute.xlu1 %1946 }
 0x57e   :  { %v1955_v31 = vmul.f32 %v1947_v14, %v1769_v41  ;;  %v1956_v6 = vmul.f32 %v1947_v14, %v1932_v54  ;;  %v7473_v36 = vpop.permute.xlu2 %2048 }
 0x57f   :  { %11243 = vst [vmem:[#allocation81_spill] sm:$0xff] %v7473_v36 }
 0x580   :  { %v1963_v16 = vadd.f32 %v1955_v31, %v1921_v48  ;;  %v1964_v53 = vadd.f32 %v1956_v6, %v1922_v21  ;;  %v2267_v13 = vpop.permute.xlu0 %2266 }
 0x582   :  { %v2005_v41 = vadd.f32 %v1997_v63, %v1963_v16  ;;  %v2006_v60 = vadd.f32 %v1998_v59, %v1964_v53 }
 0x584   :  { %2382 = vrot.lane.b32.xlu1 %v7246_v57, %s4692_s15  ;;  %v2021_v37 = vadd.f32 %v2013_v0, %v2005_v41  ;;  %v2022_v19 = vadd.f32 %v2014_v23, %v2006_v60  ;;  %2384 = vrot.lane.b32.xlu2 %v7179_v17, %s4692_s15 }
 0x586   :  { %v7489_v9 = vpop.permute.xlu1 %1980  ;;  %2075 = vmatpush.msra.mxu2 %v2021_v37  ;;  %2104 = vmatpush.msra.mxu3 %v2022_v19  ;;  %v2223_v5 = vpop.permute.xlu2 %2222 }
 0x587   :  { %11244 = vst [vmem:[#allocation82_spill] sm:$0xff] %v7489_v9  ;;  %v2240_v18 = vsel %vm11253_vm15, %v7456_v10, %v2223_v5  ;;  %vm11258_vm15 = vcmp.lt.s32.totalorder %v4937_v42, 1 }
 0x588   :  { %v7505_v43 = vpop.permute.xlu0 %2272 }
 0x58c   :  { %2388 = vrot.lane.b32.xlu1 %v7260_v28, %s4692_s15  ;;  %2390 = vrot.lane.b32.xlu2 %v7192_v22, %s4692_s15 }
 0x58e   :  { %v7495_v51 = vpop.permute.xlu1 %2033  ;;  %v7497_v8 = vpop.permute.xlu2 %2228 }
 0x58f   :  { %11245 = vst [vmem:[#allocation83_spill] sm:$0xff] %v7495_v51 }
 0x590   :  { %v7513_v61 = vpop.permute.xlu0 %2302 }
 0x594   :  { %2418 = vrot.lane.b32.xlu1 %v7164_v58, %s4693_s16  ;;  %2420 = vrot.lane.b32.xlu2 %v7201_v26, %s4693_s16 }
 0x596   :  { %v7503_v34 = vpop.permute.xlu1 %2043  ;;  %v2259_v4 = vpop.permute.xlu2 %2258 }
 0x597   :  { %11246 = vst [vmem:[#allocation84_spill] sm:$0xff] %v7503_v34 }
 0x598   :  { %v7521_v31 = vpop.permute.xlu0 %2308 }
 0x59c   :  { %2424 = vrot.lane.b32.xlu1 %v7179_v17, %s4693_s16  ;;  %2426 = vrot.lane.b32.xlu2 %v7214_v24, %s4693_s16 }
 0x59e   :  { %v7511_v49 = vpop.permute.xlu1 %2220  ;;  %v2265_v44 = vpop.permute.xlu2 %2264 }
 0x59f   :  { %v2235_v25 = vsel %vm11247_vm1, %v7511_v49, %v7497_v8  ;;  %vm11252_vm1 = vmmov %vm11251_vm0 }
 0x5a0   :  { %v7525_v21 = vpop.permute.xlu0 %2338  ;;  %v2244_v11 = vsel %vm11249_vm13, %v2235_v25, 0.0  ;;  %v2236_v3 = vsel %vm11252_vm1, %v2223_v5, %v7456_v10 }
 0x5a1   :  { %v2252_v29 = vadd.f32 %v2244_v11, %v7201_v26 }
 0x5a4   :  { %2430 = vrot.lane.b32.xlu1 %v7192_v22, %s4693_s16  ;;  %2432 = vrot.lane.b32.xlu2 %v7230_v50, %s4693_s16 }
 0x5a6   :  { %v2227_v14 = vpop.permute.xlu1 %2226  ;;  %v7519_v54 = vpop.permute.xlu2 %2270 }
 0x5a7   :  { %v2234_v45 = vsel %vm11250_vm4, %v7357_v1, %v2227_v14  ;;  %v2238_v39 = vsel %vm11251_vm0, %v2227_v14, %v7357_v1  ;;  %vm11255_vm4 = vcmp.lt.s32.totalorder %v4951_v47, 15  ;;  %vm11256_vm0 = vmmov %vm11249_vm13 }
 0x5a8   :  { %v7533_v0 = vpop.permute.xlu0 %2344  ;;  %v2242_v40 = vsel %vm11249_vm13, %v2234_v45, 0.0  ;;  %v2243_v1 = vsel %vm11255_vm4, %v2238_v39, 0.0  ;;  %v2246_v14 = vsel %vm11256_vm0, %v2236_v3, 0.0  ;;  %vm11257_vm1 = vmmov %vm11255_vm4  ;;  %vm11261_vm4 = vcmp.lt.s32.totalorder %v4937_v42, 126 }
 0x5a9   :  { %v7598_v52 = vsel %vm11257_vm1, %v2240_v18, 0.0  ;;  %vm11262_vm0 = vcmp.lt.s32.totalorder %v4937_v42, 2  ;;  %v2250_v18 = vadd.f32 %v2242_v40, %v7164_v58  ;;  %v2251_v5 = vadd.f32 %v2243_v1, %v7214_v24 }
 0x5aa   :  { %vm11263_vm1 = vcmp.lt.s32.totalorder %v4937_v42, 127  ;;  %v2277_v58 = vsel %vm11268_vm6, %v2265_v44, %v7505_v43  ;;  %vm11274_vm6 = vcmp.lt.s32.totalorder %v4937_v42, 2 }
 0x5ae   :  { %v2233_v6 = vpop.permute.xlu1 %2232  ;;  %v7523_v48 = vpop.permute.xlu2 %2300 }
 0x5af   :  { %v2315_v3 = vsel %vm11261_vm4, %v7523_v48, %v7521_v31 }
 0x5b0   :  { %v7537_v60 = vpop.permute.xlu0 %2350 }
 0x5b6   :  { %v7527_v63 = vpop.permute.xlu1 %2262  ;;  %v2307_v59 = vpop.permute.xlu2 %2306 }
 0x5b8   :  { %v7543_v36 = vpop.permute.xlu0 %2380 }
 0x5be   :  { %v7529_v16 = vpop.permute.xlu1 %2268  ;;  %v7531_v53 = vpop.permute.xlu2 %2312 }
 0x5bf   :  { %v2279_v2 = vsel %vm11248_vm2, %v7529_v16, %v7483_v20  ;;  %vm11254_vm2 = vcmp.ge.s32.totalorder %v4947_v46, 1 }
 0x5c0   :  { %v7551_v7 = vpop.permute.xlu0 %2386  ;;  %v2284_v30 = vsel %vm11254_vm2, %v2279_v2, 0.0  ;;  %v2274_v2 = vsel %vm11258_vm15, %v2259_v4, %v2267_v13  ;;  %vm11259_vm2 = vmmov %vm11258_vm15 }
 0x5c1   :  { %v2278_v10 = vsel %vm11259_vm2, %v2267_v13, %v2259_v4  ;;  %vm11260_vm13 = vmmov %vm11259_vm2  ;;  %v2292_v39 = vadd.f32 %v2284_v30, %v2252_v29  ;;  %v2237_v13 = vsel %vm11263_vm1, %v7420_v27, %v2233_v6  ;;  %vm11265_vm2 = vcmp.ge.s32.totalorder %v4947_v46, 1 }
 0x5c2   :  { %v2281_v45 = vsel %vm11260_vm13, %v7505_v43, %v2265_v44  ;;  %vm11264_vm15 = vmmov %vm11263_vm1  ;;  %v2282_v30 = vsel %vm11265_vm2, %v2278_v10, 0.0  ;;  %vm11266_vm13 = vcmp.ge.s32.totalorder %v4951_v47, 1 }
 0x5c3   :  { %v2241_v29 = vsel %vm11264_vm15, %v2233_v6, %v7420_v27  ;;  %v2283_v4 = vsel %vm11266_vm13, %v2274_v2, 0.0  ;;  %vm11269_vm1 = vmmov %vm11265_vm2  ;;  %vm11270_vm15 = vcmp.lt.s32.totalorder %v4947_v46, 14  ;;  %vm11271_vm2 = vcmp.ge.s32.totalorder %v4947_v46, 2 }
 0x5c4   :  { %v2288_v24 = vsel %vm11269_vm1, %v2281_v45, 0.0  ;;  %v2324_v27 = vsel %vm11270_vm15, %v2315_v3, 0.0  ;;  %vm11272_vm13 = vcmp.lt.s32.totalorder %v4947_v46, 15  ;;  %v2290_v44 = vadd.f32 %v2282_v30, %v2250_v18 }
 0x5c5   :  { %v2248_v2 = vsel %vm11272_vm13, %v2237_v13, 0.0  ;;  %v2291_v10 = vadd.f32 %v2283_v4, %v2251_v5  ;;  %vm11276_vm1 = vcmp.lt.s32.totalorder %v4951_v47, 14  ;;  %vm11279_vm13 = vcmp.lt.s32.totalorder %v4937_v42, 3 }
 0x5c6   :  { %v2299_v23 = vpop.permute.xlu1 %2298  ;;  %v7535_v41 = vpop.permute.xlu2 %2342  ;;  %v2256_v18 = vadd.f32 %v2248_v2, %v7179_v17 }
 0x5c7   :  { %v2314_v35 = vsel %vm11261_vm4, %v2299_v23, %v2307_v59 }
 0x5c8   :  { %v7555_v33 = vpop.permute.xlu0 %2392 }
 0x5ce   :  { %v7539_v37 = vpop.permute.xlu1 %2304  ;;  %v7541_v19 = vpop.permute.xlu2 %2348 }
 0x5d0   :  { %v7565_v12 = vpop.permute.xlu0 %2422 }
 0x5d6   :  { %v7545_v34 = vpop.permute.xlu1 %2310  ;;  %v7547_v55 = vpop.permute.xlu2 %2378 }
 0x5d8   :  { %v7642_v1 = vpop.permute.xlu0 %2428 }
 0x5de   :  { %v7549_v51 = vpop.permute.xlu1 %2340  ;;  %v7553_v9 = vpop.permute.xlu2 %2384 }
 0x5df   :  { %v2359_v11 = vsel %vm11262_vm0, %v7541_v19, %v7549_v51  ;;  %vm11267_vm0 = vmmov %vm11261_vm4  ;;  %vm11273_vm4 = vcmp.lt.s32.totalorder %v4951_v47, 15 }
 0x5e0   :  { %v2318_v40 = vsel %vm11267_vm0, %v2307_v59, %v2299_v23  ;;  %v2364_v6 = vsel %vm11271_vm2, %v2359_v11, 0.0  ;;  %v2249_v59 = vsel %vm11273_vm4, %v2241_v29, 0.0  ;;  %v2332_v23 = vadd.f32 %v2324_v27, %v2292_v39  ;;  %vm11275_vm0 = vmmov %vm11270_vm15 }
 0x5e1   :  { %v2322_v45 = vsel %vm11275_vm0, %v2314_v35, 0.0  ;;  %v2323_v3 = vsel %vm11276_vm1, %v2318_v40, 0.0  ;;  %vm11277_vm15 = vmmov %vm11274_vm6  ;;  %vm11278_vm2 = vcmp.lt.s32.totalorder %v4937_v42, 125  ;;  %v2257_v5 = vadd.f32 %v2249_v59, %v7230_v50 }
 0x5e2   :  { %v2372_v38 = vadd.f32 %v2364_v6, %v2332_v23  ;;  %vm11280_vm4 = vcmp.ge.s32.totalorder %v4947_v46, 2  ;;  %vm11282_vm0 = vcmp.ge.s32.totalorder %v4951_v47, 1  ;;  %vm11283_vm1 = vcmp.lt.s32.totalorder %v4937_v42, 1 }
 0x5e3   :  { %v2280_v30 = vsel %vm11283_vm1, %v7519_v54, %v7527_v63  ;;  %v2330_v4 = vadd.f32 %v2322_v45, %v2290_v44  ;;  %v2331_v27 = vadd.f32 %v2323_v3, %v2291_v10  ;;  %v2296_v10 = vadd.f32 %v2288_v24, %v2256_v18 }
 0x5e6   :  { %v2347_v56 = vpop.permute.xlu1 %2346  ;;  %v7559_v15 = vpop.permute.xlu2 %2390 }
 0x5e7   :  { %v2358_v43 = vsel %vm11274_vm6, %v2347_v56, %v7525_v21  ;;  %v2354_v13 = vsel %vm11277_vm15, %v7525_v21, %v2347_v56  ;;  %vm11281_vm6 = vcmp.lt.s32.totalorder %v4947_v46, 13  ;;  %v2289_v21 = vsel %vm11282_vm0, %v2277_v58, 0.0 }
 0x5e8   :  { %v2362_v29 = vsel %vm11280_vm4, %v2358_v43, 0.0  ;;  %vm11284_vm15 = vcmp.lt.s32.totalorder %v4937_v42, 126  ;;  %v2254_v43 = vadd.f32 %v2246_v14, %v7246_v57  ;;  %vm11289_vm0 = vcmp.lt.s32.totalorder %v4937_v42, 127 }
 0x5e9   :  { %v2317_v17 = vsel %vm11284_vm15, %v7539_v37, %v7531_v53  ;;  %vm11287_vm4 = vmmov %vm11284_vm15  ;;  %v2370_v59 = vadd.f32 %v2362_v29, %v2330_v4  ;;  %v2239_v44 = vsel %vm11289_vm0, %v7497_v8, %v7511_v49  ;;  %v2297_v45 = vadd.f32 %v2289_v21, %v2257_v5 }
 0x5ea   :  { %v2321_v2 = vsel %vm11287_vm4, %v7531_v53, %v7539_v37  ;;  %v2276_v53 = vsel %vm11283_vm1, %v7527_v63, %v7519_v54  ;;  %vm11293_vm4 = vcmp.lt.s32.totalorder %v4947_v46, 14  ;;  %vm11295_vm0 = vcmp.lt.s32.totalorder %v4947_v46, 13 }
 0x5eb   :  { %v2328_v49 = vsel %vm11293_vm4, %v2317_v17, 0.0  ;;  %vm11300_vm4 = vcmp.ge.s32.totalorder %v4947_v46, 2  ;;  %v2255_v21 = vadd.f32 %v7598_v52, %v7192_v22 }
 0x5ec   :  { %v2336_v29 = vadd.f32 %v2328_v49, %v2296_v10 }
 0x5ee   :  { %v7557_v62 = vpop.permute.xlu1 %2352  ;;  %v7604_v26 = vpop.permute.xlu2 %2420 }
 0x5ef   :  { %v2439_v35 = vsel %vm11279_vm13, %v7642_v1, %v7604_v26  ;;  %vm11286_vm13 = vcmp.ge.s32.totalorder %v4947_v46, 3 }
 0x5f0   :  { %v2444_v6 = vsel %vm11286_vm13, %v2439_v35, 0.0  ;;  %vm11292_vm13 = vcmp.ge.s32.totalorder %v4947_v46, 1 }
 0x5f1   :  { %v2286_v8 = vsel %vm11292_vm13, %v2280_v30, 0.0  ;;  %vm11299_vm13 = vcmp.lt.s32.totalorder %v4951_v47, 13 }
 0x5f2   :  { %v2294_v22 = vadd.f32 %v2286_v8, %v2254_v43 }
 0x5f6   :  { %v7587_v25 = vpop.permute.xlu1 %2382  ;;  %v2427_v58 = vpop.permute.xlu2 %2426 }
 0x5fe   :  { %v7655_v11 = vpop.permute.xlu1 %2388 }
 0x5ff   :  { %v2395_v39 = vsel %vm11278_vm2, %v7543_v36, %v7655_v11  ;;  %vm11285_vm2 = vcmp.ge.s32.totalorder %v4951_v47, 2 }
 0x600   :  { %v2404_v56 = vsel %vm11281_vm6, %v2395_v39, 0.0  ;;  %v2363_v50 = vsel %vm11285_vm2, %v2354_v13, 0.0  ;;  %vm11288_vm6 = vcmp.lt.s32.totalorder %v4937_v42, 125  ;;  %vm11291_vm2 = vcmp.lt.s32.totalorder %v4937_v42, 2 }
 0x601   :  { %v2412_v40 = vadd.f32 %v2404_v56, %v2372_v38  ;;  %v2394_v38 = vsel %vm11288_vm6, %v7547_v55, %v7551_v7  ;;  %v2371_v37 = vadd.f32 %v2363_v50, %v2331_v27  ;;  %vm11290_vm15 = vmmov %vm11288_vm6  ;;  %v2361_v57 = vsel %vm11291_vm2, %v7557_v62, %v7533_v0 }
 0x602   :  { %v2398_v3 = vsel %vm11290_vm15, %v7551_v7, %v7547_v55  ;;  %vm11294_vm6 = vcmp.lt.s32.totalorder %v4951_v47, 14  ;;  %v2402_v7 = vsel %vm11295_vm0, %v2394_v38, 0.0  ;;  %vm11296_vm1 = vmmov %vm11291_vm2  ;;  %vm11297_vm15 = vcmp.lt.s32.totalorder %v4937_v42, 3 }
 0x603   :  { %v7696_v23 = vadd.f32 %v2444_v6, %v2412_v40  ;;  %v2329_v54 = vsel %vm11294_vm6, %v2321_v2, 0.0  ;;  %v2410_v63 = vadd.f32 %v2402_v7, %v2370_v59  ;;  %v2357_v14 = vsel %vm11296_vm1, %v7533_v0, %v7557_v62  ;;  %vm11298_vm2 = vmmov %vm11297_vm15  ;;  %v2433_v2 = vpop.permute.xlu2 %2432 }
 0x604   :  { %v2403_v39 = vsel %vm11299_vm13, %v2398_v3, 0.0  ;;  %v2368_v35 = vsel %vm11300_vm4, %v2361_v57, 0.0  ;;  %vm11301_vm6 = vcmp.ge.s32.totalorder %v4947_v46, 3  ;;  %vm11302_vm0 = vcmp.ge.s32.totalorder %v4951_v47, 3 }
 0x605   :  { %2460 = vrot.lane.b32.xlu1 %v7696_v23, %s4694_s17  ;;  %vm11303_vm1 = vcmp.lt.s32.totalorder %v4937_v42, 126  ;;  %v2411_v0 = vadd.f32 %v2403_v39, %v2371_v37  ;;  %v2337_v4 = vadd.f32 %v2329_v54, %v2297_v45  ;;  %v2376_v17 = vadd.f32 %v2368_v35, %v2336_v29 }
 0x606   :  { %v2419_v55 = vpop.permute.xlu1 %2418  ;;  %v2316_v62 = vsel %vm11303_vm1, %v7513_v61, %v7545_v34  ;;  %vm11306_vm13 = vmmov %vm11303_vm1  ;;  %vm11307_vm4 = vcmp.lt.s32.totalorder %v4937_v42, 125  ;;  %vm11310_vm1 = vcmp.lt.s32.totalorder %v4937_v42, 1 }
 0x607   :  { %v2434_v24 = vsel %vm11297_vm15, %v2419_v55, %v2427_v58  ;;  %v2438_v13 = vsel %vm11298_vm2, %v2427_v58, %v2419_v55  ;;  %vm11304_vm15 = vcmp.ge.s32.totalorder %v4951_v47, 1  ;;  %vm11305_vm2 = vcmp.ge.s32.totalorder %v4951_v47, 2 }
 0x608   :  { %v2442_v18 = vsel %vm11301_vm6, %v2438_v13, 0.0  ;;  %v2443_v5 = vsel %vm11302_vm0, %v2434_v24, 0.0  ;;  %v2287_v30 = vsel %vm11304_vm15, %v2276_v53, 0.0  ;;  %v2369_v40 = vsel %vm11305_vm2, %v2357_v14, 0.0  ;;  %vm11311_vm15 = vmmov %vm11307_vm4 }
 0x609   :  { %v7745_v56 = vadd.f32 %v2442_v18, %v2410_v63  ;;  %v2320_v27 = vsel %vm11306_vm13, %v7545_v34, %v7513_v61  ;;  %v2397_v50 = vsel %vm11307_vm4, %v7553_v9, %v7555_v33  ;;  %v7761_v6 = vadd.f32 %v2443_v5, %v2411_v0 }
 0x60a   :  { %vm11308_vm6 = vcmp.lt.s32.totalorder %v4951_v47, 15  ;;  %vm11309_vm0 = vcmp.lt.s32.totalorder %v4947_v46, 14  ;;  %v2295_v34 = vadd.f32 %v2287_v30, %v2255_v21  ;;  %v2275_v61 = vsel %vm11310_vm1, %v7483_v20, %v7529_v16 }
 0x60b   :  { %2458 = vrot.lane.b32.xlu0 %v7745_v56, %s4694_s17  ;;  %v2245_v52 = vsel %vm11308_vm6, %v2239_v44, 0.0  ;;  %v2326_v58 = vsel %vm11309_vm0, %v2316_v62, 0.0  ;;  %v2377_v59 = vadd.f32 %v2369_v40, %v2337_v4  ;;  %v2401_v38 = vsel %vm11311_vm15, %v7555_v33, %v7553_v9 }
 0x60c   :  { %vm11312_vm2 = vcmp.lt.s32.totalorder %v4951_v47, 14  ;;  %vm11313_vm13 = vcmp.lt.s32.totalorder %v4937_v42, 2  ;;  %vm11315_vm6 = vcmp.lt.s32.totalorder %v4947_v46, 13  ;;  %v2334_v9 = vadd.f32 %v2326_v58, %v2294_v22 }
 0x60d   :  { %2466 = vrot.lane.b32.xlu1 %v7761_v6, %s4694_s17  ;;  %v2327_v43 = vsel %vm11312_vm2, %v2320_v27, 0.0  ;;  %v2356_v44 = vsel %vm11313_vm13, %v7535_v41, %v7537_v60  ;;  %vm11314_vm4 = vmmov %vm11313_vm13  ;;  %v2408_v16 = vsel %vm11315_vm6, %v2397_v50, 0.0  ;;  %vm11316_vm0 = vcmp.lt.s32.totalorder %v4937_v42, 3 }
 0x60e   :  { %v2360_v20 = vsel %vm11314_vm4, %v7537_v60, %v7535_v41  ;;  %v2425_v33 = vpop.permute.xlu1 %2424  ;;  %v2416_v10 = vadd.f32 %v2408_v16, %v2376_v17  ;;  %vm11317_vm1 = vmmov %vm11316_vm0  ;;  %vm11318_vm15 = vcmp.lt.s32.totalorder %v4951_v47, 13  ;;  %vm11319_vm2 = vcmp.lt.s32.totalorder %v4937_v42, 125 }
 0x60f   :  { %v2437_v45 = vsel %vm11316_vm0, %v2425_v33, %v2433_v2  ;;  %v2441_v53 = vsel %vm11317_vm1, %v2433_v2, %v2425_v33  ;;  %v2409_v37 = vsel %vm11318_vm15, %v2401_v38, 0.0  ;;  %v2396_v41 = vsel %vm11319_vm2, %v7587_v25, %v7559_v15  ;;  %vm11322_vm6 = vmmov %vm11319_vm2 }
 0x610   :  { %vm11320_vm13 = vcmp.ge.s32.totalorder %v4947_v46, 3  ;;  %vm11321_vm4 = vcmp.ge.s32.totalorder %v4951_v47, 3  ;;  %v2335_v57 = vadd.f32 %v2327_v43, %v2295_v34  ;;  %v2417_v8 = vadd.f32 %v2409_v37, %v2377_v59  ;;  %v2703_v34 = vld [vmem:[%s10670_s2 + $0x8] sm:$0xff]  ;;  %v2702_v43 = vld [vmem:[%s10670_s2] sm:$0xff]  ;;  %v2704_v37 = vld [vmem:[%s10670_s2 + $0x10] sm:$0xff] }
 0x611   :  { %v2448_v60 = vsel %vm11320_vm13, %v2441_v53, 0.0  ;;  %v2449_v3 = vsel %vm11321_vm4, %v2437_v45, 0.0  ;;  %v2400_v49 = vsel %vm11322_vm6, %v7559_v15, %v7587_v25  ;;  %vm11323_vm0 = vcmp.ge.s32.totalorder %v4951_v47, 1 }
 0x612   :  { %v7809_v54 = vadd.f32 %v2448_v60, %v2416_v10  ;;  %v2285_v7 = vsel %vm11323_vm0, %v2275_v61, 0.0  ;;  %v2253_v55 = vadd.f32 %v2245_v52, %v7260_v28  ;;  %vm11324_vm1 = vcmp.ge.s32.totalorder %v4947_v46, 2 }
 0x613   :  { %v2366_v63 = vsel %vm11324_vm1, %v2360_v20, 0.0  ;;  %vm11325_vm15 = vcmp.lt.s32.totalorder %v4947_v46, 13  ;;  %v7818_v24 = vadd.f32 %v2449_v3, %v2417_v8  ;;  %vm11326_vm2 = vcmp.ge.s32.totalorder %v4951_v47, 2 }
 0x614   :  { %v2406_v14 = vsel %vm11325_vm15, %v2396_v41, 0.0  ;;  %2464 = vrot.lane.b32.xlu0 %v7809_v54, %s4694_s17  ;;  %v2367_v15 = vsel %vm11326_vm2, %v2356_v44, 0.0  ;;  %v2374_v25 = vadd.f32 %v2366_v63, %v2334_v9  ;;  %vm11327_vm13 = vcmp.lt.s32.totalorder %v4951_v47, 13  ;;  %v2705_v9 = vld [vmem:[%s10670_s2 + $0x18] sm:$0xff]  ;;  %v11340_v41 = vld [vmem:[#allocation38_spill] sm:$0xff] }
 0x615   :  { %v2407_v13 = vsel %vm11327_vm13, %v2400_v49, 0.0  ;;  %v2293_v39 = vadd.f32 %v2285_v7, %v2253_v55  ;;  %vm11328_vm4 = vcmp.lt.s32.totalorder %v4937_v42, 126  ;;  %v2375_v35 = vadd.f32 %v2367_v15, %v2335_v57  ;;  %2472 = vrot.lane.b32.xlu1 %v7818_v24, %s4694_s17 }
 0x616   :  { %v2319_v28 = vsel %vm11328_vm4, %v7521_v31, %v7523_v48  ;;  %vm11329_vm6 = vcmp.lt.s32.totalorder %v4937_v42, 2  ;;  %v2414_v5 = vadd.f32 %v2406_v14, %v2374_v25  ;;  %v2431_v29 = vpop.permute.xlu1 %2430  ;;  %vm11330_vm0 = vcmp.lt.s32.totalorder %v4937_v42, 125 }
 0x617   :  { %v2355_v18 = vsel %vm11329_vm6, %v7549_v51, %v7541_v19  ;;  %v2415_v62 = vadd.f32 %v2407_v13, %v2375_v35  ;;  %v2399_v0 = vsel %vm11330_vm0, %v7655_v11, %v7543_v36  ;;  %vm11331_vm1 = vcmp.lt.s32.totalorder %v4937_v42, 3 }
 0x618   :  { %v2436_v31 = vsel %vm11331_vm1, %v7565_v12, %v2431_v29  ;;  %vm11332_vm15 = vmmov %vm11331_vm1  ;;  %vm11333_vm2 = vcmp.lt.s32.totalorder %v4951_v47, 14  ;;  %vm11334_vm13 = vcmp.ge.s32.totalorder %v4951_v47, 2  ;;  %vm11335_vm4 = vcmp.ge.s32.totalorder %v4947_v46, 3 }
 0x619   :  { %v2440_v48 = vsel %vm11332_vm15, %v2431_v29, %v7565_v12  ;;  %v2325_v51 = vsel %vm11333_vm2, %v2319_v28, 0.0  ;;  %v2365_v19 = vsel %vm11334_vm13, %v2355_v18, 0.0  ;;  %vm11336_vm6 = vcmp.ge.s32.totalorder %v4951_v47, 3 }
 0x61a   :  { %v2446_v21 = vsel %vm11335_vm4, %v2440_v48, 0.0  ;;  %v2447_v36 = vsel %vm11336_vm6, %v2436_v31, 0.0  ;;  %v2333_v11 = vadd.f32 %v2325_v51, %v2293_v39  ;;  %vm11337_vm0 = vcmp.lt.s32.totalorder %v4951_v47, 13  ;;  %vm11338_vm15 = vmmov %vm11336_vm6 }
 0x61b   :  { %v7854_v30 = vadd.f32 %v2446_v21, %v2414_v5  ;;  %v7856_v4 = vadd.f32 %v2447_v36, %v2415_v62  ;;  %v2405_v12 = vsel %vm11337_vm0, %v2399_v0, 0.0  ;;  %v2435_v17 = vsel %vm11331_vm1, %v7604_v26, %v7642_v1 }
 0x61c   :  { %v2373_v40 = vadd.f32 %v2365_v19, %v2333_v11  ;;  %v2445_v50 = vsel %vm11338_vm15, %v2435_v17, 0.0  ;;  %v11339_v16 = vmov 5   ;;  %vm11341_vm2 = vcmp.lt.s32.totalorder %v4937_v42, 112 }
 0x61d   :  { %2462 = vrot.lane.b32.xlu2 %v7854_v30, %s4694_s17  ;;  %2470 = vrot.lane.b32.xlu0 %v7856_v4, %s4694_s17  ;;  %vm11342_vm13 = vmmov %vm11341_vm2 }
 0x61e   :  { %v2413_v27 = vadd.f32 %v2405_v12, %v2373_v40  ;;  %2502 = vrot.lane.b32.xlu1 %v7854_v30, %s4687_s11  ;;  %vm11343_vm4 = vmmov %vm11341_vm2  ;;  %v11344_v12 = vld [vmem:[#allocation9_spill] sm:$0xff] }
 0x61f   :  { %vm11345_vm6 = vcmp.lt.s32.totalorder %v11344_v12, 240  ;;  %vm11346_vm0 = vmmov %vm11341_vm2 }
 0x620   :  { %v7872_v52 = vadd.f32 %v2445_v50, %v2413_v27  ;;  %vm11347_vm1 = vmmov %vm11346_vm0 }
 0x621   :  { %vm11348_vm15 = vmmov %vm11345_vm6 }
 0x625   :  { %2500 = vrot.lane.b32.xlu0 %v7696_v23, %s4687_s11  ;;  %2468 = vrot.lane.b32.xlu2 %v7872_v52, %s4694_s17 }
 0x626   :  { %2508 = vrot.lane.b32.xlu1 %v7872_v52, %s4687_s11 }
 0x62d   :  { %2506 = vrot.lane.b32.xlu0 %v7761_v6, %s4687_s11  ;;  %2498 = vrot.lane.b32.xlu2 %v7745_v56, %s4687_s11 }
 0x62e   :  { %2538 = vrot.lane.b32.xlu1 %v7745_v56, %s4695_s18 }
 0x635   :  { %2512 = vrot.lane.b32.xlu0 %v7818_v24, %s4687_s11  ;;  %2504 = vrot.lane.b32.xlu2 %v7809_v54, %s4687_s11 }
 0x636   :  { %2544 = vrot.lane.b32.xlu1 %v7809_v54, %s4695_s18 }
 0x63d   :  { %2542 = vrot.lane.b32.xlu0 %v7854_v30, %s4695_s18  ;;  %2510 = vrot.lane.b32.xlu2 %v7856_v4, %s4687_s11 }
 0x63e   :  { %2550 = vrot.lane.b32.xlu1 %v7856_v4, %s4695_s18 }
 0x645   :  { %2548 = vrot.lane.b32.xlu0 %v7872_v52, %s4695_s18  ;;  %2540 = vrot.lane.b32.xlu2 %v7696_v23, %s4695_s18 }
 0x646   :  { %2580 = vrot.lane.b32.xlu1 %v7696_v23, %s4696_s19 }
 0x64d   :  { %2578 = vrot.lane.b32.xlu0 %v7745_v56, %s4696_s19  ;;  %2546 = vrot.lane.b32.xlu2 %v7761_v6, %s4695_s18 }
 0x64e   :  { %2586 = vrot.lane.b32.xlu1 %v7761_v6, %s4696_s19 }
 0x655   :  { %2584 = vrot.lane.b32.xlu0 %v7809_v54, %s4696_s19  ;;  %2552 = vrot.lane.b32.xlu2 %v7818_v24, %s4695_s18 }
 0x656   :  { %2592 = vrot.lane.b32.xlu1 %v7818_v24, %s4696_s19 }
 0x65d   :  { %2590 = vrot.lane.b32.xlu0 %v7856_v4, %s4696_s19  ;;  %2582 = vrot.lane.b32.xlu2 %v7854_v30, %s4696_s19 }
 0x65e   :  { %2622 = vrot.lane.b32.xlu1 %v7854_v30, %s4697_s20 }
 0x665   :  { %2620 = vrot.lane.b32.xlu0 %v7696_v23, %s4697_s20  ;;  %2588 = vrot.lane.b32.xlu2 %v7872_v52, %s4696_s19 }
 0x666   :  { %2628 = vrot.lane.b32.xlu1 %v7872_v52, %s4697_s20 }
 0x66d   :  { %2626 = vrot.lane.b32.xlu0 %v7761_v6, %s4697_s20  ;;  %2618 = vrot.lane.b32.xlu2 %v7745_v56, %s4697_s20 }
 0x66e   :  { %2658 = vrot.lane.b32.xlu1 %v7745_v56, %s4698_s21 }
 0x675   :  { %2632 = vrot.lane.b32.xlu0 %v7818_v24, %s4697_s20  ;;  %2624 = vrot.lane.b32.xlu2 %v7809_v54, %s4697_s20 }
 0x676   :  { %2664 = vrot.lane.b32.xlu1 %v7809_v54, %s4698_s21 }
 0x677   :  { %v7938_v26 = vpop.permute.xlu2 %2462  ;;  %v2461_v1 = vpop.permute.xlu1 %2460 }
 0x67d   :  { %2662 = vrot.lane.b32.xlu0 %v7854_v30, %s4698_s21  ;;  %2630 = vrot.lane.b32.xlu2 %v7856_v4, %s4697_s20  ;;  %v2459_v58 = vpop.permute.xlu0 %2458 }
 0x67e   :  { %2670 = vrot.lane.b32.xlu1 %v7856_v4, %s4698_s21 }
 0x67f   :  { %v2469_v22 = vpop.permute.xlu2 %2468  ;;  %v2467_v2 = vpop.permute.xlu1 %2466 }
 0x680   :  { %v2479_v19 = vsel %vm11341_vm2, %v2469_v22, %v2461_v1  ;;  %v2478_v36 = vsel %vm11342_vm13, %v2467_v2, %v2459_v58  ;;  %v2475_v11 = vsel %vm11343_vm4, %v2461_v1, %v2469_v22  ;;  %v2474_v27 = vsel %vm11346_vm0, %v2459_v58, %v2467_v2  ;;  %vm11349_vm2 = vmmov %vm11346_vm0 }
 0x681   :  { %v2485_v40 = vsel %vm11345_vm6, %v2479_v19, 0.0  ;;  %v2483_v50 = vsel %vm11348_vm15, %v2478_v36, 0.0  ;;  %vm11350_vm13 = vmmov %vm11346_vm0  ;;  %vm11351_vm4 = vcmp.lt.s32.totalorder %v4937_v42, 16  ;;  %v2490_v2 = vadd.f32 %v2474_v27, %v7745_v56 }
 0x682   :  { %v2493_v58 = vadd.f32 %v2485_v40, %v7872_v52  ;;  %vm11352_vm0 = vmmov %vm11351_vm4  ;;  %v2491_v19 = vadd.f32 %v2483_v50, %v7761_v6 }
 0x683   :  { %vm11353_vm15 = vmmov %vm11345_vm6 }
 0x685   :  { %2668 = vrot.lane.b32.xlu0 %v7872_v52, %s4698_s21  ;;  %2660 = vrot.lane.b32.xlu2 %v7696_v23, %s4698_s21 }
 0x686   :  { %2713 = vperm.xlu1 %4450, %v2703_v34   ;;  %v7957_v59 = vpop.permute.xlu0 %2464 }
 0x687   :  { %v7955_v61 = vpop.permute.xlu2 %2498  ;;  %v2473_v38 = vpop.permute.xlu1 %2472 }
 0x688   :  { %v2481_v34 = vsel %vm11349_vm2, %v2473_v38, %v7957_v59  ;;  %vm11354_vm2 = vmmov %vm11352_vm0 }
 0x689   :  { %v2489_v52 = vsel %vm11353_vm15, %v2481_v34, 0.0  ;;  %vm11359_vm15 = vcmp.lt.s32.totalorder %v4937_v42, 96 }
 0x68a   :  { %v2497_v27 = vadd.f32 %v2489_v52, %v7818_v24 }
 0x68d   :  { %2708 = vperm.xlu0 %4426, %v2702_v43   ;;  %2666 = vrot.lane.b32.xlu2 %v7761_v6, %s4698_s21  ;;  %v2492_v43 = vadd.f32 %v2475_v11, %v7696_v23 }
 0x68e   :  { %4452 = vset.pattern.permute.xlu1 %v11339_v16 }
 0x68f   :  { %v7964_v44 = vpop.permute.xlu2 %2504  ;;  %v2471_v20 = vpop.permute.xlu0 %2470 }
 0x690   :  { %v2503_v33 = vpop.permute.xlu1 %2502  ;;  %v2480_v17 = vsel %vm11347_vm1, %v2471_v20, %v7938_v26  ;;  %v2476_v1 = vsel %vm11350_vm13, %v7938_v26, %v2471_v20  ;;  %v2477_v26 = vsel %vm11347_vm1, %v7957_v59, %v2473_v38  ;;  %vm11355_vm13 = vmmov %vm11352_vm0 }
 0x691   :  { %v2494_v20 = vadd.f32 %v2476_v1, %v7854_v30 }
 0x695   :  { %2723 = vperm.xlu0 %4426, %v2705_v9   ;;  %2672 = vrot.lane.b32.xlu2 %v7818_v24, %s4698_s21  ;;  %v2487_v9 = vsel %vm11345_vm6, %v2480_v17, 0.0  ;;  %vm11357_vm6 = vmmov %vm11352_vm0 }
 0x696   :  { %v2495_v38 = vadd.f32 %v2487_v9, %v7856_v4 }
 0x697   :  { %v2511_v10 = vpop.permute.xlu2 %2510  ;;  %v2501_v45 = vpop.permute.xlu0 %2500 }
 0x698   :  { %v2509_v53 = vpop.permute.xlu1 %2508  ;;  %v2520_v22 = vsel %vm11351_vm4, %v2511_v10, %v2503_v33  ;;  %v2516_v36 = vsel %vm11355_vm13, %v2503_v33, %v2511_v10  ;;  %vm11356_vm4 = vcmp.ge.s32.totalorder %v4937_v42, 16  ;;  %v2496_v10 = vadd.f32 %v2477_v26, %v7809_v54 }
 0x699   :  { %v2526_v11 = vsel %vm11356_vm4, %v2520_v22, 0.0  ;;  %v2515_v40 = vsel %vm11352_vm0, %v2501_v45, %v2509_v53  ;;  %vm11358_vm1 = vmmov %vm11356_vm4 }
 0x69a   :  { %vm11361_vm13 = vmmov %vm11358_vm1  ;;  %v2533_v1 = vadd.f32 %v2515_v40, %v2493_v58 }
 0x69b   :  { %vm11362_vm4 = vmmov %vm11358_vm1 }
 0x69d   :  { %4451 = vset.pattern.permute.xlu0 %v11152_v32  ;;  %2718 = vperm.xlu2 %4449, %v2704_v37   ;;  %v2519_v37 = vsel %vm11352_vm0, %v2509_v53, %v2501_v45  ;;  %v2534_v45 = vadd.f32 %v2526_v11, %v2494_v20  ;;  %v2535_v53 = vadd.f32 %v2516_v36, %v2495_v38 }
 0x69e   :  { %1535 = vperm.xlu0 %4451, %v11340_v41   ;;  %v2524_v30 = vsel %vm11358_vm1, %v2519_v37, 0.0 }
 0x69f   :  { %v7977_v60 = vpop.permute.xlu2 %2540  ;;  %v2507_v3 = vpop.permute.xlu0 %2506  ;;  %v2532_v54 = vadd.f32 %v2524_v30, %v2492_v43 }
 0x6a0   :  { %v7979_v57 = vpop.permute.xlu1 %2538  ;;  %v2518_v56 = vsel %vm11354_vm2, %v2507_v3, %v7955_v61  ;;  %vm11360_vm2 = vmmov %vm11352_vm0  ;;  %vm11364_vm0 = vcmp.lt.s32.totalorder %v11344_v12, 224 }
 0x6a1   :  { %v2514_v17 = vsel %vm11360_vm2, %v7955_v61, %v2507_v3  ;;  %v2522_v4 = vsel %vm11361_vm13, %v2518_v56, 0.0  ;;  %vm11365_vm1 = vmmov %vm11360_vm2 }
 0x6a2   :  { %v8102_v3 = vadd.f32 %v2522_v4, %v2490_v2  ;;  %v2531_v22 = vadd.f32 %v2514_v17, %v2491_v19 }
 0x6a5   :  { %4453 = vset.pattern.permute.xlu2 %v11339_v16 }
 0x6a7   :  { %v7982_v8 = vpop.permute.xlu2 %2546  ;;  %v2513_v49 = vpop.permute.xlu0 %2512 }
 0x6a8   :  { %v7984_v7 = vpop.permute.xlu1 %2544  ;;  %v2521_v6 = vsel %vm11357_vm6, %v2513_v49, %v7964_v44  ;;  %v2558_v33 = vsel %vm11359_vm15, %v7982_v8, %v7979_v57  ;;  %vm11363_vm6 = vmmov %vm11359_vm15  ;;  %v2517_v61 = vsel %vm11365_vm1, %v7964_v44, %v2513_v49 }
 0x6a9   :  { %v2528_v50 = vsel %vm11362_vm4, %v2521_v6, 0.0  ;;  %v2563_v24 = vsel %vm11364_vm0, %v2558_v33, 0.0  ;;  %vm11366_vm15 = vmmov %vm11363_vm6  ;;  %v2537_v19 = vadd.f32 %v2517_v61, %v2497_v27 }
 0x6aa   :  { %vm11367_vm2 = vmmov %vm11363_vm6  ;;  %v2536_v44 = vadd.f32 %v2528_v50, %v2496_v10  ;;  %v2571_v37 = vadd.f32 %v2563_v24, %v2531_v22 }
 0x6ab   :  { %vm11368_vm13 = vmmov %vm11367_vm2 }
 0x6ac   :  { %v8116_v58 = vsel %vm11368_vm13, %v7979_v57, %v7982_v8  ;;  %vm11369_vm4 = vmmov %vm11364_vm0  ;;  %vm11375_vm13 = vcmp.ge.s32.totalorder %v4937_v42, 32 }
 0x6ad   :  { %vm11371_vm0 = vmmov %vm11367_vm2 }
 0x6ae   :  { %vm11372_vm1 = vmmov %vm11369_vm4 }
 0x6af   :  { %v7986_v55 = vpop.permute.xlu2 %2552  ;;  %v7988_v63 = vpop.permute.xlu0 %2542 }
 0x6b0   :  { %v7990_v14 = vpop.permute.xlu1 %2550  ;;  %v2561_v34 = vsel %vm11363_vm6, %v7986_v55, %v7984_v7  ;;  %v2557_v9 = vsel %vm11366_vm15, %v7984_v7, %v7986_v55  ;;  %vm11370_vm6 = vmmov %vm11367_vm2 }
 0x6b1   :  { %v2560_v43 = vsel %vm11367_vm2, %v7990_v14, %v7988_v63  ;;  %v2569_v49 = vsel %vm11369_vm4, %v2561_v34, 0.0  ;;  %v2556_v57 = vsel %vm11371_vm0, %v7988_v63, %v7990_v14  ;;  %v2576_v26 = vadd.f32 %v2557_v9, %v2536_v44  ;;  %vm11373_vm15 = vmmov %vm11371_vm0 }
 0x6b2   :  { %v2567_v52 = vsel %vm11372_vm1, %v2560_v43, 0.0  ;;  %v2577_v63 = vadd.f32 %v2569_v49, %v2537_v19  ;;  %vm11374_vm2 = vmmov %vm11372_vm1  ;;  %vm11376_vm4 = vcmp.lt.s32.totalorder %v11344_v12, 208 }
 0x6b3   :  { %vm11379_vm1 = vmmov %vm11376_vm4 }
 0x6b7   :  { %v7992_v15 = vpop.permute.xlu2 %2582  ;;  %v7994_v25 = vpop.permute.xlu0 %2548 }
 0x6b8   :  { %v7996_v13 = vpop.permute.xlu1 %2580  ;;  %v2559_v7 = vsel %vm11370_vm6, %v7994_v25, %v7977_v60  ;;  %v2555_v56 = vsel %vm11373_vm15, %v7977_v60, %v7994_v25  ;;  %v2574_v60 = vadd.f32 %v2556_v57, %v2534_v45  ;;  %vm11377_vm6 = vmmov %vm11375_vm13  ;;  %vm11380_vm15 = vcmp.lt.s32.totalorder %v4937_v42, 48 }
 0x6b9   :  { %v2565_v14 = vsel %vm11374_vm2, %v2559_v7, 0.0  ;;  %vm11378_vm0 = vmmov %vm11377_vm6 }
 0x6ba   :  { %v2573_v10 = vadd.f32 %v2565_v14, %v2533_v1  ;;  %vm11381_vm2 = vmmov %vm11380_vm15 }
 0x6bf   :  { %v7998_v39 = vpop.permute.xlu2 %2588  ;;  %v8000_v28 = vpop.permute.xlu0 %2578 }
 0x6c0   :  { %v8002_v35 = vpop.permute.xlu1 %2586  ;;  %v2599_v25 = vsel %vm464_vm5, %v7998_v39, %v7996_v13  ;;  %v2595_v45 = vsel %vm464_vm5, %v7996_v13, %v7998_v39 }
 0x6c1   :  { %v2598_v50 = vsel %vm464_vm5, %v8002_v35, %v8000_v28  ;;  %v2594_v57 = vsel %vm464_vm5, %v8000_v28, %v8002_v35 }
 0x6c7   :  { %v8004_v18 = vpop.permute.xlu2 %2618  ;;  %v8006_v5 = vpop.permute.xlu0 %2584 }
 0x6c8   :  { %v8008_v29 = vpop.permute.xlu1 %2592 }
 0x6c9   :  { %v2601_v8 = vsel %vm464_vm5, %v8008_v29, %v8006_v5  ;;  %v2597_v11 = vsel %vm464_vm5, %v8006_v5, %v8008_v29  ;;  %v2575_v5 = vadd.f32 %v2567_v52, %v2535_v53  ;;  %v2572_v29 = vadd.f32 %v2555_v56, %v2532_v54 }
 0x6ca   :  { %v2608_v38 = vsel %vm11375_vm13, %v2601_v8, 0.0  ;;  %v2617_v27 = vadd.f32 %v2597_v11, %v2577_v63  ;;  %vm11382_vm13 = vcmp.ge.s32.totalorder %v4937_v42, 48  ;;  %v2613_v63 = vadd.f32 %v2595_v45, %v2573_v10  ;;  %v2699_v45 = vld [vmem:[%s10669_s1 + $0x8] sm:$0xff] }
 0x6cb   :  { %v2611_v11 = vadd.f32 %v2594_v57, %v2571_v37  ;;  %v8237_v37 = vld [vmem:[%s10671_s3] sm:$0xff] }
 0x6cc   :  { %2842 = vperm.xlu1 %4452, %v8237_v37  }
 0x6cf   :  { %v8010_v62 = vpop.permute.xlu2 %2624  ;;  %v8012_v0 = vpop.permute.xlu0 %2590 }
 0x6d0   :  { %v8014_v31 = vpop.permute.xlu1 %2622  ;;  %v2600_v6 = vsel %vm464_vm5, %v8012_v0, %v7992_v15  ;;  %v2596_v30 = vsel %vm464_vm5, %v7992_v15, %v8012_v0  ;;  %v2604_v15 = vsel %vm11378_vm0, %v2599_v25, 0.0  ;;  %v2616_v0 = vadd.f32 %v2608_v38, %v2576_v26  ;;  %vm11385_vm0 = vmmov %vm11382_vm13  ;;  %v8242_v38 = vld [vmem:[%s10671_s3 + $0x8] sm:$0xff] }
 0x6d1   :  { %v2606_v17 = vsel %vm11377_vm6, %v2600_v6, 0.0  ;;  %v2615_v34 = vadd.f32 %v2596_v30, %v2575_v5  ;;  %vm11384_vm6 = vmmov %vm11381_vm2  ;;  %v2612_v14 = vadd.f32 %v2604_v15, %v2572_v29  ;;  %2847 = vperm.xlu2 %4453, %v8242_v38   ;;  %v2700_v15 = vld [vmem:[%s10669_s1 + $0x10] sm:$0xff] }
 0x6d2   :  { %v2614_v22 = vadd.f32 %v2606_v17, %v2574_v60  ;;  %v8266_v17 = vld [vmem:[%s10671_s3 + $0x18] sm:$0xff] }
 0x6d4   :  { %2857 = vperm.xlu1 %4452, %v8266_v17  }
 0x6d7   :  { %v8016_v48 = vpop.permute.xlu2 %2630  ;;  %v8018_v51 = vpop.permute.xlu0 %2620 }
 0x6d8   :  { %v8022_v21 = vpop.permute.xlu1 %2628  ;;  %v2640_v40 = vsel %vm507_vm12, %v8016_v48, %v8014_v31 }
 0x6d9   :  { %v2647_v53 = vsel %vm11379_vm1, %v2640_v40, 0.0  ;;  %v2639_v9 = vsel %vm507_vm12, %v8022_v21, %v8018_v51  ;;  %vm11386_vm1 = vcmp.ge.s32.totalorder %v4937_v42, 32 }
 0x6da   :  { %v2602_v56 = vsel %vm11386_vm1, %v2598_v50, 0.0  ;;  %vm11392_vm1 = vcmp.ge.s32.totalorder %v4937_v42, 48 }
 0x6df   :  { %v8052_v41 = vpop.permute.xlu2 %2660  ;;  %v8054_v23 = vpop.permute.xlu0 %2626 }
 0x6e0   :  { %v8073_v59 = vpop.permute.xlu1 %2658  ;;  %v2638_v8 = vsel %vm507_vm12, %v8054_v23, %v8004_v18 }
 0x6e7   :  { %v8124_v55 = vpop.permute.xlu2 %2666  ;;  %v2633_v2 = vpop.permute.xlu0 %2632 }
 0x6e8   :  { %v2641_v20 = vsel %vm507_vm12, %v2633_v2, %v8010_v62  ;;  %v2665_v36 = vpop.permute.xlu1 %2664  ;;  %v2637_v4 = vsel %vm507_vm12, %v8010_v62, %v2633_v2  ;;  %v2636_v62 = vsel %vm507_vm12, %v8014_v31, %v8016_v48  ;;  %v2655_v48 = vadd.f32 %v2647_v53, %v2615_v34 }
 0x6e9   :  { %v2649_v33 = vsel %vm11376_vm4, %v2641_v20, 0.0  ;;  %v2656_v24 = vadd.f32 %v2637_v4, %v2616_v0  ;;  %vm11383_vm4 = vmmov %vm11381_vm2  ;;  %v2654_v2 = vadd.f32 %v2636_v62, %v2614_v22  ;;  %v2635_v20 = vsel %vm507_vm12, %v8018_v51, %v8022_v21  ;;  %v2701_v0 = vld [vmem:[%s10669_s1 + $0x18] sm:$0xff] }
 0x6ea   :  { %v2657_v39 = vadd.f32 %v2649_v33, %v2617_v27  ;;  %v2634_v21 = vsel %vm507_vm12, %v8004_v18, %v8054_v23  ;;  %v11396_v4 = vmov 6  }
 0x6eb   :  { %4454 = vset.pattern.permute.xlu2 %v11396_v4  ;;  %4455 = vset.pattern.permute.xlu1 %v11396_v4 }
 0x6ef   :  { %v2673_v54 = vpop.permute.xlu2 %2672  ;;  %v2663_v13 = vpop.permute.xlu0 %2662 }
 0x6f0   :  { %v2677_v1 = vsel %vm11380_vm15, %v2665_v36, %v2673_v54  ;;  %v2681_v61 = vsel %vm11381_vm2, %v2673_v54, %v2665_v36  ;;  %v2671_v43 = vpop.permute.xlu1 %2670  ;;  %vm11387_vm15 = vcmp.lt.s32.totalorder %v11344_v12, 208  ;;  %v2570_v36 = vadd.f32 %v8116_v58, %v8102_v3 }
 0x6f1   :  { %v2697_v44 = vadd.f32 %v2677_v1, %v2657_v39  ;;  %v2688_v31 = vsel %vm11382_vm13, %v2681_v61, 0.0  ;;  %v2676_v7 = vsel %vm11383_vm4, %v2663_v13, %v2671_v43  ;;  %v2680_v19 = vsel %vm11384_vm6, %v2671_v43, %v2663_v13  ;;  %vm11388_vm2 = vmmov %vm11387_vm15 }
 0x6f2   :  { %v2696_v49 = vadd.f32 %v2688_v31, %v2656_v24  ;;  %v2695_v26 = vadd.f32 %v2676_v7, %v2655_v48  ;;  %v2686_v52 = vsel %vm11385_vm0, %v2680_v19, 0.0  ;;  %v2645_v35 = vsel %vm11387_vm15, %v2639_v9, 0.0  ;;  %vm11389_vm13 = vmmov %vm11383_vm4 }
 0x6f3   :  { %2779 = vmatpush.msrb.mxu1 %v2697_v44  ;;  %v2694_v28 = vadd.f32 %v2686_v52, %v2654_v2  ;;  %v2643_v6 = vsel %vm11388_vm2, %v2638_v8, 0.0  ;;  %v2678_v51 = vsel %vm11389_vm13, %v8124_v55, %v8073_v59  ;;  %v2653_v3 = vadd.f32 %v2645_v35, %v2613_v63  ;;  %vm11390_vm6 = vmmov %vm11383_vm4 }
 0x6f4   :  { %2750 = vmatpush.msrb.mxu0 %v2696_v49  ;;  %v2652_v58 = vadd.f32 %v2635_v20, %v2612_v14  ;;  %v2610_v25 = vadd.f32 %v2602_v56, %v2570_v36  ;;  %vm11391_vm0 = vmmov %vm11383_vm4  ;;  %v2651_v30 = vadd.f32 %v2643_v6, %v2611_v11  ;;  %vm11394_vm2 = vcmask 261120  }
 0x6f5   :  { %2780 = vmatpush.msrb.mxu1 %v2695_v26  ;;  %v2674_v23 = vsel %vm11391_vm0, %v8073_v59, %v8124_v55  ;;  %vm11393_vm15 = vmmov %vm11392_vm1  ;;  %v2698_v59 = vld [vmem:[%s10669_s1] sm:$0xff] }
 0x6f6   :  { %2751 = vmatpush.msrb.mxu0 %v2694_v28  ;;  %v2682_v33 = vsel %vm11393_vm15, %v2678_v51, 0.0  ;;  %v2650_v27 = vadd.f32 %v2634_v21, %v2610_v25  ;;  %vm11395_vm13 = vmmov %vm11394_vm2 }
 0x6f7   :  { %v2669_v60 = vpop.permute.xlu0 %2668  ;;  %vm11399_vm0 = vmmov %vm11394_vm2  ;;  %v2719_v7 = vpop.permute.xlu2 %2718 }
 0x6f8   :  { %v2675_v40 = vsel %vm11383_vm4, %v8052_v41, %v2669_v60  ;;  %v2679_v18 = vsel %vm11390_vm6, %v2669_v60, %v8052_v41  ;;  %v2691_v41 = vadd.f32 %v2674_v23, %v2651_v30  ;;  %v2690_v55 = vadd.f32 %v2682_v33, %v2650_v27  ;;  %vm11397_vm4 = vmmov %vm11394_vm2  ;;  %v2714_v1 = vpop.permute.xlu1 %2713 }
 0x6f9   :  { %v2693_v5 = vadd.f32 %v2675_v40, %v2653_v3  ;;  %v2684_v29 = vsel %vm11392_vm1, %v2679_v18, 0.0  ;;  %vm11398_vm6 = vmmov %vm11394_vm2 }
 0x6fa   :  { %v2692_v10 = vadd.f32 %v2684_v29, %v2652_v58  ;;  %vm11400_vm1 = vmmov %vm11399_vm0 }
 0x6fb   :  { %2781 = vmatpush.msrb.mxu1 %v2693_v5  ;;  %vm11401_vm15 = vmmov %vm11399_vm0 }
 0x6fc   :  { %2752 = vmatpush.msrb.mxu0 %v2692_v10 }
 0x6fd   :  { %2782 = vmatpush.msrb.mxu1 %v2691_v41 }
 0x6fe   :  { %2753 = vmatpush.msrb.mxu0 %v2690_v55  ;;  %4350 = vmatmul.msk.f32.vlgmr.msrb.gmra.mxu1 %vm11394_vm2, %v2698_v59  ;;  %vm11402_vm2 = vmmov %vm11399_vm0 }
 0x6ff   :  { %4346 = vmatmul.msk.f32.vlgmr.msrb.gmra.mxu0 %vm11395_vm13, %v2698_v59  ;;  %v2709_v50 = vpop.permute.xlu0 %2708  ;;  %vm11484_vm13 = vcmp.lt.s32.totalorder %v4937_v42, 112 }
 0x706   :  { %4351 = vmatmul.msk.f32.gmra.mxu1 %vm11397_vm4, %v2699_v45  ;;  %vm11485_vm4 = vmmov %vm11484_vm13 }
 0x707   :  { %4347 = vmatmul.msk.f32.gmra.mxu0 %vm11398_vm6, %v2699_v45  ;;  %v2724_v35 = vpop.permute.xlu0 %2723  ;;  %vm11486_vm6 = vcmp.lt.s32.totalorder %v11344_v12, 240 }
 0x70e   :  { %4352 = vmatmul.msk.f32.gmra.mxu1 %vm11399_vm0, %v2700_v15  ;;  %vm11489_vm0 = vcmp.lt.s32.totalorder %v4937_v42, 16 }
 0x70f   :  { %4348 = vmatmul.msk.f32.gmra.mxu0 %vm11400_vm1, %v2700_v15  ;;  %vm11494_vm1 = vmmov %vm11489_vm0 }
 0x716   :  { %4353 = vmatmul.msk.f32.gmra.mxu1 %vm11401_vm15, %v2701_v0  ;;  %vm11497_vm15 = vcmp.ge.s32.totalorder %v4937_v42, 16 }
 0x717   :  { %4349 = vmatmul.msk.f32.gmra.mxu0 %vm11402_vm2, %v2701_v0  ;;  %vm11501_vm2 = vcmp.lt.s32.totalorder %v4937_v42, 96 }
 0x77b   :  { %v2784_v53 = vpop.f32.mrf.mxu1 }
 0x77c   :  { %v2755_v34 = vpop.f32.mrf.mxu0  ;;  %v2785_v13 = vadd.f32 %v2784_v53, %v2709_v50 }
 0x77d   :  { %v2756_v62 = vadd.f32 %v2755_v34, %v2709_v50 }
 0x77e   :  { %v2797_v9 = vmul.f32 0.5, %v2785_v13 }
 0x77f   :  { %v2796_v54 = vmul.f32 0.5, %v2756_v62 }
 0x781   :  { %4527 = vtanh.f32 %v2796_v54 }
 0x783   :  { %v2787_v39 = vpop.f32.mrf.mxu1 }
 0x784   :  { %v2758_v24 = vpop.f32.mrf.mxu0  ;;  %v2788_v48 = vadd.f32 %v2787_v39, %v2714_v1 }
 0x785   :  { %v2759_v61 = vadd.f32 %v2758_v24, %v2714_v1  ;;  %v11409_v1 = vmov 7   ;;  %v8352_v24 = vld [vmem:[%s10672_s4 + $0x8] sm:$0xff] }
 0x786   :  { %v2799_v26 = vmul.f32 0.5, %v2788_v48 }
 0x787   :  { %v4528_v22 = vpop.eup %4527  ;;  %v2798_v43 = vmul.f32 0.5, %v2759_v61 }
 0x788   :  { %v2812_v44 = vmul.f32 0.5, %v4528_v22 }
 0x789   :  { %4529 = vtanh.f32 %v2798_v43  ;;  %v11412_v43 = vmov 3  }
 0x78a   :  { %v2820_v31 = vadd.f32 0.5, %v2812_v44  ;;  %4531 = vtanh.f32 %v2797_v9  ;;  %v8383_v9 = vpop.permute.xlu1 %2842 }
 0x78b   :  { %v2790_v49 = vpop.f32.mrf.mxu1  ;;  %11411 = vst [vmem:[#allocation91_spill] sm:$0xff] %v8383_v9  ;;  %v11500_v9 = vld [vmem:[#allocation45_spill] sm:$0xff] }
 0x78c   :  { %v8288_v2 = vmul.f32 %v2820_v31, %v2756_v62  ;;  %v2761_v19 = vpop.f32.mrf.mxu0  ;;  %v2791_v11 = vadd.f32 %v2790_v49, %v2719_v7  ;;  %v8391_v31 = vld [vmem:[%s10672_s4] sm:$0xff] }
 0x78d   :  { %v2762_v57 = vadd.f32 %v2761_v19, %v2719_v7 }
 0x78e   :  { %11403 = vst [vmem:[#allocation38_spill] sm:$0xff] %v8288_v2  ;;  %2868 = vrot.lane.b32.xlu2 %v8288_v2, %s4688_s12  ;;  %v2801_v40 = vmul.f32 0.5, %v2791_v11 }
 0x78f   :  { %v4530_v8 = vpop.eup %4529  ;;  %v2800_v52 = vmul.f32 0.5, %v2762_v57 }
 0x790   :  { %v2814_v56 = vmul.f32 0.5, %v4530_v8  ;;  %v4532_v20 = vpop.eup %4531 }
 0x791   :  { %4533 = vtanh.f32 %v2800_v52  ;;  %v2813_v63 = vmul.f32 0.5, %v4532_v20  ;;  %v11418_v20 = vmov 8  }
 0x792   :  { %v2822_v28 = vadd.f32 0.5, %v2814_v56  ;;  %4535 = vtanh.f32 %v2799_v26  ;;  %v8424_v26 = vpop.permute.xlu0 %1535 }
 0x793   :  { %v2793_v36 = vpop.f32.mrf.mxu1  ;;  %v2821_v25 = vadd.f32 0.5, %v2813_v63 }
 0x794   :  { %v8292_v14 = vmul.f32 %v2822_v28, %v2759_v61  ;;  %v2794_v6 = vadd.f32 %v2793_v36, %v2724_v35  ;;  %v2764_v51 = vpop.f32.mrf.mxu0  ;;  %v8371_v61 = vpop.permute.xlu2 %2847 }
 0x795   :  { %v2765_v21 = vadd.f32 %v2764_v51, %v2724_v35  ;;  %v8296_v29 = vmul.f32 %v2821_v25, %v2785_v13  ;;  %v8319_v13 = vld [vmem:[%s10671_s3 + $0x10] sm:$0xff]  ;;  %11410 = vst [vmem:[#allocation90_spill] sm:$0xff] %v8371_v61 }
 0x796   :  { %11404 = vst [vmem:[#allocation85_spill] sm:$0xff] %v8292_v14  ;;  %v2803_v60 = vmul.f32 0.5, %v2794_v6  ;;  %2870 = vrot.lane.b32.xlu1 %v8292_v14, %s4688_s12  ;;  %v8439_v35 = vld [vmem:[%s10672_s4 + $0x10] sm:$0xff] }
 0x797   :  { %v4534_v3 = vpop.eup %4533  ;;  %v2802_v58 = vmul.f32 0.5, %v2765_v21  ;;  %11405 = vst [vmem:[#allocation86_spill] sm:$0xff] %v8296_v29 }
 0x798   :  { %v2816_v18 = vmul.f32 0.5, %v4534_v3  ;;  %4537 = vtanh.f32 %v2803_v60  ;;  %v4536_v23 = vpop.eup %4535 }
 0x799   :  { %4539 = vtanh.f32 %v2802_v58  ;;  %v2815_v30 = vmul.f32 0.5, %v4536_v23  ;;  %v11428_v23 = vmov 2  }
 0x79a   :  { %v2824_v5 = vadd.f32 0.5, %v2816_v18  ;;  %4541 = vtanh.f32 %v2801_v40 }
 0x79b   :  { %v2823_v59 = vadd.f32 0.5, %v2815_v30 }
 0x79c   :  { %v8298_v33 = vmul.f32 %v2824_v5, %v2762_v57 }
 0x79d   :  { %v8306_v50 = vmul.f32 %v2823_v59, %v2788_v48  ;;  %v8400_v48 = vpop.permute.xlu1 %2857 }
 0x79e   :  { %11406 = vst [vmem:[#allocation87_spill] sm:$0xff] %v8298_v33  ;;  %v4538_v10 = vpop.eup %4537  ;;  %2876 = vrot.lane.b32.xlu1 %v8296_v29, %s4688_s12  ;;  %2872 = vrot.lane.b32.xlu2 %v8298_v33, %s4688_s12 }
 0x79f   :  { %v4540_v27 = vpop.eup %4539  ;;  %v2819_v41 = vmul.f32 0.5, %v4538_v10  ;;  %11407 = vst [vmem:[#allocation88_spill] sm:$0xff] %v8306_v50 }
 0x7a0   :  { %v2818_v55 = vmul.f32 0.5, %v4540_v27  ;;  %v4542_v15 = vpop.eup %4541 }
 0x7a1   :  { %v2827_v45 = vadd.f32 0.5, %v2819_v41  ;;  %v2817_v62 = vmul.f32 0.5, %v4542_v15 }
 0x7a2   :  { %v2826_v0 = vadd.f32 0.5, %v2818_v55 }
 0x7a3   :  { %v8304_v53 = vmul.f32 %v2827_v45, %v2794_v6  ;;  %v2825_v54 = vadd.f32 0.5, %v2817_v62 }
 0x7a4   :  { %v8308_v34 = vmul.f32 %v2826_v0, %v2765_v21 }
 0x7a5   :  { %v8321_v39 = vmul.f32 %v2825_v54, %v2791_v11 }
 0x7a6   :  { %2878 = vrot.lane.b32.xlu2 %v8306_v50, %s4688_s12  ;;  %2882 = vrot.lane.b32.xlu1 %v8304_v53, %s4688_s12 }
 0x7a7   :  { %2874 = vrot.lane.b32.xlu0 %v8308_v34, %s4688_s12  ;;  %11408 = vst [vmem:[#allocation89_spill] sm:$0xff] %v8321_v39 }
 0x7ae   :  { %2901 = vperm.xlu2 %4454, %v8237_v37   ;;  %2909 = vperm.xlu1 %4455, %v8319_v13  }
 0x7af   :  { %2880 = vrot.lane.b32.xlu0 %v8321_v39, %s4688_s12 }
 0x7b6   :  { %2913 = vperm.xlu2 %4454, %v8266_v17   ;;  %2932 = vrot.lane.b32.xlu1 %v8288_v2, %s4689_s0 }
 0x7b7   :  { %2936 = vrot.lane.b32.xlu0 %v8298_v33, %s4689_s0  ;;  %4457 = vset.pattern.permute.xlu1 %v11152_v32 }
 0x7be   :  { %2934 = vrot.lane.b32.xlu2 %v8292_v14, %s4689_s0  ;;  %2938 = vrot.lane.b32.xlu1 %v8308_v34, %s4689_s0 }
 0x7bf   :  { %2942 = vrot.lane.b32.xlu0 %v8306_v50, %s4689_s0  ;;  %4458 = vset.pattern.permute.xlu2 %v11152_v32 }
 0x7c6   :  { %2940 = vrot.lane.b32.xlu2 %v8296_v29, %s4689_s0  ;;  %2944 = vrot.lane.b32.xlu1 %v8321_v39, %s4689_s0 }
 0x7c7   :  { %2965 = vperm.xlu0 %4451, %v8237_v37  }
 0x7ce   :  { %2946 = vrot.lane.b32.xlu2 %v8304_v53, %s4689_s0  ;;  %2969 = vperm.xlu1 %4457, %v8242_v38  }
 0x7cf   :  { %4456 = vset.pattern.permute.xlu0 %v11409_v1 }
 0x7d0   :  { %1595 = vperm.xlu0 %4456, %v8352_v24  }
 0x7d6   :  { %2973 = vperm.xlu2 %4458, %v8319_v13   ;;  %2977 = vperm.xlu1 %4457, %v8266_v17  }
 0x7d8   :  { %2998 = vrot.lane.b32.xlu0 %v8292_v14, %s4690_s13 }
 0x7de   :  { %2996 = vrot.lane.b32.xlu2 %v8288_v2, %s4690_s13  ;;  %3000 = vrot.lane.b32.xlu1 %v8298_v33, %s4690_s13 }
 0x7df   :  { %4459 = vset.pattern.permute.xlu1 %v11409_v1  ;;  %4460 = vset.pattern.permute.xlu2 %v11409_v1  ;;  %v11441_v1 = vmov 9  }
 0x7e0   :  { %3004 = vrot.lane.b32.xlu0 %v8296_v29, %s4690_s13 }
 0x7e6   :  { %3002 = vrot.lane.b32.xlu2 %v8308_v34, %s4690_s13  ;;  %3006 = vrot.lane.b32.xlu1 %v8306_v50, %s4690_s13 }
 0x7e8   :  { %3010 = vrot.lane.b32.xlu0 %v8304_v53, %s4690_s13  ;;  %v8378_v22 = vpop.permute.xlu2 %2868 }
 0x7ee   :  { %3008 = vrot.lane.b32.xlu2 %v8321_v39, %s4690_s13  ;;  %3029 = vperm.xlu1 %4459, %v8237_v37   ;;  %s4317_s13 = sshll.u32 %s10676_s8, 4  ;;  %s4318_s13 = int_to_ptr.hbm [resolvable:$true] %s4317_s13 }
 0x7f0   :  { %3037 = vperm.xlu0 %4456, %v8319_v13  }
 0x7f6   :  { %3033 = vperm.xlu2 %4460, %v8242_v38   ;;  %3041 = vperm.xlu1 %4459, %v8266_v17  }
 0x7f8   :  { %4461 = vset.pattern.permute.xlu0 %v11412_v43  ;;  %v8386_v44 = vpop.permute.xlu2 %2872 }
 0x7f9   :  { %11413 = vst [vmem:[#allocation92_spill] sm:$0xff] %v8386_v44  ;;  %1655 = vperm.xlu0 %4461, %v8391_v31  }
 0x7fe   :  { %3060 = vrot.lane.b32.xlu2 %v8288_v2, %s4691_s14  ;;  %3062 = vrot.lane.b32.xlu1 %v8292_v14, %s4691_s14 }
 0x7ff   :  { %4462 = vset.pattern.permute.xlu2 %v11412_v43  ;;  %4464 = vset.pattern.permute.xlu1 %v11412_v43 }
 0x800   :  { %v8402_v49 = vpop.permute.xlu2 %2878 }
 0x801   :  { %11414 = vst [vmem:[#allocation93_spill] sm:$0xff] %v8402_v49  ;;  %3066 = vrot.lane.b32.xlu0 %v8308_v34, %s4691_s14  ;;  %v11460_v49 = vmov 10  }
 0x806   :  { %3064 = vrot.lane.b32.xlu2 %v8298_v33, %s4691_s14  ;;  %3068 = vrot.lane.b32.xlu1 %v8296_v29, %s4691_s14 }
 0x808   :  { %v8410_v7 = vpop.permute.xlu1 %2870  ;;  %v8412_v19 = vpop.permute.xlu2 %2901 }
 0x809   :  { %11415 = vst [vmem:[#allocation94_spill] sm:$0xff] %v8410_v7  ;;  %3072 = vrot.lane.b32.xlu0 %v8321_v39, %s4691_s14 }
 0x80a   :  { %11416 = vst [vmem:[#allocation95_spill] sm:$0xff] %v8412_v19 }
 0x80e   :  { %3070 = vrot.lane.b32.xlu2 %v8306_v50, %s4691_s14  ;;  %3074 = vrot.lane.b32.xlu1 %v8304_v53, %s4691_s14  ;;  %s11951_s14 = smov 256  }
 0x810   :  { %v8420_v57 = vpop.permute.xlu1 %2876  ;;  %v8422_v8 = vpop.permute.xlu2 %2913 }
 0x811   :  { %3097 = vperm.xlu0 %4461, %v8242_v38  }
 0x816   :  { %3093 = vperm.xlu2 %4462, %v8237_v37   ;;  %3101 = vperm.xlu1 %4464, %v8319_v13  }
 0x818   :  { %v8429_v52 = vpop.permute.xlu2 %2934  ;;  %v8431_v56 = vpop.permute.xlu1 %2882 }
 0x819   :  { %11417 = vst [vmem:[#allocation96_spill] sm:$0xff] %v8429_v52  ;;  %4463 = vset.pattern.permute.xlu0 %v11418_v20  ;;  %v8434_v28 = vpop.permute.xlu0 %2874 }
 0x81a   :  { %1727 = vperm.xlu0 %4463, %v8439_v35  }
 0x81e   :  { %3105 = vperm.xlu2 %4462, %v8266_v17   ;;  %3124 = vrot.lane.b32.xlu1 %v8288_v2, %s4692_s15 }
 0x81f   :  { %4466 = vset.pattern.permute.xlu1 %v11418_v20 }
 0x820   :  { %v8446_v36 = vpop.permute.xlu2 %2940  ;;  %v8448_v63 = vpop.permute.xlu1 %2909 }
 0x821   :  { %11419 = vst [vmem:[#allocation97_spill] sm:$0xff] %v8448_v63  ;;  %v8450_v11 = vpop.permute.xlu0 %2880 }
 0x822   :  { %11420 = vst [vmem:[#allocation98_spill] sm:$0xff] %v8450_v11  ;;  %3128 = vrot.lane.b32.xlu0 %v8298_v33, %s4692_s15 }
 0x826   :  { %3126 = vrot.lane.b32.xlu2 %v8292_v14, %s4692_s15  ;;  %3130 = vrot.lane.b32.xlu1 %v8308_v34, %s4692_s15 }
 0x827   :  { %4467 = vset.pattern.permute.xlu2 %v11418_v20 }
 0x828   :  { %v8459_v6 = vpop.permute.xlu2 %2946  ;;  %v8461_v51 = vpop.permute.xlu1 %2932 }
 0x829   :  { %11421 = vst [vmem:[#allocation99_spill] sm:$0xff] %v8461_v51  ;;  %v8463_v21 = vpop.permute.xlu0 %2936 }
 0x82a   :  { %11422 = vst [vmem:[#allocation100_spill] sm:$0xff] %v8463_v21  ;;  %3134 = vrot.lane.b32.xlu0 %v8306_v50, %s4692_s15 }
 0x82e   :  { %3132 = vrot.lane.b32.xlu2 %v8296_v29, %s4692_s15  ;;  %3136 = vrot.lane.b32.xlu1 %v8321_v39, %s4692_s15 }
 0x830   :  { %v8471_v60 = vpop.permute.xlu2 %2973  ;;  %v8473_v3 = vpop.permute.xlu1 %2938 }
 0x831   :  { %11423 = vst [vmem:[#allocation101_spill] sm:$0xff] %v8471_v60  ;;  %v8475_v58 = vpop.permute.xlu0 %2942  ;;  %v11450_v60 = vmov 1  }
 0x832   :  { %11424 = vst [vmem:[#allocation102_spill] sm:$0xff] %v8475_v58  ;;  %3157 = vperm.xlu0 %4463, %v8237_v37  }
 0x836   :  { %3138 = vrot.lane.b32.xlu2 %v8304_v53, %s4692_s15  ;;  %3161 = vperm.xlu1 %4466, %v8242_v38  }
 0x838   :  { %v8481_v25 = vpop.permute.xlu2 %2996  ;;  %v8483_v40 = vpop.permute.xlu1 %2944 }
 0x839   :  { %11425 = vst [vmem:[#allocation103_spill] sm:$0xff] %v8481_v25  ;;  %v8485_v18 = vpop.permute.xlu0 %2965 }
 0x83a   :  { %11426 = vst [vmem:[#allocation104_spill] sm:$0xff] %v8483_v40  ;;  %4465 = vset.pattern.permute.xlu0 %v11428_v23 }
 0x83b   :  { %11427 = vst [vmem:[#allocation105_spill] sm:$0xff] %v8485_v18  ;;  %1787 = vperm.xlu0 %4465, %v8352_v24   ;;  %v11495_v18 = vld [vmem:[#allocation47_spill] sm:$0xff] }
 0x83e   :  { %3165 = vperm.xlu2 %4467, %v8319_v13   ;;  %3169 = vperm.xlu1 %4466, %v8266_v17  }
 0x840   :  { %v8491_v5 = vpop.permute.xlu2 %3002  ;;  %v8493_v30 = vpop.permute.xlu1 %2969 }
 0x841   :  { %11429 = vst [vmem:[#allocation106_spill] sm:$0xff] %v8493_v30 }
 0x842   :  { %v8495_v10 = vpop.permute.xlu0 %1595 }
 0x843   :  { %11430 = vst [vmem:[#allocation107_spill] sm:$0xff] %v8495_v10  ;;  %3190 = vrot.lane.b32.xlu0 %v8292_v14, %s4693_s16 }
 0x846   :  { %3188 = vrot.lane.b32.xlu2 %v8288_v2, %s4693_s16  ;;  %3192 = vrot.lane.b32.xlu1 %v8298_v33, %s4693_s16 }
 0x847   :  { %4468 = vset.pattern.permute.xlu1 %v11428_v23  ;;  %4469 = vset.pattern.permute.xlu2 %v11428_v23 }
 0x848   :  { %v8505_v27 = vpop.permute.xlu2 %3008  ;;  %v8507_v41 = vpop.permute.xlu1 %2977 }
 0x849   :  { %11431 = vst [vmem:[#allocation108_spill] sm:$0xff] %v8505_v27 }
 0x84a   :  { %v8509_v59 = vpop.permute.xlu0 %2998 }
 0x84b   :  { %11432 = vst [vmem:[#allocation109_spill] sm:$0xff] %v8509_v59  ;;  %3196 = vrot.lane.b32.xlu0 %v8296_v29, %s4693_s16 }
 0x84e   :  { %3194 = vrot.lane.b32.xlu2 %v8308_v34, %s4693_s16  ;;  %3198 = vrot.lane.b32.xlu1 %v8306_v50, %s4693_s16 }
 0x850   :  { %v8517_v55 = vpop.permute.xlu2 %3033  ;;  %v8519_v45 = vpop.permute.xlu1 %3000 }
 0x851   :  { %11433 = vst [vmem:[#allocation110_spill] sm:$0xff] %v8517_v55 }
 0x852   :  { %11434 = vst [vmem:[#allocation111_spill] sm:$0xff] %v8519_v45  ;;  %v8521_v15 = vpop.permute.xlu0 %3004 }
 0x853   :  { %11435 = vst [vmem:[#allocation112_spill] sm:$0xff] %v8521_v15  ;;  %3202 = vrot.lane.b32.xlu0 %v8304_v53, %s4693_s16 }
 0x856   :  { %3200 = vrot.lane.b32.xlu2 %v8321_v39, %s4693_s16  ;;  %3221 = vperm.xlu1 %4468, %v8237_v37  }
 0x858   :  { %v8528_v0 = vpop.permute.xlu2 %3060  ;;  %v8530_v62 = vpop.permute.xlu1 %3006 }
 0x859   :  { %11436 = vst [vmem:[#allocation113_spill] sm:$0xff] %v8528_v0 }
 0x85a   :  { %11437 = vst [vmem:[#allocation114_spill] sm:$0xff] %v8530_v62  ;;  %v8532_v54 = vpop.permute.xlu0 %3010 }
 0x85b   :  { %3229 = vperm.xlu0 %4465, %v8319_v13  }
 0x85e   :  { %3225 = vperm.xlu2 %4469, %v8242_v38   ;;  %3233 = vperm.xlu1 %4468, %v8266_v17  }
 0x860   :  { %v8537_v23 = vpop.permute.xlu2 %3064  ;;  %v8539_v20 = vpop.permute.xlu1 %3029 }
 0x861   :  { %11438 = vst [vmem:[#allocation115_spill] sm:$0xff] %v8537_v23 }
 0x862   :  { %11439 = vst [vmem:[#allocation116_spill] sm:$0xff] %v8539_v20  ;;  %v8541_v43 = vpop.permute.xlu0 %3037 }
 0x863   :  { %11440 = vst [vmem:[#allocation117_spill] sm:$0xff] %v8541_v43  ;;  %4470 = vset.pattern.permute.xlu0 %v11441_v1 }
 0x864   :  { %1850 = vperm.xlu0 %4470, %v8391_v31  }
 0x866   :  { %3252 = vrot.lane.b32.xlu2 %v8288_v2, %s4707_s26  ;;  %3254 = vrot.lane.b32.xlu1 %v8292_v14, %s4707_s26 }
 0x867   :  { %4471 = vset.pattern.permute.xlu2 %v11441_v1  ;;  %4473 = vset.pattern.permute.xlu1 %v11441_v1 }
 0x868   :  { %v8551_v32 = vpop.permute.xlu2 %3070  ;;  %v8553_v55 = vpop.permute.xlu1 %3041 }
 0x869   :  { %11442 = vst [vmem:[#allocation118_spill] sm:$0xff] %v8551_v32 }
 0x86b   :  { %v8555_v30 = vpop.permute.xlu0 %1655 }
 0x86c   :  { %11443 = vst [vmem:[#allocation119_spill] sm:$0xff] %v8555_v30  ;;  %3258 = vrot.lane.b32.xlu0 %v8308_v34, %s4707_s26 }
 0x86e   :  { %3256 = vrot.lane.b32.xlu2 %v8298_v33, %s4707_s26  ;;  %3260 = vrot.lane.b32.xlu1 %v8296_v29, %s4707_s26 }
 0x870   :  { %v8563_v59 = vpop.permute.xlu2 %3093  ;;  %v8565_v62 = vpop.permute.xlu1 %3062 }
 0x871   :  { %11444 = vst [vmem:[#allocation120_spill] sm:$0xff] %v8563_v59 }
 0x872   :  { %11445 = vst [vmem:[#allocation121_spill] sm:$0xff] %v8565_v62 }
 0x873   :  { %v8567_v1 = vpop.permute.xlu0 %3066 }
 0x874   :  { %3264 = vrot.lane.b32.xlu0 %v8321_v39, %s4707_s26 }
 0x876   :  { %3262 = vrot.lane.b32.xlu2 %v8306_v50, %s4707_s26  ;;  %3266 = vrot.lane.b32.xlu1 %v8304_v53, %s4707_s26 }
 0x878   :  { %v8575_v30 = vpop.permute.xlu2 %3105  ;;  %v8577_v32 = vpop.permute.xlu1 %3068 }
 0x879   :  { %11446 = vst [vmem:[#allocation122_spill] sm:$0xff] %v8577_v32 }
 0x87b   :  { %v8579_v52 = vpop.permute.xlu0 %3072 }
 0x87c   :  { %11447 = vst [vmem:[#allocation123_spill] sm:$0xff] %v8579_v52  ;;  %3289 = vperm.xlu0 %4470, %v8242_v38  }
 0x87e   :  { %3285 = vperm.xlu2 %4471, %v8237_v37   ;;  %3293 = vperm.xlu1 %4473, %v8319_v13  }
 0x880   :  { %v8584_v62 = vpop.permute.xlu2 %3126  ;;  %v8586_v58 = vpop.permute.xlu1 %3074 }
 0x881   :  { %11448 = vst [vmem:[#allocation124_spill] sm:$0xff] %v8584_v62 }
 0x883   :  { %v8588_v43 = vpop.permute.xlu0 %3097 }
 0x884   :  { %11449 = vst [vmem:[#allocation125_spill] sm:$0xff] %v8588_v43  ;;  %4472 = vset.pattern.permute.xlu0 %v11450_v60 }
 0x885   :  { %1896 = vperm.xlu0 %4472, %v8352_v24  }
 0x886   :  { %3297 = vperm.xlu2 %4471, %v8266_v17   ;;  %3316 = vrot.lane.b32.xlu1 %v8288_v2, %s4709_s27 }
 0x887   :  { %4475 = vset.pattern.permute.xlu1 %v11450_v60 }
 0x888   :  { %v8596_v23 = vpop.permute.xlu2 %3132  ;;  %v8598_v52 = vpop.permute.xlu1 %3101 }
 0x889   :  { %11451 = vst [vmem:[#allocation126_spill] sm:$0xff] %v8596_v23  ;;  %v11492_v23 = vld [vmem:[#allocation16_spill] sm:$0xff] }
 0x88a   :  { %11452 = vst [vmem:[#allocation127_spill] sm:$0xff] %v8598_v52 }
 0x88c   :  { %v8600_v62 = vpop.permute.xlu0 %1727 }
 0x88d   :  { %3320 = vrot.lane.b32.xlu0 %v8298_v33, %s4709_s27 }
 0x88e   :  { %3318 = vrot.lane.b32.xlu2 %v8292_v14, %s4709_s27  ;;  %3322 = vrot.lane.b32.xlu1 %v8308_v34, %s4709_s27 }
 0x88f   :  { %4476 = vset.pattern.permute.xlu2 %v11450_v60 }
 0x890   :  { %v8609_v43 = vpop.permute.xlu2 %3138  ;;  %v8611_v10 = vpop.permute.xlu1 %3124 }
 0x891   :  { %11453 = vst [vmem:[#allocation128_spill] sm:$0xff] %v8611_v10  ;;  %v11493_v10 = vld [vmem:[#allocation8_spill] sm:$0xff] }
 0x892   :  { %v1426_v20 = vmul.f32 %v11493_v10, %v11492_v23 }
 0x894   :  { %v8613_v63 = vpop.permute.xlu0 %3128 }
 0x895   :  { %11454 = vst [vmem:[#allocation129_spill] sm:$0xff] %v8613_v63  ;;  %3326 = vrot.lane.b32.xlu0 %v8306_v50, %s4709_s27 }
 0x896   :  { %3324 = vrot.lane.b32.xlu2 %v8296_v29, %s4709_s27  ;;  %3328 = vrot.lane.b32.xlu1 %v8321_v39, %s4709_s27 }
 0x898   :  { %v8621_v52 = vpop.permute.xlu2 %3165  ;;  %v8623_v45 = vpop.permute.xlu1 %3130 }
 0x899   :  { %11455 = vst [vmem:[#allocation130_spill] sm:$0xff] %v8621_v52 }
 0x89c   :  { %v8625_v60 = vpop.permute.xlu0 %3134 }
 0x89d   :  { %11456 = vst [vmem:[#allocation131_spill] sm:$0xff] %v8625_v60  ;;  %3349 = vperm.xlu0 %4472, %v8237_v37  }
 0x89e   :  { %3330 = vrot.lane.b32.xlu2 %v8304_v53, %s4709_s27  ;;  %3353 = vperm.xlu1 %4475, %v8242_v38  }
 0x8a0   :  { %v8631_v63 = vpop.permute.xlu2 %3188  ;;  %v8633_v27 = vpop.permute.xlu1 %3136 }
 0x8a1   :  { %11457 = vst [vmem:[#allocation132_spill] sm:$0xff] %v8631_v63  ;;  %v11490_v63 = vld [vmem:[#allocation12_spill] sm:$0xff] }
 0x8a2   :  { %11458 = vst [vmem:[#allocation133_spill] sm:$0xff] %v8633_v27 }
 0x8a4   :  { %v8635_v7 = vpop.permute.xlu0 %3157 }
 0x8a5   :  { %11459 = vst [vmem:[#allocation134_spill] sm:$0xff] %v8635_v7  ;;  %4474 = vset.pattern.permute.xlu0 %v11460_v49 }
 0x8a6   :  { %1942 = vperm.xlu0 %4474, %v8439_v35   ;;  %3357 = vperm.xlu2 %4476, %v8319_v13  }
 0x8a7   :  { %3361 = vperm.xlu1 %4475, %v8266_v17  }
 0x8a8   :  { %v8641_v60 = vpop.permute.xlu2 %3194  ;;  %v8643_v52 = vpop.permute.xlu1 %3161 }
 0x8a9   :  { %11461 = vst [vmem:[#allocation135_spill] sm:$0xff] %v8643_v52 }
 0x8ad   :  { %v8645_v61 = vpop.permute.xlu0 %1787 }
 0x8ae   :  { %11462 = vst [vmem:[#allocation136_spill] sm:$0xff] %v8645_v61  ;;  %3382 = vrot.lane.b32.xlu0 %v8292_v14, %s4711_s28  ;;  %3380 = vrot.lane.b32.xlu2 %v8288_v2, %s4711_s28 }
 0x8af   :  { %3384 = vrot.lane.b32.xlu1 %v8298_v33, %s4711_s28  ;;  %4478 = vset.pattern.permute.xlu2 %v11460_v49 }
 0x8b0   :  { %v8654_v35 = vpop.permute.xlu2 %3200  ;;  %v8656_v27 = vpop.permute.xlu1 %3169  ;;  %4477 = vset.pattern.permute.xlu1 %v11460_v49 }
 0x8b1   :  { %11463 = vst [vmem:[#allocation137_spill] sm:$0xff] %v8654_v35 }
 0x8b5   :  { %v8659_v52 = vpop.permute.xlu0 %3190 }
 0x8b6   :  { %11464 = vst [vmem:[#allocation138_spill] sm:$0xff] %v8659_v52  ;;  %3388 = vrot.lane.b32.xlu0 %v8296_v29, %s4711_s28  ;;  %3386 = vrot.lane.b32.xlu2 %v8308_v34, %s4711_s28 }
 0x8b7   :  { %3390 = vrot.lane.b32.xlu1 %v8306_v50, %s4711_s28 }
 0x8b8   :  { %v8667_v61 = vpop.permute.xlu2 %3225  ;;  %v8669_v21 = vpop.permute.xlu1 %3192 }
 0x8b9   :  { %11465 = vst [vmem:[#allocation139_spill] sm:$0xff] %v8667_v61 }
 0x8ba   :  { %11466 = vst [vmem:[#allocation140_spill] sm:$0xff] %v8669_v21 }
 0x8bd   :  { %v8671_v35 = vpop.permute.xlu0 %3196 }
 0x8be   :  { %11467 = vst [vmem:[#allocation141_spill] sm:$0xff] %v8671_v35  ;;  %3394 = vrot.lane.b32.xlu0 %v8304_v53, %s4711_s28  ;;  %3392 = vrot.lane.b32.xlu2 %v8321_v39, %s4711_s28 }
 0x8bf   :  { %3413 = vperm.xlu1 %4477, %v8237_v37  }
 0x8c0   :  { %v8678_v49 = vpop.permute.xlu2 %3252  ;;  %v8680_v52 = vpop.permute.xlu1 %3198 }
 0x8c1   :  { %11468 = vst [vmem:[#allocation142_spill] sm:$0xff] %v8678_v49 }
 0x8c2   :  { %11469 = vst [vmem:[#allocation143_spill] sm:$0xff] %v8680_v52  ;;  %v11473_v52 = vmov 0  }
 0x8c5   :  { %v8682_v40 = vpop.permute.xlu0 %3202 }
 0x8c6   :  { %3421 = vperm.xlu0 %4474, %v8319_v13   ;;  %3417 = vperm.xlu2 %4478, %v8242_v38  }
 0x8c7   :  { %3425 = vperm.xlu1 %4477, %v8266_v17  }
 0x8c8   :  { %v8687_v61 = vpop.permute.xlu2 %3256  ;;  %v8689_v21 = vpop.permute.xlu1 %3221 }
 0x8c9   :  { %11470 = vst [vmem:[#allocation144_spill] sm:$0xff] %v8687_v61 }
 0x8ca   :  { %11471 = vst [vmem:[#allocation145_spill] sm:$0xff] %v8689_v21 }
 0x8cd   :  { %v8691_v44 = vpop.permute.xlu0 %3229 }
 0x8ce   :  { %11472 = vst [vmem:[#allocation146_spill] sm:$0xff] %v8691_v44  ;;  %3450 = vrot.lane.b32.xlu0 %v8308_v34, %s4713_s29  ;;  %3444 = vrot.lane.b32.xlu2 %v8288_v2, %s4713_s29 }
 0x8cf   :  { %3446 = vrot.lane.b32.xlu1 %v8292_v14, %s4713_s29  ;;  %4480 = vset.pattern.permute.xlu0 %v11473_v52 }
 0x8d0   :  { %v8700_v11 = vpop.permute.xlu2 %3262  ;;  %v8702_v7 = vpop.permute.xlu1 %3233  ;;  %4482 = vset.pattern.permute.xlu1 %v11473_v52  ;;  %4479 = vset.pattern.permute.xlu2 %v11473_v52 }
 0x8d1   :  { %11474 = vst [vmem:[#allocation147_spill] sm:$0xff] %v8700_v11 }
 0x8d6   :  { %3456 = vrot.lane.b32.xlu0 %v8321_v39, %s4713_s29  ;;  %v8708_v44 = vpop.permute.xlu0 %1850  ;;  %3448 = vrot.lane.b32.xlu2 %v8298_v33, %s4713_s29 }
 0x8d7   :  { %11475 = vst [vmem:[#allocation148_spill] sm:$0xff] %v8708_v44  ;;  %3452 = vrot.lane.b32.xlu1 %v8296_v29, %s4713_s29 }
 0x8d8   :  { %v8714_v61 = vpop.permute.xlu2 %3285  ;;  %v8716_v11 = vpop.permute.xlu1 %3254 }
 0x8d9   :  { %11476 = vst [vmem:[#allocation149_spill] sm:$0xff] %v8714_v61  ;;  %v11483_v61 = vld [vmem:[#allocation22_spill] sm:$0xff] }
 0x8da   :  { %11477 = vst [vmem:[#allocation150_spill] sm:$0xff] %v8716_v11 }
 0x8de   :  { %3481 = vperm.xlu0 %4480, %v8242_v38   ;;  %v8719_v14 = vpop.permute.xlu0 %3258  ;;  %3454 = vrot.lane.b32.xlu2 %v8306_v50, %s4713_s29  ;;  %v3508_v50 = vld [vmem:[%s10672_s4] sm:$0xff] }
 0x8df   :  { %3458 = vrot.lane.b32.xlu1 %v8304_v53, %s4713_s29 }
 0x8e0   :  { %v8725_v52 = vpop.permute.xlu2 %3297  ;;  %v8727_v44 = vpop.permute.xlu1 %3260 }
 0x8e1   :  { %11478 = vst [vmem:[#allocation151_spill] sm:$0xff] %v8727_v44  ;;  %v11488_v44 = vld [vmem:[#allocation30_spill] sm:$0xff] }
 0x8e6   :  { %4481 = vset.pattern.permute.xlu0 %v11339_v16  ;;  %v8730_v39 = vpop.permute.xlu0 %3264  ;;  %3477 = vperm.xlu2 %4479, %v8237_v37  }
 0x8e7   :  { %11479 = vst [vmem:[#allocation152_spill] sm:$0xff] %v8730_v39  ;;  %3485 = vperm.xlu1 %4482, %v8319_v13   ;;  %1409 = vperm.xlu0 %4481, %v8352_v24   ;;  %v11482_v39 = vld [vmem:[#allocation46_spill] sm:$0xff] }
 0x8e8   :  { %v8735_v11 = vpop.permute.xlu2 %3318  ;;  %v8737_v33 = vpop.permute.xlu1 %3266  ;;  %v1452_v21 = vsel %vm11484_vm13, %v11483_v61, %v11482_v39  ;;  %vm11502_vm13 = vcmp.lt.s32.totalorder %v4937_v42, 127 }
 0x8e9   :  { %v2887_v0 = vsel %vm11502_vm13, %v8434_v28, %v8431_v56 }
 0x8ee   :  { %v8742_v2 = vpop.permute.xlu0 %3289  ;;  %3489 = vperm.xlu2 %4479, %v8266_v17   ;;  %v3510_v17 = vld [vmem:[%s10672_s4 + $0x10] sm:$0xff] }
 0x8ef   :  { %11480 = vst [vmem:[#allocation153_spill] sm:$0xff] %v8742_v2  ;;  %4483 = vset.pattern.permute.xlu1 %v11339_v16  ;;  %2852 = vperm.xlu0 %4481, %v8319_v13   ;;  %v1448_v2 = vsel %vm11485_vm4, %v11482_v39, %v11483_v61  ;;  %v3511_v13 = vld [vmem:[%s10672_s4 + $0x18] sm:$0xff]  ;;  %vm11503_vm4 = vmmov %vm11502_vm13  ;;  %vm11514_vm13 = vcmp.lt.s32.totalorder %v4951_v47, 15 }
 0x8f0   :  { %3514 = vperm.xlu1 %4483, %v3508_v50   ;;  %v8747_v37 = vpop.permute.xlu2 %3324  ;;  %v8749_v24 = vpop.permute.xlu1 %3293  ;;  %v1459_v50 = vsel %vm11486_vm6, %v1452_v21, 0.0  ;;  %v1482_v39 = vmul.f32 %v11490_v63, %v1448_v2  ;;  %v11496_v2 = vld [vmem:[#allocation61_spill] sm:$0xff]  ;;  %vm11504_vm6 = vmmov %vm11501_vm2 }
 0x8f1   :  { %11481 = vst [vmem:[#allocation154_spill] sm:$0xff] %v8749_v24  ;;  %v11487_v24 = vld [vmem:[#allocation10_spill] sm:$0xff]  ;;  %v1483_v35 = vmul.f32 %v11490_v63, %v1459_v50 }
 0x8f2   :  { %v1516_v49 = vsel %vm11489_vm0, %v11488_v44, %v11487_v24  ;;  %v11498_v50 = vld [vmem:[#allocation18_spill] sm:$0xff]  ;;  %vm11505_vm0 = vcmp.ge.s32.totalorder %v4937_v42, 32 }
 0x8f3   :  { %v1522_v63 = vsel %vm11497_vm15, %v1516_v49, 0.0  ;;  %v2891_v49 = vsel %vm11503_vm4, %v8431_v56, %v8434_v28  ;;  %v11508_v56 = vld [vmem:[#allocation50_spill] sm:$0xff]  ;;  %v11509_v28 = vld [vmem:[#allocation60_spill] sm:$0xff]  ;;  %vm11512_vm15 = vcmp.lt.s32.totalorder %v4937_v42, 48  ;;  %vm11516_vm4 = vcmp.ge.s32.totalorder %v4937_v42, 48 }
 0x8f4   :  { %v1546_v29 = vmul.f32 %v8424_v26, %v1522_v63  ;;  %v11507_v63 = vld [vmem:[#allocation32_spill] sm:$0xff]  ;;  %v8825_v32 = vsel %vm507_vm12, %v11509_v28, %v11508_v56  ;;  %v8844_v19 = vsel %vm507_vm12, %v11508_v56, %v11509_v28 }
 0x8f5   :  { %v11522_v28 = vld [vmem:[#allocation72_spill] sm:$0xff] }
 0x8f6   :  { %4484 = vset.pattern.permute.xlu2 %v11339_v16  ;;  %v1512_v16 = vsel %vm11494_vm1, %v11487_v24, %v11488_v44  ;;  %v1490_v24 = vadd.f32 %v1482_v39, %v1426_v20  ;;  %vm11506_vm1 = vcmp.lt.s32.totalorder %v11344_v12, 224 }
 0x8f7   :  { %3524 = vperm.xlu0 %4481, %v3510_v17   ;;  %v8773_v61 = vpop.permute.xlu0 %1896  ;;  %v1644_v17 = vsel %vm464_vm5, %v11496_v2, %v11495_v18  ;;  %v1547_v44 = vmul.f32 %v8424_v26, %v1512_v16  ;;  %v1640_v26 = vsel %vm464_vm5, %v11495_v18, %v11496_v2 }
 0x8f8   :  { %11491 = vst [vmem:[#allocation46_spill] sm:$0xff] %v8773_v61  ;;  %3529 = vperm.xlu1 %4483, %v3511_v13   ;;  %v8776_v21 = vpop.permute.xlu2 %3330  ;;  %v8778_v59 = vpop.permute.xlu1 %3316  ;;  %v1427_v13 = vmul.f32 %v11493_v10, %v11498_v50  ;;  %v11499_v61 = vld [vmem:[#allocation39_spill] sm:$0xff]  ;;  %v1650_v20 = vsel %vm11505_vm0, %v1644_v17, 0.0  ;;  %v1554_v2 = vadd.f32 %v1546_v29, %v1490_v24 }
 0x8f9   :  { %v1580_v23 = vsel %vm11501_vm2, %v11500_v9, %v11499_v61  ;;  %v1576_v10 = vsel %vm11504_vm6, %v11499_v61, %v11500_v9  ;;  %v11510_v9 = vld [vmem:[#allocation48_spill] sm:$0xff]  ;;  %v11511_v61 = vld [vmem:[#allocation67_spill] sm:$0xff]  ;;  %vm11513_vm2 = vcmp.lt.s32.totalorder %v4947_v46, 15  ;;  %vm11517_vm6 = vcmp.lt.s32.totalorder %v4937_v42, 1 }
 0x8fa   :  { %v1491_v39 = vadd.f32 %v1483_v35, %v1427_v13  ;;  %v1587_v16 = vsel %vm11506_vm1, %v1580_v23, 0.0  ;;  %v1610_v50 = vmul.f32 %v11507_v63, %v1576_v10  ;;  %v8831_v18 = vsel %vm11512_vm15, %v11511_v61, %v11510_v9  ;;  %v11515_v10 = vld [vmem:[#allocation33_spill] sm:$0xff]  ;;  %vm11518_vm0 = vmmov %vm11517_vm6 }
 0x8fb   :  { %v2898_v35 = vsel %vm11513_vm2, %v2887_v0, 0.0  ;;  %v2899_v13 = vsel %vm11514_vm13, %v2891_v49, 0.0  ;;  %v1611_v23 = vmul.f32 %v11507_v63, %v1587_v16  ;;  %v1674_v15 = vmul.f32 %v11515_v10, %v1650_v20 }
 0x8fc   :  { %v1555_v17 = vadd.f32 %v1547_v44, %v1491_v39  ;;  %v1675_v25 = vmul.f32 %v11515_v10, %v1640_v26  ;;  %v1778_v0 = vsel %vm11516_vm4, %v8831_v18, 0.0  ;;  %v2951_v44 = vsel %vm11517_vm6, %v8473_v3, %v8459_v6  ;;  %v11520_v39 = vld [vmem:[#allocation59_spill] sm:$0xff] }
 0x8fd   :  { %v2955_v24 = vsel %vm11518_vm0, %v8459_v6, %v8473_v3  ;;  %vm11519_vm1 = vcmp.lt.s32.totalorder %v11344_v12, 208  ;;  %v1802_v16 = vmul.f32 %v11520_v39, %v1778_v0  ;;  %v2922_v63 = vmul.f32 %v8422_v8, %v2898_v35  ;;  %v11521_v3 = vld [vmem:[#allocation70_spill] sm:$0xff] }
 0x8fe   :  { %v1715_v49 = vsel %vm11519_vm1, %v8825_v32, 0.0  ;;  %v2923_v56 = vmul.f32 %v8422_v8, %v2899_v13  ;;  %v8872_v6 = vsel %vm11512_vm15, %v11510_v9, %v11511_v61  ;;  %v1618_v10 = vadd.f32 %v1610_v50, %v1554_v2 }
 0x8ff   :  { %4485 = vset.pattern.permute.xlu0 %v11396_v4  ;;  %v3321_v29 = vpop.permute.xlu0 %3320  ;;  %v1619_v51 = vadd.f32 %v1611_v23, %v1555_v17  ;;  %v1803_v0 = vmul.f32 %v11520_v39, %v8872_v6  ;;  %v2866_v8 = vmul.f32 %v8400_v48, %v8308_v34  ;;  %v2867_v35 = vmul.f32 %v8400_v48, %v8304_v53 }
 0x900   :  { %1463 = vperm.xlu0 %4485, %v8391_v31   ;;  %v3358_v26 = vpop.permute.xlu2 %3357  ;;  %v8862_v20 = vpop.permute.xlu1 %3322  ;;  %4487 = vset.pattern.permute.xlu1 %v11396_v4  ;;  %v8878_v31 = vsel %vm1832_vm3, %v11522_v28, %v11521_v3  ;;  %vm11523_vm2 = vcmp.ge.s32.totalorder %v4947_v46, 1  ;;  %vm11524_vm13 = vcmp.ge.s32.totalorder %v4951_v47, 1  ;;  %vm11525_vm4 = vcmp.lt.s32.totalorder %v4937_v42, 126 }
 0x901   :  { %v2962_v9 = vsel %vm11523_vm2, %v2955_v24, 0.0  ;;  %v2963_v61 = vsel %vm11524_vm13, %v2951_v44, 0.0  ;;  %v3015_v2 = vsel %vm11525_vm4, %v8491_v5, %v8532_v54  ;;  %vm11526_vm6 = vmmov %vm11525_vm4  ;;  %v8904_v34 = vsel %vm1832_vm3, %v11521_v3, %v11522_v28 }
 0x902   :  { %v2986_v13 = vmul.f32 %v8507_v41, %v2962_v9  ;;  %v2987_v50 = vmul.f32 %v8507_v41, %v2963_v61  ;;  %v3019_v53 = vsel %vm11526_vm6, %v8532_v54, %v8491_v5  ;;  %v1846_v48 = vsel %vm1815_vm8, %v8878_v31, 0.0 }
 0x903   :  { %v2930_v41 = vadd.f32 %v2922_v63, %v2866_v8  ;;  %v2931_v17 = vadd.f32 %v2923_v56, %v2867_v35  ;;  %vm11527_vm0 = vcmp.lt.s32.totalorder %v4937_v42, 2  ;;  %v1738_v54 = vmul.f32 %v8600_v62, %v8844_v19 }
 0x904   :  { %v3079_v23 = vsel %vm11527_vm0, %v8567_v1, %v8586_v58  ;;  %vm11528_vm1 = vmmov %vm11527_vm0  ;;  %v1739_v44 = vmul.f32 %v8600_v62, %v1715_v49  ;;  %vm11529_vm15 = vcmp.lt.s32.totalorder %v4947_v46, 14  ;;  %vm11530_vm2 = vcmp.lt.s32.totalorder %v4951_v47, 14 }
 0x905   :  { %v3083_v5 = vsel %vm11528_vm1, %v8586_v58, %v8567_v1  ;;  %v3026_v24 = vsel %vm11529_vm15, %v3015_v2, 0.0  ;;  %v3027_v39 = vsel %vm11530_vm2, %v3019_v53, 0.0  ;;  %v1682_v63 = vadd.f32 %v1674_v15, %v1618_v10  ;;  %v11535_v2 = vld [vmem:[#allocation69_spill] sm:$0xff] }
 0x906   :  { %v1683_v56 = vadd.f32 %v1675_v25, %v1619_v51  ;;  %v2994_v28 = vadd.f32 %v2986_v13, %v2930_v41  ;;  %v2995_v8 = vadd.f32 %v2987_v50, %v2931_v17  ;;  %v3050_v35 = vmul.f32 %v8553_v55, %v3026_v24 }
 0x907   :  { %v3327_v3 = vpop.permute.xlu0 %3326  ;;  %v3051_v1 = vmul.f32 %v8553_v55, %v3027_v39  ;;  %vm11531_vm13 = vcmp.ge.s32.totalorder %v4947_v46, 2  ;;  %vm11532_vm4 = vcmp.ge.s32.totalorder %v4951_v47, 2  ;;  %v1746_v15 = vadd.f32 %v1738_v54, %v1682_v63 }
 0x908   :  { %2905 = vperm.xlu0 %4485, %v8242_v38   ;;  %v8927_v58 = vpop.permute.xlu2 %3380  ;;  %v3329_v62 = vpop.permute.xlu1 %3328  ;;  %v3090_v49 = vsel %vm11531_vm13, %v3083_v5, 0.0  ;;  %v3091_v9 = vsel %vm11532_vm4, %v3079_v23, 0.0  ;;  %v1747_v10 = vadd.f32 %v1739_v44, %v1683_v56  ;;  %vm11533_vm6 = vcmp.lt.s32.totalorder %v4937_v42, 125 }
 0x909   :  { %v3334_v51 = vsel %vm1215_vm14, %v3321_v29, %v3329_v62  ;;  %v3338_v25 = vsel %vm1215_vm14, %v3329_v62, %v3321_v29  ;;  %v3143_v61 = vsel %vm11533_vm6, %v8623_v45, %v8609_v43  ;;  %vm11534_vm0 = vmmov %vm11533_vm6  ;;  %v1869_v53 = vmul.f32 %v11535_v2, %v8904_v34 }
 0x90a   :  { %v3344_v38 = vsel %vm1197_vm7, %v3338_v25, 0.0  ;;  %v3345_v55 = vsel %vm1198_vm11, %v3334_v51, 0.0  ;;  %v3147_v13 = vsel %vm11534_vm0, %v8609_v43, %v8623_v45  ;;  %v3058_v41 = vadd.f32 %v3050_v35, %v2994_v28 }
 0x90b   :  { %v8949_v50 = vmul.f32 %v3358_v26, %v3344_v38  ;;  %v8951_v29 = vmul.f32 %v3358_v26, %v3345_v55  ;;  %v3059_v17 = vadd.f32 %v3051_v1, %v2995_v8  ;;  %v3332_v23 = vsel %vm1215_vm14, %v8778_v59, %v8747_v37 }
 0x90c   :  { %v3114_v5 = vmul.f32 %v8575_v30, %v3090_v49  ;;  %v3115_v54 = vmul.f32 %v8575_v30, %v3091_v9  ;;  %v3333_v43 = vsel %vm1215_vm14, %v8735_v11, %v3327_v3  ;;  %v3337_v45 = vsel %vm1215_vm14, %v3327_v3, %v8735_v11 }
 0x90d   :  { %v1810_v26 = vadd.f32 %v1802_v16, %v1746_v15  ;;  %vm11536_vm1 = vcmp.lt.s32.totalorder %v4947_v46, 13  ;;  %vm11537_vm15 = vcmp.lt.s32.totalorder %v4951_v47, 13  ;;  %v1811_v39 = vadd.f32 %v1803_v0, %v1747_v10 }
 0x90e   :  { %v3154_v44 = vsel %vm11536_vm1, %v3143_v61, 0.0  ;;  %v3155_v24 = vsel %vm11537_vm15, %v3147_v13, 0.0  ;;  %vm11538_vm2 = vcmp.lt.s32.totalorder %v4937_v42, 3  ;;  %v3271_v11 = vsel %vm1148_vm10, %v8719_v14, %v8737_v33  ;;  %v9023_v61 = vld [vmem:[%s10672_s4 + $0x8] sm:$0xff] }
 0x90f   :  { %v3207_v30 = vsel %vm11538_vm2, %v8641_v60, %v8682_v40  ;;  %vm11539_vm13 = vmmov %vm11538_vm2  ;;  %v3341_v16 = vsel %vm1198_vm11, %v3332_v23, 0.0  ;;  %v8985_v56 = vpop.permute.xlu0 %3349  ;;  %v3275_v0 = vsel %vm1148_vm10, %v8737_v33, %v8719_v14  ;;  %v3343_v8 = vsel %vm1198_vm11, %v3333_v43, 0.0  ;;  %11546 = vst [vmem:[#allocation30_spill] sm:$0xff] %v9023_v61  ;;  %v11547_v13 = vld [vmem:[#allocation77_spill] sm:$0xff]  ;;  %3519 = vperm.xlu2 %4484, %v9023_v61  }
 0x910   :  { %v3211_v63 = vsel %vm11539_vm13, %v8682_v40, %v8641_v60  ;;  %v8992_v3 = vmul.f32 %v8985_v56, %v3341_v16  ;;  %v8994_v28 = vpop.permute.xlu2 %3386  ;;  %v3354_v60 = vpop.permute.xlu1 %3353  ;;  %v3342_v40 = vsel %vm1197_vm7, %v3337_v45, 0.0  ;;  %v3178_v35 = vmul.f32 %v8656_v27, %v3154_v44 }
 0x911   :  { %v3179_v1 = vmul.f32 %v8656_v27, %v3155_v24  ;;  %v9002_v62 = vmul.f32 %v3354_v60, %v3342_v40  ;;  %v9004_v49 = vmul.f32 %v3354_v60, %v3343_v8  ;;  %v1870_v14 = vmul.f32 %v11535_v2, %v1846_v48  ;;  %v11551_v40 = vld [vmem:[#allocation78_spill] sm:$0xff] }
 0x912   :  { %v1887_v33 = vsel %vm1881_vm9, %v8878_v31, 0.0  ;;  %v3122_v9 = vadd.f32 %v3114_v5, %v3058_v41  ;;  %v3123_v51 = vadd.f32 %v3115_v54, %v3059_v17  ;;  %vm11542_vm4 = vcmp.ge.s32.totalorder %v4947_v46, 3 }
 0x913   :  { %11540 = vst [vmem:[#allocation22_spill] sm:$0xff] %v9002_v62  ;;  %v3218_v25 = vsel %vm11542_vm4, %v3211_v63, 0.0  ;;  %vm11543_vm6 = vcmp.ge.s32.totalorder %v4951_v47, 3  ;;  %vm11544_vm0 = vcmp.lt.s32.totalorder %v4947_v46, 12  ;;  %vm11545_vm1 = vcmp.lt.s32.totalorder %v4951_v47, 12  ;;  %v11678_v62 = vld [vmem:[#allocation57_spill] sm:$0xff] }
 0x914   :  { %11541 = vst [vmem:[#allocation10_spill] sm:$0xff] %v9004_v49  ;;  %v3219_v15 = vsel %vm11543_vm6, %v3207_v30, 0.0  ;;  %v3282_v27 = vsel %vm11544_vm0, %v3271_v11, 0.0  ;;  %v3283_v10 = vsel %vm11545_vm1, %v3275_v0, 0.0  ;;  %v3242_v48 = vmul.f32 %v8702_v7, %v3218_v25 }
 0x915   :  { %v3243_v38 = vmul.f32 %v8702_v7, %v3219_v15  ;;  %v1877_v55 = vadd.f32 %v1869_v53, %v1810_v26  ;;  %v1878_v31 = vadd.f32 %v1870_v14, %v1811_v39  ;;  %v1911_v2 = vmul.f32 %v11547_v13, %v1887_v33 }
 0x916   :  { %v1912_v41 = vmul.f32 %v11547_v13, %v8904_v34  ;;  %v3186_v17 = vadd.f32 %v3178_v35, %v3122_v9  ;;  %v3187_v23 = vadd.f32 %v3179_v1, %v3123_v51  ;;  %v3306_v5 = vmul.f32 %v8725_v52, %v3282_v27  ;;  %v2011_v9 = vld [vmem:[%s10673_s5 + $0x20] sm:$0xff]  ;;  %v2012_v51 = vld [vmem:[%s10673_s5 + $0x28] sm:$0xff]  ;;  %v11556_v13 = vld [vmem:[#allocation103_spill] sm:$0xff] }
 0x917   :  { %v3307_v7 = vmul.f32 %v8725_v52, %v3283_v10  ;;  %v3335_v53 = vsel %vm1215_vm14, %v8862_v20, %v8776_v21  ;;  %v3339_v54 = vsel %vm1215_vm14, %v8776_v21, %v8862_v20  ;;  %vm11548_vm15 = vcmp.ge.s32.totalorder %v4937_v42, 80  ;;  %4486 = vset.pattern.permute.xlu2 %v11396_v4 }
 0x918   :  { %v1971_v34 = vsel %vm11548_vm15, %v8825_v32, 0.0  ;;  %vm11549_vm2 = vcmp.lt.s32.totalorder %v4937_v42, 127  ;;  %vm11550_vm13 = vcmp.lt.s32.totalorder %v11344_v12, 176  ;;  %v3250_v45 = vadd.f32 %v3242_v48, %v3186_v17  ;;  %v1943_v39 = vpop.permute.xlu0 %1942  ;;  %v3393_v30 = vpop.permute.xlu2 %3392  ;;  %v11559_v17 = vld [vmem:[#allocation122_spill] sm:$0xff] }
 0x919   :  { %v2888_v43 = vsel %vm11549_vm2, %v8420_v57, %v8378_v22  ;;  %v1930_v52 = vsel %vm11550_vm13, %v8831_v18, 0.0  ;;  %v3251_v26 = vadd.f32 %v3243_v38, %v3187_v23  ;;  %v1919_v44 = vadd.f32 %v1911_v2, %v1877_v55  ;;  %v3362_v11 = vpop.permute.xlu1 %3361  ;;  %v11555_v55 = vld [vmem:[#allocation95_spill] sm:$0xff]  ;;  %v11557_v2 = vld [vmem:[#allocation112_spill] sm:$0xff]  ;;  %v11560_v23 = vld [vmem:[#allocation113_spill] sm:$0xff] }
 0x91a   :  { %v1920_v24 = vadd.f32 %v1912_v41, %v1878_v31  ;;  %v1953_v21 = vmul.f32 %v1943_v39, %v8872_v6  ;;  %v1954_v20 = vmul.f32 %v1943_v39, %v1930_v52  ;;  %v3346_v32 = vsel %vm1197_vm7, %v3339_v54, 0.0 }
 0x91b   :  { %v3347_v63 = vsel %vm1198_vm11, %v3335_v53, 0.0  ;;  %v3314_v16 = vadd.f32 %v3306_v5, %v3250_v45  ;;  %v3315_v0 = vadd.f32 %v3307_v7, %v3251_v26  ;;  %v3370_v60 = vmul.f32 %v3362_v11, %v3346_v32  ;;  %v11565_v45 = vld [vmem:[#allocation105_spill] sm:$0xff]  ;;  %v11570_v32 = vld [vmem:[#allocation116_spill] sm:$0xff] }
 0x91c   :  { %v3371_v18 = vmul.f32 %v3362_v11, %v3347_v63  ;;  %v1995_v8 = vmul.f32 %v11551_v40, %v1971_v34  ;;  %v1996_v35 = vmul.f32 %v11551_v40, %v8844_v19  ;;  %v1961_v1 = vadd.f32 %v1953_v21, %v1919_v44  ;;  %v11553_v19 = vld [vmem:[#allocation99_spill] sm:$0xff]  ;;  %v11563_v34 = vld [vmem:[#allocation86_spill] sm:$0xff]  ;;  %v11571_v11 = vld [vmem:[#allocation128_spill] sm:$0xff] }
 0x91d   :  { %v1962_v14 = vadd.f32 %v1954_v20, %v1920_v24  ;;  %v9057_v6 = vadd.f32 %v3370_v60, %v3314_v16  ;;  %vm11552_vm11 = vcmp.lt.s32.totalorder %v4951_v47, 15  ;;  %vm11554_vm4 = vcmp.lt.s32.totalorder %v4937_v42, 1  ;;  %v11572_v16 = vld [vmem:[#allocation126_spill] sm:$0xff] }
 0x91e   :  { %v9059_v33 = vadd.f32 %v3371_v18, %v3315_v0  ;;  %v2893_v25 = vsel %vm11552_vm11, %v2888_v43, 0.0  ;;  %v2003_v15 = vadd.f32 %v1995_v8, %v1961_v1  ;;  %v2948_v10 = vsel %vm11554_vm4, %v11553_v19, %v8446_v36  ;;  %v11564_v43 = vld [vmem:[#allocation91_spill] sm:$0xff]  ;;  %v11574_v18 = vld [vmem:[#allocation120_spill] sm:$0xff]  ;;  %v11575_v8 = vld [vmem:[#allocation141_spill] sm:$0xff] }
 0x91f   :  { %v2004_v27 = vadd.f32 %v1996_v35, %v1962_v14  ;;  %v2917_v31 = vmul.f32 %v11555_v55, %v2893_v25  ;;  %vm11558_vm6 = vcmp.lt.s32.totalorder %v4937_v42, 126  ;;  %vm11561_vm0 = vcmp.lt.s32.totalorder %v4937_v42, 2  ;;  %v11578_v1 = vld [vmem:[#allocation142_spill] sm:$0xff]  ;;  %v11579_v14 = vld [vmem:[#allocation151_spill] sm:$0xff] }
 0x920   :  { %v2019_v48 = vadd.f32 %v2011_v9, %v2003_v15  ;;  %v3016_v41 = vsel %vm11558_vm6, %v11557_v2, %v11556_v13  ;;  %v3076_v5 = vsel %vm11561_vm0, %v11560_v23, %v11559_v17  ;;  %v3383_v4 = vpop.permute.xlu0 %3382  ;;  %vm11562_vm1 = vcmp.ge.s32.totalorder %v4951_v47, 1  ;;  %v3418_v53 = vpop.permute.xlu2 %3417  ;;  %v11581_v15 = vld [vmem:[#allocation134_spill] sm:$0xff] }
 0x921   :  { %v2020_v38 = vadd.f32 %v2012_v51, %v2004_v27  ;;  %v2957_v7 = vsel %vm11562_vm1, %v2948_v10, 0.0  ;;  %v3385_v54 = vpop.permute.xlu1 %3384  ;;  %v2861_v52 = vmul.f32 %v11564_v43, %v11563_v34  ;;  %vm11566_vm15 = vcmp.lt.s32.totalorder %v4937_v42, 123 }
 0x922   :  { %2076 = vmatpush.msra.mxu2 %v2019_v48  ;;  %v2981_v26 = vmul.f32 %v11565_v45, %v2957_v7  ;;  %v9090_v44 = vsel %vm11566_vm15, %v3385_v54, %v3393_v30  ;;  %vm11567_vm2 = vmmov %vm11566_vm15  ;;  %vm11568_vm13 = vcmp.lt.s32.totalorder %v4951_v47, 14  ;;  %vm11569_vm11 = vcmp.ge.s32.totalorder %v4951_v47, 2  ;;  %v11584_v7 = vld [vmem:[#allocation145_spill] sm:$0xff] }
 0x923   :  { %2105 = vmatpush.msra.mxu3 %v2020_v38  ;;  %v9094_v24 = vsel %vm11567_vm2, %v3393_v30, %v3385_v54  ;;  %v3021_v39 = vsel %vm11568_vm13, %v3016_v41, 0.0  ;;  %v3085_v21 = vsel %vm11569_vm11, %v3076_v5, 0.0  ;;  %v2925_v20 = vadd.f32 %v2917_v31, %v2861_v52  ;;  %v11576_v30 = vld [vmem:[#allocation132_spill] sm:$0xff]  ;;  %vm11585_vm13 = vmmov %vm11567_vm2 }
 0x924   :  { %v3045_v63 = vmul.f32 %v11570_v32, %v3021_v39  ;;  %vm11573_vm4 = vcmp.lt.s32.totalorder %v4937_v42, 125  ;;  %v3109_v40 = vmul.f32 %v11574_v18, %v3085_v21  ;;  %vm11577_vm6 = vcmp.lt.s32.totalorder %v4937_v42, 3  ;;  %vm11586_vm11 = vmmov %vm11567_vm2 }
 0x925   :  { %v3144_v0 = vsel %vm11573_vm4, %v11572_v16, %v11571_v11  ;;  %v2989_v60 = vadd.f32 %v2981_v26, %v2925_v20  ;;  %v3204_v35 = vsel %vm11577_vm6, %v11576_v30, %v11575_v8  ;;  %v3272_v9 = vsel %vm1148_vm10, %v11579_v14, %v11578_v1 }
 0x926   :  { %vm11580_vm0 = vcmp.lt.s32.totalorder %v4951_v47, 13  ;;  %vm11582_vm1 = vcmp.ge.s32.totalorder %v4951_v47, 3  ;;  %vm11583_vm15 = vcmp.lt.s32.totalorder %v4951_v47, 12  ;;  %vm11587_vm4 = vcmp.lt.s32.totalorder %v4947_v46, 11 }
 0x927   :  { %v3149_v51 = vsel %vm11580_vm0, %v3144_v0, 0.0  ;;  %v3053_v25 = vadd.f32 %v3045_v63, %v2989_v60  ;;  %v3213_v48 = vsel %vm11582_vm1, %v3204_v35, 0.0  ;;  %v3277_v38 = vsel %vm11583_vm15, %v3272_v9, 0.0  ;;  %v11589_v63 = vld [vmem:[#allocation149_spill] sm:$0xff]  ;;  %vm11593_vm1 = vmmov %vm11567_vm2 }
 0x928   :  { %v3173_v27 = vmul.f32 %v11581_v15, %v3149_v51  ;;  %v9117_v10 = vpop.permute.xlu0 %3388  ;;  %v3237_v54 = vmul.f32 %v11584_v7, %v3213_v48  ;;  %v9132_v26 = vpop.permute.xlu2 %3444  ;;  %vm11588_vm6 = vcmp.lt.s32.totalorder %v4951_v47, 11  ;;  %v3301_v0 = vmul.f32 %v11589_v63, %v3277_v38 }
 0x929   :  { %v3400_v31 = vsel %vm11567_vm2, %v9117_v10, %v8927_v58  ;;  %v3391_v41 = vpop.permute.xlu1 %3390  ;;  %v3117_v5 = vadd.f32 %v3109_v40, %v3053_v25  ;;  %vm11592_vm0 = vcmp.lt.s32.totalorder %v4937_v42, 127  ;;  %vm11594_vm15 = vmmov %vm11588_vm6  ;;  %vm11595_vm2 = vcmp.lt.s32.totalorder %v4947_v46, 15 }
 0x92a   :  { %v3397_v34 = vsel %vm11585_vm13, %v3383_v4, %v3391_v41  ;;  %v3401_v52 = vsel %vm11586_vm11, %v3391_v41, %v3383_v4  ;;  %v2884_v4 = vsel %vm11592_vm0, %v8378_v22, %v8420_v57  ;;  %v11596_v22 = vld [vmem:[#allocation13_spill] sm:$0xff]  ;;  %vm11598_vm13 = vcmp.lt.s32.totalorder %v4937_v42, 112 }
 0x92b   :  { %v3406_v39 = vsel %vm11587_vm4, %v3397_v34, 0.0  ;;  %v3407_v21 = vsel %vm11588_vm6, %v3401_v52, 0.0  ;;  %v3181_v20 = vadd.f32 %v3173_v27, %v3117_v5  ;;  %v2892_v41 = vsel %vm11595_vm2, %v2884_v4, 0.0  ;;  %v11597_v57 = vld [vmem:[#allocation25_spill] sm:$0xff]  ;;  %v11601_v52 = vld [vmem:[#allocation19_spill] sm:$0xff]  ;;  %v11611_v4 = vld [vmem:[#allocation38_spill] sm:$0xff] }
 0x92c   :  { %v9139_v60 = vmul.f32 %v3418_v53, %v3406_v39  ;;  %v9141_v40 = vmul.f32 %v3418_v53, %v3407_v21  ;;  %v3405_v53 = vsel %vm11594_vm15, %v3400_v31, 0.0  ;;  %vm11599_vm11 = vcmp.lt.s32.totalorder %v4937_v42, 1 }
 0x92d   :  { %v3245_v35 = vadd.f32 %v3237_v54, %v3181_v20  ;;  %v1450_v54 = vsel %vm11598_vm13, %v11597_v57, %v11596_v22  ;;  %v2952_v34 = vsel %vm11599_vm11, %v8446_v36, %v11553_v19  ;;  %v2916_v21 = vmul.f32 %v11555_v55, %v2892_v41 }
 0x92e   :  { %11590 = vst [vmem:[#allocation12_spill] sm:$0xff] %v9139_v60  ;;  %vm11602_vm4 = vcmp.lt.s32.totalorder %v4937_v42, 126  ;;  %vm11603_vm6 = vcmp.lt.s32.totalorder %v4937_v42, 2  ;;  %vm11605_vm0 = vcmp.ge.s32.totalorder %v4947_v46, 1  ;;  %vm11607_vm15 = vcmp.lt.s32.totalorder %v11344_v12, 240  ;;  %v11673_v60 = vld [vmem:[#allocation43_spill] sm:$0xff] }
 0x92f   :  { %11591 = vst [vmem:[#allocation16_spill] sm:$0xff] %v9141_v40  ;;  %v3309_v9 = vadd.f32 %v3301_v0, %v3245_v35  ;;  %v3012_v20 = vsel %vm11602_vm4, %v11556_v13, %v11557_v2  ;;  %v3080_v0 = vsel %vm11603_vm6, %v11559_v17, %v11560_v23  ;;  %v11604_v35 = vld [vmem:[#allocation14_spill] sm:$0xff]  ;;  %v2956_v19 = vsel %vm11605_vm0, %v2952_v34, 0.0  ;;  %v11608_v2 = vld [vmem:[#allocation21_spill] sm:$0xff] }
 0x930   :  { %v9143_v51 = vpop.permute.xlu0 %3394  ;;  %v9171_v31 = vpop.permute.xlu2 %3448  ;;  %v9188_v36 = vmul.f32 %v11601_v52, %v11604_v35  ;;  %v9202_v13 = vsel %vm11607_vm15, %v1450_v54, 0.0  ;;  %v11609_v17 = vld [vmem:[#allocation37_spill] sm:$0xff]  ;;  %vm11615_vm11 = vcmp.lt.s32.totalorder %v4937_v42, 16  ;;  %vm11616_vm4 = vcmp.lt.s32.totalorder %v4947_v46, 14 }
 0x931   :  { %v3403_v25 = vsel %vm11593_vm1, %v9143_v51, %v8994_v28  ;;  %v9153_v27 = vpop.permute.xlu1 %3413  ;;  %v3373_v48 = vadd.f32 %v8992_v3, %v3309_v9  ;;  %v11600_v3 = vld [vmem:[#allocation20_spill] sm:$0xff]  ;;  %vm11606_vm1 = vmmov %vm11598_vm13  ;;  %vm11612_vm13 = vcmp.lt.s32.totalorder %v4951_v47, 11  ;;  %v3020_v34 = vsel %vm11616_vm4, %v3012_v20, 0.0 }
 0x932   :  { %v3429_v38 = vmul.f32 %v9153_v27, %v3405_v53  ;;  %v9175_v39 = vmul.f32 %v11601_v52, %v11600_v3  ;;  %v9198_v55 = vsel %vm11606_vm1, %v11596_v22, %v11597_v57  ;;  %vm11610_vm2 = vmmov %vm11606_vm1  ;;  %v2860_v53 = vmul.f32 %v11564_v43, %v11611_v4  ;;  %v11613_v22 = vld [vmem:[#allocation41_spill] sm:$0xff]  ;;  %v11614_v57 = vld [vmem:[#allocation52_spill] sm:$0xff] }
 0x933   :  { %v1451_v23 = vsel %vm11610_vm2, %v11609_v17, %v11608_v2  ;;  %v3411_v41 = vsel %vm11612_vm13, %v3403_v25, 0.0  ;;  %v1515_v54 = vsel %vm11615_vm11, %v11614_v57, %v11613_v22  ;;  %vm11617_vm6 = vcmp.ge.s32.totalorder %v4947_v46, 2  ;;  %vm11618_vm0 = vmmov %vm11606_vm1  ;;  %v11619_v52 = vld [vmem:[#allocation31_spill] sm:$0xff] }
 0x934   :  { %v9161_v5 = vadd.f32 %v3429_v38, %v3373_v48  ;;  %v2980_v48 = vmul.f32 %v11565_v45, %v2956_v19  ;;  %v3084_v3 = vsel %vm11617_vm6, %v3080_v0, 0.0  ;;  %v1447_v45 = vsel %vm11618_vm0, %v11608_v2, %v11609_v17  ;;  %v11620_v25 = vld [vmem:[#allocation51_spill] sm:$0xff]  ;;  %vm11621_vm1 = vmmov %vm11615_vm11 }
 0x935   :  { %v1514_v35 = vsel %vm11621_vm1, %v11620_v25, %v11619_v52  ;;  %v2924_v19 = vadd.f32 %v2916_v21, %v2860_v53  ;;  %v3044_v4 = vmul.f32 %v11570_v32, %v3020_v34  ;;  %v1457_v20 = vsel %vm11607_vm15, %v1451_v23, 0.0  ;;  %vm11622_vm2 = vmmov %vm11621_vm1 }
 0x936   :  { %v1511_v0 = vsel %vm11622_vm2, %v11613_v22, %v11614_v57  ;;  %vm11623_vm13 = vcmp.lt.s32.totalorder %v4937_v42, 125  ;;  %vm11624_vm11 = vmmov %vm11621_vm1  ;;  %vm11625_vm4 = vcmp.ge.s32.totalorder %v4937_v42, 16  ;;  %v3108_v53 = vmul.f32 %v11574_v18, %v3084_v3  ;;  %v11629_v18 = vld [vmem:[#allocation27_spill] sm:$0xff] }
 0x937   :  { %v3140_v2 = vsel %vm11623_vm13, %v11571_v11, %v11572_v16  ;;  %v1510_v32 = vsel %vm11624_vm11, %v11619_v52, %v11620_v25  ;;  %v1520_v21 = vsel %vm11625_vm4, %v1515_v54, 0.0  ;;  %v2988_v23 = vadd.f32 %v2980_v48, %v2924_v19  ;;  %vm11627_vm6 = vmmov %vm11625_vm4  ;;  %v11633_v52 = vld [vmem:[#allocation54_spill] sm:$0xff]  ;;  %v11636_v19 = vld [vmem:[#allocation36_spill] sm:$0xff] }
 0x938   :  { %v9192_v9 = vpop.permute.xlu0 %3421  ;;  %v1518_v11 = vsel %vm11627_vm6, %v1514_v35, 0.0  ;;  %vm11628_vm0 = vcmp.lt.s32.totalorder %v4937_v42, 3  ;;  %v3268_v16 = vsel %vm1148_vm10, %v11578_v1, %v11579_v14  ;;  %v9270_v57 = vmul.f32 %v11629_v18, %v1511_v0  ;;  %v3455_v3 = vpop.permute.xlu2 %3454  ;;  %v11635_v35 = vld [vmem:[#allocation28_spill] sm:$0xff] }
 0x939   :  { %v9211_v38 = vpop.permute.xlu1 %3425  ;;  %v3052_v54 = vadd.f32 %v3044_v4, %v2988_v23  ;;  %vm11630_vm1 = vcmp.lt.s32.totalorder %v4947_v46, 13  ;;  %vm11634_vm15 = vcmp.lt.s32.totalorder %v4937_v42, 96  ;;  %vm11638_vm13 = vcmp.ge.s32.totalorder %v4947_v46, 3 }
 0x93a   :  { %v3435_v43 = vmul.f32 %v9211_v38, %v3411_v41  ;;  %v11626_v41 = vld [vmem:[#allocation11_spill] sm:$0xff]  ;;  %v3148_v34 = vsel %vm11630_vm1, %v3140_v2, 0.0  ;;  %vm11637_vm2 = vmmov %vm11634_vm15  ;;  %vm11639_vm11 = vcmp.lt.s32.totalorder %v4947_v46, 12  ;;  %vm11640_vm4 = vcmp.lt.s32.totalorder %v4937_v42, 5 }
 0x93b   :  { %v9254_v22 = vmul.f32 %v11626_v41, %v1447_v45  ;;  %v9267_v48 = vmul.f32 %v11626_v41, %v1457_v20  ;;  %v11632_v45 = vld [vmem:[#allocation29_spill] sm:$0xff]  ;;  %v3172_v14 = vmul.f32 %v11581_v15, %v3148_v34  ;;  %v1578_v4 = vsel %vm11637_vm2, %v11636_v19, %v11635_v35  ;;  %vm11642_vm6 = vmmov %vm11640_vm4 }
 0x93c   :  { %v9244_v17 = vadd.f32 %v3435_v43, %v9059_v33  ;;  %v3208_v33 = vsel %vm11628_vm0, %v11575_v8, %v11576_v30  ;;  %v9275_v43 = vmul.f32 %v11629_v18, %v1520_v21  ;;  %v11631_v8 = vld [vmem:[#allocation26_spill] sm:$0xff]  ;;  %v1579_v1 = vsel %vm11634_vm15, %v11633_v52, %v11632_v45  ;;  %vm11644_vm0 = vmmov %vm11637_vm2 }
 0x93d   :  { %v9278_v30 = vmul.f32 %v11631_v8, %v1518_v11  ;;  %v3116_v20 = vadd.f32 %v3108_v53, %v3052_v54  ;;  %v3212_v0 = vsel %vm11638_vm13, %v3208_v33, 0.0  ;;  %v3276_v2 = vsel %vm11639_vm11, %v3268_v16, 0.0  ;;  %v11645_v33 = vld [vmem:[#allocation15_spill] sm:$0xff]  ;;  %v11646_v16 = vld [vmem:[#allocation49_spill] sm:$0xff] }
 0x93e   :  { %v3236_v23 = vmul.f32 %v11584_v7, %v3212_v0  ;;  %v3336_v15 = vsel %vm1215_vm14, %v8747_v37, %v8778_v59  ;;  %v9309_v11 = vmul.f32 %v11631_v8, %v1510_v32  ;;  %v9315_v7 = vsel %vm11644_vm0, %v11632_v45, %v11633_v52  ;;  %vm11647_vm14 = vmmov %vm11644_vm0  ;;  %v11650_v8 = vld [vmem:[#allocation35_spill] sm:$0xff]  ;;  %v11651_v45 = vld [vmem:[#allocation34_spill] sm:$0xff] }
 0x93f   :  { %v1643_v59 = vsel %vm464_vm5, %v11646_v16, %v11645_v33  ;;  %v1574_v37 = vsel %vm11647_vm14, %v11635_v35, %v11636_v19  ;;  %vm11648_vm1 = vcmp.lt.s32.totalorder %v11344_v12, 224  ;;  %v3180_v18 = vadd.f32 %v3172_v14, %v3116_v20  ;;  %v11653_v35 = vld [vmem:[#allocation23_spill] sm:$0xff] }
 0x940   :  { %v9285_v25 = vpop.permute.xlu0 %3450  ;;  %v1583_v32 = vsel %vm11648_vm1, %v1578_v4, 0.0  ;;  %v3300_v54 = vmul.f32 %v11589_v63, %v3276_v2  ;;  %vm11649_vm15 = vcmp.lt.s32.totalorder %v4937_v42, 123  ;;  %v1642_v52 = vsel %vm464_vm5, %v11651_v45, %v11650_v8  ;;  %vm11652_vm2 = vmmov %vm11648_vm1 }
 0x941   :  { %v3447_v21 = vpop.permute.xlu1 %3446  ;;  %v3396_v34 = vsel %vm11649_vm15, %v8927_v58, %v9117_v10  ;;  %v9342_v14 = vsel %vm11652_vm2, %v1579_v1, 0.0  ;;  %v3340_v63 = vsel %vm1197_vm7, %v3336_v15, 0.0  ;;  %v9347_v19 = vmul.f32 %v11653_v35, %v1574_v37  ;;  %v11654_v58 = vld [vmem:[#allocation42_spill] sm:$0xff] }
 0x942   :  { %v9302_v41 = vsel %vm11640_vm4, %v3447_v21, %v3455_v3  ;;  %v9306_v53 = vsel %vm11642_vm6, %v3455_v3, %v3447_v21  ;;  %v1639_v3 = vsel %vm464_vm5, %v11645_v33, %v11646_v16  ;;  %v11655_v10 = vld [vmem:[#allocation58_spill] sm:$0xff]  ;;  %v3244_v20 = vadd.f32 %v3236_v23, %v3180_v18  ;;  %v3478_v33 = vpop.permute.xlu2 %3477  ;;  %v11658_v16 = vld [vmem:[#allocation64_spill] sm:$0xff]  ;;  %v11659_v23 = vld [vmem:[#allocation63_spill] sm:$0xff] }
 0x943   :  { %11641 = vst [vmem:[#allocation8_spill] sm:$0xff] %v9302_v41  ;;  %v1706_v4 = vsel %vm507_vm12, %v11655_v10, %v11654_v58  ;;  %v3364_v0 = vmul.f32 %v8985_v56, %v3340_v63  ;;  %v9355_v2 = vmul.f32 %v11653_v35, %v1583_v32  ;;  %v9361_v1 = vsel %vm464_vm5, %v11650_v8, %v11651_v45 }
 0x944   :  { %11643 = vst [vmem:[#allocation47_spill] sm:$0xff] %v9306_v53  ;;  %vm11656_vm7 = vcmp.ge.s32.totalorder %v4937_v42, 32  ;;  %vm11657_vm13 = vcmp.lt.s32.totalorder %v4947_v46, 11  ;;  %v1707_v56 = vsel %vm507_vm12, %v11659_v23, %v11658_v16  ;;  %v3308_v32 = vadd.f32 %v3300_v54, %v3244_v20  ;;  %v11667_v20 = vld [vmem:[#allocation44_spill] sm:$0xff]  ;;  %v11674_v53 = vld [vmem:[#allocation66_spill] sm:$0xff] }
 0x945   :  { %v1648_v21 = vsel %vm11656_vm7, %v1643_v59, 0.0  ;;  %v3404_v15 = vsel %vm11657_vm13, %v3396_v34, 0.0  ;;  %vm11660_vm11 = vmmov %vm11656_vm7  ;;  %v9382_v59 = vsel %vm507_vm12, %v11654_v58, %v11655_v10  ;;  %v11661_v34 = vld [vmem:[#allocation40_spill] sm:$0xff]  ;;  %vm11662_vm4 = vcmp.lt.s32.totalorder %v11344_v12, 208 }
 0x946   :  { %v9373_v37 = vsel %vm11660_vm11, %v1642_v52, 0.0  ;;  %v3428_v18 = vmul.f32 %v9153_v27, %v3404_v15  ;;  %v9385_v45 = vmul.f32 %v11661_v34, %v1648_v21  ;;  %v1711_v63 = vsel %vm11662_vm4, %v1706_v4, 0.0  ;;  %vm11666_vm1 = vmmov %vm11662_vm4  ;;  %v11668_v21 = vld [vmem:[#allocation55_spill] sm:$0xff] }
 0x947   :  { %vm11663_vm6 = vcmp.ge.s32.totalorder %v4937_v42, 80  ;;  %v9397_v27 = vsel %vm507_vm12, %v11658_v16, %v11659_v23  ;;  %v3372_v35 = vadd.f32 %v3364_v0, %v3308_v32  ;;  %vm11664_vm0 = vcmp.lt.s32.totalorder %v4937_v42, 5 }
 0x948   :  { %v9376_v8 = vpop.permute.xlu0 %3456  ;;  %v9391_v52 = vsel %vm11663_vm6, %v1706_v4, 0.0  ;;  %vm11665_vm14 = vmmov %vm11664_vm0  ;;  %v1713_v4 = vsel %vm11666_vm1, %v1707_v56, 0.0  ;;  %vm11669_vm15 = vcmp.lt.s32.totalorder %v4937_v42, 48  ;;  %vm11670_vm2 = vcmp.ge.s32.totalorder %v4947_v46, 5 }
 0x949   :  { %v3453_v54 = vpop.permute.xlu1 %3452  ;;  %v1770_v15 = vsel %vm11669_vm15, %v11668_v21, %v11667_v20  ;;  %vm11671_vm7 = vcmp.ge.s32.totalorder %v4951_v47, 5  ;;  %vm11672_vm13 = vcmp.lt.s32.totalorder %v4937_v42, 123  ;;  %v9420_v40 = vmul.f32 %v11661_v34, %v1639_v3  ;;  %vm11676_vm11 = vmmov %vm11669_vm15 }
 0x94a   :  { %v3460_v58 = vsel %vm11664_vm0, %v9132_v26, %v3453_v54  ;;  %v3464_v10 = vsel %vm11665_vm14, %v3453_v54, %v9132_v26  ;;  %v3399_v23 = vsel %vm11672_vm13, %v8994_v28, %v9143_v51  ;;  %v3436_v26 = vadd.f32 %v3428_v18, %v3372_v35  ;;  %vm11677_vm4 = vmmov %vm11663_vm6  ;;  %v11679_v28 = vld [vmem:[#allocation73_spill] sm:$0xff] }
 0x94b   :  { %v3468_v16 = vsel %vm11670_vm2, %v3464_v10, 0.0  ;;  %v3469_v0 = vsel %vm11671_vm7, %v3460_v58, 0.0  ;;  %v9424_v41 = vmul.f32 %v11673_v60, %v9397_v27  ;;  %v11675_v10 = vld [vmem:[#allocation65_spill] sm:$0xff]  ;;  %v1969_v49 = vsel %vm11677_vm4, %v1707_v56, 0.0  ;;  %vm11680_vm6 = vmmov %vm11676_vm11 }
 0x94c   :  { %v3492_v32 = vmul.f32 %v3478_v33, %v3468_v16  ;;  %v3493_v54 = vmul.f32 %v3478_v33, %v3469_v0  ;;  %v1771_v58 = vsel %vm11676_vm11, %v11675_v10, %v11674_v53  ;;  %v1838_v51 = vsel %vm1832_vm3, %v11679_v28, %v11678_v62  ;;  %v11684_v56 = vld [vmem:[#allocation53_spill] sm:$0xff]  ;;  %vm11688_vm1 = vmmov %vm11680_vm6 }
 0x94d   :  { %v9440_v3 = vsel %vm11680_vm6, %v11667_v20, %v11668_v21  ;;  %v9448_v34 = vmul.f32 %v11673_v60, %v1713_v4  ;;  %v9452_v35 = vmul.f32 %v11684_v56, %v9382_v59  ;;  %vm11685_vm0 = vcmp.ge.s32.totalorder %v4937_v42, 48 }
 0x94e   :  { %11681 = vst [vmem:[#allocation61_spill] sm:$0xff] %v9440_v3  ;;  %v9442_v33 = vadd.f32 %v3492_v32, %v3436_v26  ;;  %v9445_v18 = vadd.f32 %v3493_v54, %v9161_v5  ;;  %v1774_v16 = vsel %vm11685_vm0, %v1770_v15, 0.0  ;;  %vm11686_vm14 = vcmp.lt.s32.totalorder %v4947_v46, 11  ;;  %v11693_v26 = vld [vmem:[#allocation68_spill] sm:$0xff]  ;;  %v11694_v32 = vld [vmem:[#allocation62_spill] sm:$0xff]  ;;  %vm11695_vm2 = vmmov %vm11685_vm0 }
 0x94f   :  { %v3410_v0 = vsel %vm11686_vm14, %v3399_v23, 0.0  ;;  %v9459_v20 = vmul.f32 %v11684_v56, %v1711_v63  ;;  %v9465_v5 = vsel %vm11688_vm1, %v11674_v53, %v11675_v10  ;;  %vm11689_vm15 = vcmp.lt.s32.totalorder %v11344_v12, 176  ;;  %v11691_v23 = vld [vmem:[#allocation56_spill] sm:$0xff]  ;;  %v3490_v56 = vpop.permute.xlu2 %3489 }
 0x950   :  { %11682 = vst [vmem:[#allocation18_spill] sm:$0xff] %v9442_v33  ;;  %v1928_v60 = vsel %vm11689_vm15, %v1771_v58, 0.0  ;;  %v3434_v4 = vmul.f32 %v9211_v38, %v3410_v0  ;;  %3540 = vrot.lane.b32.xlu2 %v9442_v33, %s4694_s17  ;;  %v9472_v21 = vpop.permute.xlu0 %3481  ;;  %v9476_v63 = vmul.f32 %v11691_v23, %v9440_v3  ;;  %v1837_v53 = vsel %vm1832_vm3, %v11694_v32, %v11693_v26  ;;  %vm11697_vm7 = vmmov %vm11689_vm15 }
 0x951   :  { %11683 = vst [vmem:[#allocation39_spill] sm:$0xff] %v9445_v18  ;;  %v1844_v54 = vsel %vm1815_vm8, %v1838_v51, 0.0  ;;  %v9486_v38 = vsel %vm11695_vm2, %v1771_v58, 0.0  ;;  %v3459_v10 = vpop.permute.xlu1 %3458  ;;  %v9489_v0 = vmul.f32 %v11691_v23, %v1774_v16  ;;  %v9493_v33 = vsel %vm11697_vm7, %v1770_v15, 0.0 }
 0x952   :  { %11687 = vst [vmem:[#allocation45_spill] sm:$0xff] %v9459_v20  ;;  %vm11699_vm13 = vcmp.lt.s32.totalorder %v4937_v42, 5  ;;  %v9505_v58 = vsel %vm1832_vm3, %v11693_v26, %v11694_v32  ;;  %v9511_v15 = vsel %vm1832_vm3, %v11678_v62, %v11679_v28  ;;  %vm11702_vm4 = vcmp.ge.s32.totalorder %v4947_v46, 5  ;;  %v11704_v32 = vld [vmem:[#allocation71_spill] sm:$0xff] }
 0x953   :  { %11690 = vst [vmem:[#allocation32_spill] sm:$0xff] %v9472_v21  ;;  %v3463_v18 = vsel %vm11699_vm13, %v9285_v25, %v3459_v10  ;;  %vm11700_vm11 = vmmov %vm11699_vm13  ;;  %vm11703_vm6 = vcmp.ge.s32.totalorder %v4951_v47, 5  ;;  %v9525_v62 = vsel %vm1815_vm8, %v1837_v53, 0.0  ;;  %v9529_v28 = vmul.f32 %v11704_v32, %v9505_v58 }
 0x954   :  { %11692 = vst [vmem:[#allocation50_spill] sm:$0xff] %v9476_v63  ;;  %v3467_v21 = vsel %vm11700_vm11, %v3459_v10, %v9285_v25  ;;  %v3475_v23 = vsel %vm11703_vm6, %v3463_v18, 0.0  ;;  %v1883_v25 = vsel %vm1881_vm9, %v1837_v53, 0.0  ;;  %v3442_v10 = vadd.f32 %v3434_v4, %v9057_v6 }
 0x955   :  { %11696 = vst [vmem:[#allocation60_spill] sm:$0xff] %v9489_v0  ;;  %v3474_v16 = vsel %vm11702_vm4, %v3467_v21, 0.0  ;;  %v3499_v26 = vmul.f32 %v3490_v56, %v3475_v23  ;;  %v9521_v3 = vmul.f32 %v11704_v32, %v1883_v25  ;;  %v9533_v18 = vsel %vm1881_vm9, %v1838_v51, 0.0  ;;  %v11708_v21 = vld [vmem:[#allocation74_spill] sm:$0xff]  ;;  %v11713_v25 = vld [vmem:[#allocation92_spill] sm:$0xff] }
 0x956   :  { %11698 = vst [vmem:[#allocation48_spill] sm:$0xff] %v9493_v33  ;;  %v3498_v33 = vmul.f32 %v3490_v56, %v3474_v16  ;;  %v9536_v61 = vmul.f32 %v11708_v21, %v1844_v54  ;;  %v9540_v6 = vmul.f32 %v11708_v21, %v9511_v15  ;;  %v11711_v56 = vld [vmem:[#allocation75_spill] sm:$0xff]  ;;  %v11712_v51 = vld [vmem:[#allocation98_spill] sm:$0xff]  ;;  %vm11714_vm0 = vcmp.lt.s32.totalorder %v4937_v42, 127  ;;  %v11720_v32 = vld [vmem:[#allocation100_spill] sm:$0xff] }
 0x957   :  { %11701 = vst [vmem:[#allocation67_spill] sm:$0xff] %v9505_v58  ;;  %v9545_v53 = vadd.f32 %v3499_v26, %v9244_v17  ;;  %v9549_v16 = vmul.f32 %v11711_v56, %v9465_v5  ;;  %v9552_v23 = vmul.f32 %v11711_v56, %v1928_v60  ;;  %v2886_v54 = vsel %vm11714_vm0, %v11713_v25, %v11712_v51  ;;  %vm11715_vm14 = vmmov %vm11714_vm0  ;;  %v11716_v17 = vld [vmem:[#allocation76_spill] sm:$0xff] }
 0x958   :  { %11705 = vst [vmem:[#allocation33_spill] sm:$0xff] %v9521_v3  ;;  %v9542_v4 = vadd.f32 %v3498_v33, %v3442_v10  ;;  %v2890_v33 = vsel %vm11715_vm14, %v11712_v51, %v11713_v25  ;;  %v9564_v10 = vmul.f32 %v11716_v17, %v9391_v52  ;;  %v9568_v26 = vmul.f32 %v11716_v17, %v9382_v59  ;;  %v11719_v60 = vld [vmem:[#allocation104_spill] sm:$0xff]  ;;  %v11723_v51 = vld [vmem:[#allocation82_spill] sm:$0xff]  ;;  %v11724_v25 = vld [vmem:[#allocation85_spill] sm:$0xff] }
 0x959   :  { %11706 = vst [vmem:[#allocation59_spill] sm:$0xff] %v9525_v62  ;;  %vm11721_vm1 = vcmp.lt.s32.totalorder %v4937_v42, 1  ;;  %v9581_v52 = vmul.f32 %v11723_v51, %v1969_v49  ;;  %v9585_v59 = vmul.f32 %v11723_v51, %v9397_v27  ;;  %v11725_v17 = vld [vmem:[#allocation90_spill] sm:$0xff]  ;;  %vm11729_vm2 = vcmp.lt.s32.totalorder %v4947_v46, 15  ;;  %v11733_v51 = vld [vmem:[#allocation93_spill] sm:$0xff]  ;;  %vm11735_vm13 = vmmov %vm11714_vm0 }
 0x95a   :  { %11707 = vst [vmem:[#allocation70_spill] sm:$0xff] %v9529_v28  ;;  %v2950_v21 = vsel %vm11721_vm1, %v11720_v32, %v11719_v60  ;;  %vm11722_vm15 = vmmov %vm11721_vm1  ;;  %3546 = vrot.lane.b32.xlu0 %v9542_v4, %s4694_s17  ;;  %v9589_v12 = vmul.f32 %v11725_v17, %v11724_v25  ;;  %vm11730_vm7 = vcmp.lt.s32.totalorder %v4951_v47, 15  ;;  %v11732_v28 = vld [vmem:[#allocation24_spill] sm:$0xff]  ;;  %v11734_v3 = vld [vmem:[#allocation94_spill] sm:$0xff]  ;;  %vm11737_vm4 = vcmp.ge.s32.totalorder %v4947_v46, 1 }
 0x95b   :  { %11709 = vst [vmem:[#allocation72_spill] sm:$0xff] %v9542_v4  ;;  %v2954_v56 = vsel %vm11722_vm15, %v11719_v60, %v11720_v32  ;;  %v2896_v60 = vsel %vm11729_vm2, %v2886_v54, 0.0  ;;  %v2897_v49 = vsel %vm11730_vm7, %v2890_v33, 0.0  ;;  %v11731_v32 = vld [vmem:[#allocation17_spill] sm:$0xff]  ;;  %v9605_v25 = vsel %vm11735_vm13, %v11734_v3, %v11733_v51  ;;  %vm11736_vm11 = vmmov %vm11714_vm0 }
 0x95c   :  { %11710 = vst [vmem:[#allocation69_spill] sm:$0xff] %v9545_v53  ;;  %v11727_v53 = vld [vmem:[#allocation88_spill] sm:$0xff]  ;;  %v2960_v54 = vsel %vm11737_vm4, %v2954_v56, 0.0  ;;  %vm11738_vm6 = vcmp.ge.s32.totalorder %v4951_v47, 1  ;;  %vm11741_vm0 = vcmp.lt.s32.totalorder %v4937_v42, 126  ;;  %vm11747_vm1 = vcmp.lt.s32.totalorder %v4937_v42, 2 }
 0x95d   :  { %11717 = vst [vmem:[#allocation77_spill] sm:$0xff] %v9564_v10  ;;  %v1410_v10 = vpop.permute.xlu0 %1409  ;;  %v2961_v33 = vsel %vm11738_vm6, %v2950_v21, 0.0  ;;  %vm11742_vm14 = vmmov %vm11741_vm0  ;;  %v11744_v21 = vld [vmem:[#allocation107_spill] sm:$0xff]  ;;  %vm11750_vm2 = vcmp.lt.s32.totalorder %v4947_v46, 14  ;;  %vm11751_vm7 = vcmp.lt.s32.totalorder %v4951_v47, 14  ;;  %vm11753_vm13 = vcmp.ge.s32.totalorder %v4947_v46, 2 }
 0x95e   :  { %11718 = vst [vmem:[#allocation78_spill] sm:$0xff] %v9568_v26  ;;  %v9593_v26 = vmul.f32 %v11725_v17, %v11727_v53  ;;  %v1424_v4 = vmul.f32 %v1410_v10, %v11731_v32  ;;  %v1425_v27 = vmul.f32 %v1410_v10, %v11732_v28  ;;  %v9611_v53 = vsel %vm11736_vm11, %v11733_v51, %v11734_v3  ;;  %v11739_v17 = vld [vmem:[#allocation108_spill] sm:$0xff]  ;;  %v11740_v28 = vld [vmem:[#allocation111_spill] sm:$0xff]  ;;  %v11743_v51 = vld [vmem:[#allocation97_spill] sm:$0xff] }
 0x95f   :  { %11726 = vst [vmem:[#allocation99_spill] sm:$0xff] %v9589_v12  ;;  %v3014_v10 = vsel %vm11741_vm0, %v11740_v28, %v11739_v17  ;;  %v3018_v32 = vsel %vm11742_vm14, %v11739_v17, %v11740_v28  ;;  %v2920_v0 = vmul.f32 %v11743_v51, %v2896_v60  ;;  %v2921_v56 = vmul.f32 %v11743_v51, %v2897_v49  ;;  %v11746_v12 = vld [vmem:[#allocation115_spill] sm:$0xff]  ;;  %vm11748_vm15 = vmmov %vm11747_vm1  ;;  %v11749_v60 = vld [vmem:[#allocation101_spill] sm:$0xff] }
 0x960   :  { %11728 = vst [vmem:[#allocation95_spill] sm:$0xff] %v9593_v26  ;;  %v1488_v63 = vadd.f32 %v9254_v22, %v1424_v4  ;;  %v1489_v3 = vadd.f32 %v9267_v48, %v1425_v27  ;;  %v1608_v62 = vmul.f32 %v11744_v21, %v9315_v7  ;;  %v1609_v58 = vmul.f32 %v11744_v21, %v9342_v14  ;;  %v11745_v26 = vld [vmem:[#allocation123_spill] sm:$0xff]  ;;  %v11752_v17 = vld [vmem:[#allocation117_spill] sm:$0xff] }
 0x961   :  { %v3078_v20 = vsel %vm11747_vm1, %v11746_v12, %v11745_v26  ;;  %v3082_v22 = vsel %vm11748_vm15, %v11745_v26, %v11746_v12  ;;  %v2984_v49 = vmul.f32 %v11749_v60, %v2960_v54  ;;  %v2985_v7 = vmul.f32 %v11749_v60, %v2961_v33  ;;  %v11756_v26 = vld [vmem:[#allocation129_spill] sm:$0xff] }
 0x962   :  { %v1552_v48 = vadd.f32 %v9275_v43, %v1488_v63  ;;  %v1553_v4 = vadd.f32 %v9270_v57, %v1489_v3  ;;  %v3024_v14 = vsel %vm11750_vm2, %v3014_v10, 0.0  ;;  %v3025_v27 = vsel %vm11751_vm7, %v3018_v32, 0.0  ;;  %v11755_v63 = vld [vmem:[#allocation133_spill] sm:$0xff]  ;;  %v11759_v32 = vld [vmem:[#allocation87_spill] sm:$0xff] }
 0x963   :  { %v3048_v28 = vmul.f32 %v11752_v17, %v3024_v14  ;;  %v3049_v51 = vmul.f32 %v11752_v17, %v3025_v27  ;;  %v3088_v43 = vsel %vm11753_vm13, %v3082_v22, 0.0  ;;  %vm11754_vm11 = vcmp.ge.s32.totalorder %v4951_v47, 2  ;;  %v11760_v22 = vld [vmem:[#allocation89_spill] sm:$0xff]  ;;  %v11762_v14 = vld [vmem:[#allocation136_spill] sm:$0xff] }
 0x964   :  { %v1616_v21 = vadd.f32 %v1608_v62, %v1552_v48  ;;  %v1617_v12 = vadd.f32 %v1609_v58, %v1553_v4  ;;  %v3089_v57 = vsel %vm11754_vm11, %v3078_v20, 0.0  ;;  %vm11757_vm4 = vcmp.lt.s32.totalorder %v4937_v42, 125  ;;  %v11761_v20 = vld [vmem:[#allocation127_spill] sm:$0xff] }
 0x965   :  { %v3142_v54 = vsel %vm11757_vm4, %v11756_v26, %v11755_v63  ;;  %vm11758_vm6 = vmmov %vm11757_vm4  ;;  %v2853_v10 = vpop.permute.xlu0 %2852  ;;  %v3112_v4 = vmul.f32 %v11761_v20, %v3088_v43  ;;  %v3113_v60 = vmul.f32 %v11761_v20, %v3089_v57  ;;  %v1800_v27 = vmul.f32 %v11762_v14, %v9486_v38  ;;  %v11766_v57 = vld [vmem:[#allocation140_spill] sm:$0xff]  ;;  %v11772_v20 = vld [vmem:[#allocation130_spill] sm:$0xff] }
 0x966   :  { %v3146_v33 = vsel %vm11758_vm6, %v11755_v63, %v11756_v26  ;;  %v1680_v62 = vadd.f32 %v9385_v45, %v1616_v21  ;;  %v1681_v58 = vadd.f32 %v9420_v40, %v1617_v12  ;;  %v2864_v3 = vmul.f32 %v2853_v10, %v11759_v32  ;;  %v11765_v26 = vld [vmem:[#allocation137_spill] sm:$0xff] }
 0x967   :  { %v2865_v48 = vmul.f32 %v2853_v10, %v11760_v22  ;;  %v1801_v17 = vmul.f32 %v11762_v14, %v9465_v5  ;;  %vm11763_vm0 = vcmp.lt.s32.totalorder %v4947_v46, 13  ;;  %vm11764_vm14 = vcmp.lt.s32.totalorder %v4951_v47, 13  ;;  %v11769_v10 = vld [vmem:[#allocation152_spill] sm:$0xff] }
 0x968   :  { %v1744_v63 = vadd.f32 %v9424_v41, %v1680_v62  ;;  %v1745_v45 = vadd.f32 %v9448_v34, %v1681_v58  ;;  %v2928_v21 = vadd.f32 %v2920_v0, %v2864_v3  ;;  %v3152_v12 = vsel %vm11763_vm0, %v3142_v54, 0.0  ;;  %v11770_v62 = vld [vmem:[#allocation144_spill] sm:$0xff]  ;;  %v11771_v58 = vld [vmem:[#allocation46_spill] sm:$0xff] }
 0x969   :  { %v2929_v40 = vadd.f32 %v2921_v56, %v2865_v48  ;;  %v3153_v43 = vsel %vm11764_vm14, %v3146_v33, 0.0  ;;  %vm11767_vm1 = vcmp.lt.s32.totalorder %v4937_v42, 3  ;;  %v3270_v54 = vsel %vm1148_vm10, %v11770_v62, %v11769_v10 }
 0x96a   :  { %v3206_v38 = vsel %vm11767_vm1, %v11766_v57, %v11765_v26  ;;  %vm11768_vm15 = vmmov %vm11767_vm1  ;;  %v2992_v5 = vadd.f32 %v2984_v49, %v2928_v21  ;;  %v1808_v0 = vadd.f32 %v1800_v27, %v1744_v63  ;;  %v1809_v56 = vadd.f32 %v1801_v17, %v1745_v45  ;;  %v11775_v21 = vld [vmem:[#allocation146_spill] sm:$0xff] }
 0x96b   :  { %v3210_v41 = vsel %vm11768_vm15, %v11765_v26, %v11766_v57  ;;  %v2993_v34 = vadd.f32 %v2985_v7, %v2929_v40  ;;  %v3274_v33 = vsel %vm1148_vm10, %v11769_v10, %v11770_v62  ;;  %v1909_v32 = vmul.f32 %v11771_v58, %v9533_v18  ;;  %v2010_v10 = vld [vmem:[%s10673_s5 + $0x18] sm:$0xff] }
 0x96c   :  { %v1910_v3 = vmul.f32 %v11771_v58, %v9511_v15  ;;  %v3056_v49 = vadd.f32 %v3048_v28, %v2992_v5  ;;  %v1875_v22 = vadd.f32 %v9540_v6, %v1808_v0  ;;  %v1876_v48 = vadd.f32 %v9536_v61, %v1809_v56  ;;  %v11781_v5 = vld [vmem:[#allocation154_spill] sm:$0xff] }
 0x96d   :  { %v3057_v7 = vadd.f32 %v3049_v51, %v2993_v34  ;;  %v3176_v14 = vmul.f32 %v11772_v20, %v3152_v12  ;;  %v3177_v27 = vmul.f32 %v11772_v20, %v3153_v43  ;;  %vm11773_vm2 = vcmp.ge.s32.totalorder %v4947_v46, 3  ;;  %v9707_v18 = vpop.permute.xlu0 %3524  ;;  %v2009_v56 = vld [vmem:[%s10673_s5 + $0x10] sm:$0xff] }
 0x96e   :  { %v3216_v17 = vsel %vm11773_vm2, %v3210_v41, 0.0  ;;  %vm11774_vm7 = vcmp.ge.s32.totalorder %v4951_v47, 3  ;;  %v3120_v45 = vadd.f32 %v3112_v4, %v3056_v49  ;;  %v1917_v28 = vadd.f32 %v1909_v32, %v1875_v22  ;;  %v11778_v4 = vld [vmem:[#allocation102_spill] sm:$0xff] }
 0x96f   :  { %v3217_v63 = vsel %vm11774_vm7, %v3206_v38, 0.0  ;;  %v3121_v15 = vadd.f32 %v3113_v60, %v3057_v7  ;;  %v1918_v51 = vadd.f32 %v1910_v3, %v1876_v48  ;;  %v3240_v6 = vmul.f32 %v11775_v21, %v3216_v17  ;;  %v11779_v60 = vld [vmem:[#allocation96_spill] sm:$0xff]  ;;  %v11787_v22 = vld [vmem:[#allocation114_spill] sm:$0xff]  ;;  %v11788_v48 = vld [vmem:[#allocation109_spill] sm:$0xff] }
 0x970   :  { %v3241_v61 = vmul.f32 %v11775_v21, %v3217_v63  ;;  %vm11776_vm13 = vcmp.lt.s32.totalorder %v4947_v46, 12  ;;  %vm11777_vm11 = vcmp.lt.s32.totalorder %v4951_v47, 12  ;;  %v3184_v43 = vadd.f32 %v3176_v14, %v3120_v45 }
 0x971   :  { %v3280_v40 = vsel %vm11776_vm13, %v3270_v54, 0.0  ;;  %v3281_v12 = vsel %vm11777_vm11, %v3274_v33, 0.0  ;;  %v3185_v26 = vadd.f32 %v3177_v27, %v3121_v15  ;;  %v1959_v57 = vadd.f32 %v9549_v16, %v1917_v28 }
 0x972   :  { %v1960_v38 = vadd.f32 %v9552_v23, %v1918_v51  ;;  %vm11780_vm4 = vcmp.lt.s32.totalorder %v4937_v42, 1  ;;  %v3304_v34 = vmul.f32 %v11781_v5, %v3280_v40  ;;  %v3305_v0 = vmul.f32 %v11781_v5, %v3281_v12 }
 0x973   :  { %v2949_v41 = vsel %vm11780_vm4, %v11779_v60, %v11778_v4  ;;  %vm11782_vm6 = vcmp.lt.s32.totalorder %v4947_v46, 15  ;;  %v3248_v23 = vadd.f32 %v3240_v6, %v3184_v43  ;;  %v3249_v62 = vadd.f32 %v3241_v61, %v3185_v26  ;;  %vm11783_vm0 = vmmov %vm11780_vm4 }
 0x974   :  { %v2894_v16 = vsel %vm11782_vm6, %v9605_v25, 0.0  ;;  %v2001_v54 = vadd.f32 %v9581_v52, %v1959_v57  ;;  %v2002_v33 = vadd.f32 %v9585_v59, %v1960_v38  ;;  %v2953_v58 = vsel %vm11783_vm0, %v11778_v4, %v11779_v60  ;;  %v11799_v4 = vld [vmem:[#allocation118_spill] sm:$0xff]  ;;  %v11800_v60 = vld [vmem:[#allocation121_spill] sm:$0xff] }
 0x975   :  { %vm11784_vm14 = vcmp.lt.s32.totalorder %v4947_v46, 11  ;;  %vm11785_vm1 = vcmp.lt.s32.totalorder %v4937_v42, 5  ;;  %v3312_v59 = vadd.f32 %v3304_v34, %v3248_v23  ;;  %v3313_v3 = vadd.f32 %v3305_v0, %v3249_v62  ;;  %v1464_v15 = vpop.permute.xlu0 %1463  ;;  %v11803_v0 = vld [vmem:[#allocation110_spill] sm:$0xff] }
 0x976   :  { %v3408_v32 = vsel %vm11784_vm14, %v9090_v44, 0.0  ;;  %v3462_v25 = vsel %vm11785_vm1, %v9171_v31, %v9376_v8  ;;  %vm11786_vm15 = vmmov %vm11785_vm1  ;;  %v2017_v49 = vadd.f32 %v2009_v56, %v2001_v54  ;;  %v2018_v7 = vadd.f32 %v2010_v10, %v2002_v33 }
 0x977   :  { %v3466_v52 = vsel %vm11786_vm15, %v9376_v8, %v9171_v31  ;;  %vm11789_vm2 = vcmp.lt.s32.totalorder %v4937_v42, 126  ;;  %vm11791_vm13 = vcmp.lt.s32.totalorder %v4951_v47, 11  ;;  %v3432_v31 = vmul.f32 %v9192_v9, %v3408_v32  ;;  %v3486_v8 = vpop.permute.xlu1 %3485 }
 0x978   :  { %v3013_v20 = vsel %vm11789_vm2, %v11788_v48, %v11787_v22  ;;  %vm11790_vm7 = vmmov %vm11789_vm2  ;;  %v3409_v14 = vsel %vm11791_vm13, %v9094_v24, 0.0  ;;  %vm11792_vm11 = vcmp.ge.s32.totalorder %v4947_v46, 1  ;;  %v3376_v63 = vadd.f32 %v8949_v50, %v3312_v59  ;;  %2077 = vmatpush.msra.mxu2 %v2017_v49  ;;  %2106 = vmatpush.msra.mxu3 %v2018_v7  ;;  %v11812_v49 = vld [vmem:[#allocation125_spill] sm:$0xff] }
 0x979   :  { %v3017_v44 = vsel %vm11790_vm7, %v11787_v22, %v11788_v48  ;;  %v2958_v27 = vsel %vm11792_vm11, %v2953_v58, 0.0  ;;  %v3433_v17 = vmul.f32 %v9192_v9, %v3409_v14  ;;  %v3377_v45 = vadd.f32 %v8951_v29, %v3313_v3  ;;  %v11813_v48 = vld [vmem:[#allocation143_spill] sm:$0xff] }
 0x97a   :  { %vm11793_vm4 = vcmp.ge.s32.totalorder %v4947_v46, 5  ;;  %vm11794_vm6 = vcmp.ge.s32.totalorder %v4951_v47, 5  ;;  %v1478_v51 = vmul.f32 %v1464_v15, %v9198_v55  ;;  %v1479_v21 = vmul.f32 %v1464_v15, %v9202_v13  ;;  %v11798_v55 = vld [vmem:[#allocation106_spill] sm:$0xff] }
 0x97b   :  { %v3472_v28 = vsel %vm11793_vm4, %v3466_v52, 0.0  ;;  %v3473_v24 = vsel %vm11794_vm6, %v3462_v25, 0.0  ;;  %v3440_v9 = vadd.f32 %v3432_v31, %v3376_v63  ;;  %v3441_v40 = vadd.f32 %v3433_v17, %v3377_v45  ;;  %v11808_v25 = vld [vmem:[#allocation131_spill] sm:$0xff]  ;;  %v11809_v52 = vld [vmem:[#allocation124_spill] sm:$0xff] }
 0x97c   :  { %v3496_v6 = vmul.f32 %v3486_v8, %v3472_v28  ;;  %v3497_v61 = vmul.f32 %v3486_v8, %v3473_v24  ;;  %vm11795_vm0 = vcmp.lt.s32.totalorder %v4947_v46, 14  ;;  %vm11796_vm14 = vcmp.lt.s32.totalorder %v4951_v47, 14  ;;  %v11817_v8 = vld [vmem:[#allocation45_spill] sm:$0xff]  ;;  %v11819_v63 = vld [vmem:[#allocation95_spill] sm:$0xff] }
 0x97d   :  { %v3022_v50 = vsel %vm11795_vm0, %v3013_v20, 0.0  ;;  %v3023_v29 = vsel %vm11796_vm14, %v3017_v44, 0.0  ;;  %v1486_v12 = vadd.f32 %v1478_v51, %v9175_v39  ;;  %v1487_v43 = vadd.f32 %v1479_v21, %v9188_v36  ;;  %v11814_v20 = vld [vmem:[#allocation138_spill] sm:$0xff]  ;;  %v11822_v24 = vld [vmem:[#allocation67_spill] sm:$0xff]  ;;  %v11823_v51 = vld [vmem:[#allocation148_spill] sm:$0xff] }
 0x97e   :  { %vm11797_vm1 = vcmp.ge.s32.totalorder %v4951_v47, 1  ;;  %v2982_v57 = vmul.f32 %v11798_v55, %v2958_v27  ;;  %v9781_v13 = vadd.f32 %v3496_v6, %v3440_v9  ;;  %v9783_v38 = vadd.f32 %v3497_v61, %v3441_v40  ;;  %v11824_v6 = vld [vmem:[#allocation59_spill] sm:$0xff]  ;;  %v11825_v40 = vld [vmem:[#allocation60_spill] sm:$0xff] }
 0x97f   :  { %v2959_v26 = vsel %vm11797_vm1, %v2949_v41, 0.0  ;;  %vm11801_vm15 = vcmp.lt.s32.totalorder %v4937_v42, 2  ;;  %v1550_v36 = vadd.f32 %v9278_v30, %v1486_v12  ;;  %v1551_v41 = vadd.f32 %v9309_v11, %v1487_v43  ;;  %v11805_v30 = vld [vmem:[#allocation119_spill] sm:$0xff] }
 0x980   :  { %v3077_v5 = vsel %vm11801_vm15, %v11800_v60, %v11799_v4  ;;  %vm11802_vm2 = vmmov %vm11801_vm15  ;;  %v2983_v34 = vmul.f32 %v11798_v55, %v2959_v26  ;;  %v3046_v56 = vmul.f32 %v11803_v0, %v3022_v50  ;;  %v3047_v10 = vmul.f32 %v11803_v0, %v3023_v29  ;;  %3552 = vrot.lane.b32.xlu0 %v9783_v38, %s4694_s17  ;;  %v11826_v29 = vld [vmem:[#allocation50_spill] sm:$0xff]  ;;  %v11829_v55 = vld [vmem:[#allocation147_spill] sm:$0xff] }
 0x981   :  { %v3081_v39 = vsel %vm11802_vm2, %v11799_v4, %v11800_v60  ;;  %3544 = vrot.lane.b32.xlu2 %v9781_v13, %s4694_s17  ;;  %vm11804_vm7 = vcmp.lt.s32.totalorder %v4951_v47, 15  ;;  %v1670_v62 = vmul.f32 %v11805_v30, %v9373_v37  ;;  %v1671_v11 = vmul.f32 %v11805_v30, %v9361_v1  ;;  %v2906_v37 = vpop.permute.xlu0 %2905  ;;  %v11830_v4 = vld [vmem:[#allocation150_spill] sm:$0xff]  ;;  %v11832_v0 = vld [vmem:[#allocation61_spill] sm:$0xff] }
 0x982   :  { %v2895_v23 = vsel %vm11804_vm7, %v9611_v53, 0.0  ;;  %v1614_v54 = vadd.f32 %v9347_v19, %v1550_v36  ;;  %v1615_v33 = vadd.f32 %v9355_v2, %v1551_v41  ;;  %vm11806_vm13 = vcmp.ge.s32.totalorder %v4947_v46, 2 }
 0x983   :  { %v3086_v58 = vsel %vm11806_vm13, %v3081_v39, 0.0  ;;  %vm11807_vm11 = vcmp.ge.s32.totalorder %v4951_v47, 2  ;;  %vm11810_vm4 = vcmp.lt.s32.totalorder %v4937_v42, 125  ;;  %v2918_v2 = vmul.f32 %v2906_v37, %v2894_v16  ;;  %v11818_v16 = vld [vmem:[#allocation99_spill] sm:$0xff] }
 0x984   :  { %v3087_v32 = vsel %vm11807_vm11, %v3077_v5, 0.0  ;;  %v3141_v53 = vsel %vm11810_vm4, %v11809_v52, %v11808_v25  ;;  %vm11811_vm6 = vmmov %vm11810_vm4  ;;  %v1678_v19 = vadd.f32 %v1670_v62, %v1614_v54  ;;  %v1679_v59 = vadd.f32 %v1671_v11, %v1615_v33  ;;  %v11831_v5 = vld [vmem:[#allocation30_spill] sm:$0xff]  ;;  %v11834_v62 = vld [vmem:[#allocation48_spill] sm:$0xff] }
 0x985   :  { %v3145_v1 = vsel %vm11811_vm6, %v11808_v25, %v11809_v52  ;;  %v2919_v3 = vmul.f32 %v2906_v37, %v2895_v23  ;;  %v3110_v7 = vmul.f32 %v11812_v49, %v3086_v58  ;;  %v3111_v22 = vmul.f32 %v11812_v49, %v3087_v32  ;;  %v11833_v23 = vld [vmem:[#allocation79_spill] sm:$0xff]  ;;  %v11836_v52 = vld [vmem:[#allocation33_spill] sm:$0xff] }
 0x986   :  { %vm11815_vm0 = vcmp.lt.s32.totalorder %v4937_v42, 3  ;;  %v1742_v31 = vadd.f32 %v9452_v35, %v1678_v19  ;;  %v1743_v27 = vadd.f32 %v11817_v8, %v1679_v59  ;;  %v2926_v17 = vadd.f32 %v2918_v2, %v11818_v16  ;;  %v11835_v54 = vld [vmem:[#allocation135_spill] sm:$0xff]  ;;  %v11842_v16 = vld [vmem:[#allocation77_spill] sm:$0xff] }
 0x987   :  { %v3205_v44 = vsel %vm11815_vm0, %v11814_v20, %v11813_v48  ;;  %vm11816_vm14 = vmmov %vm11815_vm0  ;;  %v2927_v45 = vadd.f32 %v2919_v3, %v11819_v63  ;;  %vm11820_vm1 = vcmp.lt.s32.totalorder %v4947_v46, 13  ;;  %vm11821_vm15 = vcmp.lt.s32.totalorder %v4951_v47, 13  ;;  %v11843_v63 = vld [vmem:[#allocation78_spill] sm:$0xff] }
 0x988   :  { %v3209_v14 = vsel %vm11816_vm14, %v11813_v48, %v11814_v20  ;;  %v3150_v15 = vsel %vm11820_vm1, %v3141_v53, 0.0  ;;  %v3151_v28 = vsel %vm11821_vm15, %v3145_v1, 0.0  ;;  %v1865_v21 = vmul.f32 %v11823_v51, %v11822_v24  ;;  %3577 = vperm.xlu0 %4485, %v11831_v5   ;;  %v11837_v1 = vld [vmem:[#allocation70_spill] sm:$0xff] }
 0x989   :  { %v1866_v61 = vmul.f32 %v11823_v51, %v11824_v6  ;;  %v2990_v9 = vadd.f32 %v2982_v57, %v2926_v17  ;;  %v2991_v35 = vadd.f32 %v2983_v34, %v2927_v45  ;;  %v1806_v50 = vadd.f32 %v11825_v40, %v1742_v31  ;;  %v2008_v31 = vld [vmem:[%s10673_s5 + $0x8] sm:$0xff] }
 0x98a   :  { %v1807_v12 = vadd.f32 %v11826_v29, %v1743_v27  ;;  %vm11827_vm2 = vcmp.ge.s32.totalorder %v4947_v46, 3  ;;  %vm11828_vm7 = vcmp.ge.s32.totalorder %v4951_v47, 3  ;;  %v3269_v60 = vsel %vm1148_vm10, %v11830_v4, %v11829_v55 }
 0x98b   :  { %v3214_v43 = vsel %vm11827_vm2, %v3209_v14, 0.0  ;;  %v3215_v26 = vsel %vm11828_vm7, %v3205_v44, 0.0  ;;  %v3273_v57 = vsel %vm1148_vm10, %v11829_v55, %v11830_v4  ;;  %v3054_v39 = vadd.f32 %v3046_v56, %v2990_v9  ;;  %v11838_v56 = vld [vmem:[#allocation139_spill] sm:$0xff]  ;;  %v2007_v14 = vld [vmem:[%s10673_s5] sm:$0xff] }
 0x98c   :  { %v3055_v36 = vadd.f32 %v3047_v10, %v2991_v35  ;;  %v1873_v41 = vadd.f32 %v1865_v21, %v1806_v50  ;;  %v1874_v34 = vadd.f32 %v1866_v61, %v1807_v12  ;;  %v1949_v30 = vmul.f32 %v11833_v23, %v11832_v0  ;;  %v2023_v21 = vld [vmem:[%s10674_s6] sm:$0xff]  ;;  %v11845_v61 = vld [vmem:[#allocation22_spill] sm:$0xff]  ;;  %v11847_v50 = vld [vmem:[#allocation47_spill] sm:$0xff] }
 0x98d   :  { %v1950_v11 = vmul.f32 %v11833_v23, %v11834_v62  ;;  %v3174_v33 = vmul.f32 %v11835_v54, %v3150_v15  ;;  %v3175_v58 = vmul.f32 %v11835_v54, %v3151_v28  ;;  %v3118_v32 = vadd.f32 %v3110_v7, %v3054_v39  ;;  %v11841_v7 = vld [vmem:[#allocation153_spill] sm:$0xff]  ;;  %v11846_v35 = vld [vmem:[#allocation10_spill] sm:$0xff]  ;;  %v11849_v12 = vld [vmem:[#allocation8_spill] sm:$0xff] }
 0x98e   :  { %v3119_v25 = vadd.f32 %v3111_v22, %v3055_v36  ;;  %v1915_v53 = vadd.f32 %v11836_v52, %v1873_v41  ;;  %v1916_v37 = vadd.f32 %v11837_v1, %v1874_v34  ;;  %v3238_v10 = vmul.f32 %v11838_v56, %v3214_v43  ;;  %v11855_v39 = vld [vmem:[#allocation16_spill] sm:$0xff]  ;;  %v2025_v0 = vld [vmem:[%s10674_s6 + $0x10] sm:$0xff]  ;;  %v11858_v23 = vld [vmem:[#allocation39_spill] sm:$0xff]  ;;  %v3520_v52 = vpop.permute.xlu2 %3519 }
 0x98f   :  { %v3239_v19 = vmul.f32 %v11838_v56, %v3215_v26  ;;  %vm11839_vm10 = vcmp.lt.s32.totalorder %v4947_v46, 12  ;;  %vm11840_vm13 = vcmp.lt.s32.totalorder %v4951_v47, 12  ;;  %v3182_v3 = vadd.f32 %v3174_v33, %v3118_v32  ;;  %v11853_v26 = vld [vmem:[#allocation32_spill] sm:$0xff]  ;;  %v2026_v62 = vld [vmem:[%s10674_s6 + $0x18] sm:$0xff]  ;;  %v9956_v33 = vld [vmem:[%s10672_s4 + $0x10] sm:$0xff] }
 0x990   :  { %v3278_v59 = vsel %vm11839_vm10, %v3269_v60, 0.0  ;;  %v3279_v2 = vsel %vm11840_vm13, %v3273_v57, 0.0  ;;  %v3183_v49 = vadd.f32 %v3175_v58, %v3119_v25  ;;  %v1957_v48 = vadd.f32 %v1949_v30, %v1915_v53  ;;  %3608 = vrot.lane.b32.xlu0 %v9781_v13, %s4687_s11  ;;  %v11854_v60 = vld [vmem:[#allocation12_spill] sm:$0xff]  ;;  %v9936_v30 = vld [vmem:[%s10672_s4 + $0x18] sm:$0xff]  ;;  %v11865_v58 = vld [vmem:[#allocation18_spill] sm:$0xff] }
 0x991   :  { %v1958_v20 = vadd.f32 %v1950_v11, %v1916_v37  ;;  %v3302_v22 = vmul.f32 %v11841_v7, %v3278_v59  ;;  %v3303_v44 = vmul.f32 %v11841_v7, %v3279_v2  ;;  %v3246_v8 = vadd.f32 %v3238_v10, %v3182_v3  ;;  %v9922_v34 = vld [vmem:[%s10672_s4] sm:$0xff]  ;;  %v11861_v11 = vld [vmem:[#allocation69_spill] sm:$0xff]  ;;  %v3515_v3 = vpop.permute.xlu1 %3514 }
 0x992   :  { %v3247_v27 = vadd.f32 %v3239_v19, %v3183_v49  ;;  %v1999_v17 = vadd.f32 %v11842_v16, %v1957_v48  ;;  %v11844_v6 = vmov 4   ;;  %vm11848_vm11 = vcmp.ge.s32.totalorder %v4947_v46, 5  ;;  %v11866_v32 = vld [vmem:[#allocation72_spill] sm:$0xff] }
 0x993   :  { %v2000_v45 = vadd.f32 %v11843_v63, %v1958_v20  ;;  %v3310_v15 = vadd.f32 %v3302_v22, %v3246_v8  ;;  %4488 = vset.pattern.permute.xlu0 %v11844_v6  ;;  %v3470_v29 = vsel %vm11848_vm11, %v11847_v50, 0.0  ;;  %vm11850_vm4 = vcmp.ge.s32.totalorder %v4951_v47, 5  ;;  %v2024_v47 = vld [vmem:[%s10674_s6 + $0x8] sm:$0xff] }
 0x994   :  { %v3311_v28 = vadd.f32 %v3303_v44, %v3247_v27  ;;  %v2015_v24 = vadd.f32 %v2007_v14, %v1999_v17  ;;  %v3471_v43 = vsel %vm11850_vm4, %v11849_v12, 0.0  ;;  %vm11851_vm6 = vcmask 261120  }
 0x995   :  { %v2016_v51 = vadd.f32 %v2008_v31, %v2000_v45  ;;  %v3374_v9 = vadd.f32 %v11845_v61, %v3310_v15  ;;  %vm11852_vm0 = vmmov %vm11851_vm6  ;;  %v3494_v55 = vmul.f32 %v11853_v26, %v3470_v29  ;;  %v3495_v4 = vmul.f32 %v11853_v26, %v3471_v43  ;;  %v11875_v45 = vld [vmem:[#allocation9_spill] sm:$0xff] }
 0x996   :  { %v3375_v40 = vadd.f32 %v11846_v35, %v3311_v28  ;;  %2078 = vmatpush.msra.mxu2 %v2015_v24  ;;  %vm11856_vm14 = vmmov %vm11852_vm0  ;;  %v11862_v54 = vmov 7   ;;  %v11867_v25 = vmov 3   ;;  %v11868_v53 = vmov 8  }
 0x997   :  { %2107 = vmatpush.msra.mxu3 %v2016_v51  ;;  %4338 = vmatmul.msk.f32.vlgmr.msra.gmra.mxu2 %vm11851_vm6, %v2023_v21  ;;  %v3438_v57 = vadd.f32 %v11854_v60, %v3374_v9  ;;  %vm11857_vm1 = vmmov %vm11852_vm0  ;;  %vm11869_vm13 = vcmp.lt.s32.totalorder %v4937_v42, 112  ;;  %vm11871_vm4 = vcmp.lt.s32.totalorder %v4937_v42, 16  ;;  %v11877_v61 = vmov 1  }
 0x998   :  { %4342 = vmatmul.msk.f32.vlgmr.msra.gmra.mxu3 %vm11852_vm0, %v2023_v21  ;;  %v3439_v36 = vadd.f32 %v11855_v39, %v3375_v40  ;;  %vm11859_vm15 = vmmov %vm11852_vm0  ;;  %v3532_v12 = vmul.f32 %v3515_v3, %v11865_v58 }
 0x999   :  { %v9904_v41 = vadd.f32 %v3494_v55, %v3438_v57  ;;  %vm11860_vm2 = vmmov %vm11852_vm0  ;;  %v10036_v22 = vpop.permute.xlu1 %3529  ;;  %v3533_v55 = vmul.f32 %v3515_v3, %v11858_v23 }
 0x99a   :  { %v9906_v46 = vadd.f32 %v3495_v4, %v3439_v36  ;;  %vm11863_vm7 = vmmov %vm11852_vm0  ;;  %v11881_v36 = vld [vmem:[#allocation83_spill] sm:$0xff] }
 0x99b   :  { %3542 = vrot.lane.b32.xlu1 %v9904_v41, %s4694_s17  ;;  %vm11864_vm10 = vmmov %vm11852_vm0  ;;  %v3534_v63 = vmul.f32 %v3520_v52, %v9904_v41 }
 0x99c   :  { %3614 = vrot.lane.b32.xlu0 %v9906_v46, %s4687_s11  ;;  %3550 = vrot.lane.b32.xlu2 %v9906_v46, %s4694_s17  ;;  %vm11870_vm11 = vmmov %vm11869_vm13  ;;  %v3535_v24 = vmul.f32 %v3520_v52, %v9906_v46 }
 0x99d   :  { %vm11872_vm6 = vmmov %vm11871_vm4 }
 0x99e   :  { %vm11873_vm0 = vmmov %vm11870_vm11 }
 0x99f   :  { %4339 = vmatmul.msk.f32.gmra.mxu2 %vm11856_vm14, %v2024_v47  ;;  %vm11874_vm14 = vmmov %vm11873_vm0 }
 0x9a0   :  { %4343 = vmatmul.msk.f32.gmra.mxu3 %vm11857_vm1, %v2024_v47  ;;  %vm11876_vm1 = vcmp.lt.s32.totalorder %v11875_v45, 240 }
 0x9a3   :  { %3548 = vrot.lane.b32.xlu1 %v11858_v23, %s4694_s17 }
 0x9a4   :  { %3637 = vperm.xlu0 %4488, %v9922_v34   ;;  %3573 = vperm.xlu2 %4486, %v9922_v34  }
 0x9a7   :  { %4340 = vmatmul.msk.f32.gmra.mxu2 %vm11859_vm15, %v2025_v0  ;;  %vm11878_vm15 = vmmov %vm11873_vm0 }
 0x9a8   :  { %4344 = vmatmul.msk.f32.gmra.mxu3 %vm11860_vm2, %v2025_v0  ;;  %vm11879_vm2 = vmmov %vm11873_vm0 }
 0x9aa   :  { %v3541_v1 = vpop.permute.xlu2 %3540 }
 0x9ab   :  { %3554 = vrot.lane.b32.xlu1 %v11861_v11, %s4694_s17 }
 0x9ac   :  { %3585 = vperm.xlu2 %4486, %v9936_v30   ;;  %3670 = vrot.lane.b32.xlu0 %v9904_v41, %s4695_s18 }
 0x9ad   :  { %4493 = vset.pattern.permute.xlu0 %v11862_v54 }
 0x9af   :  { %4341 = vmatmul.msk.f32.gmra.mxu2 %vm11863_vm7, %v2026_v62  ;;  %vm11880_vm7 = vmmov %vm11876_vm1 }
 0x9b0   :  { %4345 = vmatmul.msk.f32.gmra.mxu3 %vm11864_vm10, %v2026_v62  ;;  %vm11882_vm10 = vmmov %vm11873_vm0 }
 0x9b3   :  { %3581 = vperm.xlu1 %4487, %v9956_v33  }
 0x9b4   :  { %3676 = vrot.lane.b32.xlu0 %v11858_v23, %s4695_s18  ;;  %3606 = vrot.lane.b32.xlu2 %v9904_v41, %s4687_s11 }
 0x9b5   :  { %4490 = vset.pattern.permute.xlu2 %v11844_v6 }
 0x9bb   :  { %3604 = vrot.lane.b32.xlu1 %v11865_v58, %s4687_s11 }
 0x9bc   :  { %3682 = vrot.lane.b32.xlu0 %v11861_v11, %s4695_s18  ;;  %3612 = vrot.lane.b32.xlu2 %v11858_v23, %s4687_s11 }
 0x9bd   :  { %4489 = vset.pattern.permute.xlu1 %v11844_v6 }
 0x9c3   :  { %3610 = vrot.lane.b32.xlu1 %v11866_v32, %s4687_s11 }
 0x9c4   :  { %3709 = vperm.xlu0 %4493, %v9956_v33   ;;  %3618 = vrot.lane.b32.xlu2 %v11861_v11, %s4687_s11 }
 0x9cb   :  { %3616 = vrot.lane.b32.xlu1 %v9783_v38, %s4687_s11 }
 0x9cc   :  { %3738 = vrot.lane.b32.xlu0 %v11866_v32, %s4696_s19  ;;  %3645 = vperm.xlu2 %4490, %v9956_v33   ;;  %v10004_v37 = vpop.permute.xlu0 %3546 }
 0x9cd   :  { %4495 = vset.pattern.permute.xlu0 %v11867_v25 }
 0x9d3   :  { %3641 = vperm.xlu1 %4489, %v11831_v5  }
 0x9d4   :  { %3744 = vrot.lane.b32.xlu0 %v9783_v38, %s4696_s19  ;;  %3668 = vrot.lane.b32.xlu2 %v11865_v58, %s4695_s18 }
 0x9d5   :  { %4492 = vset.pattern.permute.xlu2 %v11862_v54 }
 0x9db   :  { %3649 = vperm.xlu1 %4489, %v9936_v30   ;;  %v3545_v56 = vpop.permute.xlu2 %3544 }
 0x9dc   :  { %3769 = vperm.xlu0 %4495, %v11831_v5   ;;  %3674 = vrot.lane.b32.xlu2 %v11866_v32, %s4695_s18  ;;  %v10001_v5 = vld [vmem:[%s10672_s4 + $0x8] sm:$0xff] }
 0x9e3   :  { %3672 = vrot.lane.b32.xlu1 %v9781_v13, %s4695_s18 }
 0x9e4   :  { %3800 = vrot.lane.b32.xlu0 %v9781_v13, %s4697_s20  ;;  %3680 = vrot.lane.b32.xlu2 %v9783_v38, %s4695_s18 }
 0x9e5   :  { %4500 = vset.pattern.permute.xlu0 %v11868_v53  ;;  %4491 = vset.pattern.permute.xlu1 %v11862_v54 }
 0x9eb   :  { %3678 = vrot.lane.b32.xlu1 %v9906_v46, %s4695_s18 }
 0x9ec   :  { %3866 = vrot.lane.b32.xlu0 %v11866_v32, %s4698_s21  ;;  %3705 = vperm.xlu2 %4492, %v10001_v5  }
 0x9f2   :  { %v3553_v10 = vpop.permute.xlu0 %3552 }
 0x9f3   :  { %3701 = vperm.xlu1 %4491, %v9922_v34   ;;  %v10016_v19 = vsel %vm11869_vm13, %v3545_v56, %v3553_v10  ;;  %v10020_v59 = vsel %vm11870_vm11, %v3553_v10, %v3545_v56  ;;  %vm11883_vm13 = vmmov %vm11873_vm0 }
 0x9f4   :  { %3806 = vrot.lane.b32.xlu0 %v9906_v46, %s4697_s20  ;;  %3732 = vrot.lane.b32.xlu2 %v11865_v58, %s4696_s19  ;;  %vm11884_vm11 = vmmov %vm11876_vm1 }
 0x9f5   :  { %4494 = vset.pattern.permute.xlu2 %v11867_v25 }
 0x9f6   :  { %v3551_v2 = vpop.permute.xlu2 %3550 }
 0x9fa   :  { %v3578_v49 = vpop.permute.xlu0 %3577 }
 0x9fb   :  { %3713 = vperm.xlu1 %4491, %v9936_v30  }
 0x9fc   :  { %3872 = vrot.lane.b32.xlu0 %v9783_v38, %s4698_s21  ;;  %3736 = vrot.lane.b32.xlu2 %v9781_v13, %s4696_s19 }
 0x9fe   :  { %v3574_v48 = vpop.permute.xlu2 %3573 }
 0xa02   :  { %v10033_v20 = vpop.permute.xlu0 %3608 }
 0xa03   :  { %3734 = vrot.lane.b32.xlu1 %v9904_v41, %s4696_s19 }
 0xa04   :  { %3938 = vrot.lane.b32.xlu0 %v11861_v11, %s4714_s22  ;;  %3742 = vrot.lane.b32.xlu2 %v9906_v46, %s4696_s19 }
 0xa05   :  { %4496 = vset.pattern.permute.xlu1 %v11867_v25 }
 0xa06   :  { %v3586_v7 = vpop.permute.xlu2 %3585 }
 0xa0b   :  { %3740 = vrot.lane.b32.xlu1 %v11858_v23, %s4696_s19 }
 0xa0c   :  { %3833 = vperm.xlu0 %4500, %v10001_v5   ;;  %3765 = vperm.xlu2 %4494, %v9922_v34  }
 0xa0d   :  { %v3543_v31 = vpop.permute.xlu1 %3542 }
 0xa0e   :  { %v3607_v44 = vpop.permute.xlu2 %3606  ;;  %v3615_v14 = vpop.permute.xlu0 %3614  ;;  %v3557_v16 = vsel %vm11873_vm0, %v3543_v31, %v3551_v2  ;;  %v3561_v17 = vsel %vm11874_vm14, %v3551_v2, %v3543_v31  ;;  %v11885_v31 = vld [vmem:[#allocation80_spill] sm:$0xff]  ;;  %vm11890_vm14 = vcmp.lt.s32.totalorder %v4937_v42, 16 }
 0xa0f   :  { %v10044_v8 = vsel %vm11871_vm4, %v3607_v44, %v3615_v14  ;;  %v10048_v27 = vsel %vm11872_vm6, %v3615_v14, %v3607_v44  ;;  %v3567_v15 = vsel %vm11876_vm1, %v3561_v17, 0.0  ;;  %v3590_v28 = vmul.f32 %v3578_v49, %v3557_v16  ;;  %vm11886_vm4 = vmmov %vm11876_vm1 }
 0xa10   :  { %v3591_v51 = vmul.f32 %v3578_v49, %v3567_v15  ;;  %vm11888_vm6 = vcmp.lt.s32.totalorder %v4937_v42, 96  ;;  %vm11891_vm1 = vmmov %vm11890_vm14 }
 0xa11   :  { %v10058_v21 = vadd.f32 %v3590_v28, %v3534_v63  ;;  %v3536_v28 = vmul.f32 %v9707_v18, %v9781_v13  ;;  %vm11889_vm0 = vmmov %vm11888_vm6 }
 0xa12   :  { %v10064_v6 = vadd.f32 %v3591_v51, %v3535_v24 }
 0xa13   :  { %3746 = vrot.lane.b32.xlu1 %v11861_v11, %s4696_s19 }
 0xa14   :  { %3936 = vrot.lane.b32.xlu0 %v9783_v38, %s4714_s22  ;;  %3802 = vrot.lane.b32.xlu2 %v11866_v32, %s4697_s20 }
 0xa15   :  { %4504 = vset.pattern.permute.xlu0 %v11877_v61  ;;  %v3549_v40 = vpop.permute.xlu1 %3548 }
 0xa16   :  { %v10069_v9 = vpop.permute.xlu2 %3612  ;;  %v10071_v35 = vpop.permute.xlu0 %3637  ;;  %v3556_v50 = vsel %vm11878_vm15, %v3541_v1, %v3549_v40  ;;  %v3560_v29 = vsel %vm11879_vm2, %v3549_v40, %v3541_v1  ;;  %v3537_v40 = vmul.f32 %v9707_v18, %v9783_v38  ;;  %vm11892_vm15 = vcmp.ge.s32.totalorder %v4937_v42, 16  ;;  %vm11894_vm2 = vmmov %vm11889_vm0 }
 0xa17   :  { %v3565_v43 = vsel %vm11880_vm7, %v3560_v29, 0.0  ;;  %v3588_v26 = vmul.f32 %v3574_v48, %v3556_v50  ;;  %vm11895_vm7 = vmmov %vm11889_vm0 }
 0xa18   :  { %v3589_v4 = vmul.f32 %v3574_v48, %v3565_v43 }
 0xa19   :  { %v10081_v39 = vadd.f32 %v3588_v26, %v3532_v12  ;;  %v3569_v12 = vsel %vm11886_vm4, %v10020_v59, 0.0  ;;  %vm11899_vm4 = vmmov %vm11891_vm1 }
 0xa1a   :  { %v2080_v60 = vpop.f32.mrf.mxu2  ;;  %v10085_v62 = vadd.f32 %v3589_v4, %v3533_v55 }
 0xa1b   :  { %v2109_v57 = vpop.f32.mrf.mxu3  ;;  %v2081_v47 = vadd.f32 %v2080_v60, %v11881_v36  ;;  %3777 = vperm.xlu1 %4496, %v9936_v30  }
 0xa1c   :  { %v2110_v0 = vadd.f32 %v2109_v57, %v11881_v36  ;;  %3860 = vrot.lane.b32.xlu0 %v11865_v58, %s4698_s21  ;;  %3773 = vperm.xlu2 %4494, %v9956_v33  }
 0xa1d   :  { %v2121_v54 = vmul.f32 0.5, %v2081_v47  ;;  %v3555_v56 = vpop.permute.xlu1 %3554 }
 0xa1e   :  { %v2122_v25 = vmul.f32 0.5, %v2110_v0  ;;  %v10091_v52 = vpop.permute.xlu2 %3618  ;;  %v10093_v1 = vpop.permute.xlu0 %3670  ;;  %v3559_v10 = vsel %vm11882_vm10, %v10004_v37, %v3555_v56  ;;  %v3563_v2 = vsel %vm11883_vm13, %v3555_v56, %v10004_v37  ;;  %vm11896_vm10 = vmmov %vm11891_vm1 }
 0xa1f   :  { %4543 = vtanh.f32 %v2121_v54  ;;  %v3571_v3 = vsel %vm11884_vm11, %v3563_v2, 0.0  ;;  %v10103_v49 = vmul.f32 %v3586_v7, %v3559_v10  ;;  %vm11897_vm13 = vmmov %vm11891_vm1 }
 0xa20   :  { %4545 = vtanh.f32 %v2122_v25  ;;  %v10105_v48 = vmul.f32 %v3586_v7, %v3571_v3  ;;  %v11887_v25 = vld [vmem:[#allocation84_spill] sm:$0xff]  ;;  %vm11898_vm11 = vmmov %vm11891_vm1 }
 0xa22   :  { %v2083_v44 = vpop.f32.mrf.mxu2 }
 0xa23   :  { %v2112_v14 = vpop.f32.mrf.mxu3  ;;  %v2084_v16 = vadd.f32 %v2083_v44, %v11885_v31  ;;  %3810 = vrot.lane.b32.xlu1 %v11861_v11, %s4697_s20 }
 0xa24   :  { %v2113_v17 = vadd.f32 %v2112_v14, %v11885_v31  ;;  %3926 = vrot.lane.b32.xlu0 %v9904_v41, %s4714_s22  ;;  %4497 = vset.pattern.permute.xlu2 %v11868_v53 }
 0xa25   :  { %v4544_v63 = vpop.eup %4543  ;;  %v2123_v37 = vmul.f32 0.5, %v2084_v16  ;;  %3841 = vperm.xlu2 %4497, %v9936_v30   ;;  %4498 = vset.pattern.permute.xlu1 %v11868_v53  ;;  %v3582_v29 = vpop.permute.xlu1 %3581 }
 0xa26   :  { %v2124_v15 = vmul.f32 0.5, %v2113_v17  ;;  %v4546_v7 = vpop.eup %4545  ;;  %v2137_v24 = vmul.f32 0.5, %v4544_v63  ;;  %v10117_v51 = vpop.permute.xlu2 %3645  ;;  %v3592_v26 = vmul.f32 %v3582_v29, %v10016_v19  ;;  %v3593_v55 = vmul.f32 %v3582_v29, %v3569_v12 }
 0xa27   :  { %v3677_v61 = vpop.permute.xlu0 %3676  ;;  %v2138_v50 = vmul.f32 0.5, %v4546_v7  ;;  %4547 = vtanh.f32 %v2123_v37 }
 0xa28   :  { %v2145_v43 = vadd.f32 0.5, %v2137_v24  ;;  %4549 = vtanh.f32 %v2124_v15  ;;  %v10126_v57 = vadd.f32 %v3592_v26, %v3536_v28  ;;  %v10128_v53 = vadd.f32 %v3593_v55, %v3537_v40 }
 0xa29   :  { %v2146_v4 = vadd.f32 0.5, %v2138_v50 }
 0xa2a   :  { %v2153_v60 = vmul.f32 %v2145_v43, %v2081_v47  ;;  %v2086_v36 = vpop.f32.mrf.mxu2 }
 0xa2b   :  { %v2115_v18 = vpop.f32.mrf.mxu3  ;;  %v2154_v54 = vmul.f32 %v2146_v4, %v2110_v0  ;;  %v10131_v56 = vadd.f32 %v2086_v36, %v11887_v25  ;;  %3808 = vrot.lane.b32.xlu1 %v9783_v38, %s4697_s20 }
 0xa2c   :  { %v10134_v10 = vadd.f32 %v2115_v18, %v11887_v25  ;;  %v2161_v59 = vmul.f32 0.5, %v2153_v60  ;;  %4009 = vperm.xlu0 %4504, %v9936_v30   ;;  %v11893_v60 = vld [vmem:[#allocation81_spill] sm:$0xff] }
 0xa2d   :  { %v4548_v19 = vpop.eup %4547  ;;  %v2162_v2 = vmul.f32 0.5, %v2154_v54  ;;  %v2125_v47 = vmul.f32 0.5, %v10131_v56  ;;  %3798 = vrot.lane.b32.xlu2 %v9904_v41, %s4697_s20  ;;  %v3605_v7 = vpop.permute.xlu1 %3604 }
 0xa2e   :  { %v2126_v3 = vmul.f32 0.5, %v10134_v10  ;;  %v4550_v0 = vpop.eup %4549  ;;  %4551 = vtanh.f32 %v2161_v59  ;;  %v2139_v44 = vmul.f32 0.5, %v4548_v19  ;;  %v3669_v14 = vpop.permute.xlu2 %3668  ;;  %v3620_v28 = vsel %vm11890_vm14, %v3605_v7, %v10069_v9 }
 0xa2f   :  { %v3683_v31 = vpop.permute.xlu0 %3682  ;;  %4553 = vtanh.f32 %v2162_v2  ;;  %v2140_v63 = vmul.f32 0.5, %v4550_v0  ;;  %v10145_v37 = vsel %vm11888_vm6, %v3669_v14, %v3677_v61  ;;  %v10149_v15 = vsel %vm11889_vm0, %v3677_v61, %v3669_v14  ;;  %vm11900_vm6 = vmmov %vm11892_vm15 }
 0xa30   :  { %v2147_v38 = vadd.f32 0.5, %v2139_v44  ;;  %4555 = vtanh.f32 %v2125_v47  ;;  %v3624_v24 = vsel %vm11891_vm1, %v10069_v9, %v3605_v7  ;;  %v3653_v29 = vmul.f32 %v10071_v35, %v3620_v28  ;;  %vm11902_vm0 = vmmov %vm11900_vm6 }
 0xa31   :  { %v2148_v40 = vadd.f32 0.5, %v2140_v63  ;;  %4557 = vtanh.f32 %v2126_v3  ;;  %v3628_v50 = vsel %vm11892_vm15, %v3624_v24, 0.0  ;;  %v4617_v24 = vld [vmem:[#allocation2] sm:$0xff]  ;;  %vm11904_vm14 = vmmov %vm11902_vm0 }
 0xa32   :  { %v2155_v61 = vmul.f32 %v2147_v38, %v2084_v16  ;;  %v3652_v12 = vmul.f32 %v10071_v35, %v3628_v50  ;;  %v2089_v43 = vpop.f32.mrf.mxu2  ;;  %v10162_v4 = vadd.f32 %v3653_v29, %v10085_v62  ;;  %vm11906_vm1 = vmmov %vm11894_vm2 }
 0xa33   :  { %v2118_v26 = vpop.f32.mrf.mxu3  ;;  %v2156_v55 = vmul.f32 %v2148_v40, %v2113_v17  ;;  %v10165_v36 = vadd.f32 %v2089_v43, %v11893_v60  ;;  %3874 = vrot.lane.b32.xlu1 %v11861_v11, %s4698_s21  ;;  %vm11907_vm15 = vmmov %vm11906_vm1 }
 0xa34   :  { %v10168_v9 = vadd.f32 %v2118_v26, %v11893_v60  ;;  %v4552_v18 = vpop.eup %4551  ;;  %v2163_v54 = vmul.f32 0.5, %v2155_v61  ;;  %4005 = vperm.xlu0 %4504, %v9956_v33   ;;  %v10172_v16 = vadd.f32 %v3652_v12, %v10081_v39  ;;  %v4618_v61 = vld [vmem:[#allocation2 + $0x8] sm:$0xff] }
 0xa35   :  { %v4554_v35 = vpop.eup %4553  ;;  %v2177_v25 = vmul.f32 0.5, %v4552_v18  ;;  %v2164_v59 = vmul.f32 0.5, %v2156_v55  ;;  %v2127_v17 = vmul.f32 0.5, %v10165_v36  ;;  %3864 = vrot.lane.b32.xlu2 %v9781_v13, %s4698_s21  ;;  %v3611_v63 = vpop.permute.xlu1 %3610 }
 0xa36   :  { %v2128_v62 = vmul.f32 0.5, %v10168_v9  ;;  %v4556_v19 = vpop.eup %4555  ;;  %v2178_v2 = vmul.f32 0.5, %v4554_v35  ;;  %4559 = vtanh.f32 %v2163_v54  ;;  %v3675_v47 = vpop.permute.xlu2 %3674  ;;  %v10193_v29 = vsel %vm11896_vm10, %v3611_v63, %v10091_v52  ;;  %vm11910_vm10 = vmmov %vm11906_vm1 }
 0xa37   :  { %v10180_v3 = vpop.permute.xlu0 %3709  ;;  %v4558_v39 = vpop.eup %4557  ;;  %v2185_v0 = vadd.f32 0.5, %v2177_v25  ;;  %4561 = vtanh.f32 %v2164_v59  ;;  %v2141_v44 = vmul.f32 0.5, %v4556_v19  ;;  %v10184_v14 = vsel %vm11894_vm2, %v3675_v47, %v3683_v31 }
 0xa38   :  { %v2186_v7 = vadd.f32 0.5, %v2178_v2  ;;  %v2142_v38 = vmul.f32 0.5, %v4558_v39  ;;  %4563 = vtanh.f32 %v2127_v17  ;;  %v10188_v28 = vsel %vm11895_vm7, %v3683_v31, %v3675_v47  ;;  %vm11909_vm7 = vmmov %vm11906_vm1 }
 0xa39   :  { %v2193_v40 = vmul.f32 %v4617_v24, %v2185_v0  ;;  %v2149_v50 = vadd.f32 0.5, %v2141_v44  ;;  %4565 = vtanh.f32 %v2128_v62  ;;  %v10198_v26 = vsel %vm11897_vm13, %v10091_v52, %v3611_v63  ;;  %v4619_v44 = vld [vmem:[#allocation2 + $0x10] sm:$0xff] }
 0xa3a   :  { %v2194_v12 = vmul.f32 %v4618_v61, %v2186_v7  ;;  %v2150_v43 = vadd.f32 0.5, %v2142_v38  ;;  %vm11908_vm2 = vcmp.lt.s32.totalorder %v11875_v45, 224 }
 0xa3b   :  { %2201 = vst [vmem:[#allocation5] sm:$0xff] %v2193_v40  ;;  %v2157_v31 = vmul.f32 %v2149_v50, %v10131_v56  ;;  %3837 = vperm.xlu1 %4498, %v9956_v33   ;;  %v4620_v40 = vld [vmem:[#allocation2 + $0x18] sm:$0xff]  ;;  %vm11911_vm13 = vmmov %vm11908_vm2 }
 0xa3c   :  { %v4560_v55 = vpop.eup %4559  ;;  %2202 = vst [vmem:[#allocation5 + $0x8] sm:$0xff] %v2194_v12  ;;  %v2158_v60 = vmul.f32 %v2150_v43, %v10134_v10  ;;  %4001 = vperm.xlu0 %4504, %v10001_v5  }
 0xa3d   :  { %v4562_v18 = vpop.eup %4561  ;;  %v2179_v54 = vmul.f32 0.5, %v4560_v55  ;;  %v2165_v35 = vmul.f32 0.5, %v2157_v31  ;;  %3930 = vrot.lane.b32.xlu2 %v11866_v32, %s4714_s22  ;;  %v3617_v2 = vpop.permute.xlu1 %3616 }
 0xa3e   :  { %v4564_v25 = vpop.eup %4563  ;;  %v2180_v52 = vmul.f32 0.5, %v4562_v18  ;;  %v2166_v59 = vmul.f32 0.5, %v2158_v60  ;;  %v10206_v17 = vpop.permute.xlu2 %3680  ;;  %v3622_v0 = vsel %vm11898_vm11, %v10033_v20, %v3617_v2  ;;  %v3626_v38 = vsel %vm11899_vm4, %v3617_v2, %v10033_v20  ;;  %vm11913_vm11 = vmmov %vm11908_vm2 }
 0xa3f   :  { %v10208_v56 = vpop.permute.xlu0 %3738  ;;  %v4566_v62 = vpop.eup %4565  ;;  %v2187_v19 = vadd.f32 0.5, %v2179_v54  ;;  %4567 = vtanh.f32 %v2165_v35  ;;  %v2143_v10 = vmul.f32 0.5, %v4564_v25  ;;  %v3657_v24 = vmul.f32 %v10117_v51, %v3622_v0  ;;  %vm11914_vm4 = vmmov %vm11908_vm2 }
 0xa40   :  { %v2188_v47 = vadd.f32 0.5, %v2180_v52  ;;  %4569 = vtanh.f32 %v2166_v59  ;;  %v2144_v39 = vmul.f32 0.5, %v4566_v62  ;;  %v3632_v12 = vsel %vm11900_vm6, %v3626_v38, 0.0 }
 0xa41   :  { %v2195_v63 = vmul.f32 %v4619_v44, %v2187_v19  ;;  %v2151_v7 = vadd.f32 0.5, %v2143_v10  ;;  %v3656_v31 = vmul.f32 %v10117_v51, %v3632_v12  ;;  %v10222_v55 = vadd.f32 %v3657_v24, %v10128_v53 }
 0xa42   :  { %v2196_v50 = vmul.f32 %v4620_v40, %v2188_v47  ;;  %v2152_v61 = vadd.f32 0.5, %v2144_v39  ;;  %v11901_v35 = vmov 2   ;;  %v4621_v47 = vld [vmem:[#allocation2 + $0x20] sm:$0xff]  ;;  %v11903_v38 = vmov 10  }
 0xa43   :  { %2203 = vst [vmem:[#allocation5 + $0x10] sm:$0xff] %v2195_v63  ;;  %v2159_v43 = vmul.f32 %v2151_v7, %v10165_v36  ;;  %v10227_v54 = vadd.f32 %v3656_v31, %v10126_v57  ;;  %4499 = vset.pattern.permute.xlu1 %v11901_v35  ;;  %v3630_v57 = vsel %vm11902_vm0, %v10048_v27, 0.0  ;;  %v4622_v63 = vld [vmem:[#allocation2 + $0x28] sm:$0xff]  ;;  %v3538_v27 = vmul.f32 %v10036_v22, %v11866_v32 }
 0xa44   :  { %2204 = vst [vmem:[#allocation5 + $0x18] sm:$0xff] %v2196_v50  ;;  %v2160_v60 = vmul.f32 %v2152_v61, %v10168_v9  ;;  %3997 = vperm.xlu0 %4504, %v9922_v34   ;;  %3905 = vperm.xlu1 %4499, %v9936_v30   ;;  %v3634_v12 = vsel %vm11904_vm14, %v10198_v26, 0.0  ;;  %vm11915_vm6 = vcmp.ge.s32.totalorder %v4937_v42, 32 }
 0xa45   :  { %v4568_v20 = vpop.eup %4567  ;;  %v2167_v18 = vmul.f32 0.5, %v2159_v43  ;;  %3804 = vrot.lane.b32.xlu2 %v11858_v23, %s4697_s20  ;;  %v3642_v59 = vpop.permute.xlu1 %3641  ;;  %v3602_v32 = vadd.f32 %v10103_v49, %v3538_v27  ;;  %v11905_v49 = vmov 0   ;;  %vm11916_vm0 = vmmov %vm11915_vm6 }
 0xa46   :  { %v4570_v36 = vpop.eup %4569  ;;  %v2181_v51 = vmul.f32 0.5, %v4568_v20  ;;  %v2168_v25 = vmul.f32 0.5, %v2160_v60  ;;  %v10233_v53 = vpop.permute.xlu2 %3705  ;;  %v3654_v19 = vmul.f32 %v3642_v59, %v3630_v57  ;;  %v3655_v10 = vmul.f32 %v3642_v59, %v10044_v8  ;;  %vm11917_vm14 = vmmov %vm11916_vm0 }
 0xa47   :  { %v3745_v9 = vpop.permute.xlu0 %3744  ;;  %v2182_v52 = vmul.f32 0.5, %v4570_v36  ;;  %4571 = vtanh.f32 %v2167_v18  ;;  %v4623_v18 = vld [vmem:[#allocation2 + $0x30] sm:$0xff] }
 0xa48   :  { %v2189_v62 = vadd.f32 0.5, %v2181_v51  ;;  %4573 = vtanh.f32 %v2168_v25  ;;  %v3662_v0 = vadd.f32 %v3654_v19, %v10058_v21  ;;  %v3663_v44 = vadd.f32 %v3655_v10, %v10064_v6 }
 0xa49   :  { %v2190_v2 = vadd.f32 0.5, %v2182_v52  ;;  %v3539_v21 = vmul.f32 %v10036_v22, %v11861_v11  ;;  %v4624_v52 = vld [vmem:[#allocation2 + $0x38] sm:$0xff] }
 0xa4a   :  { %v2197_v39 = vmul.f32 %v4621_v47, %v2189_v62 }
 0xa4b   :  { %v2198_v7 = vmul.f32 %v4622_v63, %v2190_v2  ;;  %v3603_v60 = vadd.f32 %v10105_v48, %v3539_v21  ;;  %v11912_v21 = vmov 9  }
 0xa4c   :  { %2205 = vst [vmem:[#allocation5 + $0x20] sm:$0xff] %v2197_v39  ;;  %4508 = vset.pattern.permute.xlu0 %v11903_v38  ;;  %3796 = vrot.lane.b32.xlu1 %v11865_v58, %s4697_s20 }
 0xa4d   :  { %v4572_v24 = vpop.eup %4571  ;;  %2206 = vst [vmem:[#allocation5 + $0x28] sm:$0xff] %v2198_v7  ;;  %3870 = vrot.lane.b32.xlu2 %v9906_v46, %s4698_s21  ;;  %4037 = vperm.xlu0 %4508, %v9922_v34   ;;  %v3650_v43 = vpop.permute.xlu1 %3649 }
 0xa4e   :  { %v4574_v8 = vpop.eup %4573  ;;  %v2183_v6 = vmul.f32 0.5, %v4572_v24  ;;  %v10251_v40 = vpop.permute.xlu2 %3732  ;;  %v3658_v11 = vmul.f32 %v3650_v43, %v3634_v12  ;;  %v3659_v22 = vmul.f32 %v3650_v43, %v10193_v29 }
 0xa4f   :  { %v10253_v50 = vpop.permute.xlu0 %3769  ;;  %v2184_v61 = vmul.f32 0.5, %v4574_v8 }
 0xa50   :  { %v2191_v31 = vadd.f32 0.5, %v2183_v6  ;;  %v3666_v51 = vadd.f32 %v3658_v11, %v3602_v32  ;;  %v3667_v25 = vadd.f32 %v3659_v22, %v3603_v60  ;;  %v3693_v32 = vsel %vm11913_vm11, %v10149_v15, 0.0 }
 0xa51   :  { %v2192_v20 = vadd.f32 0.5, %v2184_v61  ;;  %v3699_v15 = vsel %vm11914_vm4, %v10188_v28, 0.0 }
 0xa52   :  { %v2199_v36 = vmul.f32 %v4623_v18, %v2191_v31 }
 0xa53   :  { %v2200_v59 = vmul.f32 %v4624_v52, %v2192_v20 }
 0xa54   :  { %2207 = vst [vmem:[#allocation5 + $0x30] sm:$0xff] %v2199_v36  ;;  %3862 = vrot.lane.b32.xlu1 %v9904_v41, %s4698_s21 }
 0xa55   :  { %2208 = vst [vmem:[#allocation5 + $0x38] sm:$0xff] %v2200_v59  ;;  %3928 = vrot.lane.b32.xlu2 %v9781_v13, %s4714_s22  ;;  %4510 = vset.pattern.permute.xlu0 %v11905_v49  ;;  %v3673_v62 = vpop.permute.xlu1 %3672 }
 0xa56   :  { %v3737_v48 = vpop.permute.xlu2 %3736  ;;  %v3686_v19 = vsel %vm11906_vm1, %v3673_v62, %v10206_v17  ;;  %v3690_v13 = vsel %vm11907_vm15, %v10206_v17, %v3673_v62  ;;  %vm11918_vm1 = vcmp.lt.s32.totalorder %v11875_v45, 208  ;;  %vm11919_vm15 = vmmov %vm11916_vm0 }
 0xa57   :  { %v10266_v26 = vpop.permute.xlu0 %3800  ;;  %v3750_v29 = vsel %vm464_vm5, %v3737_v48, %v3745_v9  ;;  %v3754_v57 = vsel %vm464_vm5, %v3745_v9, %v3737_v48  ;;  %v3697_v41 = vsel %vm11908_vm2, %v3690_v13, 0.0  ;;  %v3720_v10 = vmul.f32 %v10180_v3, %v3686_v19  ;;  %vm11925_vm11 = vmmov %vm11918_vm1 }
 0xa58   :  { %v3721_v2 = vmul.f32 %v10180_v3, %v3697_v41  ;;  %v3760_v20 = vsel %vm11915_vm6, %v3754_v57, 0.0  ;;  %vm11921_vm2 = vcmp.lt.s32.totalorder %v4937_v42, 48 }
 0xa59   :  { %v3728_v47 = vadd.f32 %v3720_v10, %v10227_v54  ;;  %vm11926_vm4 = vmmov %vm11921_vm2 }
 0xa5a   :  { %v3729_v9 = vadd.f32 %v3721_v2, %v10222_v55 }
 0xa5c   :  { %3901 = vperm.xlu1 %4499, %v9956_v33  }
 0xa5d   :  { %3829 = vperm.xlu2 %4497, %v9922_v34   ;;  %v3679_v63 = vpop.permute.xlu1 %3678 }
 0xa5e   :  { %v3743_v39 = vpop.permute.xlu2 %3742  ;;  %v3685_v17 = vsel %vm11909_vm7, %v10093_v1, %v3679_v63  ;;  %v3689_v7 = vsel %vm11910_vm10, %v3679_v63, %v10093_v1  ;;  %vm11922_vm7 = vmmov %vm11918_vm1 }
 0xa5f   :  { %v10292_v24 = vpop.permute.xlu0 %3866  ;;  %v3695_v3 = vsel %vm11911_vm13, %v3689_v7, 0.0  ;;  %v3718_v55 = vmul.f32 %v10233_v53, %v3685_v17  ;;  %vm11923_vm10 = vmmov %vm11921_vm2  ;;  %vm11924_vm13 = vcmp.ge.s32.totalorder %v4937_v42, 48 }
 0xa60   :  { %v3719_v54 = vmul.f32 %v10233_v53, %v3695_v3  ;;  %vm11928_vm6 = vmmov %vm11924_vm13 }
 0xa61   :  { %v3726_v27 = vadd.f32 %v3718_v55, %v3662_v0 }
 0xa62   :  { %v3727_v8 = vadd.f32 %v3719_v54, %v3663_v44 }
 0xa64   :  { %4501 = vset.pattern.permute.xlu1 %v11912_v21 }
 0xa65   :  { %4502 = vset.pattern.permute.xlu2 %v11901_v35  ;;  %3969 = vperm.xlu1 %4501, %v9936_v30   ;;  %v3702_v1 = vpop.permute.xlu1 %3701 }
 0xa66   :  { %3897 = vperm.xlu2 %4502, %v10001_v5   ;;  %v3766_v6 = vpop.permute.xlu2 %3765  ;;  %v3716_v61 = vmul.f32 %v3702_v1, %v10145_v37  ;;  %v3717_v12 = vmul.f32 %v3702_v1, %v3693_v32 }
 0xa67   :  { %v3807_v44 = vpop.permute.xlu0 %3806 }
 0xa68   :  { %v3724_v53 = vadd.f32 %v3716_v61, %v10172_v16  ;;  %v3725_v0 = vadd.f32 %v3717_v12, %v10162_v4 }
 0xa6d   :  { %3868 = vrot.lane.b32.xlu1 %v11858_v23, %s4698_s21  ;;  %v3714_v31 = vpop.permute.xlu1 %3713 }
 0xa6e   :  { %4503 = vset.pattern.permute.xlu2 %v11912_v21  ;;  %v10309_v43 = vpop.permute.xlu2 %3802  ;;  %v3722_v37 = vmul.f32 %v3714_v31, %v10184_v14  ;;  %v3723_v16 = vmul.f32 %v3714_v31, %v3699_v15  ;;  %4505 = vset.pattern.permute.xlu1 %v11901_v35 }
 0xa6f   :  { %3965 = vperm.xlu2 %4503, %v9956_v33   ;;  %v10319_v11 = vpop.permute.xlu0 %3872 }
 0xa70   :  { %v3730_v4 = vadd.f32 %v3722_v37, %v3666_v51  ;;  %v3731_v60 = vadd.f32 %v3723_v16, %v3667_v25 }
 0xa75   :  { %3934 = vrot.lane.b32.xlu1 %v9906_v46, %s4714_s22  ;;  %v3735_v28 = vpop.permute.xlu1 %3734 }
 0xa76   :  { %v3774_v22 = vpop.permute.xlu2 %3773  ;;  %v3749_v14 = vsel %vm464_vm5, %v3735_v28, %v3743_v39  ;;  %v3753_v35 = vsel %vm464_vm5, %v3743_v39, %v3735_v28 }
 0xa77   :  { %v3784_v18 = vmul.f32 %v3774_v22, %v3760_v20  ;;  %v3785_v36 = vmul.f32 %v3774_v22, %v3750_v29  ;;  %3924 = vrot.lane.b32.xlu2 %v11865_v58, %s4714_s22  ;;  %v3758_v52 = vsel %vm11916_vm0, %v3753_v35, 0.0  ;;  %v3783_v59 = vmul.f32 %v10253_v50, %v3749_v14  ;;  %v10339_v58 = vpop.permute.xlu0 %3938  ;;  %vm11929_vm0 = vmmov %vm11921_vm2 }
 0xa78   :  { %v3782_v46 = vmul.f32 %v10253_v50, %v3758_v52 }
 0xa79   :  { %v10331_v51 = vadd.f32 %v3784_v18, %v3728_v47  ;;  %v10333_v25 = vadd.f32 %v3785_v36, %v3729_v9  ;;  %v3791_v48 = vadd.f32 %v3783_v59, %v3727_v8  ;;  %v4128_v18 = vld [vmem:[%s10675_s7] sm:$0xff] }
 0xa7a   :  { %v3790_v29 = vadd.f32 %v3782_v46, %v3726_v27  ;;  %v4131_v46 = vld [vmem:[%s10675_s7 + $0x18] sm:$0xff] }
 0xa7d   :  { %3893 = vperm.xlu1 %4505, %v9922_v34   ;;  %v3741_v57 = vpop.permute.xlu1 %3740 }
 0xa7e   :  { %v3748_v19 = vsel %vm464_vm5, %v10251_v40, %v3741_v57  ;;  %v3752_v13 = vsel %vm464_vm5, %v3741_v57, %v10251_v40 }
 0xa7f   :  { %3961 = vperm.xlu2 %4503, %v10001_v5   ;;  %v3842_v62 = vpop.permute.xlu2 %3841  ;;  %v3756_v50 = vsel %vm11917_vm14, %v3752_v13, 0.0  ;;  %v3781_v41 = vmul.f32 %v3766_v6, %v3748_v19  ;;  %v3834_v63 = vpop.permute.xlu0 %3833  ;;  %vm11930_vm14 = vmmov %vm11929_vm0 }
 0xa80   :  { %v3780_v10 = vmul.f32 %v3766_v6, %v3756_v50 }
 0xa81   :  { %v10351_v2 = vadd.f32 %v3781_v41, %v3725_v0 }
 0xa82   :  { %v10353_v47 = vadd.f32 %v3780_v10, %v3724_v53 }
 0xa85   :  { %3932 = vrot.lane.b32.xlu1 %v11858_v23, %s4714_s22  ;;  %v3747_v9 = vpop.permute.xlu1 %3746 }
 0xa86   :  { %4506 = vset.pattern.permute.xlu1 %v11903_v38  ;;  %v3755_v54 = vsel %vm464_vm5, %v3747_v9, %v10208_v56  ;;  %v3751_v8 = vsel %vm464_vm5, %v10208_v56, %v3747_v9  ;;  %vm11920_vm5 = vmmov %vm11918_vm1 }
 0xa87   :  { %3957 = vperm.xlu2 %4503, %v9922_v34   ;;  %v3799_v39 = vpop.permute.xlu2 %3798  ;;  %v3762_v21 = vsel %vm11919_vm15, %v3755_v54, 0.0  ;;  %vm11932_vm15 = vmmov %vm11929_vm0 }
 0xa88   :  { %v10360_v40 = vsel %vm507_vm12, %v3799_v39, %v3807_v44  ;;  %v10364_v17 = vsel %vm507_vm12, %v3807_v44, %v3799_v39 }
 0xa89   :  { %v3823_v7 = vsel %vm11918_vm1, %v10364_v17, 0.0  ;;  %v3846_v23 = vmul.f32 %v3834_v63, %v10360_v40  ;;  %vm11931_vm1 = vmmov %vm11928_vm6 }
 0xa8a   :  { %v3847_v3 = vmul.f32 %v3834_v63, %v3823_v7 }
 0xa8b   :  { %v10371_v55 = vadd.f32 %v3846_v23, %v3790_v29 }
 0xa8c   :  { %v10376_v27 = vadd.f32 %v3847_v3, %v3791_v48 }
 0xa8d   :  { %4049 = vperm.xlu1 %4506, %v9936_v30   ;;  %v3778_v38 = vpop.permute.xlu1 %3777 }
 0xa8e   :  { %v3786_v1 = vmul.f32 %v3778_v38, %v3762_v21  ;;  %v3787_v32 = vmul.f32 %v3778_v38, %v3751_v8 }
 0xa8f   :  { %4507 = vset.pattern.permute.xlu2 %v11905_v49  ;;  %v10385_v6 = vpop.permute.xlu2 %3864 }
 0xa90   :  { %4089 = vperm.xlu2 %4507, %v9936_v30   ;;  %v3794_v61 = vadd.f32 %v3786_v1, %v3730_v4  ;;  %v3795_v12 = vadd.f32 %v3787_v32, %v3731_v60 }
 0xa95   :  { %4045 = vperm.xlu1 %4506, %v9956_v33   ;;  %v3811_v53 = vpop.permute.xlu1 %3810 }
 0xa96   :  { %v10394_v0 = vsel %vm507_vm12, %v10309_v43, %v3811_v53  ;;  %v10399_v44 = vsel %vm507_vm12, %v3811_v53, %v10309_v43  ;;  %v4129_v43 = vld [vmem:[%s10675_s7 + $0x8] sm:$0xff] }
 0xa97   :  { %v10389_v56 = vpop.permute.xlu2 %3930  ;;  %v3827_v30 = vsel %vm11920_vm5, %v10399_v44, 0.0  ;;  %v3850_v31 = vmul.f32 %v3842_v62, %v10394_v0  ;;  %vm11933_vm5 = vmmov %vm11931_vm1 }
 0xa98   :  { %4085 = vperm.xlu2 %4507, %v9956_v33   ;;  %v3851_v15 = vmul.f32 %v3842_v62, %v3827_v30  ;;  %v10499_v30 = vsel %vm11930_vm14, %v10385_v6, %v10319_v11 }
 0xa99   :  { %v3858_v37 = vadd.f32 %v3850_v31, %v3794_v61  ;;  %v10488_v61 = vsel %vm11929_vm0, %v10319_v11, %v10385_v6  ;;  %v3943_v6 = vsel %vm1832_vm3, %v10389_v56, %v10339_v58 }
 0xa9a   :  { %v3859_v16 = vadd.f32 %v3851_v15, %v3795_v12 }
 0xa9d   :  { %4041 = vperm.xlu1 %4506, %v10001_v5   ;;  %v3809_v4 = vpop.permute.xlu1 %3808 }
 0xa9f   :  { %v3805_v60 = vpop.permute.xlu2 %3804 }
 0xaa0   :  { %4077 = vperm.xlu2 %4507, %v9922_v34   ;;  %v10421_v34 = vsel %vm507_vm12, %v3809_v4, %v10266_v26 }
 0xaa5   :  { %4509 = vset.pattern.permute.xlu1 %v11905_v49  ;;  %v3875_v33 = vpop.permute.xlu1 %3874  ;;  %v10429_v49 = vsel %vm507_vm12, %v10266_v26, %v3809_v4 }
 0xaa6   :  { %v10415_v20 = vsel %vm11921_vm2, %v10292_v24, %v3875_v33  ;;  %4081 = vperm.xlu1 %4509, %v10001_v5   ;;  %v3825_v5 = vsel %vm11922_vm7, %v10421_v34, 0.0  ;;  %v10442_v26 = vsel %vm11923_vm10, %v3875_v33, %v10292_v24  ;;  %vm11935_vm7 = vcmp.lt.s32.totalorder %v11875_v45, 176  ;;  %v4110_v45 = vld [vmem:[%s10673_s5 + $0x10] sm:$0xff] }
 0xaa7   :  { %v3871_v22 = vpop.permute.xlu2 %3870  ;;  %v3890_v57 = vsel %vm11924_vm13, %v10442_v26, 0.0  ;;  %vm11936_vm10 = vcmp.ge.s32.totalorder %v4937_v42, 80  ;;  %vm11937_vm13 = vmmov %vm11935_vm7  ;;  %v4108_v42 = vld [vmem:[%s10673_s5] sm:$0xff] }
 0xaa8   :  { %4139 = vperm.xlu2 %4507, %v4129_v43  }
 0xaad   :  { %v3838_v36 = vpop.permute.xlu1 %3837 }
 0xaae   :  { %v3848_v14 = vmul.f32 %v3838_v36, %v10429_v49  ;;  %v3849_v35 = vmul.f32 %v3838_v36, %v3825_v5  ;;  %4134 = vperm.xlu1 %4509, %v4128_v18  }
 0xaaf   :  { %v10434_v28 = vpop.permute.xlu2 %3928 }
 0xab0   :  { %v3856_v52 = vadd.f32 %v3848_v14, %v10331_v51  ;;  %v3857_v59 = vadd.f32 %v3849_v35, %v10333_v25  ;;  %v10451_v25 = vpop.permute.xlu0 %3936 }
 0xab6   :  { %4149 = vperm.xlu1 %4509, %v4131_v46   ;;  %v3906_v29 = vpop.permute.xlu1 %3905 }
 0xab7   :  { %v3830_v48 = vpop.permute.xlu2 %3829  ;;  %v3914_v62 = vmul.f32 %v3906_v29, %v3890_v57  ;;  %v3915_v51 = vmul.f32 %v3906_v29, %v10415_v20 }
 0xab8   :  { %v3861_v7 = vpop.permute.xlu0 %3860 }
 0xab9   :  { %v3922_v19 = vadd.f32 %v3914_v62, %v3858_v37  ;;  %v3923_v13 = vadd.f32 %v3915_v51, %v3859_v16 }
 0xabe   :  { %v3797_v24 = vpop.permute.xlu1 %3796 }
 0xabf   :  { %v10455_v41 = vsel %vm507_vm12, %v3797_v24, %v3805_v60  ;;  %v10459_v10 = vsel %vm507_vm12, %v3805_v60, %v3797_v24  ;;  %vm11927_vm12 = vmmov %vm11921_vm2  ;;  %v3947_v60 = vsel %vm1832_vm3, %v10339_v58, %v10389_v56 }
 0xac0   :  { %v3898_v50 = vpop.permute.xlu2 %3897  ;;  %v3821_v9 = vsel %vm11925_vm11, %v10459_v10, 0.0  ;;  %v3844_v39 = vmul.f32 %v3830_v48, %v10455_v41  ;;  %v10493_v53 = vpop.permute.xlu0 %3926  ;;  %v3955_v33 = vsel %vm1815_vm8, %v3947_v60, 0.0  ;;  %v3994_v5 = vsel %vm1881_vm9, %v3947_v60, 0.0  ;;  %vm11934_vm2 = vmmov %vm11929_vm0 }
 0xac1   :  { %v3845_v63 = vmul.f32 %v3830_v48, %v3821_v9  ;;  %vm11938_vm11 = vmmov %vm11936_vm10 }
 0xac2   :  { %v3852_v23 = vadd.f32 %v3844_v39, %v10353_v47 }
 0xac3   :  { %v3853_v3 = vadd.f32 %v3845_v63, %v10351_v2 }
 0xac6   :  { %v3863_v54 = vpop.permute.xlu1 %3862 }
 0xac7   :  { %v10469_v8 = vsel %vm11926_vm4, %v3863_v54, %v3871_v22  ;;  %v10473_v38 = vsel %vm11927_vm12, %v3871_v22, %v3863_v54  ;;  %vm11939_vm4 = vmmov %vm11935_vm7  ;;  %vm11943_vm12 = vcmask 261120  }
 0xac8   :  { %v3886_v1 = vsel %vm11928_vm6, %v10473_v38, 0.0  ;;  %v3911_v32 = vmul.f32 %v3898_v50, %v10469_v8  ;;  %v4010_v11 = vpop.permute.xlu0 %4009  ;;  %vm11944_vm6 = vmmov %vm11943_vm12 }
 0xac9   :  { %v10475_v21 = vpop.permute.xlu2 %3965  ;;  %v3910_v47 = vmul.f32 %v3898_v50, %v3886_v1  ;;  %v4018_v14 = vmul.f32 %v4010_v11, %v3994_v5  ;;  %v4019_v35 = vmul.f32 %v4010_v11, %v3943_v6  ;;  %vm11945_vm0 = vmmov %vm11944_vm6 }
 0xaca   :  { %v10482_v2 = vadd.f32 %v3911_v32, %v10376_v27  ;;  %v3888_v27 = vsel %vm11931_vm1, %v10488_v61, 0.0  ;;  %vm11946_vm14 = vmmov %vm11945_vm0 }
 0xacb   :  { %v10491_v12 = vadd.f32 %v3910_v47, %v10371_v55  ;;  %vm11947_vm1 = vmmov %vm11945_vm0 }
 0xace   :  { %v3902_v31 = vpop.permute.xlu1 %3901 }
 0xacf   :  { %v3912_v15 = vmul.f32 %v3902_v31, %v3888_v27  ;;  %v3913_v37 = vmul.f32 %v3902_v31, %v10499_v30 }
 0xad0   :  { %v10523_v29 = vpop.permute.xlu0 %4005 }
 0xad1   :  { %v3925_v16 = vpop.permute.xlu2 %3924  ;;  %v10505_v4 = vadd.f32 %v3912_v15, %v3856_v52  ;;  %v10507_v55 = vadd.f32 %v3913_v37, %v3857_v59 }
 0xad7   :  { %v3970_v43 = vpop.permute.xlu1 %3969 }
 0xad8   :  { %v3978_v18 = vmul.f32 %v3970_v43, %v3943_v6  ;;  %v3979_v36 = vmul.f32 %v3970_v43, %v3955_v33  ;;  %v10525_v57 = vpop.permute.xlu0 %4001  ;;  %v3946_v43 = vsel %vm1832_vm3, %v10451_v25, %v10434_v28  ;;  %v4074_v33 = vsel %vm11936_vm10, %v10399_v44, 0.0 }
 0xad9   :  { %v10519_v22 = vpop.permute.xlu2 %3961  ;;  %v4068_v44 = vsel %vm11938_vm11, %v10459_v10, 0.0 }
 0xada   :  { %v3986_v52 = vadd.f32 %v3978_v18, %v3922_v19  ;;  %v3987_v59 = vadd.f32 %v3979_v36, %v3923_v13 }
 0xadc   :  { %v4026_v46 = vadd.f32 %v4018_v14, %v3986_v52  ;;  %v4027_v48 = vadd.f32 %v4019_v35, %v3987_v59  ;;  %v4035_v52 = vsel %vm11937_vm13, %v10442_v26, 0.0  ;;  %v3992_v59 = vsel %vm1881_vm9, %v3946_v43, 0.0 }
 0xadf   :  { %v3869_v58 = vpop.permute.xlu1 %3868 }
 0xae0   :  { %v3998_v50 = vpop.permute.xlu0 %3997  ;;  %v3880_v9 = vsel %vm11932_vm15, %v3869_v58, %v3861_v7  ;;  %v3876_v13 = vsel %vm11934_vm2, %v3861_v7, %v3869_v58  ;;  %vm11948_vm15 = vmmov %vm11945_vm0 }
 0xae1   :  { %v3958_v56 = vpop.permute.xlu2 %3957  ;;  %v3884_v19 = vsel %vm11933_vm5, %v3880_v9, 0.0  ;;  %vm11949_vm5 = vmmov %vm11945_vm0 }
 0xae2   :  { %vm11950_vm2 = vmmov %vm11945_vm0 }
 0xae7   :  { %v3935_v62 = vpop.permute.xlu1 %3934 }
 0xae8   :  { %v4038_v60 = vpop.permute.xlu0 %4037  ;;  %v3945_v10 = vsel %vm1832_vm3, %v3935_v62, %v10493_v53 }
 0xae9   :  { %v4052_v14 = vmul.f32 %v4038_v60, %v3876_v13 }
 0xaea   :  { %v4090_v51 = vpop.permute.xlu2 %4089 }
 0xaef   :  { %v3894_v24 = vpop.permute.xlu1 %3893 }
 0xaf0   :  { %v3908_v63 = vmul.f32 %v3894_v24, %v3884_v19  ;;  %v3909_v54 = vmul.f32 %v3894_v24, %v3876_v13  ;;  %v3953_v24 = vsel %vm1815_vm8, %v3946_v43, 0.0 }
 0xaf2   :  { %v10529_v39 = vpop.permute.xlu2 %4085  ;;  %v3916_v31 = vadd.f32 %v3908_v63, %v3852_v23  ;;  %v3917_v11 = vadd.f32 %v3909_v54, %v3853_v3  ;;  %v3942_v3 = vsel %vm1832_vm3, %v10434_v28, %v10451_v25  ;;  %v3977_v54 = vmul.f32 %v10475_v21, %v3953_v24 }
 0xaf3   :  { %v3976_v28 = vmul.f32 %v10475_v21, %v3942_v3  ;;  %v4114_v21 = vld [vmem:[%s10673_s5 + $0x30] sm:$0xff] }
 0xaf7   :  { %v3933_v1 = vpop.permute.xlu1 %3932 }
 0xaf8   :  { %v3940_v32 = vsel %vm1832_vm3, %v3925_v16, %v3933_v1  ;;  %v3944_v47 = vsel %vm1832_vm3, %v3933_v1, %v3925_v16  ;;  %v4029_v16 = vsel %vm11935_vm7, %v3880_v9, 0.0  ;;  %v4098_v1 = vmul.f32 %v4090_v51, %v4074_v33 }
 0xaf9   :  { %v3949_v27 = vsel %vm1815_vm8, %v3944_v47, 0.0  ;;  %v3972_v15 = vmul.f32 %v3958_v56, %v3940_v32  ;;  %v3988_v37 = vsel %vm1881_vm9, %v3944_v47, 0.0  ;;  %v4013_v36 = vmul.f32 %v3998_v50, %v3940_v32 }
 0xafa   :  { %v3973_v7 = vmul.f32 %v3958_v56, %v3949_v27  ;;  %v4012_v6 = vmul.f32 %v3998_v50, %v3988_v37  ;;  %v4078_v5 = vpop.permute.xlu2 %4077  ;;  %v4053_v58 = vmul.f32 %v4038_v60, %v4029_v16  ;;  %v4099_v47 = vmul.f32 %v4090_v51, %v10394_v0  ;;  %v4115_v37 = vld [vmem:[%s10673_s5 + $0x38] sm:$0xff] }
 0xafb   :  { %v3980_v23 = vadd.f32 %v3972_v15, %v3916_v31  ;;  %v4092_v25 = vmul.f32 %v4078_v5, %v4068_v44  ;;  %v4093_v19 = vmul.f32 %v4078_v5, %v10455_v41  ;;  %v3984_v41 = vadd.f32 %v3976_v28, %v10505_v4 }
 0xafc   :  { %v3981_v18 = vadd.f32 %v3973_v7, %v3917_v11  ;;  %v3941_v0 = vsel %vm1832_vm3, %v10493_v53, %v3935_v62  ;;  %v4016_v51 = vmul.f32 %v10523_v29, %v3992_v59  ;;  %v4017_v4 = vmul.f32 %v10523_v29, %v3942_v3  ;;  %vm11940_vm3 = vmmov %vm11936_vm10 }
 0xafd   :  { %v4020_v35 = vadd.f32 %v4012_v6, %v3980_v23  ;;  %v3974_v7 = vmul.f32 %v10519_v22, %v3941_v0  ;;  %v4033_v53 = vsel %vm11939_vm4, %v10488_v61, 0.0  ;;  %v3990_v23 = vsel %vm1881_vm9, %v3945_v10, 0.0  ;;  %vm11942_vm9 = vmmov %vm11940_vm3 }
 0xafe   :  { %v4021_v56 = vadd.f32 %v4013_v36, %v3981_v18  ;;  %v4024_v43 = vadd.f32 %v4016_v51, %v3984_v41  ;;  %v4072_v18 = vsel %vm11940_vm3, %v10421_v34, 0.0  ;;  %v4097_v5 = vmul.f32 %v10529_v39, %v10429_v49 }
 0xaff   :  { %v4050_v50 = vpop.permute.xlu1 %4049  ;;  %v4060_v9 = vadd.f32 %v4052_v14, %v4020_v35  ;;  %v4096_v36 = vmul.f32 %v10529_v39, %v4072_v18  ;;  %v4014_v14 = vmul.f32 %v10525_v57, %v3990_v23  ;;  %v4113_v35 = vld [vmem:[%s10673_s5 + $0x28] sm:$0xff]  ;;  %v4015_v49 = vmul.f32 %v10525_v57, %v3941_v0 }
 0xb00   :  { %v4058_v26 = vmul.f32 %v4050_v50, %v10415_v20  ;;  %v4059_v13 = vmul.f32 %v4050_v50, %v4035_v52  ;;  %v4061_v63 = vadd.f32 %v4053_v58, %v4021_v56  ;;  %v3985_v20 = vadd.f32 %v3977_v54, %v10507_v55 }
 0xb01   :  { %v10573_v32 = vadd.f32 %v4092_v25, %v4060_v9  ;;  %v3951_v55 = vsel %vm1815_vm8, %v3945_v10, 0.0  ;;  %vm11941_vm8 = vmmov %vm11939_vm4  ;;  %v4070_v57 = vsel %vm11942_vm9, %v10364_v17, 0.0 }
 0xb02   :  { %v4066_v31 = vadd.f32 %v4058_v26, %v4026_v46  ;;  %v4067_v27 = vadd.f32 %v4059_v13, %v4027_v48  ;;  %v10576_v15 = vadd.f32 %v4093_v19, %v4061_v63  ;;  %v4025_v16 = vadd.f32 %v4017_v4, %v3985_v20 }
 0xb03   :  { %v3975_v62 = vmul.f32 %v10519_v22, %v3951_v55  ;;  %v3982_v22 = vadd.f32 %v3974_v7, %v10491_v12  ;;  %v4031_v12 = vsel %vm11941_vm8, %v10473_v38, 0.0  ;;  %v4130_v38 = vld [vmem:[%s10675_s7 + $0x10] sm:$0xff]  ;;  %v4116_v10 = vadd.f32 %v4108_v42, %v10573_v32 }
 0xb04   :  { %v4106_v46 = vadd.f32 %v4098_v1, %v4066_v31  ;;  %v4107_v48 = vadd.f32 %v4099_v47, %v4067_v27  ;;  %4144 = vperm.xlu0 %4510, %v4130_v38   ;;  %v4124_v47 = vld [vmem:[%s10674_s6] sm:$0xff]  ;;  %v4125_v31 = vld [vmem:[%s10674_s6 + $0x8] sm:$0xff]  ;;  %v4126_v32 = vld [vmem:[%s10674_s6 + $0x10] sm:$0xff] }
 0xb05   :  { %v3983_v34 = vadd.f32 %v3975_v62, %v10482_v2  ;;  %v4022_v44 = vadd.f32 %v4014_v14, %v3982_v22  ;;  %v4127_v27 = vld [vmem:[%s10674_s6 + $0x18] sm:$0xff]  ;;  %s4715_s6 = smov [#allocation5]  }
 0xb06   :  { %v4122_v60 = vadd.f32 %v4114_v21, %v4106_v46  ;;  %v4123_v11 = vadd.f32 %v4115_v37, %v4107_v48  ;;  %v4140_v48 = vpop.permute.xlu2 %4139  ;;  %s4315_s21 = sshll.u32 %s4715_s6, 4  ;;  %s4316_s21 = int_to_ptr.vmem [resolvable:$true] %s4315_s21 }
 0xb07   :  { %v4046_v6 = vpop.permute.xlu1 %4045  ;;  %v4023_v24 = vadd.f32 %v4015_v49, %v3983_v34 }
 0xb08   :  { %v4056_v29 = vmul.f32 %v4046_v6, %v10499_v30  ;;  %v4057_v33 = vmul.f32 %v4046_v6, %v4033_v53  ;;  %4176 = vmatpush.msrb.mxu2 %v4122_v60  ;;  %4205 = vmatpush.msrb.mxu3 %v4123_v11  ;;  %v4112_v30 = vld [vmem:[%s10673_s5 + $0x20] sm:$0xff] }
 0xb0a   :  { %v4064_v61 = vadd.f32 %v4056_v29, %v4024_v43  ;;  %v4065_v3 = vadd.f32 %v4057_v33, %v4025_v16 }
 0xb0c   :  { %v4104_v52 = vadd.f32 %v4096_v36, %v4064_v61  ;;  %v4105_v59 = vadd.f32 %v4097_v5, %v4065_v3 }
 0xb0e   :  { %v4120_v39 = vadd.f32 %v4112_v30, %v4104_v52  ;;  %v4121_v58 = vadd.f32 %v4113_v35, %v4105_v59 }
 0xb0f   :  { %v4042_v56 = vpop.permute.xlu1 %4041 }
 0xb10   :  { %v4054_v28 = vmul.f32 %v4042_v56, %v10469_v8  ;;  %v4055_v25 = vmul.f32 %v4042_v56, %v4031_v12  ;;  %4177 = vmatpush.msrb.mxu2 %v4120_v39  ;;  %4206 = vmatpush.msrb.mxu3 %v4121_v58  ;;  %v4111_v8 = vld [vmem:[%s10673_s5 + $0x18] sm:$0xff] }
 0xb12   :  { %v4062_v50 = vadd.f32 %v4054_v28, %v4022_v44  ;;  %v4063_v2 = vadd.f32 %v4055_v25, %v4023_v24 }
 0xb18   :  { %v4082_v9 = vpop.permute.xlu1 %4081 }
 0xb19   :  { %v4094_v19 = vmul.f32 %v4082_v9, %v4070_v57  ;;  %v4095_v26 = vmul.f32 %v4082_v9, %v10360_v40  ;;  %v4109_v40 = vld [vmem:[%s10673_s5 + $0x8] sm:$0xff] }
 0xb1a   :  { %v4117_v1 = vadd.f32 %v4109_v40, %v10576_v15 }
 0xb1b   :  { %v4102_v13 = vadd.f32 %v4094_v19, %v4062_v50  ;;  %v4103_v63 = vadd.f32 %v4095_v26, %v4063_v2 }
 0xb1d   :  { %v4118_v17 = vadd.f32 %v4110_v45, %v4102_v13  ;;  %v4119_v54 = vadd.f32 %v4111_v8, %v4103_v63 }
 0xb1f   :  { %4178 = vmatpush.msrb.mxu2 %v4118_v17  ;;  %4207 = vmatpush.msrb.mxu3 %v4119_v54 }
 0xb20   :  { %v4135_v15 = vpop.permute.xlu1 %4134 }
 0xb21   :  { %4179 = vmatpush.msrb.mxu2 %v4116_v10  ;;  %4208 = vmatpush.msrb.mxu3 %v4117_v1  ;;  %v4625_v10 = vld [vmem:[#allocation2 + $0x40] sm:$0xff] }
 0xb22   :  { %4354 = vmatmul.msk.f32.vlgmr.msrb.gmra.mxu2 %vm11943_vm12, %v4124_v47  ;;  %4358 = vmatmul.msk.f32.vlgmr.msrb.gmra.mxu3 %vm11944_vm6, %v4124_v47 }
 0xb28   :  { %v4150_v58 = vpop.permute.xlu1 %4149 }
 0xb2a   :  { %4355 = vmatmul.msk.f32.gmra.mxu2 %vm11945_vm0, %v4125_v31  ;;  %4359 = vmatmul.msk.f32.gmra.mxu3 %vm11946_vm14, %v4125_v31  ;;  %v4626_v31 = vld [vmem:[#allocation2 + $0x48] sm:$0xff] }
 0xb32   :  { %4356 = vmatmul.msk.f32.gmra.mxu2 %vm11947_vm1, %v4126_v32  ;;  %4360 = vmatmul.msk.f32.gmra.mxu3 %vm11948_vm15, %v4126_v32 }
 0xb3a   :  { %4357 = vmatmul.msk.f32.gmra.mxu2 %vm11949_vm5, %v4127_v27  ;;  %4361 = vmatmul.msk.f32.gmra.mxu3 %vm11950_vm2, %v4127_v27 }
 0xb76   :  { %v4145_v23 = vpop.permute.xlu0 %4144 }
 0xba5   :  { %v4181_v41 = vpop.f32.mrf.mxu2  ;;  %v4210_v20 = vpop.f32.mrf.mxu3 }
 0xba6   :  { %v4182_v21 = vadd.f32 %v4181_v41, %v4135_v15  ;;  %v4211_v37 = vadd.f32 %v4210_v20, %v4135_v15 }
 0xba8   :  { %v4222_v0 = vmul.f32 0.5, %v4182_v21  ;;  %v4223_v46 = vmul.f32 0.5, %v4211_v37 }
 0xbaa   :  { %4575 = vtanh.f32 %v4222_v0 }
 0xbab   :  { %4577 = vtanh.f32 %v4223_v46 }
 0xbad   :  { %v4184_v51 = vpop.f32.mrf.mxu2  ;;  %v4213_v4 = vpop.f32.mrf.mxu3 }
 0xbae   :  { %v4185_v55 = vadd.f32 %v4184_v51, %v4140_v48  ;;  %v4214_v60 = vadd.f32 %v4213_v4, %v4140_v48 }
 0xbb0   :  { %v4576_v11 = vpop.eup %4575  ;;  %v4224_v7 = vmul.f32 0.5, %v4185_v55  ;;  %v4225_v6 = vmul.f32 0.5, %v4214_v60 }
 0xbb1   :  { %v4578_v43 = vpop.eup %4577  ;;  %v4238_v16 = vmul.f32 0.5, %v4576_v11 }
 0xbb2   :  { %v4239_v53 = vmul.f32 0.5, %v4578_v43  ;;  %4579 = vtanh.f32 %v4224_v7 }
 0xbb3   :  { %v4246_v62 = vadd.f32 0.5, %v4238_v16  ;;  %4581 = vtanh.f32 %v4225_v6  ;;  %v4627_v6 = vld [vmem:[#allocation2 + $0x50] sm:$0xff] }
 0xbb4   :  { %v4247_v29 = vadd.f32 0.5, %v4239_v53  ;;  %v4628_v53 = vld [vmem:[#allocation2 + $0x58] sm:$0xff] }
 0xbb5   :  { %v4254_v33 = vmul.f32 %v4246_v62, %v4182_v21  ;;  %v4187_v18 = vpop.f32.mrf.mxu2  ;;  %v4216_v36 = vpop.f32.mrf.mxu3 }
 0xbb6   :  { %v4255_v5 = vmul.f32 %v4247_v29, %v4211_v37  ;;  %v4188_v61 = vadd.f32 %v4187_v18, %v4145_v23  ;;  %v4217_v3 = vadd.f32 %v4216_v36, %v4145_v23 }
 0xbb7   :  { %v4262_v22 = vmul.f32 0.5, %v4254_v33 }
 0xbb8   :  { %v4580_v14 = vpop.eup %4579  ;;  %v4263_v30 = vmul.f32 0.5, %v4255_v5  ;;  %v4226_v35 = vmul.f32 0.5, %v4188_v61  ;;  %v4227_v34 = vmul.f32 0.5, %v4217_v3 }
 0xbb9   :  { %v4582_v52 = vpop.eup %4581  ;;  %4583 = vtanh.f32 %v4262_v22  ;;  %v4240_v59 = vmul.f32 0.5, %v4580_v14 }
 0xbba   :  { %4585 = vtanh.f32 %v4263_v30  ;;  %v4241_v49 = vmul.f32 0.5, %v4582_v52  ;;  %v4630_v52 = vld [vmem:[#allocation2 + $0x68] sm:$0xff] }
 0xbbb   :  { %v4248_v39 = vadd.f32 0.5, %v4240_v59  ;;  %4587 = vtanh.f32 %v4226_v35  ;;  %v4629_v35 = vld [vmem:[#allocation2 + $0x60] sm:$0xff] }
 0xbbc   :  { %v4249_v12 = vadd.f32 0.5, %v4241_v49  ;;  %4589 = vtanh.f32 %v4227_v34 }
 0xbbd   :  { %v4256_v56 = vmul.f32 %v4248_v39, %v4185_v55  ;;  %v4190_v44 = vpop.f32.mrf.mxu2  ;;  %v4219_v24 = vpop.f32.mrf.mxu3 }
 0xbbe   :  { %v4257_v28 = vmul.f32 %v4249_v12, %v4214_v60  ;;  %v4191_v25 = vadd.f32 %v4190_v44, %v4150_v58  ;;  %v4220_v50 = vadd.f32 %v4219_v24, %v4150_v58  ;;  %v4631_v24 = vld [vmem:[#allocation2 + $0x70] sm:$0xff] }
 0xbbf   :  { %v4584_v2 = vpop.eup %4583  ;;  %v4264_v9 = vmul.f32 0.5, %v4256_v56 }
 0xbc0   :  { %v4586_v57 = vpop.eup %4585  ;;  %v4278_v19 = vmul.f32 0.5, %v4584_v2  ;;  %v4265_v26 = vmul.f32 0.5, %v4257_v28  ;;  %v4228_v45 = vmul.f32 0.5, %v4191_v25  ;;  %v4229_v8 = vmul.f32 0.5, %v4220_v50 }
 0xbc1   :  { %v4588_v38 = vpop.eup %4587  ;;  %v4279_v13 = vmul.f32 0.5, %v4586_v57  ;;  %4591 = vtanh.f32 %v4264_v9 }
 0xbc2   :  { %v4590_v63 = vpop.eup %4589  ;;  %v4286_v42 = vadd.f32 0.5, %v4278_v19  ;;  %4593 = vtanh.f32 %v4265_v26  ;;  %v4242_v40 = vmul.f32 0.5, %v4588_v38 }
 0xbc3   :  { %v4287_v17 = vadd.f32 0.5, %v4279_v13  ;;  %4595 = vtanh.f32 %v4228_v45  ;;  %v4243_v54 = vmul.f32 0.5, %v4590_v63 }
 0xbc4   :  { %v4294_v1 = vmul.f32 %v4625_v10, %v4286_v42  ;;  %4597 = vtanh.f32 %v4229_v8  ;;  %v4250_v47 = vadd.f32 0.5, %v4242_v40 }
 0xbc5   :  { %v4295_v32 = vmul.f32 %v4626_v31, %v4287_v17  ;;  %v4251_v27 = vadd.f32 0.5, %v4243_v54 }
 0xbc6   :  { %4303 = vst [vmem:[#allocation5 + $0x40] sm:$0xff] %v4294_v1  ;;  %v4258_v15 = vmul.f32 %v4250_v47, %v4188_v61 }
 0xbc7   :  { %v4592_v41 = vpop.eup %4591  ;;  %4304 = vst [vmem:[#allocation5 + $0x48] sm:$0xff] %v4295_v32  ;;  %v4259_v20 = vmul.f32 %v4251_v27, %v4217_v3 }
 0xbc8   :  { %v4594_v21 = vpop.eup %4593  ;;  %v4280_v37 = vmul.f32 0.5, %v4592_v41  ;;  %v4266_v0 = vmul.f32 0.5, %v4258_v15 }
 0xbc9   :  { %v4596_v46 = vpop.eup %4595  ;;  %v4281_v48 = vmul.f32 0.5, %v4594_v21  ;;  %v4267_v51 = vmul.f32 0.5, %v4259_v20 }
 0xbca   :  { %v4598_v4 = vpop.eup %4597  ;;  %v4288_v55 = vadd.f32 0.5, %v4280_v37  ;;  %v4244_v60 = vmul.f32 0.5, %v4596_v46  ;;  %4599 = vtanh.f32 %v4266_v0 }
 0xbcb   :  { %v4289_v11 = vadd.f32 0.5, %v4281_v48  ;;  %v4245_v7 = vmul.f32 0.5, %v4598_v4  ;;  %4601 = vtanh.f32 %v4267_v51 }
 0xbcc   :  { %v4296_v43 = vmul.f32 %v4627_v6, %v4288_v55  ;;  %v4252_v16 = vadd.f32 0.5, %v4244_v60 }
 0xbcd   :  { %v4297_v62 = vmul.f32 %v4628_v53, %v4289_v11  ;;  %v4253_v23 = vadd.f32 0.5, %v4245_v7 }
 0xbce   :  { %4305 = vst [vmem:[#allocation5 + $0x50] sm:$0xff] %v4296_v43  ;;  %v4260_v29 = vmul.f32 %v4252_v16, %v4191_v25  ;;  %v4632_v25 = vld [vmem:[#allocation2 + $0x78] sm:$0xff] }
 0xbcf   :  { %4306 = vst [vmem:[#allocation5 + $0x58] sm:$0xff] %v4297_v62  ;;  %v4261_v33 = vmul.f32 %v4253_v23, %v4220_v50 }
 0xbd0   :  { %v4600_v18 = vpop.eup %4599  ;;  %v4268_v36 = vmul.f32 0.5, %v4260_v29 }
 0xbd1   :  { %v4602_v5 = vpop.eup %4601  ;;  %v4269_v61 = vmul.f32 0.5, %v4261_v33  ;;  %v4282_v3 = vmul.f32 0.5, %v4600_v18 }
 0xbd2   :  { %4603 = vtanh.f32 %v4268_v36  ;;  %v4283_v22 = vmul.f32 0.5, %v4602_v5 }
 0xbd3   :  { %4605 = vtanh.f32 %v4269_v61  ;;  %v4290_v14 = vadd.f32 0.5, %v4282_v3 }
 0xbd4   :  { %v4291_v30 = vadd.f32 0.5, %v4283_v22 }
 0xbd5   :  { %v4298_v34 = vmul.f32 %v4629_v35, %v4290_v14 }
 0xbd6   :  { %v4299_v59 = vmul.f32 %v4630_v52, %v4291_v30 }
 0xbd7   :  { %4307 = vst [vmem:[#allocation5 + $0x60] sm:$0xff] %v4298_v34 }
 0xbd8   :  { %v4604_v49 = vpop.eup %4603  ;;  %4308 = vst [vmem:[#allocation5 + $0x68] sm:$0xff] %v4299_v59 }
 0xbd9   :  { %v4606_v39 = vpop.eup %4605  ;;  %v4284_v58 = vmul.f32 0.5, %v4604_v49 }
 0xbda   :  { %v4285_v12 = vmul.f32 0.5, %v4606_v39 }
 0xbdb   :  { %v4292_v56 = vadd.f32 0.5, %v4284_v58 }
 0xbdc   :  { %v4293_v44 = vadd.f32 0.5, %v4285_v12 }
 0xbdd   :  { %v4300_v28 = vmul.f32 %v4631_v24, %v4292_v56 }
 0xbde   :  { %v4301_v50 = vmul.f32 %v4632_v25, %v4293_v44 }
 0xbdf   :  { %4309 = vst [vmem:[#allocation5 + $0x70] sm:$0xff] %v4300_v28 }
 0xbe0   :  { %4310 = vst [vmem:[#allocation5 + $0x78] sm:$0xff] %v4301_v50 }
 0xbe1   :  { %4323 = dma.vmem_to_hbm [thread:$0]  %s4316_s21, 2048, %s4318_s13, [#allocation4], %s11951_s14, %s11951_s14, %s4687_s11  }
 0xbe2   :  { %4683 = dma.done.wait [#allocation4], 2048  }
 0xbe3   :  { %4684 = vsyncadd [#allocation4], 4294965248 }
 0xbe4   :  { %4328 = vsyncpa [#allocation3], 1 }
 0xbe5   :  { %4329 = vsyncpa [#allocation4], 1 }

</bundles_post_ra>
